<compile_context>
chip_gen: v6e
topology: v6e:2x2x1
jax: 0.10.0
libtpu: 0.0.40
codegen_flags: <defaults>
</compile_context>

<pallas_src>
import math

import jax
import jax.numpy as jnp
from jax.experimental import pallas as pl
from jax.experimental.pallas import tpu as pltpu

BN_EPS = 1e-5


# --------------------------------------------------------------------------
# Wrapper-side weight folding
# --------------------------------------------------------------------------
def _toeplitz_weights(w_oihw, W):
    """(Cout, Cin, 3, 3) OIHW -> (W*Cin, 3*W*Cout) bf16 banded block-Toeplitz.

    Column taps and width zero-padding live in the band structure; the three
    kernel-row (kh) planes are concatenated along the output columns so each
    conv needs a single MXU matmul per activation tile.
    """
    Cout, Cin, KH, KW = w_oihw.shape
    wt = jnp.transpose(w_oihw, (2, 3, 1, 0)).astype(jnp.float32)  # (kh,kw,ci,co)
    idx = jnp.arange(W)
    t = jnp.zeros((KH, W, Cin, W, Cout), jnp.float32)
    for kw in range(KW):
        band = (idx[:, None] == idx[None, :] + (kw - 1)).astype(jnp.float32)
        t = t + jnp.einsum("ab,kio->kaibo", band, wt[:, kw])
    t = t.reshape(KH, W * Cin, W * Cout)
    return jnp.concatenate([t[0], t[1], t[2]], axis=1).astype(jnp.bfloat16)


# --------------------------------------------------------------------------
# Public forward
# --------------------------------------------------------------------------
@jax.jit
def basic_block(x_nchw, w1, g1, b1, w2, g2, b2):
    """x_nchw: (N, C, H, W). Conv weights PyTorch OIHW: (Cout, Cin, 3, 3)."""
    N, C, H, W = x_nchw.shape
    planes = w1.shape[0]
    assert planes == C, "identity residual requires inplanes == planes"
    WC = W * C
    M = N * H
    assert WC % 128 == 0, "lane-dense layout needs W*C to be a multiple of 128"
    assert W & (W - 1) == 0, "lane-roll channel reduction needs power-of-two W"
    assert M % 8 == 0, "sublane alignment"

    inv_count = 1.0 / float(N * H * W)

    # NCHW -> lane-fused (N*H, W*C); lane index = w*C + c, row index = n*H + h.
    x_f = jnp.transpose(x_nchw, (0, 2, 3, 1)).reshape(M, WC).astype(jnp.float32)

    t1 = _toeplitz_weights(w1, W)                      # (WC, 3*WC) bf16
    t2 = _toeplitz_weights(w2, W)
    g1r = jnp.tile(g1.astype(jnp.float32), W).reshape(1, WC)
    b1r = jnp.tile(b1.astype(jnp.float32), W).reshape(1, WC)
    g2r = jnp.tile(g2.astype(jnp.float32), W).reshape(1, WC)
    b2r = jnp.tile(b2.astype(jnp.float32), W).reshape(1, WC)

    def kernel(x_ref, t1_ref, t2_ref, g1_ref, b1_ref, g2_ref, b2_ref, o_ref):
        x = x_ref[...]                                            # (M, WC) f32

        # Image-boundary masks for the kh=0 / kh=2 row taps.  Built once; the
        # kernel is a single invocation (no serial grid loop re-doing this).
        r = jax.lax.broadcasted_iota(jnp.int32, (M, 1), 0) % H
        not_top = r != 0          # a valid row exists above, same image
        not_bot = r != H - 1      # a valid row exists below, same image

        def conv3x3(a, t_ref):
            # Single bf16 MXU push against the 3 concatenated kh planes.
            y = jnp.dot(a.astype(jnp.bfloat16), t_ref[...],
                        preferred_element_type=jnp.float32)      # (M, 3*WC) f32
            y0 = y[:, :WC]             # kh = 0 tap: out[h] += y0[h-1]
            y1 = y[:, WC:2 * WC]       # kh = 1 tap: out[h] += y1[h]
            y2 = y[:, 2 * WC:]         # kh = 2 tap: out[h] += y2[h+1]
            from_above = jnp.where(not_top, pltpu.roll(y0, shift=1, axis=0), 0.0)
            from_below = jnp.where(not_bot, pltpu.roll(y2, shift=M - 1, axis=0), 0.0)
            return y1 + from_above + from_below

        def bn_scale_shift(y, g_ref, b_ref):
            # Single-pass per-lane batch statistics.
            s = jnp.sum(y, axis=0, keepdims=True)                 # (1, WC)
            ss = jnp.sum(y * y, axis=0, keepdims=True)
            # Circular lane-roll tree: sums the W lane-groups of each channel
            # and leaves the per-channel total broadcast to every lane
            # position (pure XLU rotates + VPU adds; no relayouts).
            sh = C * (W // 2)
            while sh >= C:
                s = s + pltpu.roll(s, shift=sh, axis=1)
                ss = ss + pltpu.roll(ss, shift=sh, axis=1)
                sh //= 2
            mean = s * inv_count
            var = jnp.maximum(ss * inv_count - mean * mean, 0.0)
            scale = g_ref[...] * jax.lax.rsqrt(var + BN_EPS)
            shift = b_ref[...] - mean * scale
            return scale, shift

        y1c = conv3x3(x, t1_ref)                                  # conv1
        sc1, sh1 = bn_scale_shift(y1c, g1_ref, b1_ref)            # bn1 (train)
        a1 = jnp.maximum(y1c * sc1 + sh1, 0.0)                    # relu
        y2c = conv3x3(a1, t2_ref)                                 # conv2
        sc2, sh2 = bn_scale_shift(y2c, g2_ref, b2_ref)            # bn2 (train)
        o_ref[...] = jnp.maximum(y2c * sc2 + sh2 + x, 0.0)        # +res, relu

    # Realistic VMEM budget (inputs + output + conv intermediates) with margin.
    io_bytes = (x_f.size * 4 + t1.size * 2 + t2.size * 2 + 4 * WC * 4
                + M * WC * 4 + 2 * M * 3 * WC * 4)
    vmem_limit = int(min(48 * 1024 * 1024, max(4 * 1024 * 1024, 4 * io_bytes)))

    out_f = pl.pallas_call(
        kernel,
        out_shape=jax.ShapeDtypeStruct((M, WC), jnp.float32),
        compiler_params=pltpu.CompilerParams(vmem_limit_bytes=vmem_limit),
    )(x_f, t1, t2, g1r, b1r, g2r, b2r)

    # lane-fused layout -> NCHW
    return jnp.transpose(out_f.reshape(N, H, W, C), (0, 3, 1, 2))


# --------------------------------------------------------------------------
# Pure-JAX reference (training-mode BN), for the correctness check
# --------------------------------------------------------------------------
def basic_block_reference(x, w1, g1, b1, w2, g2, b2, conv_dtype=jnp.float32):
    precision = (jax.lax.Precision.HIGHEST if conv_dtype is jnp.float32
                 else jax.lax.Precision.DEFAULT)

    def conv(y, w):
        return jax.lax.conv_general_dilated(
            y.astype(conv_dtype), w.astype(conv_dtype),
            window_strides=(1, 1), padding=((1, 1), (1, 1)),
            dimension_numbers=("NCHW", "OIHW", "NCHW"),
            preferred_element_type=jnp.float32,
            precision=precision)

    def bn(y, g, b):
        m = jnp.mean(y, axis=(0, 2, 3), keepdims=True)
        v = jnp.mean((y - m) ** 2, axis=(0, 2, 3), keepdims=True)
        return ((y - m) * jax.lax.rsqrt(v + BN_EPS)
                * g.reshape(1, -1, 1, 1) + b.reshape(1, -1, 1, 1))

    out = jnp.maximum(bn(conv(x, w1), g1, b1), 0.0)
    out = bn(conv(out, w2), g2, b2)
    return jnp.maximum(out + x, 0.0)


if __name__ == "__main__":
    # BasicBlock(inplanes=8, planes=8, stride=1); W*C = 128 = one full lane row.
    N, C, H, W = 2, 8, 16, 16
    planes = C

    key = jax.random.PRNGKey(0)
    kx, k1, k2 = jax.random.split(key, 3)

    x = jax.random.normal(kx, (N, C, H, W), dtype=jnp.float32)

    fan = 3 * 3 * planes
    w1 = jax.random.normal(k1, (planes, C, 3, 3), jnp.float32) * math.sqrt(2.0 / fan)
    w2 = jax.random.normal(k2, (planes, planes, 3, 3), jnp.float32) * math.sqrt(2.0 / fan)
    g1 = jnp.ones((planes,), jnp.float32)
    b1 = jnp.zeros((planes,), jnp.float32)
    g2 = jnp.ones((planes,), jnp.float32)
    b2 = jnp.zeros((planes,), jnp.float32)

    out = jax.block_until_ready(basic_block(x, w1, g1, b1, w2, g2, b2))
    assert out.shape == (N, C, H, W), out.shape

    # Matched-precision reference (bf16 conv operands, f32 accumulation):
    # validates the fused algorithm (Toeplitz conv, roll taps, in-kernel BN).
    ref_bf16 = jax.block_until_ready(
        basic_block_reference(x, w1, g1, b1, w2, g2, b2, conv_dtype=jnp.bfloat16))
    err_matched = float(jnp.max(jnp.abs(out - ref_bf16)))
    assert err_matched < 5e-3, f"matched-precision max abs err {err_matched}"

    # Full f32 reference: bounds the bf16 operand-rounding error of the kernel.
    ref = jax.block_until_ready(basic_block_reference(x, w1, g1, b1, w2, g2, b2))
    err_full = float(jnp.max(jnp.abs(out - ref)))
    assert err_full < 6e-2, f"full-precision max abs err {err_full}"

    print("KERNEL_OK")
</pallas_src>

<mosaic_0001>
module attributes {stable_mosaic.version = 11 : i64} {
  func.func @kernel(%arg0: memref<32x128xf32, #tpu.memory_space<vmem>>, %arg1: memref<128x384xbf16, #tpu.memory_space<vmem>>, %arg2: memref<128x384xbf16, #tpu.memory_space<vmem>>, %arg3: memref<1x128xf32, #tpu.memory_space<vmem>>, %arg4: memref<1x128xf32, #tpu.memory_space<vmem>>, %arg5: memref<1x128xf32, #tpu.memory_space<vmem>>, %arg6: memref<1x128xf32, #tpu.memory_space<vmem>>, %arg7: memref<32x128xf32, #tpu.memory_space<vmem>>) attributes {dimension_semantics = [], scalar_prefetch = 0 : i64, scratch_operands = 0 : i64, tpu.core_type = #tpu.core_type<tc>} {
    %c0 = arith.constant 0 : index
    %c0_0 = arith.constant 0 : index
    %0 = vector.load %arg0[%c0, %c0_0] : memref<32x128xf32, #tpu.memory_space<vmem>>, vector<32x128xf32>
    %1 = tpu.iota {dimensions = array<i32: 0>} : vector<32x1xi32>
    %c16_i32 = arith.constant 16 : i32
    %c0_i32 = arith.constant 0 : i32
    %2 = arith.cmpi eq, %c16_i32, %c0_i32 : i32
    %c1_i32 = arith.constant 1 : i32
    %3 = arith.select %2, %c1_i32, %c16_i32 : i32
    %4 = vector.broadcast %3 : i32 to vector<32x1xi32>
    %5 = arith.remsi %1, %4 : vector<32x1xi32>
    %c0_i32_1 = arith.constant 0 : i32
    %6 = vector.broadcast %c0_i32_1 : i32 to vector<32x1xi32>
    %7 = arith.cmpi ne, %5, %6 : vector<32x1xi32>
    %c0_i32_2 = arith.constant 0 : i32
    %8 = vector.broadcast %c0_i32_2 : i32 to vector<32x1xi32>
    %9 = arith.cmpi slt, %5, %8 : vector<32x1xi32>
    %c0_i32_3 = arith.constant 0 : i32
    %10 = arith.cmpi slt, %3, %c0_i32_3 : i32
    %11 = vector.broadcast %10 : i1 to vector<32x1xi1>
    %12 = vector.broadcast %11 : vector<32x1xi1> to vector<32x1xi1>
    %13 = arith.xori %9, %12 : vector<32x1xi1>
    %14 = arith.andi %13, %7 : vector<32x1xi1>
    %15 = vector.broadcast %3 : i32 to vector<32x1xi32>
    %16 = arith.addi %5, %15 : vector<32x1xi32>
    %17 = arith.select %14, %16, %5 : vector<32x1xi1>, vector<32x1xi32>
    %c0_i32_4 = arith.constant 0 : i32
    %18 = vector.broadcast %c0_i32_4 : i32 to vector<32x1xi32>
    %19 = arith.cmpi ne, %17, %18 : vector<32x1xi32>
    %c15_i32 = arith.constant 15 : i32
    %20 = vector.broadcast %c15_i32 : i32 to vector<32x1xi32>
    %21 = arith.cmpi ne, %17, %20 : vector<32x1xi32>
    %22 = arith.truncf %0 : vector<32x128xf32> to vector<32x128xbf16>
    %c0_5 = arith.constant 0 : index
    %c0_6 = arith.constant 0 : index
    %23 = vector.load %arg1[%c0_5, %c0_6] : memref<128x384xbf16, #tpu.memory_space<vmem>>, vector<128x384xbf16>
    %cst = arith.constant dense<0.000000e+00> : vector<32x384xf32>
    %24 = tpu.matmul %22, %23, %cst {dimension_numbers = #tpu.dot_dimension_numbers<[1], [0], [0], [1], [0, 0, 1, 1], [], []>} : vector<32x128xbf16>, vector<128x384xbf16>, vector<32x384xf32> -> vector<32x384xf32>
    %25 = vector.extract_strided_slice %24 {offsets = [0, 0], sizes = [32, 128], strides = [1, 1]} : vector<32x384xf32> to vector<32x128xf32>
    %26 = vector.extract_strided_slice %24 {offsets = [0, 128], sizes = [32, 128], strides = [1, 1]} : vector<32x384xf32> to vector<32x128xf32>
    %27 = vector.extract_strided_slice %24 {offsets = [0, 256], sizes = [32, 128], strides = [1, 1]} : vector<32x384xf32> to vector<32x128xf32>
    %c1_i32_7 = arith.constant 1 : i32
    %28 = tpu.dynamic_rotate %25 by %c1_i32_7 dim 0 : vector<32x128xf32>, i32 -> vector<32x128xf32>
    %cst_8 = arith.constant 0.000000e+00 : f32
    %29 = vector.shape_cast %19 : vector<32x1xi1> to vector<32x1xi1>
    %30 = vector.broadcast %29 : vector<32x1xi1> to vector<32x128xi1>
    %31 = vector.broadcast %cst_8 : f32 to vector<32x128xf32>
    %32 = arith.select %30, %28, %31 : vector<32x128xi1>, vector<32x128xf32>
    %c31_i32 = arith.constant 31 : i32
    %33 = tpu.dynamic_rotate %27 by %c31_i32 dim 0 : vector<32x128xf32>, i32 -> vector<32x128xf32>
    %cst_9 = arith.constant 0.000000e+00 : f32
    %34 = vector.shape_cast %21 : vector<32x1xi1> to vector<32x1xi1>
    %35 = vector.broadcast %34 : vector<32x1xi1> to vector<32x128xi1>
    %36 = vector.broadcast %cst_9 : f32 to vector<32x128xf32>
    %37 = arith.select %35, %33, %36 : vector<32x128xi1>, vector<32x128xf32>
    %38 = arith.addf %26, %32 : vector<32x128xf32>
    %39 = arith.addf %38, %37 : vector<32x128xf32>
    %cst_10 = arith.constant dense<0.000000e+00> : vector<128xf32>
    %40 = vector.multi_reduction <add>, %39, %cst_10 [0] : vector<32x128xf32> to vector<128xf32>
    %41 = vector.shape_cast %40 : vector<128xf32> to vector<1x128xf32>
    %42 = arith.mulf %39, %39 : vector<32x128xf32>
    %cst_11 = arith.constant dense<0.000000e+00> : vector<128xf32>
    %43 = vector.multi_reduction <add>, %42, %cst_11 [0] : vector<32x128xf32> to vector<128xf32>
    %44 = vector.shape_cast %43 : vector<128xf32> to vector<1x128xf32>
    %c64_i32 = arith.constant 64 : i32
    %45 = tpu.dynamic_rotate %41 by %c64_i32 dim 1 : vector<1x128xf32>, i32 -> vector<1x128xf32>
    %46 = arith.addf %41, %45 : vector<1x128xf32>
    %c64_i32_12 = arith.constant 64 : i32
    %47 = tpu.dynamic_rotate %44 by %c64_i32_12 dim 1 : vector<1x128xf32>, i32 -> vector<1x128xf32>
    %48 = arith.addf %44, %47 : vector<1x128xf32>
    %c32_i32 = arith.constant 32 : i32
    %49 = tpu.dynamic_rotate %46 by %c32_i32 dim 1 : vector<1x128xf32>, i32 -> vector<1x128xf32>
    %50 = arith.addf %46, %49 : vector<1x128xf32>
    %c32_i32_13 = arith.constant 32 : i32
    %51 = tpu.dynamic_rotate %48 by %c32_i32_13 dim 1 : vector<1x128xf32>, i32 -> vector<1x128xf32>
    %52 = arith.addf %48, %51 : vector<1x128xf32>
    %c16_i32_14 = arith.constant 16 : i32
    %53 = tpu.dynamic_rotate %50 by %c16_i32_14 dim 1 : vector<1x128xf32>, i32 -> vector<1x128xf32>
    %54 = arith.addf %50, %53 : vector<1x128xf32>
    %c16_i32_15 = arith.constant 16 : i32
    %55 = tpu.dynamic_rotate %52 by %c16_i32_15 dim 1 : vector<1x128xf32>, i32 -> vector<1x128xf32>
    %56 = arith.addf %52, %55 : vector<1x128xf32>
    %c8_i32 = arith.constant 8 : i32
    %57 = tpu.dynamic_rotate %54 by %c8_i32 dim 1 : vector<1x128xf32>, i32 -> vector<1x128xf32>
    %58 = arith.addf %54, %57 : vector<1x128xf32>
    %c8_i32_16 = arith.constant 8 : i32
    %59 = tpu.dynamic_rotate %56 by %c8_i32_16 dim 1 : vector<1x128xf32>, i32 -> vector<1x128xf32>
    %60 = arith.addf %56, %59 : vector<1x128xf32>
    %cst_17 = arith.constant 0.001953125 : f32
    %61 = vector.broadcast %cst_17 : f32 to vector<1x128xf32>
    %62 = arith.mulf %58, %61 : vector<1x128xf32>
    %cst_18 = arith.constant 0.001953125 : f32
    %63 = vector.broadcast %cst_18 : f32 to vector<1x128xf32>
    %64 = arith.mulf %60, %63 : vector<1x128xf32>
    %65 = arith.mulf %62, %62 : vector<1x128xf32>
    %66 = arith.subf %64, %65 : vector<1x128xf32>
    %cst_19 = arith.constant 0.000000e+00 : f32
    %67 = vector.broadcast %cst_19 : f32 to vector<1x128xf32>
    %68 = arith.maximumf %66, %67 : vector<1x128xf32>
    %c0_20 = arith.constant 0 : index
    %c0_21 = arith.constant 0 : index
    %69 = vector.load %arg3[%c0_20, %c0_21] : memref<1x128xf32, #tpu.memory_space<vmem>>, vector<1x128xf32>
    %cst_22 = arith.constant 9.99999974E-6 : f32
    %70 = vector.broadcast %cst_22 : f32 to vector<1x128xf32>
    %71 = arith.addf %68, %70 : vector<1x128xf32>
    %72 = math.rsqrt %71 : vector<1x128xf32>
    %73 = arith.mulf %69, %72 : vector<1x128xf32>
    %c0_23 = arith.constant 0 : index
    %c0_24 = arith.constant 0 : index
    %74 = vector.load %arg4[%c0_23, %c0_24] : memref<1x128xf32, #tpu.memory_space<vmem>>, vector<1x128xf32>
    %75 = arith.mulf %62, %73 : vector<1x128xf32>
    %76 = arith.subf %74, %75 : vector<1x128xf32>
    %77 = vector.broadcast %73 : vector<1x128xf32> to vector<32x128xf32>
    %78 = arith.mulf %39, %77 : vector<32x128xf32>
    %79 = vector.broadcast %76 : vector<1x128xf32> to vector<32x128xf32>
    %80 = arith.addf %78, %79 : vector<32x128xf32>
    %cst_25 = arith.constant 0.000000e+00 : f32
    %81 = vector.broadcast %cst_25 : f32 to vector<32x128xf32>
    %82 = arith.maximumf %80, %81 : vector<32x128xf32>
    %83 = arith.truncf %82 : vector<32x128xf32> to vector<32x128xbf16>
    %c0_26 = arith.constant 0 : index
    %c0_27 = arith.constant 0 : index
    %84 = vector.load %arg2[%c0_26, %c0_27] : memref<128x384xbf16, #tpu.memory_space<vmem>>, vector<128x384xbf16>
    %cst_28 = arith.constant dense<0.000000e+00> : vector<32x384xf32>
    %85 = tpu.matmul %83, %84, %cst_28 {dimension_numbers = #tpu.dot_dimension_numbers<[1], [0], [0], [1], [0, 0, 1, 1], [], []>} : vector<32x128xbf16>, vector<128x384xbf16>, vector<32x384xf32> -> vector<32x384xf32>
    %86 = vector.extract_strided_slice %85 {offsets = [0, 0], sizes = [32, 128], strides = [1, 1]} : vector<32x384xf32> to vector<32x128xf32>
    %87 = vector.extract_strided_slice %85 {offsets = [0, 128], sizes = [32, 128], strides = [1, 1]} : vector<32x384xf32> to vector<32x128xf32>
    %88 = vector.extract_strided_slice %85 {offsets = [0, 256], sizes = [32, 128], strides = [1, 1]} : vector<32x384xf32> to vector<32x128xf32>
    %c1_i32_29 = arith.constant 1 : i32
    %89 = tpu.dynamic_rotate %86 by %c1_i32_29 dim 0 : vector<32x128xf32>, i32 -> vector<32x128xf32>
    %cst_30 = arith.constant 0.000000e+00 : f32
    %90 = vector.shape_cast %19 : vector<32x1xi1> to vector<32x1xi1>
    %91 = vector.broadcast %90 : vector<32x1xi1> to vector<32x128xi1>
    %92 = vector.broadcast %cst_30 : f32 to vector<32x128xf32>
    %93 = arith.select %91, %89, %92 : vector<32x128xi1>, vector<32x128xf32>
    %c31_i32_31 = arith.constant 31 : i32
    %94 = tpu.dynamic_rotate %88 by %c31_i32_31 dim 0 : vector<32x128xf32>, i32 -> vector<32x128xf32>
    %cst_32 = arith.constant 0.000000e+00 : f32
    %95 = vector.shape_cast %21 : vector<32x1xi1> to vector<32x1xi1>
    %96 = vector.broadcast %95 : vector<32x1xi1> to vector<32x128xi1>
    %97 = vector.broadcast %cst_32 : f32 to vector<32x128xf32>
    %98 = arith.select %96, %94, %97 : vector<32x128xi1>, vector<32x128xf32>
    %99 = arith.addf %87, %93 : vector<32x128xf32>
    %100 = arith.addf %99, %98 : vector<32x128xf32>
    %cst_33 = arith.constant dense<0.000000e+00> : vector<128xf32>
    %101 = vector.multi_reduction <add>, %100, %cst_33 [0] : vector<32x128xf32> to vector<128xf32>
    %102 = vector.shape_cast %101 : vector<128xf32> to vector<1x128xf32>
    %103 = arith.mulf %100, %100 : vector<32x128xf32>
    %cst_34 = arith.constant dense<0.000000e+00> : vector<128xf32>
    %104 = vector.multi_reduction <add>, %103, %cst_34 [0] : vector<32x128xf32> to vector<128xf32>
    %105 = vector.shape_cast %104 : vector<128xf32> to vector<1x128xf32>
    %c64_i32_35 = arith.constant 64 : i32
    %106 = tpu.dynamic_rotate %102 by %c64_i32_35 dim 1 : vector<1x128xf32>, i32 -> vector<1x128xf32>
    %107 = arith.addf %102, %106 : vector<1x128xf32>
    %c64_i32_36 = arith.constant 64 : i32
    %108 = tpu.dynamic_rotate %105 by %c64_i32_36 dim 1 : vector<1x128xf32>, i32 -> vector<1x128xf32>
    %109 = arith.addf %105, %108 : vector<1x128xf32>
    %c32_i32_37 = arith.constant 32 : i32
    %110 = tpu.dynamic_rotate %107 by %c32_i32_37 dim 1 : vector<1x128xf32>, i32 -> vector<1x128xf32>
    %111 = arith.addf %107, %110 : vector<1x128xf32>
    %c32_i32_38 = arith.constant 32 : i32
    %112 = tpu.dynamic_rotate %109 by %c32_i32_38 dim 1 : vector<1x128xf32>, i32 -> vector<1x128xf32>
    %113 = arith.addf %109, %112 : vector<1x128xf32>
    %c16_i32_39 = arith.constant 16 : i32
    %114 = tpu.dynamic_rotate %111 by %c16_i32_39 dim 1 : vector<1x128xf32>, i32 -> vector<1x128xf32>
    %115 = arith.addf %111, %114 : vector<1x128xf32>
    %c16_i32_40 = arith.constant 16 : i32
    %116 = tpu.dynamic_rotate %113 by %c16_i32_40 dim 1 : vector<1x128xf32>, i32 -> vector<1x128xf32>
    %117 = arith.addf %113, %116 : vector<1x128xf32>
    %c8_i32_41 = arith.constant 8 : i32
    %118 = tpu.dynamic_rotate %115 by %c8_i32_41 dim 1 : vector<1x128xf32>, i32 -> vector<1x128xf32>
    %119 = arith.addf %115, %118 : vector<1x128xf32>
    %c8_i32_42 = arith.constant 8 : i32
    %120 = tpu.dynamic_rotate %117 by %c8_i32_42 dim 1 : vector<1x128xf32>, i32 -> vector<1x128xf32>
    %121 = arith.addf %117, %120 : vector<1x128xf32>
    %cst_43 = arith.constant 0.001953125 : f32
    %122 = vector.broadcast %cst_43 : f32 to vector<1x128xf32>
    %123 = arith.mulf %119, %122 : vector<1x128xf32>
    %cst_44 = arith.constant 0.001953125 : f32
    %124 = vector.broadcast %cst_44 : f32 to vector<1x128xf32>
    %125 = arith.mulf %121, %124 : vector<1x128xf32>
    %126 = arith.mulf %123, %123 : vector<1x128xf32>
    %127 = arith.subf %125, %126 : vector<1x128xf32>
    %cst_45 = arith.constant 0.000000e+00 : f32
    %128 = vector.broadcast %cst_45 : f32 to vector<1x128xf32>
    %129 = arith.maximumf %127, %128 : vector<1x128xf32>
    %c0_46 = arith.constant 0 : index
    %c0_47 = arith.constant 0 : index
    %130 = vector.load %arg5[%c0_46, %c0_47] : memref<1x128xf32, #tpu.memory_space<vmem>>, vector<1x128xf32>
    %cst_48 = arith.constant 9.99999974E-6 : f32
    %131 = vector.broadcast %cst_48 : f32 to vector<1x128xf32>
    %132 = arith.addf %129, %131 : vector<1x128xf32>
    %133 = math.rsqrt %132 : vector<1x128xf32>
    %134 = arith.mulf %130, %133 : vector<1x128xf32>
    %c0_49 = arith.constant 0 : index
    %c0_50 = arith.constant 0 : index
    %135 = vector.load %arg6[%c0_49, %c0_50] : memref<1x128xf32, #tpu.memory_space<vmem>>, vector<1x128xf32>
    %136 = arith.mulf %123, %134 : vector<1x128xf32>
    %137 = arith.subf %135, %136 : vector<1x128xf32>
    %138 = vector.broadcast %134 : vector<1x128xf32> to vector<32x128xf32>
    %139 = arith.mulf %100, %138 : vector<32x128xf32>
    %140 = vector.broadcast %137 : vector<1x128xf32> to vector<32x128xf32>
    %141 = arith.addf %139, %140 : vector<32x128xf32>
    %142 = arith.addf %141, %0 : vector<32x128xf32>
    %cst_51 = arith.constant 0.000000e+00 : f32
    %143 = vector.broadcast %cst_51 : f32 to vector<32x128xf32>
    %144 = arith.maximumf %142, %143 : vector<32x128xf32>
    %c0_52 = arith.constant 0 : index
    %c0_53 = arith.constant 0 : index
    %145 = vector.load %arg7[%c0_52, %c0_53] : memref<32x128xf32, #tpu.memory_space<vmem>>, vector<32x128xf32>
    tpu.vector_store %arg7[%c0_52, %c0_53], %144 {strides = array<i32>} : memref<32x128xf32, #tpu.memory_space<vmem>>, vector<32x128xf32>,
    return
  }
}

</mosaic_0001>

<bundles_post_ra>
// kernel: squeeze.2
= control target key start
LH: loop header
LB: loop body
LE: loop exit
PB: predicated region body
PF: predicated region fallthrough
CT: control target
= control target key end

     0   :  { %s14549_s0 = inlined_call_operand.vmem [shape: bf16[1,16,8,16,8], index: 0, kind: input, shape index: {}]   ;;  %s14550_s1 = inlined_call_operand.vmem [shape: bf16[128,128], index: 1, kind: output, shape index: {}]  }
   0x1   :  { %14554 = sst [smem:[#allocation11_spill]] %s14550_s1 }
   0x2   :  { %v12026_v0 = vld [vmem:[%s14549_s0 + $0x138] sm:$0xff]   ;;  %v11242_v1 = vld [vmem:[%s14549_s0 + $0x130] sm:$0xff]   ;;  %v11243_v2 = vld [vmem:[%s14549_s0 + $0x128] sm:$0xff]   ;;  %s12044_s18 = smov 3  ;;  %s12046_s19 = smov 12  ;;  %vm4102_vm0 = vcmask 1043458  }
   0x3   :  { %v10956_v3 = vunpack.c.h.bf16 %v12026_v0  ;;  %v10959_v4 = vunpack.c.l.bf16 %v11242_v1  ;;  %v10960_v5 = vunpack.c.h.bf16 %v11242_v1  ;;  %v10963_v6 = vunpack.c.l.bf16 %v11243_v2  ;;  %v11244_v7 = vld [vmem:[%s14549_s0 + $0x120] sm:$0xff]   ;;  %v11245_v8 = vld [vmem:[%s14549_s0 + $0x118] sm:$0xff]   ;;  %v11246_v9 = vld [vmem:[%s14549_s0 + $0x110] sm:$0xff]   ;;  %s12057_s26 = smov 48  ;;  %s12059_s27 = smov 192 }
   0x4   :  { %v10964_v10 = vunpack.c.h.bf16 %v11243_v2  ;;  %v10967_v11 = vunpack.c.l.bf16 %v11244_v7  ;;  %v10968_v12 = vunpack.c.h.bf16 %v11244_v7  ;;  %v10971_v13 = vunpack.c.l.bf16 %v11245_v8  ;;  %v11247_v14 = vld [vmem:[%s14549_s0 + $0x108] sm:$0xff]   ;;  %v11248_v15 = vld [vmem:[%s14549_s0 + $0x100] sm:$0xff]   ;;  %v11273_v16 = vld [vmem:[%s14549_s0 + $0x38] sm:$0xff]   ;;  %s12070_s5 = smov 3  ;;  %s12078_s10 = smov 12 }
   0x5   :  { %2837 = vst [vmem:[#allocation1 + $0x278] sm:$0xff] %v10956_v3  ;;  %2869 = vst [vmem:[#allocation1 + $0x268] sm:$0xff] %v10960_v5  ;;  %v10972_v17 = vunpack.c.h.bf16 %v11245_v8  ;;  %v10975_v18 = vunpack.c.l.bf16 %v11246_v9  ;;  %v10976_v19 = vunpack.c.h.bf16 %v11246_v9  ;;  %v10979_v20 = vunpack.c.l.bf16 %v11247_v14  ;;  %v11274_v21 = vld [vmem:[%s14549_s0 + $0x30] sm:$0xff]   ;;  %v11275_v22 = vld [vmem:[%s14549_s0 + $0x28] sm:$0xff]   ;;  %s12080_s11 = smov 48  ;;  %s12088_s16 = smov 192 }
   0x6   :  { %v11276_v23 = vld [vmem:[%s14549_s0 + $0x20] sm:$0xff]   ;;  %2885 = vst [vmem:[#allocation1 + $0x260] sm:$0xff] %v10959_v4  ;;  %2917 = vst [vmem:[#allocation1 + $0x250] sm:$0xff] %v10963_v6  ;;  %v10980_v24 = vunpack.c.h.bf16 %v11247_v14  ;;  %v10983_v25 = vunpack.c.l.bf16 %v11248_v15  ;;  %v10984_v26 = vunpack.c.h.bf16 %v11248_v15  ;;  %v11083_v27 = vunpack.c.l.bf16 %v11273_v16  ;;  %v11277_v28 = vld [vmem:[%s14549_s0 + $0x18] sm:$0xff]   ;;  %s12090_s17 = smov 3  ;;  %s12100_s24 = smov 12 }
   0x7   :  { %2901 = vst [vmem:[#allocation1 + $0x258] sm:$0xff] %v10964_v10  ;;  %2933 = vst [vmem:[#allocation1 + $0x248] sm:$0xff] %v10968_v12  ;;  %v11278_v29 = vld [vmem:[%s14549_s0 + $0x10] sm:$0xff]   ;;  %vm4106_vm1 = vcmask 1045508   ;;  %v11084_v30 = vunpack.c.h.bf16 %v11273_v16  ;;  %v11087_v31 = vunpack.c.l.bf16 %v11274_v21  ;;  %v11088_v32 = vunpack.c.h.bf16 %v11274_v21  ;;  %v11279_v34 = vld [vmem:[%s14549_s0 + $0x8] sm:$0xff]   ;;  %s12102_s25 = smov 48 }
   0x8   :  { %2949 = vst [vmem:[#allocation1 + $0x240] sm:$0xff] %v10967_v11  ;;  %2981 = vst [vmem:[#allocation1 + $0x230] sm:$0xff] %v10971_v13  ;;  %v11091_v33 = vunpack.c.l.bf16 %v11275_v22  ;;  %v11110_v35 = vld [vmem:[%s14549_s0] sm:$0xff]   ;;  %vm4110_vm2 = vcmask 1047558   ;;  %v11092_v36 = vunpack.c.h.bf16 %v11275_v22  ;;  %v11095_v37 = vunpack.c.l.bf16 %v11276_v23  ;;  %v12095_v40 = vld [vmem:[%s14549_s0 + $0x178] sm:$0xff]   ;;  %s12110_s3 = smov 192 }
   0x9   :  { %2965 = vst [vmem:[#allocation1 + $0x238] sm:$0xff] %v10972_v17  ;;  %2997 = vst [vmem:[#allocation1 + $0x228] sm:$0xff] %v10976_v19  ;;  %v11096_v38 = vunpack.c.h.bf16 %v11276_v23  ;;  %v11099_v39 = vunpack.c.l.bf16 %v11277_v28  ;;  %v11234_v41 = vld [vmem:[%s14549_s0 + $0x170] sm:$0xff]   ;;  %v11100_v42 = vunpack.c.h.bf16 %v11277_v28  ;;  %v11103_v43 = vunpack.c.l.bf16 %v11278_v29  ;;  %v11235_v46 = vld [vmem:[%s14549_s0 + $0x168] sm:$0xff]   ;;  %s12112_s4 = smov 3  ;;  %s12123_s12 = smov 12 }
   0xa   :  { %3013 = vst [vmem:[#allocation1 + $0x220] sm:$0xff] %v10975_v18  ;;  %3045 = vst [vmem:[#allocation1 + $0x210] sm:$0xff] %v10979_v20  ;;  %v11104_v44 = vunpack.c.h.bf16 %v11278_v29  ;;  %v11107_v45 = vunpack.c.l.bf16 %v11279_v34  ;;  %v11236_v47 = vld [vmem:[%s14549_s0 + $0x160] sm:$0xff]   ;;  %v11108_v48 = vunpack.c.h.bf16 %v11279_v34  ;;  %v11111_v49 = vunpack.c.l.bf16 %v11110_v35  ;;  %v11237_v52 = vld [vmem:[%s14549_s0 + $0x158] sm:$0xff]   ;;  %s12125_s13 = smov 48  ;;  %s12136_s22 = smov 192 }
   0xb   :  { %3029 = vst [vmem:[#allocation1 + $0x218] sm:$0xff] %v10980_v24  ;;  %3061 = vst [vmem:[#allocation1 + $0x208] sm:$0xff] %v10984_v26  ;;  %v11112_v50 = vunpack.c.h.bf16 %v11110_v35  ;;  %v10955_v51 = vunpack.c.l.bf16 %v12026_v0  ;;  %v12121_v53 = vld [vmem:[%s14549_s0 + $0x150] sm:$0xff]   ;;  %v10924_v54 = vunpack.c.h.bf16 %v12095_v40  ;;  %v10927_v55 = vunpack.c.l.bf16 %v11234_v41  ;;  %v11239_v58 = vld [vmem:[%s14549_s0 + $0x148] sm:$0xff]   ;;  %s12138_s23 = smov 3  ;;  %s12153_s8 = smov 12 }
   0xc   :  { %3077 = vst [vmem:[#allocation1 + $0x200] sm:$0xff] %v10983_v25  ;;  %3877 = vst [vmem:[#allocation1 + $0x70] sm:$0xff] %v11083_v27  ;;  %v10928_v56 = vunpack.c.h.bf16 %v11234_v41  ;;  %v10931_v57 = vunpack.c.l.bf16 %v11235_v46  ;;  %v12134_v59 = vld [vmem:[%s14549_s0 + $0x140] sm:$0xff]   ;;  %v10932_v60 = vunpack.c.h.bf16 %v11235_v46  ;;  %v10935_v61 = vunpack.c.l.bf16 %v11236_v47  ;;  %v11265_v0 = vld [vmem:[%s14549_s0 + $0x78] sm:$0xff]   ;;  %s12155_s9 = smov 48  ;;  %s12174_s30 = smov 192 }
   0xd   :  { %3861 = vst [vmem:[#allocation1 + $0x78] sm:$0xff] %v11084_v30  ;;  %3893 = vst [vmem:[#allocation1 + $0x68] sm:$0xff] %v11088_v32  ;;  %v10936_v62 = vunpack.c.h.bf16 %v11236_v47  ;;  %v10939_v63 = vunpack.c.l.bf16 %v11237_v52  ;;  %v12146_v1 = vld [vmem:[%s14549_s0 + $0x70] sm:$0xff]   ;;  %v12151_v2 = vld [vmem:[%s14549_s0 + $0x68] sm:$0xff]   ;;  %v10940_v3 = vunpack.c.h.bf16 %v11237_v52  ;;  %v10943_v4 = vunpack.c.l.bf16 %v12121_v53  ;;  %s12176_s2 = smov 3  ;;  %s12195_s28 = smov 12 }
   0xe   :  { %3909 = vst [vmem:[#allocation1 + $0x60] sm:$0xff] %v11087_v31  ;;  %3941 = vst [vmem:[#allocation1 + $0x50] sm:$0xff] %v11091_v33  ;;  %v10944_v5 = vunpack.c.h.bf16 %v12121_v53  ;;  %v10947_v6 = vunpack.c.l.bf16 %v11239_v58  ;;  %v12162_v7 = vld [vmem:[%s14549_s0 + $0x60] sm:$0xff]   ;;  %v12167_v8 = vld [vmem:[%s14549_s0 + $0x58] sm:$0xff]   ;;  %v10948_v10 = vunpack.c.h.bf16 %v11239_v58  ;;  %v10951_v11 = vunpack.c.l.bf16 %v12134_v59  ;;  %s12197_s29 = smov 48  ;;  %s12242_s6 = smov 3 }
   0xf   :  { %3925 = vst [vmem:[#allocation1 + $0x58] sm:$0xff] %v11092_v36  ;;  %3957 = vst [vmem:[#allocation1 + $0x48] sm:$0xff] %v11096_v38  ;;  %v12172_v9 = vld [vmem:[%s14549_s0 + $0x50] sm:$0xff]   ;;  %v10952_v12 = vunpack.c.h.bf16 %v12134_v59  ;;  %v11051_v13 = vunpack.c.l.bf16 %v11265_v0  ;;  %v12183_v14 = vld [vmem:[%s14549_s0 + $0x48] sm:$0xff]   ;;  %v11052_v20 = vunpack.c.h.bf16 %v11265_v0  ;;  %v11055_v21 = vunpack.c.l.bf16 %v12146_v1  ;;  %s12288_s7 = smov 192  ;;  %s12290_s14 = smov 3 }
  0x10   :  { %3973 = vst [vmem:[#allocation1 + $0x40] sm:$0xff] %v11095_v37  ;;  %4005 = vst [vmem:[#allocation1 + $0x30] sm:$0xff] %v11099_v39  ;;  %v12188_v15 = vld [vmem:[%s14549_s0 + $0x40] sm:$0xff]   ;;  %v12193_v16 = vld [vmem:[%s14549_s0 + $0x338] sm:$0xff]   ;;  %v11056_v22 = vunpack.c.h.bf16 %v12146_v1  ;;  %v11059_v23 = vunpack.c.l.bf16 %v12151_v2  ;;  %v11060_v29 = vunpack.c.h.bf16 %v12151_v2  ;;  %v11063_v30 = vunpack.c.l.bf16 %v12162_v7  ;;  %s12370_s20 = smov 12  ;;  %s12372_s21 = smov 48 }
  0x11   :  { %3989 = vst [vmem:[#allocation1 + $0x38] sm:$0xff] %v11100_v42  ;;  %4021 = vst [vmem:[#allocation1 + $0x28] sm:$0xff] %v11104_v44  ;;  %v12208_v24 = vld [vmem:[%s14549_s0 + $0x330] sm:$0xff]   ;;  %v12213_v25 = vld [vmem:[%s14549_s0 + $0x328] sm:$0xff]   ;;  %v11064_v31 = vunpack.c.h.bf16 %v12162_v7  ;;  %v11067_v36 = vunpack.c.l.bf16 %v12167_v8  ;;  %v11068_v37 = vunpack.c.h.bf16 %v12167_v8  ;;  %v11071_v38 = vunpack.c.l.bf16 %v12172_v9  ;;  %s12394_s15 = smov 3  ;;  %s12443_s1 = smov 12 }
  0x12   :  { %4037 = vst [vmem:[#allocation1 + $0x20] sm:$0xff] %v11103_v43  ;;  %4069 = vst [vmem:[#allocation1 + $0x10] sm:$0xff] %v11107_v45  ;;  %v4453_v17 = vld [vmem:[#allocation1 + $0x20f] ss:$16 sm:%s12070_s5]   ;;  %v12218_v26 = vld [vmem:[%s14549_s0 + $0x320] sm:$0xff]   ;;  %s12263_s5 = smov 12  ;;  %v11072_v44 = vunpack.c.h.bf16 %v12172_v9  ;;  %v11075_v45 = vunpack.c.l.bf16 %v12183_v14  ;;  %v11076_v46 = vunpack.c.h.bf16 %v12183_v14  ;;  %v11079_v53 = vunpack.c.l.bf16 %v12188_v15 }
  0x13   :  { %4053 = vst [vmem:[#allocation1 + $0x18] sm:$0xff] %v11108_v48  ;;  %4084 = vst [vmem:[#allocation1 + $0x8] sm:$0xff] %v11112_v50  ;;  %v4456_v18 = vld [vmem:[#allocation1 + $0x20f] ss:$16 sm:%s12078_s10]   ;;  %v12233_v33 = vld [vmem:[%s14549_s0 + $0x310] sm:$0xff]   ;;  %s12265_s10 = smov 48  ;;  %v10923_v40 = vunpack.c.l.bf16 %v12095_v40 }
  0x14   :  { %2853 = vst [vmem:[#allocation1 + $0x270] sm:$0xff] %v10955_v51  ;;  %4097 = vst [vmem:[#allocation1] sm:$0xff] %v11111_v49  ;;  %v4461_v19 = vld [vmem:[#allocation1 + $0x20f] ss:$16 sm:%s12080_s11]   ;;  %v4458_v27 = vsel %vm4102_vm0, %v4456_v18, %v4453_v17  ;;  %s12240_s11 = smov 192  ;;  %v12251_v39 = vld [vmem:[%s14549_s0 + $0x300] sm:$0xff]  }
  0x15   :  { %2581 = vst [vmem:[#allocation1 + $0x2f8] sm:$0xff] %v10924_v54  ;;  %2613 = vst [vmem:[#allocation1 + $0x2e8] sm:$0xff] %v10928_v56  ;;  %v4466_v28 = vld [vmem:[#allocation1 + $0x20f] ss:$16 sm:%s12088_s16]   ;;  %v4463_v35 = vsel %vm4106_vm1, %v4461_v19, %v4458_v27  ;;  %v12261_v42 = vld [vmem:[%s14549_s0 + $0x230] sm:$0xff]   ;;  %v11080_v54 = vunpack.c.h.bf16 %v12188_v15  ;;  %s12349_s16 = smov 3  ;;  %v10728_v9 = vunpack.c.h.bf16 %v12251_v39 }
  0x16   :  { %2629 = vst [vmem:[#allocation1 + $0x2e0] sm:$0xff] %v10927_v55  ;;  %2661 = vst [vmem:[#allocation1 + $0x2d0] sm:$0xff] %v10931_v57  ;;  %v12228_v32 = vld [vmem:[%s14549_s0 + $0x318] sm:$0xff]   ;;  %v12238_v34 = vld [vmem:[%s14549_s0 + $0x308] sm:$0xff]   ;;  %v12268_v43 = vsel %vm4110_vm2, %v4466_v28, %v4463_v35  ;;  %v10700_v55 = vunpack.c.h.bf16 %v12193_v16  ;;  %vm4112_vm3 = vcmask 64512   ;;  %vm4449_vm4 = vcmask 1048512  }
  0x17   :  { %2645 = vst [vmem:[#allocation1 + $0x2d8] sm:$0xff] %v10932_v60  ;;  %2677 = vst [vmem:[#allocation1 + $0x2c8] sm:$0xff] %v10936_v62  ;;  %v12256_v41 = vld [vmem:[%s14549_s0 + $0x238] sm:$0xff]   ;;  %v12276_v47 = vld [vmem:[%s14549_s0 + $0x228] sm:$0xff]   ;;  %v10704_v60 = vunpack.c.h.bf16 %v12208_v24  ;;  %v10712_v62 = vunpack.c.h.bf16 %v12218_v26  ;;  %v10716_v2 = vunpack.c.h.bf16 %v12228_v32  ;;  %vm4816_vm5 = vcmask 982912  }
  0x18   :  { %2693 = vst [vmem:[#allocation1 + $0x2c0] sm:$0xff] %v10935_v61  ;;  %2725 = vst [vmem:[#allocation1 + $0x2b0] sm:$0xff] %v10939_v63  ;;  %v12281_v48 = vld [vmem:[%s14549_s0 + $0x220] sm:$0xff]   ;;  %v12286_v49 = vld [vmem:[%s14549_s0 + $0x218] sm:$0xff]   ;;  %v10708_v61 = vunpack.c.h.bf16 %v12213_v25  ;;  %v10836_v19 = vunpack.c.h.bf16 %v12276_v47  ;;  %vm5183_vm6 = vcmask 917312   ;;  %vm5550_vm7 = vcmask 851712  }
  0x19   :  { %2709 = vst [vmem:[#allocation1 + $0x2b8] sm:$0xff] %v10940_v3  ;;  %2741 = vst [vmem:[#allocation1 + $0x2a8] sm:$0xff] %v10944_v5  ;;  %v12302_v56 = vld [vmem:[%s14549_s0 + $0x210] sm:$0xff]   ;;  %v12307_v57 = vld [vmem:[%s14549_s0 + $0x208] sm:$0xff]   ;;  %v10720_v3 = vunpack.c.h.bf16 %v12233_v33  ;;  %vm5917_vm8 = vcmask 786112   ;;  %vm6284_vm9 = vcmask 720512  }
  0x1a   :  { %2757 = vst [vmem:[#allocation1 + $0x2a0] sm:$0xff] %v10943_v4  ;;  %2789 = vst [vmem:[#allocation1 + $0x290] sm:$0xff] %v10947_v6  ;;  %v4431_v50 = vld [vmem:[#allocation1 + $0xf] ss:$16 sm:%s12044_s18]   ;;  %v12317_v63 = vld [vmem:[%s14549_s0 + $0x200] sm:$0xff]   ;;  %s12324_s18 = smov 12  ;;  %v10724_v4 = vunpack.c.h.bf16 %v12238_v34  ;;  %v10848_v24 = vunpack.c.h.bf16 %v12302_v56  ;;  %v10852_v25 = vunpack.c.h.bf16 %v12307_v57 }
  0x1b   :  { %2773 = vst [vmem:[#allocation1 + $0x298] sm:$0xff] %v10948_v10  ;;  %2805 = vst [vmem:[#allocation1 + $0x288] sm:$0xff] %v10952_v12  ;;  %v4434_v51 = vld [vmem:[#allocation1 + $0xf] ss:$16 sm:%s12046_s19]   ;;  %s12326_s19 = smov 48  ;;  %v12335_v5 = vld [vmem:[%s14549_s0 + $0x370] sm:$0xff]   ;;  %v10828_v10 = vunpack.c.h.bf16 %v12256_v41  ;;  %v10856_v26 = vunpack.c.h.bf16 %v12317_v63 }
  0x1c   :  { %2821 = vst [vmem:[#allocation1 + $0x280] sm:$0xff] %v10951_v11  ;;  %3621 = vst [vmem:[#allocation1 + $0xf0] sm:$0xff] %v11051_v13  ;;  %v4439_v52 = vld [vmem:[#allocation1 + $0xf] ss:$16 sm:%s12057_s26]   ;;  %v4436_v58 = vsel %vm4102_vm0, %v4434_v51, %v4431_v50  ;;  %v12345_v7 = vld [vmem:[%s14549_s0 + $0x360] sm:$0xff]   ;;  %s12347_s26 = smov 192  ;;  %v10832_v11 = vunpack.c.h.bf16 %v12261_v42 }
  0x1d   :  { %3605 = vst [vmem:[#allocation1 + $0xf8] sm:$0xff] %v11052_v20  ;;  %3637 = vst [vmem:[#allocation1 + $0xe8] sm:$0xff] %v11056_v22  ;;  %v4444_v59 = vld [vmem:[#allocation1 + $0xf] ss:$16 sm:%s12059_s27]   ;;  %v4441_v1 = vsel %vm4106_vm1, %v4439_v52, %v4436_v58  ;;  %v12363_v13 = vld [vmem:[%s14549_s0 + $0x350] sm:$0xff]   ;;  %v10840_v20 = vunpack.c.h.bf16 %v12281_v48  ;;  %s12392_s27 = smov 192 }
  0x1e   :  { %3653 = vst [vmem:[#allocation1 + $0xe0] sm:$0xff] %v11055_v21  ;;  %3685 = vst [vmem:[#allocation1 + $0xd0] sm:$0xff] %v11059_v23  ;;  %v12322_v0 = vld [vmem:[%s14549_s0 + $0x378] sm:$0xff]   ;;  %v12340_v6 = vld [vmem:[%s14549_s0 + $0x368] sm:$0xff]   ;;  %v4446_v8 = vsel %vm4110_vm2, %v4444_v59, %v4441_v1  ;;  %v10844_v21 = vunpack.c.h.bf16 %v12286_v49  ;;  %v10688_v39 = vunpack.c.h.bf16 %v12363_v13  ;;  %vm6651_vm10 = vcmask 654912  }
  0x1f   :  { %3669 = vst [vmem:[#allocation1 + $0xd8] sm:$0xff] %v11060_v29  ;;  %3701 = vst [vmem:[#allocation1 + $0xc8] sm:$0xff] %v11064_v31  ;;  %v12358_v12 = vld [vmem:[%s14549_s0 + $0x358] sm:$0xff]   ;;  %v12368_v14 = vld [vmem:[%s14549_s0 + $0x348] sm:$0xff]   ;;  %v11302_v15 = vpack.i.bf16 %v12268_v43, %v4446_v8  ;;  %v10672_v31 = vunpack.c.h.bf16 %v12335_v5  ;;  %v10676_v32 = vunpack.c.h.bf16 %v12340_v6  ;;  %vm7018_vm11 = vcmask 589312  }
  0x20   :  { %3717 = vst [vmem:[#allocation1 + $0xc0] sm:$0xff] %v11063_v30  ;;  %3733 = vst [vmem:[#allocation1 + $0xb8] sm:$0xff] %v11068_v37  ;;  %v11176_v27 = vld [vmem:[%s14549_s0 + $0x340] sm:$0xff]   ;;  %v11201_v28 = vld [vmem:[%s14549_s0 + $0x278] sm:$0xff]   ;;  %v10668_v30 = vunpack.c.h.bf16 %v12322_v0  ;;  %v10680_v37 = vunpack.c.h.bf16 %v12345_v7  ;;  %vm7385_vm12 = vcmask 523712   ;;  %vm7752_vm13 = vcmask 458112  }
  0x21   :  { %3749 = vst [vmem:[#allocation1 + $0xb0] sm:$0xff] %v11067_v36  ;;  %3781 = vst [vmem:[#allocation1 + $0xa0] sm:$0xff] %v11071_v38  ;;  %v11202_v33 = vld [vmem:[%s14549_s0 + $0x270] sm:$0xff]   ;;  %v11203_v34 = vld [vmem:[%s14549_s0 + $0x268] sm:$0xff]   ;;  %v10684_v38 = vunpack.c.h.bf16 %v12358_v12  ;;  %vm8119_vm14 = vcmask 392512   ;;  %vm8486_vm15 = vcmask 326912  }
  0x22   :  { %3765 = vst [vmem:[#allocation1 + $0xa8] sm:$0xff] %v11072_v44  ;;  %3797 = vst [vmem:[#allocation1 + $0x98] sm:$0xff] %v11076_v46  ;;  %v4545_v16 = vld [vmem:[#allocation1 + $0x28f] ss:$16 sm:%s12112_s4]   ;;  %s14551_s4 = smov 120   ;;  %v11204_v35 = vld [vmem:[%s14549_s0 + $0x260] sm:$0xff]   ;;  %v10692_v44 = vunpack.c.h.bf16 %v12368_v14  ;;  %v10796_v46 = vunpack.c.h.bf16 %v11201_v28  ;;  %v10800_v47 = vunpack.c.h.bf16 %v11202_v33 }
  0x23   :  { %3813 = vst [vmem:[#allocation1 + $0x90] sm:$0xff] %v11075_v45  ;;  %3829 = vst [vmem:[#allocation1 + $0x88] sm:$0xff] %v11080_v54  ;;  %v4548_v17 = vld [vmem:[#allocation1 + $0x28f] ss:$16 sm:%s12123_s12]   ;;  %11303 = vrot.lane.b32.xlu0 %v11302_v15, %s14551_s4  ;;  %s12410_s12 = smov 12  ;;  %v11206_v42 = vld [vmem:[%s14549_s0 + $0x250] sm:$0xff]   ;;  %v10696_v45 = vunpack.c.h.bf16 %v11176_v27  ;;  %v10804_v54 = vunpack.c.h.bf16 %v11203_v34 }
  0x24   :  { %2597 = vst [vmem:[#allocation1 + $0x2f0] sm:$0xff] %v10923_v40  ;;  %3845 = vst [vmem:[#allocation1 + $0x80] sm:$0xff] %v11079_v53  ;;  %v4553_v18 = vld [vmem:[#allocation1 + $0x28f] ss:$16 sm:%s12125_s13]   ;;  %v4550_v22 = vsel %vm4102_vm0, %v4548_v17, %v4545_v16  ;;  %s12412_s13 = smov 48  ;;  %s12429_s4 = smov 192  ;;  %v10808_v40 = vunpack.c.h.bf16 %v11204_v35  ;;  %v10816_v56 = vunpack.c.h.bf16 %v11206_v42 }
  0x25   :  { %789 = vst [vmem:[#allocation1 + $0x678] sm:$0xff] %v10700_v55  ;;  %821 = vst [vmem:[#allocation1 + $0x668] sm:$0xff] %v10704_v60  ;;  %v4558_v23 = vld [vmem:[#allocation1 + $0x28f] ss:$16 sm:%s12136_s22]   ;;  %v4555_v29 = vsel %vm4106_vm1, %v4553_v18, %v4550_v22  ;;  %s12431_s22 = smov 3  ;;  %v11208_v48 = vld [vmem:[%s14549_s0 + $0x240] sm:$0xff]  }
  0x26   :  { %853 = vst [vmem:[#allocation1 + $0x658] sm:$0xff] %v10708_v61  ;;  %885 = vst [vmem:[#allocation1 + $0x648] sm:$0xff] %v10712_v62  ;;  %v12415_v36 = vsel %vm4110_vm2, %v4558_v23, %v4555_v29  ;;  %v11205_v41 = vld [vmem:[%s14549_s0 + $0x258] sm:$0xff]   ;;  %v11207_v43 = vld [vmem:[%s14549_s0 + $0x248] sm:$0xff]   ;;  %14555 = sst [smem:[#allocation2_spill]] %s12431_s22  ;;  %s12445_s22 = smov 48  ;;  %v10824_v60 = vunpack.c.h.bf16 %v11208_v48 }
  0x27   :  { %917 = vst [vmem:[#allocation1 + $0x638] sm:$0xff] %v10716_v2  ;;  %949 = vst [vmem:[#allocation1 + $0x628] sm:$0xff] %v10720_v3  ;;  %v11225_v49 = vld [vmem:[%s14549_s0 + $0x1b8] sm:$0xff]   ;;  %v11226_v50 = vld [vmem:[%s14549_s0 + $0x1b0] sm:$0xff]   ;;  %v10812_v55 = vunpack.c.h.bf16 %v11205_v41  ;;  %v10820_v59 = vunpack.c.h.bf16 %v11207_v43 }
  0x28   :  { %981 = vst [vmem:[#allocation1 + $0x618] sm:$0xff] %v10724_v4  ;;  %1013 = vst [vmem:[#allocation1 + $0x608] sm:$0xff] %v10728_v9  ;;  %v10892_v61 = vunpack.c.h.bf16 %v11225_v49  ;;  %v11227_v62 = vld [vmem:[%s14549_s0 + $0x1a8] sm:$0xff]   ;;  %v11228_v63 = vld [vmem:[%s14549_s0 + $0x1a0] sm:$0xff]   ;;  %v10896_v1 = vunpack.c.h.bf16 %v11226_v50 }
  0x29   :  { %1813 = vst [vmem:[#allocation1 + $0x478] sm:$0xff] %v10828_v10  ;;  %1845 = vst [vmem:[#allocation1 + $0x468] sm:$0xff] %v10832_v11  ;;  %v10900_v2 = vunpack.c.h.bf16 %v11227_v62  ;;  %v10904_v3 = vunpack.c.h.bf16 %v11228_v63  ;;  %v11229_v4 = vld [vmem:[%s14549_s0 + $0x198] sm:$0xff]   ;;  %v11230_v5 = vld [vmem:[%s14549_s0 + $0x190] sm:$0xff]  }
  0x2a   :  { %1877 = vst [vmem:[#allocation1 + $0x458] sm:$0xff] %v10836_v19  ;;  %1909 = vst [vmem:[#allocation1 + $0x448] sm:$0xff] %v10840_v20  ;;  %v4522_v51 = vld [vmem:[#allocation1 + $0x8f] ss:$16 sm:%s12090_s17]   ;;  %s12458_s17 = smov 192  ;;  %v10908_v11 = vunpack.c.h.bf16 %v11229_v4  ;;  %v10912_v12 = vunpack.c.h.bf16 %v11230_v5  ;;  %v11232_v17 = vld [vmem:[%s14549_s0 + $0x180] sm:$0xff]  }
  0x2b   :  { %1941 = vst [vmem:[#allocation1 + $0x438] sm:$0xff] %v10844_v21  ;;  %1973 = vst [vmem:[#allocation1 + $0x428] sm:$0xff] %v10848_v24  ;;  %v4525_v52 = vld [vmem:[#allocation1 + $0x8f] ss:$16 sm:%s12100_s24]   ;;  %s12460_s24 = smov 3  ;;  %v10920_v23 = vunpack.c.h.bf16 %v11232_v17  ;;  %v11258_v28 = vld [vmem:[%s14549_s0 + $0xb0] sm:$0xff]  }
  0x2c   :  { %2005 = vst [vmem:[#allocation1 + $0x418] sm:$0xff] %v10852_v25  ;;  %2037 = vst [vmem:[#allocation1 + $0x408] sm:$0xff] %v10856_v26  ;;  %v4530_v53 = vld [vmem:[#allocation1 + $0x8f] ss:$16 sm:%s12102_s25]   ;;  %v4527_v57 = vsel %vm4102_vm0, %v4525_v52, %v4522_v51  ;;  %s12472_s25 = smov 12  ;;  %v11260_v33 = vld [vmem:[%s14549_s0 + $0xa0] sm:$0xff]  }
  0x2d   :  { %533 = vst [vmem:[#allocation1 + $0x6f8] sm:$0xff] %v10668_v30  ;;  %565 = vst [vmem:[#allocation1 + $0x6e8] sm:$0xff] %v10672_v31  ;;  %v4535_v58 = vld [vmem:[#allocation1 + $0x8f] ss:$16 sm:%s12110_s3]   ;;  %v4532_v0 = vsel %vm4106_vm1, %v4530_v53, %v4527_v57  ;;  %s12474_s3 = smov 48  ;;  %v11024_v31 = vunpack.c.h.bf16 %v11258_v28  ;;  %v11262_v35 = vld [vmem:[%s14549_s0 + $0x90] sm:$0xff]   ;;  %v11032_v41 = vunpack.c.h.bf16 %v11260_v33 }
  0x2e   :  { %597 = vst [vmem:[#allocation1 + $0x6d8] sm:$0xff] %v10676_v32  ;;  %629 = vst [vmem:[#allocation1 + $0x6c8] sm:$0xff] %v10680_v37  ;;  %v11231_v6 = vld [vmem:[%s14549_s0 + $0x188] sm:$0xff]   ;;  %v4537_v7 = vsel %vm4110_vm2, %v4535_v58, %v4532_v0  ;;  %v11257_v18 = vld [vmem:[%s14549_s0 + $0xb8] sm:$0xff]   ;;  %v11040_v43 = vunpack.c.h.bf16 %v11262_v35 }
  0x2f   :  { %661 = vst [vmem:[#allocation1 + $0x6b8] sm:$0xff] %v10684_v38  ;;  %693 = vst [vmem:[#allocation1 + $0x6a8] sm:$0xff] %v10688_v39  ;;  %v4499_v8 = vld [vmem:[#allocation1 + $0x60f] ss:$16 sm:%s12176_s2]   ;;  %v10916_v13 = vunpack.c.h.bf16 %v11231_v6  ;;  %v11312_v14 = vpack.i.bf16 %v12415_v36, %v4537_v7  ;;  %s12489_s2 = smov 192  ;;  %v11020_v24 = vunpack.c.h.bf16 %v11257_v18  ;;  %v11264_v48 = vld [vmem:[%s14549_s0 + $0x80] sm:$0xff]  }
  0x30   :  { %725 = vst [vmem:[#allocation1 + $0x698] sm:$0xff] %v10692_v44  ;;  %757 = vst [vmem:[#allocation1 + $0x688] sm:$0xff] %v10696_v45  ;;  %v4502_v9 = vld [vmem:[#allocation1 + $0x60f] ss:$16 sm:%s12195_s28]   ;;  %s12491_s28 = smov 3  ;;  %v11162_v58 = vld [vmem:[%s14549_s0 + $0x3b0] sm:$0xff]  }
  0x31   :  { %1557 = vst [vmem:[#allocation1 + $0x4f8] sm:$0xff] %v10796_v46  ;;  %1589 = vst [vmem:[#allocation1 + $0x4e8] sm:$0xff] %v10800_v47  ;;  %v4507_v10 = vld [vmem:[#allocation1 + $0x60f] ss:$16 sm:%s12197_s29]   ;;  %v4504_v15 = vsel %vm4102_vm0, %v4502_v9, %v4499_v8  ;;  %s12537_s29 = smov 12  ;;  %v11164_v63 = vld [vmem:[%s14549_s0 + $0x3a0] sm:$0xff]  }
  0x32   :  { %1621 = vst [vmem:[#allocation1 + $0x4d8] sm:$0xff] %v10804_v54  ;;  %1653 = vst [vmem:[#allocation1 + $0x4c8] sm:$0xff] %v10808_v40  ;;  %v4512_v16 = vld [vmem:[#allocation1 + $0x60f] ss:$16 sm:%s12240_s11]   ;;  %v4509_v22 = vsel %vm4106_vm1, %v4507_v10, %v4504_v15  ;;  %s12507_s11 = smov 12  ;;  %v11048_v54 = vunpack.c.h.bf16 %v11264_v48  ;;  %v11166_v5 = vld [vmem:[%s14549_s0 + $0x390] sm:$0xff]  }
  0x33   :  { %1685 = vst [vmem:[#allocation1 + $0x4b8] sm:$0xff] %v10812_v55  ;;  %1717 = vst [vmem:[#allocation1 + $0x4a8] sm:$0xff] %v10816_v56  ;;  %v4476_v19 = vld [vmem:[#allocation1 + $0x40f] ss:$16 sm:%s12138_s23]   ;;  %s14556_s23 = smov 120   ;;  %v4514_v27 = vsel %vm4110_vm2, %v4512_v16, %v4509_v22  ;;  %v11168_v7 = vld [vmem:[%s14549_s0 + $0x380] sm:$0xff]  }
  0x34   :  { %1749 = vst [vmem:[#allocation1 + $0x498] sm:$0xff] %v10820_v59  ;;  %1781 = vst [vmem:[#allocation1 + $0x488] sm:$0xff] %v10824_v60  ;;  %v4479_v20 = vld [vmem:[#allocation1 + $0x40f] ss:$16 sm:%s12153_s8]   ;;  %11313 = vrot.lane.b32.xlu1 %v11312_v14, %s14556_s23  ;;  %s12509_s8 = smov 48  ;;  %v10664_v14 = vunpack.c.h.bf16 %v11168_v7  ;;  %v11194_v18 = vld [vmem:[%s14549_s0 + $0x2b0] sm:$0xff]  }
  0x35   :  { %2325 = vst [vmem:[#allocation1 + $0x378] sm:$0xff] %v10892_v61  ;;  %2357 = vst [vmem:[#allocation1 + $0x368] sm:$0xff] %v10896_v1  ;;  %v4484_v21 = vld [vmem:[#allocation1 + $0x40f] ss:$16 sm:%s12155_s9]   ;;  %v4481_v25 = vsel %vm4102_vm0, %v4479_v20, %v4476_v19  ;;  %s12521_s9 = smov 192  ;;  %v10640_v61 = vunpack.c.h.bf16 %v11162_v58  ;;  %v10768_v20 = vunpack.c.h.bf16 %v11194_v18  ;;  %v11196_v22 = vld [vmem:[%s14549_s0 + $0x2a0] sm:$0xff]  }
  0x36   :  { %2389 = vst [vmem:[#allocation1 + $0x358] sm:$0xff] %v10900_v2  ;;  %2421 = vst [vmem:[#allocation1 + $0x348] sm:$0xff] %v10904_v3  ;;  %v4489_v26 = vld [vmem:[#allocation1 + $0x40f] ss:$16 sm:%s12174_s30]   ;;  %v4486_v30 = vsel %vm4106_vm1, %v4484_v21, %v4481_v25  ;;  %s12523_s30 = smov 3  ;;  %v10648_v3 = vunpack.c.h.bf16 %v11164_v63  ;;  %v11198_v28 = vld [vmem:[%s14549_s0 + $0x290] sm:$0xff]  }
  0x37   :  { %2453 = vst [vmem:[#allocation1 + $0x338] sm:$0xff] %v10908_v11  ;;  %2485 = vst [vmem:[#allocation1 + $0x328] sm:$0xff] %v10912_v12  ;;  %v11259_v29 = vld [vmem:[%s14549_s0 + $0xa8] sm:$0xff]   ;;  %v11261_v34 = vld [vmem:[%s14549_s0 + $0x98] sm:$0xff]   ;;  %v4491_v36 = vsel %vm4110_vm2, %v4489_v26, %v4486_v30  ;;  %v10656_v12 = vunpack.c.h.bf16 %v11166_v5  ;;  %v10776_v26 = vunpack.c.h.bf16 %v11196_v22 }
  0x38   :  { %2517 = vst [vmem:[#allocation1 + $0x318] sm:$0xff] %v10916_v13  ;;  %2549 = vst [vmem:[#allocation1 + $0x308] sm:$0xff] %v10920_v23  ;;  %v11028_v32 = vunpack.c.h.bf16 %v11259_v29  ;;  %v4591_v37 = vld [vmem:[#allocation1 + $0x68f] ss:$16 sm:%s12290_s14]   ;;  %v11036_v42 = vunpack.c.h.bf16 %v11261_v34  ;;  %v11307_v44 = vpack.i.bf16 %v4514_v27, %v4491_v36  ;;  %s12539_s14 = smov 48  ;;  %v11200_v30 = vld [vmem:[%s14549_s0 + $0x280] sm:$0xff]  }
  0x39   :  { %3349 = vst [vmem:[#allocation1 + $0x178] sm:$0xff] %v11020_v24  ;;  %v4594_v38 = vld [vmem:[#allocation1 + $0x68f] ss:$16 sm:%s12324_s18]   ;;  %3381 = vst [vmem:[#allocation1 + $0x168] sm:$0xff] %v11024_v31  ;;  %s12555_s18 = smov 192  ;;  %v10784_v31 = vunpack.c.h.bf16 %v11198_v28  ;;  %v10792_v33 = vunpack.c.h.bf16 %v11200_v30  ;;  %v11218_v35 = vld [vmem:[%s14549_s0 + $0x1f0] sm:$0xff]  }
  0x3a   :  { %v4599_v39 = vld [vmem:[#allocation1 + $0x68f] ss:$16 sm:%s12326_s19]   ;;  %v4596_v45 = vsel %vm4102_vm0, %v4594_v38, %v4591_v37  ;;  %3413 = vst [vmem:[#allocation1 + $0x158] sm:$0xff] %v11028_v32  ;;  %3445 = vst [vmem:[#allocation1 + $0x148] sm:$0xff] %v11032_v41  ;;  %11308 = vrot.lane.b32.xlu0 %v11307_v44, %s14556_s23  ;;  %s12557_s19 = smov 3  ;;  %v11154_v18 = vld [vmem:[%s14549_s0 + $0x3f0] sm:$0xff]  }
  0x3b   :  { %v4604_v46 = vld [vmem:[#allocation1 + $0x68f] ss:$16 sm:%s12347_s26]   ;;  %v4601_v52 = vsel %vm4106_vm1, %v4599_v39, %v4596_v45  ;;  %3477 = vst [vmem:[#allocation1 + $0x138] sm:$0xff] %v11036_v42  ;;  %3509 = vst [vmem:[#allocation1 + $0x128] sm:$0xff] %v11040_v43  ;;  %14557 = sst [smem:[#allocation3_spill]] %s12557_s19  ;;  %s12598_s26 = smov 12  ;;  %v10864_v42 = vunpack.c.h.bf16 %v11218_v35 }
  0x3c   :  { %v11263_v47 = vld [vmem:[%s14549_s0 + $0x88] sm:$0xff]   ;;  %v4606_v56 = vsel %vm4110_vm2, %v4604_v46, %v4601_v52  ;;  %v11161_v57 = vld [vmem:[%s14549_s0 + $0x3b8] sm:$0xff]   ;;  %3573 = vst [vmem:[#allocation1 + $0x108] sm:$0xff] %v11048_v54  ;;  %309 = vst [vmem:[#allocation1 + $0x768] sm:$0xff] %v10640_v61  ;;  %s12681_s19 = smov 3 }
  0x3d   :  { %v4568_v49 = vld [vmem:[#allocation1 + $0x48f] ss:$16 sm:%s12242_s6]   ;;  %v11044_v53 = vunpack.c.h.bf16 %v11263_v47  ;;  %v10636_v60 = vunpack.c.h.bf16 %v11161_v57  ;;  %s12569_s6 = smov 12  ;;  %373 = vst [vmem:[#allocation1 + $0x748] sm:$0xff] %v10648_v3  ;;  %437 = vst [vmem:[#allocation1 + $0x728] sm:$0xff] %v10656_v12  ;;  %v11220_v47 = vld [vmem:[%s14549_s0 + $0x1e0] sm:$0xff]  }
  0x3e   :  { %v4571_v50 = vld [vmem:[#allocation1 + $0x48f] ss:$16 sm:%s12263_s5]   ;;  %14558 = sst [smem:[#allocation4_spill]] %s12569_s6  ;;  %s12571_s5 = smov 48  ;;  %501 = vst [vmem:[#allocation1 + $0x708] sm:$0xff] %v10664_v14  ;;  %1333 = vst [vmem:[#allocation1 + $0x568] sm:$0xff] %v10768_v20 }
  0x3f   :  { %v4576_v51 = vld [vmem:[#allocation1 + $0x48f] ss:$16 sm:%s12265_s10]   ;;  %v4573_v40 = vsel %vm4102_vm0, %v4571_v50, %v4568_v49  ;;  %3541 = vst [vmem:[#allocation1 + $0x118] sm:$0xff] %v11044_v53  ;;  %14559 = sst [smem:[#allocation5_spill]] %s12571_s5  ;;  %s12583_s10 = smov 192  ;;  %277 = vst [vmem:[#allocation1 + $0x778] sm:$0xff] %v10636_v60  ;;  %v10872_v50 = vunpack.c.h.bf16 %v11220_v47 }
  0x40   :  { %v4581_v55 = vld [vmem:[#allocation1 + $0x48f] ss:$16 sm:%s12288_s7]   ;;  %v4578_v59 = vsel %vm4106_vm1, %v4576_v51, %v4573_v40  ;;  %14560 = sst [smem:[#allocation6_spill]] %s12583_s10  ;;  %s12585_s7 = smov 3  ;;  %1397 = vst [vmem:[#allocation1 + $0x548] sm:$0xff] %v10776_v26  ;;  %1461 = vst [vmem:[#allocation1 + $0x528] sm:$0xff] %v10784_v31 }
  0x41   :  { %v11163_v62 = vld [vmem:[%s14549_s0 + $0x3a8] sm:$0xff]   ;;  %v11165_v0 = vld [vmem:[%s14549_s0 + $0x398] sm:$0xff]   ;;  %v4583_v1 = vsel %vm4110_vm2, %v4581_v55, %v4578_v59  ;;  %s12626_s10 = smov 12  ;;  %s12639_s6 = smov 192  ;;  %1525 = vst [vmem:[#allocation1 + $0x508] sm:$0xff] %v10792_v33  ;;  %2101 = vst [vmem:[#allocation1 + $0x3e8] sm:$0xff] %v10864_v42 }
  0x42   :  { %v10644_v2 = vunpack.c.h.bf16 %v11163_v62  ;;  %v10652_v4 = vunpack.c.h.bf16 %v11165_v0  ;;  %v11167_v6 = vld [vmem:[%s14549_s0 + $0x388] sm:$0xff]   ;;  %v11317_v8 = vpack.i.bf16 %v4606_v56, %v4583_v1  ;;  %v11193_v17 = vld [vmem:[%s14549_s0 + $0x2b8] sm:$0xff]   ;;  %s12653_s5 = smov 3  ;;  %v11222_v52 = vld [vmem:[%s14549_s0 + $0x1d0] sm:$0xff]   ;;  %2165 = vst [vmem:[#allocation1 + $0x3c8] sm:$0xff] %v10872_v50 }
  0x43   :  { %v4637_v9 = vld [vmem:[#allocation1 + $0x30f] ss:$16 sm:%s12394_s15]   ;;  %v10660_v13 = vunpack.c.h.bf16 %v11167_v6  ;;  %s12600_s15 = smov 48  ;;  %v10764_v19 = vunpack.c.h.bf16 %v11193_v17  ;;  %v11224_v54 = vld [vmem:[%s14549_s0 + $0x1c0] sm:$0xff]   ;;  %v10880_v55 = vunpack.c.h.bf16 %v11222_v52  ;;  %v11250_v59 = vld [vmem:[%s14549_s0 + $0xf0] sm:$0xff]  }
  0x44   :  { %v4640_v10 = vld [vmem:[#allocation1 + $0x30f] ss:$16 sm:%s12410_s12]   ;;  %341 = vst [vmem:[#allocation1 + $0x758] sm:$0xff] %v10644_v2  ;;  %405 = vst [vmem:[#allocation1 + $0x738] sm:$0xff] %v10652_v4  ;;  %11318 = vrot.lane.b32.xlu1 %v11317_v8, %s14556_s23  ;;  %s12612_s12 = smov 192  ;;  %v10888_v57 = vunpack.c.h.bf16 %v11224_v54  ;;  %v10992_v2 = vunpack.c.h.bf16 %v11250_v59  ;;  %v11252_v6 = vld [vmem:[%s14549_s0 + $0xe0] sm:$0xff]  }
  0x45   :  { %v4645_v11 = vld [vmem:[#allocation1 + $0x30f] ss:$16 sm:%s12412_s13]   ;;  %v4642_v15 = vsel %vm4102_vm0, %v4640_v10, %v4637_v9  ;;  %469 = vst [vmem:[#allocation1 + $0x718] sm:$0xff] %v10660_v13  ;;  %s12614_s13 = smov 3  ;;  %1301 = vst [vmem:[#allocation1 + $0x578] sm:$0xff] %v10764_v19  ;;  %v11000_v9 = vunpack.c.h.bf16 %v11252_v6  ;;  %v11256_v13 = vld [vmem:[%s14549_s0 + $0xc0] sm:$0xff]  }
  0x46   :  { %v4650_v16 = vld [vmem:[#allocation1 + $0x30f] ss:$16 sm:%s12429_s4]   ;;  %v4647_v24 = vsel %vm4106_vm1, %v4645_v11, %v4642_v15  ;;  %s12628_s4 = smov 48  ;;  %2229 = vst [vmem:[#allocation1 + $0x3a8] sm:$0xff] %v10880_v55  ;;  %2293 = vst [vmem:[#allocation1 + $0x388] sm:$0xff] %v10888_v57  ;;  %v11254_v11 = vld [vmem:[%s14549_s0 + $0xd0] sm:$0xff]  }
  0x47   :  { %v11195_v21 = vld [vmem:[%s14549_s0 + $0x2a8] sm:$0xff]   ;;  %v11197_v23 = vld [vmem:[%s14549_s0 + $0x298] sm:$0xff]   ;;  %v4652_v46 = vsel %vm4110_vm2, %v4650_v16, %v4647_v24  ;;  %3125 = vst [vmem:[#allocation1 + $0x1e8] sm:$0xff] %v10992_v2  ;;  %v11008_v14 = vunpack.c.h.bf16 %v11254_v11  ;;  %v11016_v16 = vunpack.c.h.bf16 %v11256_v13  ;;  %3189 = vst [vmem:[#allocation1 + $0x1c8] sm:$0xff] %v11000_v9  ;;  %v10608_v24 = vunpack.c.h.bf16 %v11154_v18 }
  0x48   :  { %v10772_v25 = vunpack.c.h.bf16 %v11195_v21  ;;  %v10780_v27 = vunpack.c.h.bf16 %v11197_v23  ;;  %v11199_v29 = vld [vmem:[%s14549_s0 + $0x288] sm:$0xff]   ;;  %v11217_v34 = vld [vmem:[%s14549_s0 + $0x1f8] sm:$0xff]   ;;  %v11188_v54 = vld [vmem:[%s14549_s0 + $0x2e0] sm:$0xff]  }
  0x49   :  { %v10788_v32 = vunpack.c.h.bf16 %v11199_v29  ;;  %v11219_v36 = vld [vmem:[%s14549_s0 + $0x1e8] sm:$0xff]   ;;  %v10860_v41 = vunpack.c.h.bf16 %v11217_v34  ;;  %v11221_v48 = vld [vmem:[%s14549_s0 + $0x1d8] sm:$0xff]   ;;  %3253 = vst [vmem:[#allocation1 + $0x1a8] sm:$0xff] %v11008_v14  ;;  %3317 = vst [vmem:[#allocation1 + $0x188] sm:$0xff] %v11016_v16 }
  0x4a   :  { %v4614_v37 = vld [vmem:[#allocation1 + $0x10f] ss:$16 sm:%s12349_s16]   ;;  %1365 = vst [vmem:[#allocation1 + $0x558] sm:$0xff] %v10772_v25  ;;  %1429 = vst [vmem:[#allocation1 + $0x538] sm:$0xff] %v10780_v27  ;;  %v10868_v43 = vunpack.c.h.bf16 %v11219_v36  ;;  %s12655_s16 = smov 12  ;;  %v10876_v51 = vunpack.c.h.bf16 %v11221_v48  ;;  %v11156_v29 = vld [vmem:[%s14549_s0 + $0x3e0] sm:$0xff]  }
  0x4b   :  { %v4617_v38 = vld [vmem:[#allocation1 + $0x10f] ss:$16 sm:%s12370_s20]   ;;  %1493 = vst [vmem:[#allocation1 + $0x518] sm:$0xff] %v10788_v32  ;;  %2069 = vst [vmem:[#allocation1 + $0x3f8] sm:$0xff] %v10860_v41  ;;  %s12667_s20 = smov 48  ;;  %v10616_v32 = vunpack.c.h.bf16 %v11156_v29  ;;  %v11158_v34 = vld [vmem:[%s14549_s0 + $0x3d0] sm:$0xff]  }
  0x4c   :  { %v4622_v39 = vld [vmem:[#allocation1 + $0x10f] ss:$16 sm:%s12372_s21]   ;;  %v4619_v44 = vsel %vm4102_vm0, %v4617_v38, %v4614_v37  ;;  %2133 = vst [vmem:[#allocation1 + $0x3d8] sm:$0xff] %v10868_v43  ;;  %s12669_s21 = smov 192  ;;  %2197 = vst [vmem:[#allocation1 + $0x3b8] sm:$0xff] %v10876_v51  ;;  %v11160_v36 = vld [vmem:[%s14549_s0 + $0x3c0] sm:$0xff]   ;;  %v10624_v38 = vunpack.c.h.bf16 %v11158_v34 }
  0x4d   :  { %v4627_v45 = vld [vmem:[#allocation1 + $0x10f] ss:$16 sm:%s12392_s27]   ;;  %v4624_v49 = vsel %vm4106_vm1, %v4622_v39, %v4619_v44  ;;  %s12683_s27 = smov 12  ;;  %53 = vst [vmem:[#allocation1 + $0x7e8] sm:$0xff] %v10608_v24  ;;  %v10632_v41 = vunpack.c.h.bf16 %v11160_v36  ;;  %v11186_v43 = vld [vmem:[%s14549_s0 + $0x2f0] sm:$0xff]   ;;  %117 = vst [vmem:[#allocation1 + $0x7c8] sm:$0xff] %v10616_v32 }
  0x4e   :  { %v11223_v53 = vld [vmem:[%s14549_s0 + $0x1c8] sm:$0xff]   ;;  %v4629_v40 = vsel %vm4110_vm2, %v4627_v45, %v4624_v49  ;;  %v11249_v58 = vld [vmem:[%s14549_s0 + $0xf8] sm:$0xff]   ;;  %v10736_v50 = vunpack.c.h.bf16 %v11186_v43  ;;  %181 = vst [vmem:[#allocation1 + $0x7a8] sm:$0xff] %v10624_v38 }
  0x4f   :  { %v10884_v56 = vunpack.c.h.bf16 %v11223_v53  ;;  %v11251_v60 = vld [vmem:[%s14549_s0 + $0xe8] sm:$0xff]   ;;  %v11322_v61 = vpack.i.bf16 %v4652_v46, %v4629_v40  ;;  %v10988_v1 = vunpack.c.h.bf16 %v11249_v58  ;;  %v11253_v7 = vld [vmem:[%s14549_s0 + $0xd8] sm:$0xff]   ;;  %245 = vst [vmem:[#allocation1 + $0x788] sm:$0xff] %v10632_v41  ;;  %v11190_v58 = vld [vmem:[%s14549_s0 + $0x2d0] sm:$0xff]  }
  0x50   :  { %v4683_v62 = vld [vmem:[#allocation1 + $0x70f] ss:$16 sm:%s12460_s24]   ;;  %v10996_v3 = vunpack.c.h.bf16 %v11251_v60  ;;  %s12696_s24 = smov 48  ;;  %v11004_v10 = vunpack.c.h.bf16 %v11253_v7  ;;  %1077 = vst [vmem:[#allocation1 + $0x5e8] sm:$0xff] %v10736_v50  ;;  %v11192_v60 = vld [vmem:[%s14549_s0 + $0x2c0] sm:$0xff]  }
  0x51   :  { %v4686_v63 = vld [vmem:[#allocation1 + $0x70f] ss:$16 sm:%s12472_s25]   ;;  %2261 = vst [vmem:[#allocation1 + $0x398] sm:$0xff] %v10884_v56  ;;  %s12698_s25 = smov 192  ;;  %11323 = vrot.lane.b32.xlu0 %v11322_v61, %s14556_s23  ;;  %3093 = vst [vmem:[#allocation1 + $0x1f8] sm:$0xff] %v10988_v1  ;;  %v10744_v56 = vunpack.c.h.bf16 %v11188_v54  ;;  %v10752_v61 = vunpack.c.h.bf16 %v11190_v58 }
  0x52   :  { %v4691_v0 = vld [vmem:[#allocation1 + $0x70f] ss:$16 sm:%s12474_s3]   ;;  %v4688_v4 = vsel %vm4102_vm0, %v4686_v63, %v4683_v62  ;;  %14561 = sst [smem:[#allocation7_spill]] %s12698_s25  ;;  %3157 = vst [vmem:[#allocation1 + $0x1d8] sm:$0xff] %v10996_v3  ;;  %s12711_s25 = smov 3  ;;  %3221 = vst [vmem:[#allocation1 + $0x1b8] sm:$0xff] %v11004_v10  ;;  %v10760_v63 = vunpack.c.h.bf16 %v11192_v60 }
  0x53   :  { %v4696_v5 = vld [vmem:[#allocation1 + $0x70f] ss:$16 sm:%s12489_s2]   ;;  %v4693_v8 = vsel %vm4106_vm1, %v4691_v0, %v4688_v4  ;;  %s14562_s3 = sld [smem:[#allocation2_spill]]  ;;  %s12713_s2 = smov 12  ;;  %v4798_v0 = vld [vmem:[#allocation1 + $0xe] ss:$16 sm:%s12614_s13]  }
  0x54   :  { %v11255_v12 = vld [vmem:[%s14549_s0 + $0xc8] sm:$0xff]   ;;  %14563 = sst [smem:[#allocation2_spill]] %s12711_s25  ;;  %v11153_v17 = vld [vmem:[%s14549_s0 + $0x3f8] sm:$0xff]   ;;  %s12724_s25 = smov 48  ;;  %v4698_v28 = vsel %vm4110_vm2, %v4696_v5, %v4693_v8  ;;  %1141 = vst [vmem:[#allocation1 + $0x5c8] sm:$0xff] %v10744_v56  ;;  %1205 = vst [vmem:[#allocation1 + $0x5a8] sm:$0xff] %v10752_v61 }
  0x55   :  { %14564 = sst [smem:[#allocation8_spill]] %s12713_s2  ;;  %v11012_v15 = vunpack.c.h.bf16 %v11255_v12  ;;  %v11155_v19 = vld [vmem:[%s14549_s0 + $0x3e8] sm:$0xff]   ;;  %s12726_s2 = smov 192  ;;  %v10604_v23 = vunpack.c.h.bf16 %v11153_v17  ;;  %v11157_v30 = vld [vmem:[%s14549_s0 + $0x3d8] sm:$0xff]   ;;  %1269 = vst [vmem:[#allocation1 + $0x588] sm:$0xff] %v10760_v63 }
  0x56   :  { %v4663_v21 = vld [vmem:[#allocation1 + $0x50f] ss:$16 sm:%s12443_s1]   ;;  %v10612_v25 = vunpack.c.h.bf16 %v11155_v19  ;;  %s12740_s1 = smov 3  ;;  %v10620_v33 = vunpack.c.h.bf16 %v11157_v30  ;;  %v4801_v1 = vld [vmem:[#allocation1 + $0xe] ss:$16 sm:%s12626_s10]   ;;  %s11999_s10 = smov 112  }
  0x57   :  { %v4668_v22 = vld [vmem:[#allocation1 + $0x50f] ss:$16 sm:%s12445_s22]   ;;  %3285 = vst [vmem:[#allocation1 + $0x198] sm:$0xff] %v11012_v15  ;;  %s12742_s22 = smov 12  ;;  %21 = vst [vmem:[#allocation1 + $0x7f8] sm:$0xff] %v10604_v23  ;;  %v4803_v6 = vsel %vm4102_vm0, %v4801_v1, %v4798_v0 }
  0x58   :  { %v4673_v27 = vld [vmem:[#allocation1 + $0x50f] ss:$16 sm:%s12458_s17]   ;;  %85 = vst [vmem:[#allocation1 + $0x7d8] sm:$0xff] %v10612_v25  ;;  %s12754_s17 = smov 48  ;;  %149 = vst [vmem:[#allocation1 + $0x7b8] sm:$0xff] %v10620_v33 }
  0x59   :  { %v4660_v20 = vld [vmem:[#allocation1 + $0x50f] ss:$16 sm:%s14562_s3]   ;;  %14565 = sst [smem:[#allocation9_spill]] %s12754_s17  ;;  %s12756_s3 = smov 192  ;;  %v4806_v2 = vld [vmem:[#allocation1 + $0xe] ss:$16 sm:%s12628_s4]  }
  0x5a   :  { %v4665_v26 = vsel %vm4102_vm0, %v4663_v21, %v4660_v20  ;;  %v11159_v35 = vld [vmem:[%s14549_s0 + $0x3c8] sm:$0xff]   ;;  %14566 = sst [smem:[#allocation10_spill]] %s12756_s3  ;;  %v11185_v42 = vld [vmem:[%s14549_s0 + $0x2f8] sm:$0xff]   ;;  %s12768_s17 = smov 3  ;;  %v4808_v10 = vsel %vm4106_vm1, %v4806_v2, %v4803_v6 }
  0x5b   :  { %v4670_v31 = vsel %vm4106_vm1, %v4668_v22, %v4665_v26  ;;  %v10628_v39 = vunpack.c.h.bf16 %v11159_v35  ;;  %v11187_v44 = vld [vmem:[%s14549_s0 + $0x2e8] sm:$0xff]   ;;  %s12770_s3 = smov 12  ;;  %v10732_v49 = vunpack.c.h.bf16 %v11185_v42  ;;  %v11189_v40 = vld [vmem:[%s14549_s0 + $0x2d8] sm:$0xff]   ;;  %s14575_s13 = sld [smem:[#allocation10_spill]] }
  0x5c   :  { %v4675_v37 = vsel %vm4110_vm2, %v4673_v27, %v4670_v31  ;;  %v4729_v46 = vld [vmem:[#allocation1 + $0x38f] ss:$16 sm:%s12523_s30]   ;;  %v10740_v51 = vunpack.c.h.bf16 %v11187_v44  ;;  %s12783_s30 = smov 48  ;;  %v10748_v57 = vunpack.c.h.bf16 %v11189_v40  ;;  %v4811_v11 = vld [vmem:[#allocation1 + $0xe] ss:$16 sm:%s12639_s6]   ;;  %s4942_s4 = smov 48 }
  0x5d   :  { %v11327_v45 = vpack.i.bf16 %v4698_v28, %v4675_v37  ;;  %v4732_v47 = vld [vmem:[#allocation1 + $0x38f] ss:$16 sm:%s12537_s29]   ;;  %213 = vst [vmem:[#allocation1 + $0x798] sm:$0xff] %v10628_v39  ;;  %s12785_s29 = smov 192  ;;  %1045 = vst [vmem:[#allocation1 + $0x5f8] sm:$0xff] %v10732_v49  ;;  %v4813_v18 = vsel %vm4110_vm2, %v4811_v11, %v4808_v10  ;;  %s4947_s6 = smov 192 }
  0x5e   :  { %v4737_v48 = vld [vmem:[#allocation1 + $0x38f] ss:$16 sm:%s12539_s14]   ;;  %v4734_v52 = vsel %vm4102_vm0, %v4732_v47, %v4729_v46  ;;  %1109 = vst [vmem:[#allocation1 + $0x5d8] sm:$0xff] %v10740_v51  ;;  %s12798_s14 = smov 3  ;;  %1173 = vst [vmem:[#allocation1 + $0x5b8] sm:$0xff] %v10748_v57 }
  0x5f   :  { %v4742_v53 = vld [vmem:[#allocation1 + $0x38f] ss:$16 sm:%s12555_s18]   ;;  %11328 = vrot.lane.b32.xlu1 %v11327_v45, %s14556_s23  ;;  %v4739_v55 = vsel %vm4106_vm1, %v4737_v48, %v4734_v52  ;;  %s12800_s18 = smov 12  ;;  %v4820_v12 = vld [vmem:[#allocation1 + $0x20e] ss:$16 sm:%s12653_s5]   ;;  %s4957_s5 = smov 3 }
  0x60   :  { %v11191_v59 = vld [vmem:[%s14549_s0 + $0x2c8] sm:$0xff]   ;;  %v4744_v9 = vsel %vm4110_vm2, %v4742_v53, %v4739_v55 }
  0x61   :  { %v10756_v62 = vunpack.c.h.bf16 %v11191_v59  ;;  %v4706_v3 = vld [vmem:[#allocation1 + $0x18f] ss:$16 sm:%s12491_s28]   ;;  %v4823_v14 = vld [vmem:[#allocation1 + $0x20e] ss:$16 sm:%s12655_s16]   ;;  %s14567_s28 = sld [smem:[#allocation7_spill]]  ;;  %s4960_s16 = smov 12 }
  0x62   :  { %v4709_v4 = vld [vmem:[#allocation1 + $0x18f] ss:$16 sm:%s12507_s11]   ;;  %v4828_v15 = vld [vmem:[#allocation1 + $0x20e] ss:$16 sm:%s12667_s20]   ;;  %s14568_s11 = sld [smem:[#allocation2_spill]]  ;;  %v4825_v19 = vsel %vm4102_vm0, %v4823_v14, %v4820_v12  ;;  %s4965_s20 = smov 48 }
  0x63   :  { %v4714_v5 = vld [vmem:[#allocation1 + $0x18f] ss:$16 sm:%s12509_s8]   ;;  %v4711_v7 = vsel %vm4102_vm0, %v4709_v4, %v4706_v3  ;;  %1237 = vst [vmem:[#allocation1 + $0x598] sm:$0xff] %v10756_v62  ;;  %v4833_v16 = vld [vmem:[#allocation1 + $0x20e] ss:$16 sm:%s12669_s21]   ;;  %s14569_s8 = sld [smem:[#allocation8_spill]]  ;;  %v4830_v27 = vsel %vm4106_vm1, %v4828_v15, %v4825_v19 }
  0x64   :  { %v4719_v8 = vld [vmem:[#allocation1 + $0x18f] ss:$16 sm:%s12521_s9]   ;;  %v4716_v13 = vsel %vm4106_vm1, %v4714_v5, %v4711_v7  ;;  %v4843_v20 = vld [vmem:[#allocation1 + $0x40e] ss:$16 sm:%s12681_s19]   ;;  %s14570_s9 = sld [smem:[#allocation9_spill]]  ;;  %v4835_v31 = vsel %vm4110_vm2, %v4833_v16, %v4830_v27  ;;  %s4970_s21 = smov 192 }
  0x65   :  { %v4721_v17 = vsel %vm4110_vm2, %v4719_v8, %v4716_v13  ;;  %v4846_v21 = vld [vmem:[#allocation1 + $0x40e] ss:$16 sm:%s12683_s27]   ;;  %v4775_v24 = vld [vmem:[#allocation1 + $0x78f] ss:$16 sm:%s12585_s7]   ;;  %s14571_s7 = sld [smem:[#allocation3_spill]]  ;;  %v11342_v35 = vpack.i.bf16 %v4835_v31, %v4813_v18  ;;  %s4983_s19 = smov 12 }
  0x66   :  { %v4851_v22 = vld [vmem:[#allocation1 + $0x40e] ss:$16 sm:%s12696_s24]   ;;  %v11332_v23 = vpack.i.bf16 %v4744_v9, %v4721_v17  ;;  %v4778_v25 = vld [vmem:[#allocation1 + $0x78f] ss:$16 sm:%s12598_s26]   ;;  %v4848_v28 = vsel %vm4102_vm0, %v4846_v21, %v4843_v20  ;;  %s14572_s26 = sld [smem:[#allocation4_spill]]  ;;  %s4988_s27 = smov 48 }
  0x67   :  { %v4783_v26 = vld [vmem:[#allocation1 + $0x78f] ss:$16 sm:%s12600_s15]   ;;  %v4780_v29 = vsel %vm4102_vm0, %v4778_v25, %v4775_v24  ;;  %s14573_s15 = sld [smem:[#allocation5_spill]]  ;;  %v4856_v32 = vld [vmem:[#allocation1 + $0x40e] ss:$16 sm:%s14567_s28]   ;;  %v4853_v39 = vsel %vm4106_vm1, %v4851_v22, %v4848_v28  ;;  %s4993_s24 = smov 192 }
  0x68   :  { %v4788_v30 = vld [vmem:[#allocation1 + $0x78f] ss:$16 sm:%s12612_s12]   ;;  %v4866_v33 = vld [vmem:[#allocation1 + $0x60e] ss:$16 sm:%s14568_s11]   ;;  %11333 = vrot.lane.b32.xlu0 %v11332_v23, %s14556_s23  ;;  %v4785_v34 = vsel %vm4106_vm1, %v4783_v26, %v4780_v29  ;;  %s14574_s12 = sld [smem:[#allocation6_spill]]  ;;  %v4858_v56 = vsel %vm4110_vm2, %v4856_v32, %v4853_v39  ;;  %s5057_s28 = smov 48 }
  0x69   :  { %v4869_v36 = vld [vmem:[#allocation1 + $0x60e] ss:$16 sm:%s14569_s8]   ;;  %v4790_v52 = vsel %vm4110_vm2, %v4788_v30, %v4785_v34  ;;  %s5062_s11 = smov 192  ;;  %s5072_s8 = smov 3 }
  0x6a   :  { %v4874_v37 = vld [vmem:[#allocation1 + $0x60e] ss:$16 sm:%s12724_s25]   ;;  %v4871_v41 = vsel %vm4102_vm0, %v4869_v36, %v4866_v33  ;;  %s5003_s25 = smov 3 }
  0x6b   :  { %v4879_v38 = vld [vmem:[#allocation1 + $0x60e] ss:$16 sm:%s12726_s2]   ;;  %v4752_v45 = vld [vmem:[#allocation1 + $0x58f] ss:$16 sm:%s14571_s7]   ;;  %v4876_v48 = vsel %vm4106_vm1, %v4874_v37, %v4871_v41  ;;  %s5006_s2 = smov 12  ;;  %s5080_s7 = smov 48 }
  0x6c   :  { %v4889_v42 = vld [vmem:[#allocation1 + $0x8e] ss:$16 sm:%s12740_s1]   ;;  %v4755_v46 = vld [vmem:[#allocation1 + $0x58f] ss:$16 sm:%s14572_s26]   ;;  %11343 = vrot.lane.b32.xlu0 %v11342_v35, %s11999_s10  ;;  %v4881_v61 = vsel %vm4110_vm2, %v4879_v38, %v4876_v48  ;;  %s5011_s1 = smov 48  ;;  %s5085_s26 = smov 192 }
  0x6d   :  { %v4892_v43 = vld [vmem:[#allocation1 + $0x8e] ss:$16 sm:%s12742_s22]   ;;  %v4760_v47 = vld [vmem:[#allocation1 + $0x58f] ss:$16 sm:%s14573_s15]   ;;  %v4757_v50 = vsel %vm4102_vm0, %v4755_v46, %v4752_v45  ;;  %v11347_v11 = vpack.i.bf16 %v4881_v61, %v4858_v56  ;;  %s5016_s22 = smov 192  ;;  %s5095_s15 = smov 3 }
  0x6e   :  { %v4897_v44 = vld [vmem:[#allocation1 + $0x8e] ss:$16 sm:%s14570_s9]   ;;  %v4894_v49 = vsel %vm4102_vm0, %v4892_v43, %v4889_v42  ;;  %v4765_v51 = vld [vmem:[#allocation1 + $0x58f] ss:$16 sm:%s14574_s12]   ;;  %v4762_v55 = vsel %vm4106_vm1, %v4760_v47, %v4757_v50  ;;  %s5075_s9 = smov 12  ;;  %s5098_s12 = smov 12 }
  0x6f   :  { %v4899_v53 = vsel %vm4106_vm1, %v4897_v44, %v4894_v49  ;;  %v4902_v54 = vld [vmem:[#allocation1 + $0x8e] ss:$16 sm:%s14575_s13]   ;;  %v4767_v60 = vsel %vm4110_vm2, %v4765_v51, %v4762_v55  ;;  %s5103_s13 = smov 48 }
  0x70   :  { %v4912_v40 = vld [vmem:[#allocation1 + $0x28e] ss:$16 sm:%s12768_s17]   ;;  %v4904_v62 = vsel %vm4110_vm2, %v4902_v54, %v4899_v53  ;;  %v11337_v2 = vpack.i.bf16 %v4790_v52, %v4767_v60  ;;  %s5026_s17 = smov 3 }
  0x71   :  { %v4915_v57 = vld [vmem:[#allocation1 + $0x28e] ss:$16 sm:%s12770_s3]   ;;  %s5029_s3 = smov 12 }
  0x72   :  { %v4920_v58 = vld [vmem:[#allocation1 + $0x28e] ss:$16 sm:%s12783_s30]   ;;  %v4917_v63 = vsel %vm4102_vm0, %v4915_v57, %v4912_v40  ;;  %11338 = vrot.lane.b32.xlu1 %v11337_v2, %s14556_s23  ;;  %s4980_s23 = smov 3  ;;  %s5034_s30 = smov 48 }
  0x73   :  { %v4925_v59 = vld [vmem:[#allocation1 + $0x28e] ss:$16 sm:%s12785_s29]   ;;  %v4922_v3 = vsel %vm4106_vm1, %v4920_v58, %v4917_v63  ;;  %s5039_s29 = smov 192 }
  0x74   :  { %v4935_v0 = vld [vmem:[#allocation1 + $0x48e] ss:$16 sm:%s12798_s14]   ;;  %v4927_v7 = vsel %vm4110_vm2, %v4925_v59, %v4922_v3  ;;  %s5049_s14 = smov 3 }
  0x75   :  { %v4938_v1 = vld [vmem:[#allocation1 + $0x48e] ss:$16 sm:%s12800_s18]   ;;  %v11352_v12 = vpack.i.bf16 %v4927_v7, %v4904_v62  ;;  %s5052_s18 = smov 12 }
  0x76   :  { %v4940_v4 = vsel %vm4102_vm0, %v4938_v1, %v4935_v0  ;;  %v4943_v5 = vld [vmem:[#allocation1 + $0x48e] ss:$16 sm:%s4942_s4]   ;;  %11348 = vrot.lane.b32.xlu1 %v11347_v11, %s11999_s10  ;;  %s5108_s4 = smov 192 }
  0x77   :  { %v4948_v6 = vld [vmem:[#allocation1 + $0x48e] ss:$16 sm:%s4947_s6]   ;;  %v4945_v8 = vsel %vm4106_vm1, %v4943_v5, %v4940_v4  ;;  %11353 = vrot.lane.b32.xlu0 %v11352_v12, %s11999_s10  ;;  %s5118_s6 = smov 3 }
  0x78   :  { %v4958_v9 = vld [vmem:[#allocation1 + $0x68e] ss:$16 sm:%s4957_s5]   ;;  %v4950_v16 = vsel %vm4110_vm2, %v4948_v6, %v4945_v8  ;;  %s5121_s5 = smov 12 }
  0x79   :  { %v4961_v10 = vld [vmem:[#allocation1 + $0x68e] ss:$16 sm:%s4960_s16]   ;;  %s5126_s16 = smov 48 }
  0x7a   :  { %v4963_v13 = vsel %vm4102_vm0, %v4961_v10, %v4958_v9  ;;  %v4966_v14 = vld [vmem:[#allocation1 + $0x68e] ss:$16 sm:%s4965_s20]   ;;  %s5131_s20 = smov 192 }
  0x7b   :  { %v4971_v15 = vld [vmem:[#allocation1 + $0x68e] ss:$16 sm:%s4970_s21]   ;;  %v4968_v17 = vsel %vm4106_vm1, %v4966_v14, %v4963_v13  ;;  %s5141_s21 = smov 3 }
  0x7c   :  { %v4981_v18 = vld [vmem:[#allocation1 + $0x10e] ss:$16 sm:%s4980_s23]   ;;  %v4973_v20 = vsel %vm4110_vm2, %v4971_v15, %v4968_v17  ;;  %s5144_s23 = smov 12 }
  0x7d   :  { %v4984_v19 = vld [vmem:[#allocation1 + $0x10e] ss:$16 sm:%s4983_s19]   ;;  %v11357_v27 = vpack.i.bf16 %v4973_v20, %v4950_v16  ;;  %s5149_s19 = smov 48 }
  0x7e   :  { %v4986_v21 = vsel %vm4102_vm0, %v4984_v19, %v4981_v18  ;;  %v4989_v22 = vld [vmem:[#allocation1 + $0x10e] ss:$16 sm:%s4988_s27]   ;;  %s5154_s27 = smov 192 }
  0x7f   :  { %v4994_v23 = vld [vmem:[#allocation1 + $0x10e] ss:$16 sm:%s4993_s24]   ;;  %v4991_v24 = vsel %vm4106_vm1, %v4989_v22, %v4986_v21  ;;  %11358 = vrot.lane.b32.xlu1 %v11357_v27, %s11999_s10  ;;  %s5164_s24 = smov 3 }
  0x80   :  { %v5004_v25 = vld [vmem:[#allocation1 + $0x30e] ss:$16 sm:%s5003_s25]   ;;  %v4996_v28 = vsel %vm4110_vm2, %v4994_v23, %v4991_v24  ;;  %s5167_s25 = smov 12  ;;  %v5165_v14 = vld [vmem:[#allocation1 + $0xd] ss:$16 sm:%s5164_s24]   ;;  %s5327_s24 = smov 12 }
  0x81   :  { %v5007_v26 = vld [vmem:[#allocation1 + $0x30e] ss:$16 sm:%s5006_s2]   ;;  %v5168_v15 = vld [vmem:[#allocation1 + $0xd] ss:$16 sm:%s5167_s25]   ;;  %s5172_s2 = smov 48  ;;  %s5332_s25 = smov 48 }
  0x82   :  { %v5009_v29 = vsel %vm4102_vm0, %v5007_v26, %v5004_v25  ;;  %v5012_v30 = vld [vmem:[#allocation1 + $0x30e] ss:$16 sm:%s5011_s1]   ;;  %s5177_s1 = smov 192  ;;  %v5170_v17 = vsel %vm4102_vm0, %v5168_v15, %v5165_v14  ;;  %v5173_v18 = vld [vmem:[#allocation1 + $0xd] ss:$16 sm:%s5172_s2]   ;;  %s5337_s2 = smov 192 }
  0x83   :  { %v5017_v31 = vld [vmem:[#allocation1 + $0x30e] ss:$16 sm:%s5016_s22]   ;;  %v5014_v32 = vsel %vm4106_vm1, %v5012_v30, %v5009_v29  ;;  %v5178_v19 = vld [vmem:[#allocation1 + $0xd] ss:$16 sm:%s5177_s1]   ;;  %s5186_s22 = smov 3  ;;  %v5175_v21 = vsel %vm4106_vm1, %v5173_v18, %v5170_v17  ;;  %s5347_s1 = smov 3 }
  0x84   :  { %v5027_v33 = vld [vmem:[#allocation1 + $0x50e] ss:$16 sm:%s5026_s17]   ;;  %v5019_v35 = vsel %vm4110_vm2, %v5017_v31, %v5014_v32  ;;  %v5187_v22 = vld [vmem:[#allocation1 + $0x20d] ss:$16 sm:%s5186_s22]   ;;  %s5189_s17 = smov 12  ;;  %v5180_v25 = vsel %vm4110_vm2, %v5178_v19, %v5175_v21  ;;  %s5350_s22 = smov 12 }
  0x85   :  { %v5030_v34 = vld [vmem:[#allocation1 + $0x50e] ss:$16 sm:%s5029_s3]   ;;  %v11362_v39 = vpack.i.bf16 %v5019_v35, %v4996_v28  ;;  %s5194_s3 = smov 48  ;;  %v5190_v23 = vld [vmem:[#allocation1 + $0x20d] ss:$16 sm:%s5189_s17]   ;;  %s5355_s17 = smov 48 }
  0x86   :  { %v5032_v36 = vsel %vm4102_vm0, %v5030_v34, %v5027_v33  ;;  %v5035_v37 = vld [vmem:[#allocation1 + $0x50e] ss:$16 sm:%s5034_s30]   ;;  %v5195_v24 = vld [vmem:[#allocation1 + $0x20d] ss:$16 sm:%s5194_s3]   ;;  %s5199_s30 = smov 192  ;;  %v5192_v26 = vsel %vm4102_vm0, %v5190_v23, %v5187_v22  ;;  %s5360_s3 = smov 192 }
  0x87   :  { %v5040_v38 = vld [vmem:[#allocation1 + $0x50e] ss:$16 sm:%s5039_s29]   ;;  %v5037_v41 = vsel %vm4106_vm1, %v5035_v37, %v5032_v36  ;;  %11363 = vrot.lane.b32.xlu0 %v11362_v39, %s11999_s10  ;;  %s5209_s29 = smov 3  ;;  %v5200_v27 = vld [vmem:[#allocation1 + $0x20d] ss:$16 sm:%s5199_s30]   ;;  %v5197_v29 = vsel %vm4106_vm1, %v5195_v24, %v5192_v26  ;;  %s5370_s30 = smov 3 }
  0x88   :  { %v5050_v42 = vld [vmem:[#allocation1 + $0x70e] ss:$16 sm:%s5049_s14]   ;;  %v5042_v44 = vsel %vm4110_vm2, %v5040_v38, %v5037_v41  ;;  %v5210_v28 = vld [vmem:[#allocation1 + $0x40d] ss:$16 sm:%s5209_s29]   ;;  %s5217_s14 = smov 48  ;;  %v5202_v32 = vsel %vm4110_vm2, %v5200_v27, %v5197_v29  ;;  %s5373_s29 = smov 12 }
  0x89   :  { %v5053_v43 = vld [vmem:[#allocation1 + $0x70e] ss:$16 sm:%s5052_s18]   ;;  %v5218_v31 = vld [vmem:[#allocation1 + $0x40d] ss:$16 sm:%s5217_s14]   ;;  %s5222_s18 = smov 192  ;;  %v11382_v36 = vpack.i.bf16 %v5202_v32, %v5180_v25  ;;  %s5383_s14 = smov 192 }
  0x8a   :  { %v5055_v45 = vsel %vm4102_vm0, %v5053_v43, %v5050_v42  ;;  %v5058_v46 = vld [vmem:[#allocation1 + $0x70e] ss:$16 sm:%s5057_s28]   ;;  %s5232_s28 = smov 3  ;;  %v5223_v34 = vld [vmem:[#allocation1 + $0x40d] ss:$16 sm:%s5222_s18]   ;;  %s5393_s18 = smov 3 }
  0x8b   :  { %v5063_v47 = vld [vmem:[#allocation1 + $0x70e] ss:$16 sm:%s5062_s11]   ;;  %v5060_v48 = vsel %vm4106_vm1, %v5058_v46, %v5055_v45  ;;  %v5233_v35 = vld [vmem:[#allocation1 + $0x60d] ss:$16 sm:%s5232_s28]   ;;  %s5235_s11 = smov 12  ;;  %s5396_s28 = smov 12 }
  0x8c   :  { %v5073_v49 = vld [vmem:[#allocation1 + $0x18e] ss:$16 sm:%s5072_s8]   ;;  %v5065_v51 = vsel %vm4110_vm2, %v5063_v47, %v5060_v48  ;;  %s5240_s8 = smov 48  ;;  %v5236_v38 = vld [vmem:[#allocation1 + $0x60d] ss:$16 sm:%s5235_s11]   ;;  %s5401_s11 = smov 48 }
  0x8d   :  { %v5076_v50 = vld [vmem:[#allocation1 + $0x18e] ss:$16 sm:%s5075_s9]   ;;  %v11367_v40 = vpack.i.bf16 %v5065_v51, %v5042_v44  ;;  %v5241_v39 = vld [vmem:[#allocation1 + $0x60d] ss:$16 sm:%s5240_s8]   ;;  %s5245_s9 = smov 192  ;;  %v5238_v42 = vsel %vm4102_vm0, %v5236_v38, %v5233_v35  ;;  %s5406_s8 = smov 192 }
  0x8e   :  { %v5078_v52 = vsel %vm4102_vm0, %v5076_v50, %v5073_v49  ;;  %v5081_v53 = vld [vmem:[#allocation1 + $0x18e] ss:$16 sm:%s5080_s7]   ;;  %s5255_s7 = smov 3  ;;  %v5246_v43 = vld [vmem:[#allocation1 + $0x60d] ss:$16 sm:%s5245_s9]   ;;  %v5243_v45 = vsel %vm4106_vm1, %v5241_v39, %v5238_v42  ;;  %s5416_s9 = smov 3 }
  0x8f   :  { %v5086_v54 = vld [vmem:[#allocation1 + $0x18e] ss:$16 sm:%s5085_s26]   ;;  %v5083_v55 = vsel %vm4106_vm1, %v5081_v53, %v5078_v52  ;;  %11368 = vrot.lane.b32.xlu1 %v11367_v40, %s11999_s10  ;;  %v5256_v44 = vld [vmem:[#allocation1 + $0x8d] ss:$16 sm:%s5255_s7]   ;;  %s5258_s26 = smov 12  ;;  %v5248_v48 = vsel %vm4110_vm2, %v5246_v43, %v5243_v45  ;;  %s5419_s7 = smov 12 }
  0x90   :  { %v5096_v56 = vld [vmem:[#allocation1 + $0x38e] ss:$16 sm:%s5095_s15]   ;;  %v5088_v58 = vsel %vm4110_vm2, %v5086_v54, %v5083_v55  ;;  %s5263_s15 = smov 48  ;;  %v5259_v46 = vld [vmem:[#allocation1 + $0x8d] ss:$16 sm:%s5258_s26]   ;;  %s5424_s26 = smov 48 }
  0x91   :  { %v5099_v57 = vld [vmem:[#allocation1 + $0x38e] ss:$16 sm:%s5098_s12]   ;;  %s12000_s12 = smov 104   ;;  %v5264_v47 = vld [vmem:[#allocation1 + $0x8d] ss:$16 sm:%s5263_s15]   ;;  %v5261_v49 = vsel %vm4102_vm0, %v5259_v46, %v5256_v44  ;;  %s5429_s15 = smov 192 }
  0x92   :  { %v5101_v59 = vsel %vm4102_vm0, %v5099_v57, %v5096_v56  ;;  %v5104_v60 = vld [vmem:[#allocation1 + $0x38e] ss:$16 sm:%s5103_s13]   ;;  %s5268_s13 = smov 192  ;;  %v5266_v53 = vsel %vm4106_vm1, %v5264_v47, %v5261_v49  ;;  %v5361_v15 = vld [vmem:[#allocation1 + $0x10d] ss:$16 sm:%s5360_s3]   ;;  %s5531_s3 = smov 3 }
  0x93   :  { %v5109_v61 = vld [vmem:[#allocation1 + $0x38e] ss:$16 sm:%s5108_s4]   ;;  %v5106_v62 = vsel %vm4106_vm1, %v5104_v60, %v5101_v59  ;;  %s5278_s4 = smov 3  ;;  %v5269_v50 = vld [vmem:[#allocation1 + $0x8d] ss:$16 sm:%s5268_s13]   ;;  %s5439_s13 = smov 3 }
  0x94   :  { %v5119_v63 = vld [vmem:[#allocation1 + $0x58e] ss:$16 sm:%s5118_s6]   ;;  %v5111_v1 = vsel %vm4110_vm2, %v5109_v61, %v5106_v62  ;;  %v5279_v51 = vld [vmem:[#allocation1 + $0x28d] ss:$16 sm:%s5278_s4]   ;;  %s5281_s6 = smov 12  ;;  %v5271_v55 = vsel %vm4110_vm2, %v5269_v50, %v5266_v53  ;;  %s5442_s4 = smov 12 }
  0x95   :  { %v5122_v0 = vld [vmem:[#allocation1 + $0x58e] ss:$16 sm:%s5121_s5]   ;;  %v11372_v5 = vpack.i.bf16 %v5111_v1, %v5088_v58  ;;  %s5286_s5 = smov 48  ;;  %v5282_v54 = vld [vmem:[#allocation1 + $0x28d] ss:$16 sm:%s5281_s6]   ;;  %s5447_s6 = smov 48 }
  0x96   :  { %v5124_v2 = vsel %vm4102_vm0, %v5122_v0, %v5119_v63  ;;  %v5127_v3 = vld [vmem:[#allocation1 + $0x58e] ss:$16 sm:%s5126_s16]   ;;  %v5287_v40 = vld [vmem:[#allocation1 + $0x28d] ss:$16 sm:%s5286_s5]   ;;  %s5291_s16 = smov 192  ;;  %v5284_v56 = vsel %vm4102_vm0, %v5282_v54, %v5279_v51  ;;  %s5452_s5 = smov 192 }
  0x97   :  { %v5132_v4 = vld [vmem:[#allocation1 + $0x58e] ss:$16 sm:%s5131_s20]   ;;  %v5129_v6 = vsel %vm4106_vm1, %v5127_v3, %v5124_v2  ;;  %11373 = vrot.lane.b32.xlu0 %v11372_v5, %s11999_s10  ;;  %s5301_s20 = smov 3  ;;  %v5292_v57 = vld [vmem:[#allocation1 + $0x28d] ss:$16 sm:%s5291_s16]   ;;  %v5289_v59 = vsel %vm4106_vm1, %v5287_v40, %v5284_v56  ;;  %s5462_s16 = smov 3 }
  0x98   :  { %v5142_v7 = vld [vmem:[#allocation1 + $0x78e] ss:$16 sm:%s5141_s21]   ;;  %v5134_v9 = vsel %vm4110_vm2, %v5132_v4, %v5129_v6  ;;  %v5302_v58 = vld [vmem:[#allocation1 + $0x48d] ss:$16 sm:%s5301_s20]   ;;  %s5304_s21 = smov 12  ;;  %v5294_v62 = vsel %vm4110_vm2, %v5292_v57, %v5289_v59  ;;  %s5465_s20 = smov 12 }
  0x99   :  { %v5145_v8 = vld [vmem:[#allocation1 + $0x78e] ss:$16 sm:%s5144_s23]   ;;  %s5309_s23 = smov 48  ;;  %v5305_v60 = vld [vmem:[#allocation1 + $0x48d] ss:$16 sm:%s5304_s21]   ;;  %v11392_v2 = vpack.i.bf16 %v5294_v62, %v5271_v55  ;;  %s5470_s21 = smov 48 }
  0x9a   :  { %v5147_v10 = vsel %vm4102_vm0, %v5145_v8, %v5142_v7  ;;  %v5150_v11 = vld [vmem:[#allocation1 + $0x78e] ss:$16 sm:%s5149_s19]   ;;  %v5310_v61 = vld [vmem:[#allocation1 + $0x48d] ss:$16 sm:%s5309_s23]   ;;  %s5314_s19 = smov 192  ;;  %v5307_v63 = vsel %vm4102_vm0, %v5305_v60, %v5302_v58  ;;  %s5475_s23 = smov 192 }
  0x9b   :  { %v5155_v12 = vld [vmem:[#allocation1 + $0x78e] ss:$16 sm:%s5154_s27]   ;;  %v5152_v13 = vsel %vm4106_vm1, %v5150_v11, %v5147_v10  ;;  %11383 = vrot.lane.b32.xlu0 %v11382_v36, %s12000_s12  ;;  %s5324_s27 = smov 3  ;;  %v5315_v0 = vld [vmem:[#allocation1 + $0x48d] ss:$16 sm:%s5314_s19]   ;;  %v5312_v3 = vsel %vm4106_vm1, %v5310_v61, %v5307_v63  ;;  %s5485_s19 = smov 3 }
  0x9c   :  { %v5157_v16 = vsel %vm4110_vm2, %v5155_v12, %v5152_v13  ;;  %v5325_v1 = vld [vmem:[#allocation1 + $0x68d] ss:$16 sm:%s5324_s27]   ;;  %v5317_v6 = vsel %vm4110_vm2, %v5315_v0, %v5312_v3  ;;  %s5488_s27 = smov 12 }
  0x9d   :  { %v11377_v20 = vpack.i.bf16 %v5157_v16, %v5134_v9  ;;  %v5328_v4 = vld [vmem:[#allocation1 + $0x68d] ss:$16 sm:%s5327_s24]   ;;  %s5493_s24 = smov 48 }
  0x9e   :  { %v5333_v5 = vld [vmem:[#allocation1 + $0x68d] ss:$16 sm:%s5332_s25]   ;;  %v5330_v7 = vsel %vm4102_vm0, %v5328_v4, %v5325_v1  ;;  %s5498_s25 = smov 192 }
  0x9f   :  { %11378 = vrot.lane.b32.xlu1 %v11377_v20, %s11999_s10  ;;  %s5212_s10 = smov 12  ;;  %v5338_v8 = vld [vmem:[#allocation1 + $0x68d] ss:$16 sm:%s5337_s2]   ;;  %11393 = vrot.lane.b32.xlu0 %v11392_v2, %s12000_s12  ;;  %v5335_v10 = vsel %vm4106_vm1, %v5333_v5, %v5330_v7  ;;  %s5508_s2 = smov 3  ;;  %v5532_v5 = vld [vmem:[#allocation1 + $0xc] ss:$16 sm:%s5531_s3]  }
  0xa0   :  { %v5213_v30 = vld [vmem:[#allocation1 + $0x40d] ss:$16 sm:%s5212_s10]   ;;  %v5340_v13 = vsel %vm4110_vm2, %v5338_v8, %v5335_v10  ;;  %s5378_s10 = smov 48  ;;  %s5694_s3 = smov 12 }
  0xa1   :  { %v5215_v33 = vsel %vm4102_vm0, %v5213_v30, %v5210_v28  ;;  %v5348_v9 = vld [vmem:[#allocation1 + $0x10d] ss:$16 sm:%s5347_s1]   ;;  %v11397_v17 = vpack.i.bf16 %v5340_v13, %v5317_v6  ;;  %s5511_s1 = smov 12 }
  0xa2   :  { %v5220_v37 = vsel %vm4106_vm1, %v5218_v31, %v5215_v33  ;;  %v5351_v11 = vld [vmem:[#allocation1 + $0x10d] ss:$16 sm:%s5350_s22]   ;;  %s5516_s22 = smov 48 }
  0xa3   :  { %v5225_v41 = vsel %vm4110_vm2, %v5223_v34, %v5220_v37  ;;  %v5356_v12 = vld [vmem:[#allocation1 + $0x10d] ss:$16 sm:%s5355_s17]   ;;  %v5353_v14 = vsel %vm4102_vm0, %v5351_v11, %v5348_v9  ;;  %s5521_s17 = smov 192 }
  0xa4   :  { %v11387_v52 = vpack.i.bf16 %v5248_v48, %v5225_v41  ;;  %v5371_v16 = vld [vmem:[#allocation1 + $0x30d] ss:$16 sm:%s5370_s30]   ;;  %v5358_v18 = vsel %vm4106_vm1, %v5356_v12, %v5353_v14  ;;  %s5534_s30 = smov 12 }
  0xa5   :  { %v5374_v19 = vld [vmem:[#allocation1 + $0x30d] ss:$16 sm:%s5373_s29]   ;;  %v5363_v21 = vsel %vm4110_vm2, %v5361_v15, %v5358_v18  ;;  %s5539_s29 = smov 48  ;;  %v5535_v7 = vld [vmem:[#allocation1 + $0xc] ss:$16 sm:%s5534_s30]   ;;  %s5699_s30 = smov 48 }
  0xa6   :  { %11388 = vrot.lane.b32.xlu1 %v11387_v52, %s12000_s12  ;;  %v5379_v20 = vld [vmem:[#allocation1 + $0x30d] ss:$16 sm:%s5378_s10]   ;;  %v5376_v22 = vsel %vm4102_vm0, %v5374_v19, %v5371_v16  ;;  %v5540_v8 = vld [vmem:[#allocation1 + $0xc] ss:$16 sm:%s5539_s29]   ;;  %s5544_s10 = smov 192  ;;  %v5537_v10 = vsel %vm4102_vm0, %v5535_v7, %v5532_v5  ;;  %s5704_s29 = smov 192 }
  0xa7   :  { %v5384_v23 = vld [vmem:[#allocation1 + $0x30d] ss:$16 sm:%s5383_s14]   ;;  %v5381_v25 = vsel %vm4106_vm1, %v5379_v20, %v5376_v22  ;;  %v5545_v11 = vld [vmem:[#allocation1 + $0xc] ss:$16 sm:%s5544_s10]   ;;  %s5553_s14 = smov 3  ;;  %v5542_v13 = vsel %vm4106_vm1, %v5540_v8, %v5537_v10  ;;  %s5714_s10 = smov 3 }
  0xa8   :  { %v5394_v24 = vld [vmem:[#allocation1 + $0x50d] ss:$16 sm:%s5393_s18]   ;;  %v5386_v28 = vsel %vm4110_vm2, %v5384_v23, %v5381_v25  ;;  %s5556_s18 = smov 12  ;;  %v5554_v14 = vld [vmem:[#allocation1 + $0x20c] ss:$16 sm:%s5553_s14]   ;;  %v5547_v16 = vsel %vm4110_vm2, %v5545_v11, %v5542_v13  ;;  %s5717_s14 = smov 12 }
  0xa9   :  { %v5397_v26 = vld [vmem:[#allocation1 + $0x50d] ss:$16 sm:%s5396_s28]   ;;  %v11402_v32 = vpack.i.bf16 %v5386_v28, %v5363_v21  ;;  %v5557_v15 = vld [vmem:[#allocation1 + $0x20c] ss:$16 sm:%s5556_s18]   ;;  %s5561_s28 = smov 48  ;;  %s5722_s18 = smov 48 }
  0xaa   :  { %11398 = vrot.lane.b32.xlu1 %v11397_v17, %s12000_s12  ;;  %v5402_v27 = vld [vmem:[#allocation1 + $0x50d] ss:$16 sm:%s5401_s11]   ;;  %v5399_v29 = vsel %vm4102_vm0, %v5397_v26, %v5394_v24  ;;  %s5566_s11 = smov 192  ;;  %v5559_v17 = vsel %vm4102_vm0, %v5557_v15, %v5554_v14  ;;  %v5562_v18 = vld [vmem:[#allocation1 + $0x20c] ss:$16 sm:%s5561_s28]   ;;  %s5727_s28 = smov 192 }
  0xab   :  { %v5407_v30 = vld [vmem:[#allocation1 + $0x50d] ss:$16 sm:%s5406_s8]   ;;  %v5404_v33 = vsel %vm4106_vm1, %v5402_v27, %v5399_v29  ;;  %11403 = vrot.lane.b32.xlu0 %v11402_v32, %s12000_s12  ;;  %v5567_v19 = vld [vmem:[#allocation1 + $0x20c] ss:$16 sm:%s5566_s11]   ;;  %s5576_s8 = smov 3  ;;  %v5564_v20 = vsel %vm4106_vm1, %v5562_v18, %v5559_v17  ;;  %s5737_s11 = smov 3 }
  0xac   :  { %v5417_v31 = vld [vmem:[#allocation1 + $0x70d] ss:$16 sm:%s5416_s9]   ;;  %v5409_v36 = vsel %vm4110_vm2, %v5407_v30, %v5404_v33  ;;  %s5579_s9 = smov 12  ;;  %v5577_v21 = vld [vmem:[#allocation1 + $0x40c] ss:$16 sm:%s5576_s8]   ;;  %v5569_v23 = vsel %vm4110_vm2, %v5567_v19, %v5564_v20  ;;  %s5740_s8 = smov 12 }
  0xad   :  { %v5420_v34 = vld [vmem:[#allocation1 + $0x70d] ss:$16 sm:%s5419_s7]   ;;  %v5580_v22 = vld [vmem:[#allocation1 + $0x40c] ss:$16 sm:%s5579_s9]   ;;  %s5589_s7 = smov 192  ;;  %v11422_v27 = vpack.i.bf16 %v5569_v23, %v5547_v16  ;;  %s5745_s9 = smov 48 }
  0xae   :  { %v5425_v35 = vld [vmem:[#allocation1 + $0x70d] ss:$16 sm:%s5424_s26]   ;;  %v5422_v37 = vsel %vm4102_vm0, %v5420_v34, %v5417_v31  ;;  %v5582_v24 = vsel %vm4102_vm0, %v5580_v22, %v5577_v21  ;;  %v5590_v26 = vld [vmem:[#allocation1 + $0x40c] ss:$16 sm:%s5589_s7]   ;;  %s5599_s26 = smov 3  ;;  %s5760_s7 = smov 3 }
  0xaf   :  { %v5430_v38 = vld [vmem:[#allocation1 + $0x70d] ss:$16 sm:%s5429_s15]   ;;  %v5427_v41 = vsel %vm4106_vm1, %v5425_v35, %v5422_v37  ;;  %s5602_s15 = smov 12  ;;  %v5600_v29 = vld [vmem:[#allocation1 + $0x60c] ss:$16 sm:%s5599_s26]   ;;  %s5763_s26 = smov 12 }
  0xb0   :  { %v5440_v39 = vld [vmem:[#allocation1 + $0x18d] ss:$16 sm:%s5439_s13]   ;;  %v5432_v44 = vsel %vm4110_vm2, %v5430_v38, %v5427_v41  ;;  %v5603_v30 = vld [vmem:[#allocation1 + $0x60c] ss:$16 sm:%s5602_s15]   ;;  %s5607_s13 = smov 48  ;;  %s5768_s15 = smov 48 }
  0xb1   :  { %v5443_v42 = vld [vmem:[#allocation1 + $0x18d] ss:$16 sm:%s5442_s4]   ;;  %v11407_v48 = vpack.i.bf16 %v5432_v44, %v5409_v36  ;;  %s5612_s4 = smov 192  ;;  %v5605_v32 = vsel %vm4102_vm0, %v5603_v30, %v5600_v29  ;;  %v5608_v33 = vld [vmem:[#allocation1 + $0x60c] ss:$16 sm:%s5607_s13]   ;;  %s5773_s13 = smov 192 }
  0xb2   :  { %v5448_v43 = vld [vmem:[#allocation1 + $0x18d] ss:$16 sm:%s5447_s6]   ;;  %v5445_v45 = vsel %vm4102_vm0, %v5443_v42, %v5440_v39  ;;  %v5613_v34 = vld [vmem:[#allocation1 + $0x60c] ss:$16 sm:%s5612_s4]   ;;  %s5622_s6 = smov 3  ;;  %v5610_v35 = vsel %vm4106_vm1, %v5608_v33, %v5605_v32  ;;  %s5783_s4 = smov 3 }
  0xb3   :  { %v5453_v46 = vld [vmem:[#allocation1 + $0x18d] ss:$16 sm:%s5452_s5]   ;;  %v5450_v49 = vsel %vm4106_vm1, %v5448_v43, %v5445_v45  ;;  %11408 = vrot.lane.b32.xlu1 %v11407_v48, %s12000_s12  ;;  %s5625_s5 = smov 12  ;;  %v5623_v36 = vld [vmem:[#allocation1 + $0x8c] ss:$16 sm:%s5622_s6]   ;;  %v5615_v38 = vsel %vm4110_vm2, %v5613_v34, %v5610_v35  ;;  %s5786_s6 = smov 12 }
  0xb4   :  { %v5463_v47 = vld [vmem:[#allocation1 + $0x38d] ss:$16 sm:%s5462_s16]   ;;  %v5455_v52 = vsel %vm4110_vm2, %v5453_v46, %v5450_v49  ;;  %s12001_s16 = smov 96   ;;  %v5626_v37 = vld [vmem:[#allocation1 + $0x8c] ss:$16 sm:%s5625_s5]   ;;  %s5898_s5 = smov 3 }
  0xb5   :  { %v5466_v50 = vld [vmem:[#allocation1 + $0x38d] ss:$16 sm:%s5465_s20]   ;;  %s5630_s20 = smov 48  ;;  %v5628_v39 = vsel %vm4102_vm0, %v5626_v37, %v5623_v36  ;;  %v5723_v7 = vld [vmem:[#allocation1 + $0x10c] ss:$16 sm:%s5722_s18]   ;;  %v11904_v37 = vld [vmem:[%s14549_s0 + $0x320] sm:$0xff]  }
  0xb6   :  { %v5471_v51 = vld [vmem:[#allocation1 + $0x38d] ss:$16 sm:%s5470_s21]   ;;  %v5468_v53 = vsel %vm4102_vm0, %v5466_v50, %v5463_v47  ;;  %s5635_s21 = smov 192  ;;  %v5631_v41 = vld [vmem:[#allocation1 + $0x8c] ss:$16 sm:%s5630_s20]   ;;  %s5875_s18 = smov 3 }
  0xb7   :  { %v5476_v54 = vld [vmem:[#allocation1 + $0x38d] ss:$16 sm:%s5475_s23]   ;;  %v5473_v55 = vsel %vm4106_vm1, %v5471_v51, %v5468_v53  ;;  %v5636_v42 = vld [vmem:[#allocation1 + $0x8c] ss:$16 sm:%s5635_s21]   ;;  %s5645_s23 = smov 3  ;;  %v5633_v44 = vsel %vm4106_vm1, %v5631_v41, %v5628_v39  ;;  %s5901_s20 = smov 12 }
  0xb8   :  { %v5486_v40 = vld [vmem:[#allocation1 + $0x58d] ss:$16 sm:%s5485_s19]   ;;  %v5478_v58 = vsel %vm4110_vm2, %v5476_v54, %v5473_v55  ;;  %s5648_s19 = smov 12  ;;  %v5646_v45 = vld [vmem:[#allocation1 + $0x28c] ss:$16 sm:%s5645_s23]   ;;  %v5638_v47 = vsel %vm4110_vm2, %v5636_v42, %v5633_v44  ;;  %s5852_s23 = smov 3 }
  0xb9   :  { %v5489_v56 = vld [vmem:[#allocation1 + $0x58d] ss:$16 sm:%s5488_s27]   ;;  %v11412_v62 = vpack.i.bf16 %v5478_v58, %v5455_v52  ;;  %v5649_v46 = vld [vmem:[#allocation1 + $0x28c] ss:$16 sm:%s5648_s19]   ;;  %s5653_s27 = smov 48  ;;  %s5791_s19 = smov 48 }
  0xba   :  { %v5494_v57 = vld [vmem:[#allocation1 + $0x58d] ss:$16 sm:%s5493_s24]   ;;  %v5491_v59 = vsel %vm4102_vm0, %v5489_v56, %v5486_v40  ;;  %s5658_s24 = smov 192  ;;  %v5651_v48 = vsel %vm4102_vm0, %v5649_v46, %v5646_v45  ;;  %v5654_v49 = vld [vmem:[#allocation1 + $0x28c] ss:$16 sm:%s5653_s27]   ;;  %s5796_s27 = smov 192 }
  0xbb   :  { %v5499_v60 = vld [vmem:[#allocation1 + $0x58d] ss:$16 sm:%s5498_s25]   ;;  %v5496_v63 = vsel %vm4106_vm1, %v5494_v57, %v5491_v59  ;;  %11413 = vrot.lane.b32.xlu0 %v11412_v62, %s12000_s12  ;;  %v5659_v50 = vld [vmem:[#allocation1 + $0x28c] ss:$16 sm:%s5658_s24]   ;;  %s5668_s25 = smov 3  ;;  %v5656_v51 = vsel %vm4106_vm1, %v5654_v49, %v5651_v48  ;;  %s5806_s24 = smov 3 }
  0xbc   :  { %v5509_v61 = vld [vmem:[#allocation1 + $0x78d] ss:$16 sm:%s5508_s2]   ;;  %v5501_v2 = vsel %vm4110_vm2, %v5499_v60, %v5496_v63  ;;  %s5671_s2 = smov 12  ;;  %v5669_v52 = vld [vmem:[#allocation1 + $0x48c] ss:$16 sm:%s5668_s25]   ;;  %v5661_v54 = vsel %vm4110_vm2, %v5659_v50, %v5656_v51  ;;  %s5809_s25 = smov 12 }
  0xbd   :  { %v5512_v0 = vld [vmem:[#allocation1 + $0x78d] ss:$16 sm:%s5511_s1]   ;;  %v5672_v53 = vld [vmem:[#allocation1 + $0x48c] ss:$16 sm:%s5671_s2]   ;;  %s5676_s1 = smov 48  ;;  %v11432_v57 = vpack.i.bf16 %v5661_v54, %v5638_v47  ;;  %v11906_v45 = vld [vmem:[%s14549_s0 + $0x310] sm:$0xff]  }
  0xbe   :  { %v5517_v1 = vld [vmem:[#allocation1 + $0x78d] ss:$16 sm:%s5516_s22]   ;;  %v5514_v3 = vsel %vm4102_vm0, %v5512_v0, %v5509_v61  ;;  %s5681_s22 = smov 192  ;;  %v5674_v40 = vsel %vm4102_vm0, %v5672_v53, %v5669_v52  ;;  %v5677_v55 = vld [vmem:[#allocation1 + $0x48c] ss:$16 sm:%s5676_s1]   ;;  %v12986_v61 = vpop.permute.xlu0 %11303  ;;  %v10719_v46 = vunpack.c.l.bf16 %v11906_v45  ;;  %v11908_v49 = vld [vmem:[%s14549_s0 + $0x300] sm:$0xff]  }
  0xbf   :  { %v5522_v4 = vld [vmem:[#allocation1 + $0x78d] ss:$16 sm:%s5521_s17]   ;;  %v5519_v6 = vsel %vm4106_vm1, %v5517_v1, %v5514_v3  ;;  %11423 = vrot.lane.b32.xlu0 %v11422_v27, %s12001_s16  ;;  %v5682_v56 = vld [vmem:[#allocation1 + $0x48c] ss:$16 sm:%s5681_s22]   ;;  %s5691_s17 = smov 3  ;;  %v5679_v58 = vsel %vm4106_vm1, %v5677_v55, %v5674_v40  ;;  %v10727_v50 = vunpack.c.l.bf16 %v11908_v49  ;;  %s5860_s1 = smov 48 }
  0xc0   :  { %v5524_v9 = vsel %vm4110_vm2, %v5522_v4, %v5519_v6  ;;  %v5692_v59 = vld [vmem:[#allocation1 + $0x68c] ss:$16 sm:%s5691_s17]   ;;  %v5684_v62 = vsel %vm4110_vm2, %v5682_v56, %v5679_v58  ;;  %v11910_v56 = vld [vmem:[%s14549_s0 + $0x230] sm:$0xff]   ;;  %965 = vst [vmem:[#allocation1 + $0x620] sm:$0xff] %v10719_v46  ;;  %s5865_s22 = smov 192  ;;  %s5906_s21 = smov 48 }
  0xc1   :  { %v11417_v12 = vpack.i.bf16 %v5524_v9, %v5501_v2  ;;  %v5695_v60 = vld [vmem:[#allocation1 + $0x68c] ss:$16 sm:%s5694_s3]   ;;  %s5814_s3 = smov 48  ;;  %1029 = vst [vmem:[#allocation1 + $0x600] sm:$0xff] %v10727_v50  ;;  %v5902_v45 = vld [vmem:[#allocation1 + $0xb] ss:$16 sm:%s5901_s20]  }
  0xc2   :  { %v5697_v63 = vsel %vm4102_vm0, %v5695_v60, %v5692_v59  ;;  %v5700_v0 = vld [vmem:[#allocation1 + $0x68c] ss:$16 sm:%s5699_s30]   ;;  %s5819_s30 = smov 192  ;;  %v11922_v46 = vld [vmem:[%s14549_s0 + $0x350] sm:$0xff]   ;;  %v11924_v50 = vld [vmem:[%s14549_s0 + $0x340] sm:$0xff]   ;;  %s5974_s2 = smov 48 }
  0xc3   :  { %11418 = vrot.lane.b32.xlu1 %v11417_v12, %s12000_s12  ;;  %s5584_s12 = smov 48  ;;  %v5705_v1 = vld [vmem:[#allocation1 + $0x68c] ss:$16 sm:%s5704_s29]   ;;  %11433 = vrot.lane.b32.xlu0 %v11432_v57, %s12001_s16  ;;  %v5702_v2 = vsel %vm4106_vm1, %v5700_v0, %v5697_v63  ;;  %v10831_v57 = vunpack.c.l.bf16 %v11910_v56  ;;  %s5989_s29 = smov 3 }
  0xc4   :  { %v5585_v25 = vld [vmem:[#allocation1 + $0x40c] ss:$16 sm:%s5584_s12]   ;;  %v5707_v5 = vsel %vm4110_vm2, %v5705_v1, %v5702_v2  ;;  %s5750_s12 = smov 192  ;;  %v11912_v1 = vld [vmem:[%s14549_s0 + $0x220] sm:$0xff]   ;;  %s6035_s17 = smov 3 }
  0xc5   :  { %v5587_v28 = vsel %vm4106_vm1, %v5585_v25, %v5582_v24  ;;  %v5715_v3 = vld [vmem:[#allocation1 + $0x10c] ss:$16 sm:%s5714_s10]   ;;  %v11437_v9 = vpack.i.bf16 %v5707_v5, %v5684_v62  ;;  %v13001_v24 = vpop.permute.xlu1 %11313  ;;  %v11902_v25 = vld [vmem:[%s14549_s0 + $0x330] sm:$0xff]   ;;  %v10839_v2 = vunpack.c.l.bf16 %v11912_v1  ;;  %1861 = vst [vmem:[#allocation1 + $0x460] sm:$0xff] %v10831_v57  ;;  %s5923_s10 = smov 12  ;;  %s6061_s20 = smov 12 }
  0xc6   :  { %v5592_v31 = vsel %vm4110_vm2, %v5590_v26, %v5587_v28  ;;  %v5718_v4 = vld [vmem:[#allocation1 + $0x10c] ss:$16 sm:%s5717_s14]   ;;  %v10703_v26 = vunpack.c.l.bf16 %v11902_v25  ;;  %v11918_v25 = vld [vmem:[%s14549_s0 + $0x370] sm:$0xff]   ;;  %s5928_s14 = smov 48  ;;  %v5924_v1 = vld [vmem:[#allocation1 + $0x20b] ss:$16 sm:%s5923_s10]  }
  0xc7   :  { %v11427_v43 = vpack.i.bf16 %v5615_v38, %v5592_v31  ;;  %v5720_v6 = vsel %vm4102_vm0, %v5718_v4, %v5715_v3  ;;  %v5728_v8 = vld [vmem:[#allocation1 + $0x10c] ss:$16 sm:%s5727_s28]   ;;  %v10711_v38 = vunpack.c.l.bf16 %v11904_v37  ;;  %1925 = vst [vmem:[#allocation1 + $0x440] sm:$0xff] %v10839_v2  ;;  %s5878_s28 = smov 12  ;;  %v11926_v57 = vld [vmem:[%s14549_s0 + $0x270] sm:$0xff]   ;;  %s6313_s10 = smov 12 }
  0xc8   :  { %v5725_v10 = vsel %vm4106_vm1, %v5723_v7, %v5720_v6  ;;  %v5738_v11 = vld [vmem:[#allocation1 + $0x30c] ss:$16 sm:%s5737_s11]   ;;  %837 = vst [vmem:[#allocation1 + $0x660] sm:$0xff] %v10703_v26  ;;  %v10671_v26 = vunpack.c.l.bf16 %v11918_v25  ;;  %v5929_v2 = vld [vmem:[#allocation1 + $0x20b] ss:$16 sm:%s5928_s14]   ;;  %s5992_s11 = smov 12 }
  0xc9   :  { %11428 = vrot.lane.b32.xlu1 %v11427_v43, %s12001_s16  ;;  %v5741_v12 = vld [vmem:[#allocation1 + $0x30c] ss:$16 sm:%s5740_s8]   ;;  %v5730_v13 = vsel %vm4110_vm2, %v5728_v8, %v5725_v10  ;;  %s5829_s8 = smov 3  ;;  %901 = vst [vmem:[#allocation1 + $0x640] sm:$0xff] %v10711_v38  ;;  %s6038_s14 = smov 12 }
  0xca   :  { %v5743_v14 = vsel %vm4102_vm0, %v5741_v12, %v5738_v11  ;;  %v5746_v15 = vld [vmem:[#allocation1 + $0x30c] ss:$16 sm:%s5745_s9]   ;;  %s5832_s9 = smov 12  ;;  %581 = vst [vmem:[#allocation1 + $0x6e0] sm:$0xff] %v10671_v26 }
  0xcb   :  { %v5751_v16 = vld [vmem:[#allocation1 + $0x30c] ss:$16 sm:%s5750_s12]   ;;  %v5748_v17 = vsel %vm4106_vm1, %v5746_v15, %v5743_v14  ;;  %s6048_s12 = smov 192 }
  0xcc   :  { %v5761_v18 = vld [vmem:[#allocation1 + $0x50c] ss:$16 sm:%s5760_s7]   ;;  %v5753_v20 = vsel %vm4110_vm2, %v5751_v16, %v5748_v17  ;;  %v11916_v16 = vld [vmem:[%s14549_s0 + $0x200] sm:$0xff]   ;;  %s5883_s7 = smov 48 }
  0xcd   :  { %11438 = vrot.lane.b32.xlu1 %v11437_v9, %s12001_s16  ;;  %v5764_v19 = vld [vmem:[#allocation1 + $0x50c] ss:$16 sm:%s5763_s26]   ;;  %v11442_v29 = vpack.i.bf16 %v5753_v20, %v5730_v13  ;;  %v11914_v9 = vld [vmem:[%s14549_s0 + $0x210] sm:$0xff]   ;;  %v10855_v17 = vunpack.c.l.bf16 %v11916_v16  ;;  %s5888_s26 = smov 192  ;;  %v11932_v16 = vld [vmem:[%s14549_s0 + $0x240] sm:$0xff]  }
  0xce   :  { %v5766_v21 = vsel %vm4102_vm0, %v5764_v19, %v5761_v18  ;;  %v5769_v22 = vld [vmem:[#allocation1 + $0x50c] ss:$16 sm:%s5768_s15]   ;;  %v10847_v10 = vunpack.c.l.bf16 %v11914_v9  ;;  %s5951_s15 = smov 48 }
  0xcf   :  { %v5774_v23 = vld [vmem:[#allocation1 + $0x50c] ss:$16 sm:%s5773_s13]   ;;  %v5771_v30 = vsel %vm4106_vm1, %v5769_v22, %v5766_v21  ;;  %11443 = vrot.lane.b32.xlu0 %v11442_v29, %s12001_s16  ;;  %s5837_s13 = smov 48  ;;  %2053 = vst [vmem:[#allocation1 + $0x400] sm:$0xff] %v10855_v17  ;;  %v10823_v17 = vunpack.c.l.bf16 %v11932_v16  ;;  %v11947_v16 = vld [vmem:[%s14549_s0 + $0x90] sm:$0xff]  }
  0xd0   :  { %v11903_v27 = vld [vmem:[%s14549_s0 + $0x328] sm:$0xff]   ;;  %v5776_v33 = vsel %vm4110_vm2, %v5774_v23, %v5771_v30  ;;  %v11905_v39 = vld [vmem:[%s14549_s0 + $0x318] sm:$0xff]   ;;  %1989 = vst [vmem:[#allocation1 + $0x420] sm:$0xff] %v10847_v10 }
  0xd1   :  { %v10707_v28 = vunpack.c.l.bf16 %v11903_v27  ;;  %v5784_v31 = vld [vmem:[#allocation1 + $0x70c] ss:$16 sm:%s5783_s4]   ;;  %v10715_v41 = vunpack.c.l.bf16 %v11905_v39  ;;  %s5842_s4 = smov 192  ;;  %1797 = vst [vmem:[#allocation1 + $0x480] sm:$0xff] %v10823_v17  ;;  %v11039_v17 = vunpack.c.l.bf16 %v11947_v16 }
  0xd2   :  { %v5787_v32 = vld [vmem:[#allocation1 + $0x70c] ss:$16 sm:%s5786_s6]   ;;  %s6176_s6 = smov 12 }
  0xd3   :  { %v5789_v34 = vsel %vm4102_vm0, %v5787_v32, %v5784_v31  ;;  %v5792_v35 = vld [vmem:[#allocation1 + $0x70c] ss:$16 sm:%s5791_s19]   ;;  %869 = vst [vmem:[#allocation1 + $0x650] sm:$0xff] %v10707_v28  ;;  %933 = vst [vmem:[#allocation1 + $0x630] sm:$0xff] %v10715_v41  ;;  %s5855_s19 = smov 12 }
  0xd4   :  { %v5797_v36 = vld [vmem:[#allocation1 + $0x70c] ss:$16 sm:%s5796_s27]   ;;  %v5794_v42 = vsel %vm4106_vm1, %v5792_v35, %v5789_v34  ;;  %v11920_v34 = vld [vmem:[%s14549_s0 + $0x360] sm:$0xff]   ;;  %s6020_s27 = smov 48  ;;  %3525 = vst [vmem:[#allocation1 + $0x120] sm:$0xff] %v11039_v17 }
  0xd5   :  { %v5807_v43 = vld [vmem:[#allocation1 + $0x18c] ss:$16 sm:%s5806_s24]   ;;  %v5799_v51 = vsel %vm4110_vm2, %v5797_v36, %v5794_v42  ;;  %v10679_v35 = vunpack.c.l.bf16 %v11920_v34  ;;  %s6130_s24 = smov 12 }
  0xd6   :  { %v5810_v44 = vld [vmem:[#allocation1 + $0x18c] ss:$16 sm:%s5809_s25]   ;;  %v11447_v58 = vpack.i.bf16 %v5799_v51, %v5776_v33  ;;  %v13072_v33 = vpop.permute.xlu0 %11308  ;;  %v10695_v51 = vunpack.c.l.bf16 %v11924_v50  ;;  %s5969_s25 = smov 12 }
  0xd7   :  { %v11907_v47 = vld [vmem:[%s14549_s0 + $0x308] sm:$0xff]   ;;  %v5812_v52 = vsel %vm4102_vm0, %v5810_v44, %v5807_v43  ;;  %v11909_v40 = vld [vmem:[%s14549_s0 + $0x238] sm:$0xff]   ;;  %645 = vst [vmem:[#allocation1 + $0x6c0] sm:$0xff] %v10679_v35 }
  0xd8   :  { %v10723_v48 = vunpack.c.l.bf16 %v11907_v47  ;;  %v5815_v53 = vld [vmem:[#allocation1 + $0x18c] ss:$16 sm:%s5814_s3]   ;;  %v10827_v55 = vunpack.c.l.bf16 %v11909_v40  ;;  %11448 = vrot.lane.b32.xlu1 %v11447_v58, %s12001_s16  ;;  %v5899_v44 = vld [vmem:[#allocation1 + $0xb] ss:$16 sm:%s5898_s5]   ;;  %v10687_v47 = vunpack.c.l.bf16 %v11922_v46  ;;  %v10799_v58 = vunpack.c.l.bf16 %v11926_v57  ;;  %773 = vst [vmem:[#allocation1 + $0x680] sm:$0xff] %v10695_v51  ;;  %s6117_s5 = smov 192 }
  0xd9   :  { %v5820_v54 = vld [vmem:[#allocation1 + $0x18c] ss:$16 sm:%s5819_s30]   ;;  %v5817_v59 = vsel %vm4106_vm1, %v5815_v53, %v5812_v52  ;;  %v5904_v53 = vsel %vm4102_vm0, %v5902_v45, %v5899_v44  ;;  %v5970_v35 = vld [vmem:[#allocation1 + $0x60b] ss:$16 sm:%s5969_s25]   ;;  %s5979_s30 = smov 192  ;;  %s6071_s25 = smov 192 }
  0xda   :  { %v5830_v60 = vld [vmem:[#allocation1 + $0x38c] ss:$16 sm:%s5829_s8]   ;;  %997 = vst [vmem:[#allocation1 + $0x610] sm:$0xff] %v10723_v48  ;;  %v5822_v3 = vsel %vm4110_vm2, %v5820_v54, %v5817_v59  ;;  %1829 = vst [vmem:[#allocation1 + $0x470] sm:$0xff] %v10827_v55  ;;  %v5907_v54 = vld [vmem:[#allocation1 + $0xb] ss:$16 sm:%s5906_s21]  }
  0xdb   :  { %v5833_v62 = vld [vmem:[#allocation1 + $0x38c] ss:$16 sm:%s5832_s9]   ;;  %709 = vst [vmem:[#allocation1 + $0x6a0] sm:$0xff] %v10687_v47  ;;  %1605 = vst [vmem:[#allocation1 + $0x4e0] sm:$0xff] %v10799_v58  ;;  %v5980_v44 = vld [vmem:[#allocation1 + $0x60b] ss:$16 sm:%s5979_s30]  }
  0xdc   :  { %v11911_v63 = vld [vmem:[%s14549_s0 + $0x228] sm:$0xff]   ;;  %v5835_v4 = vsel %vm4102_vm0, %v5833_v62, %v5830_v60  ;;  %v11913_v7 = vld [vmem:[%s14549_s0 + $0x218] sm:$0xff]   ;;  %v5909_v60 = vsel %vm4106_vm1, %v5907_v54, %v5904_v53  ;;  %s5997_s8 = smov 48  ;;  %s6066_s21 = smov 48 }
  0xdd   :  { %v10835_v0 = vunpack.c.l.bf16 %v11911_v63  ;;  %v5838_v5 = vld [vmem:[#allocation1 + $0x38c] ss:$16 sm:%s5837_s13]   ;;  %v10843_v8 = vunpack.c.l.bf16 %v11913_v7  ;;  %v13102_v63 = vpop.permute.xlu1 %11318  ;;  %v5990_v45 = vld [vmem:[#allocation1 + $0x8b] ss:$16 sm:%s5989_s29]   ;;  %s6012_s13 = smov 3  ;;  %s6084_s30 = smov 12 }
  0xde   :  { %v5843_v6 = vld [vmem:[#allocation1 + $0x38c] ss:$16 sm:%s5842_s4]   ;;  %v5840_v11 = vsel %vm4106_vm1, %v5838_v5, %v5835_v4  ;;  %v11928_v5 = vld [vmem:[%s14549_s0 + $0x260] sm:$0xff]   ;;  %v5993_v51 = vld [vmem:[#allocation1 + $0x8b] ss:$16 sm:%s5992_s11]   ;;  %s6089_s29 = smov 48 }
  0xdf   :  { %v5853_v12 = vld [vmem:[#allocation1 + $0x58c] ss:$16 sm:%s5852_s23]   ;;  %1893 = vst [vmem:[#allocation1 + $0x450] sm:$0xff] %v10835_v0  ;;  %v5845_v20 = vsel %vm4110_vm2, %v5843_v6, %v5840_v11  ;;  %1957 = vst [vmem:[#allocation1 + $0x430] sm:$0xff] %v10843_v8  ;;  %s5911_s23 = smov 192  ;;  %v10807_v6 = vunpack.c.l.bf16 %v11928_v5  ;;  %s6094_s11 = smov 192 }
  0xe0   :  { %v5856_v13 = vld [vmem:[#allocation1 + $0x58c] ss:$16 sm:%s5855_s19]   ;;  %v11452_v29 = vpack.i.bf16 %v5845_v20, %v5822_v3  ;;  %v5912_v40 = vld [vmem:[#allocation1 + $0xb] ss:$16 sm:%s5911_s23]   ;;  %s5956_s23 = smov 192  ;;  %s5966_s19 = smov 3 }
  0xe1   :  { %v11915_v14 = vld [vmem:[%s14549_s0 + $0x208] sm:$0xff]   ;;  %v11917_v18 = vld [vmem:[%s14549_s0 + $0x338] sm:$0xff]   ;;  %v5858_v21 = vsel %vm4102_vm0, %v5856_v13, %v5853_v12  ;;  %v13105_v0 = vsel %vm4110_vm2, %v5912_v40, %v5909_v60  ;;  %v11930_v12 = vld [vmem:[%s14549_s0 + $0x250] sm:$0xff]   ;;  %1669 = vst [vmem:[#allocation1 + $0x4c0] sm:$0xff] %v10807_v6  ;;  %s6140_s3 = smov 192  ;;  %s6359_s4 = smov 12 }
  0xe2   :  { %v10851_v15 = vunpack.c.l.bf16 %v11915_v14  ;;  %v10699_v19 = vunpack.c.l.bf16 %v11917_v18  ;;  %v5861_v22 = vld [vmem:[#allocation1 + $0x58c] ss:$16 sm:%s5860_s1]   ;;  %11453 = vrot.lane.b32.xlu0 %v11452_v29, %s12001_s16  ;;  %v10815_v13 = vunpack.c.l.bf16 %v11930_v12  ;;  %v5952_v20 = vld [vmem:[#allocation1 + $0x40b] ss:$16 sm:%s5951_s15]   ;;  %s6002_s15 = smov 192  ;;  %v11941_v40 = vld [vmem:[%s14549_s0 + $0x180] sm:$0xff]  }
  0xe3   :  { %v5866_v23 = vld [vmem:[#allocation1 + $0x58c] ss:$16 sm:%s5865_s22]   ;;  %v5863_v30 = vsel %vm4106_vm1, %v5861_v22, %v5858_v21  ;;  %s5920_s22 = smov 3  ;;  %v5957_v26 = vld [vmem:[#allocation1 + $0x40b] ss:$16 sm:%s5956_s23]   ;;  %s6242_s23 = smov 3 }
  0xe4   :  { %v11919_v27 = vld [vmem:[%s14549_s0 + $0x368] sm:$0xff]   ;;  %2021 = vst [vmem:[#allocation1 + $0x410] sm:$0xff] %v10851_v15  ;;  %805 = vst [vmem:[#allocation1 + $0x670] sm:$0xff] %v10699_v19  ;;  %v11921_v36 = vld [vmem:[%s14549_s0 + $0x358] sm:$0xff]   ;;  %v5868_v38 = vsel %vm4110_vm2, %v5866_v23, %v5863_v30  ;;  %s6300_s1 = smov 192  ;;  %s6494_s9 = smov 3 }
  0xe5   :  { %v10675_v28 = vunpack.c.l.bf16 %v11919_v27  ;;  %v5876_v31 = vld [vmem:[#allocation1 + $0x78c] ss:$16 sm:%s5875_s18]   ;;  %v10683_v37 = vunpack.c.l.bf16 %v11921_v36  ;;  %v5921_v62 = vld [vmem:[#allocation1 + $0x20b] ss:$16 sm:%s5920_s22]   ;;  %s5933_s18 = smov 192  ;;  %1733 = vst [vmem:[#allocation1 + $0x4a0] sm:$0xff] %v10815_v13 }
  0xe6   :  { %v5879_v32 = vld [vmem:[#allocation1 + $0x78c] ss:$16 sm:%s5878_s28]   ;;  %s5943_s28 = smov 3  ;;  %v5926_v9 = vsel %vm4102_vm0, %v5924_v1, %v5921_v62  ;;  %v5934_v10 = vld [vmem:[#allocation1 + $0x20b] ss:$16 sm:%s5933_s18]   ;;  %v11935_v30 = vld [vmem:[%s14549_s0 + $0x1b0] sm:$0xff]  }
  0xe7   :  { %v5881_v39 = vsel %vm4102_vm0, %v5879_v32, %v5876_v31  ;;  %v5884_v41 = vld [vmem:[#allocation1 + $0x78c] ss:$16 sm:%s5883_s7]   ;;  %613 = vst [vmem:[#allocation1 + $0x6d0] sm:$0xff] %v10675_v28  ;;  %677 = vst [vmem:[#allocation1 + $0x6b0] sm:$0xff] %v10683_v37  ;;  %v5944_v11 = vld [vmem:[#allocation1 + $0x40b] ss:$16 sm:%s5943_s28]   ;;  %v5931_v18 = vsel %vm4106_vm1, %v5929_v2, %v5926_v9  ;;  %v10895_v31 = vunpack.c.l.bf16 %v11935_v30 }
  0xe8   :  { %v5889_v42 = vld [vmem:[#allocation1 + $0x78c] ss:$16 sm:%s5888_s26]   ;;  %v5886_v43 = vsel %vm4106_vm1, %v5884_v41, %v5881_v39  ;;  %v5936_v23 = vsel %vm4110_vm2, %v5934_v10, %v5931_v18  ;;  %v5967_v27 = vld [vmem:[#allocation1 + $0x60b] ss:$16 sm:%s5966_s19]   ;;  %v11937_v39 = vld [vmem:[%s14549_s0 + $0x1a0] sm:$0xff]   ;;  %s6015_s19 = smov 12 }
  0xe9   :  { %v11923_v48 = vld [vmem:[%s14549_s0 + $0x348] sm:$0xff]   ;;  %v5891_v52 = vsel %vm4110_vm2, %v5889_v42, %v5886_v43  ;;  %v11925_v55 = vld [vmem:[%s14549_s0 + $0x278] sm:$0xff]   ;;  %v11462_v32 = vpack.i.bf16 %v5936_v23, %v13105_v0  ;;  %v10903_v41 = vunpack.c.l.bf16 %v11937_v39  ;;  %v5972_v43 = vsel %vm4102_vm0, %v5970_v35, %v5967_v27  ;;  %2373 = vst [vmem:[#allocation1 + $0x360] sm:$0xff] %v10895_v31  ;;  %v11943_v0 = vld [vmem:[%s14549_s0 + $0xb0] sm:$0xff]   ;;  %s6025_s22 = smov 192  ;;  %s6043_s18 = smov 48 }
  0xea   :  { %v10691_v49 = vunpack.c.l.bf16 %v11923_v48  ;;  %v10795_v56 = vunpack.c.l.bf16 %v11925_v55  ;;  %v11457_v59 = vpack.i.bf16 %v5891_v52, %v5868_v38  ;;  %v11927_v3 = vld [vmem:[%s14549_s0 + $0x268] sm:$0xff]   ;;  %v11929_v7 = vld [vmem:[%s14549_s0 + $0x258] sm:$0xff]   ;;  %v11939_v48 = vld [vmem:[%s14549_s0 + $0x190] sm:$0xff]   ;;  %v10919_v55 = vunpack.c.l.bf16 %v11941_v40  ;;  %s6058_s7 = smov 3  ;;  %s6112_s26 = smov 48 }
  0xeb   :  { %v10803_v4 = vunpack.c.l.bf16 %v11927_v3  ;;  %v10811_v8 = vunpack.c.l.bf16 %v11929_v7  ;;  %v11931_v14 = vld [vmem:[%s14549_s0 + $0x248] sm:$0xff]   ;;  %v11933_v21 = vld [vmem:[%s14549_s0 + $0x378] sm:$0xff]   ;;  %2437 = vst [vmem:[#allocation1 + $0x340] sm:$0xff] %v10903_v41  ;;  %v11023_v1 = vunpack.c.l.bf16 %v11943_v0  ;;  %v11949_v23 = vld [vmem:[%s14549_s0 + $0x80] sm:$0xff]   ;;  %s6471_s28 = smov 3 }
  0xec   :  { %741 = vst [vmem:[#allocation1 + $0x690] sm:$0xff] %v10691_v49  ;;  %1573 = vst [vmem:[#allocation1 + $0x4f0] sm:$0xff] %v10795_v56  ;;  %11458 = vrot.lane.b32.xlu1 %v11457_v59, %s12001_s16  ;;  %s5946_s16 = smov 12  ;;  %v10819_v15 = vunpack.c.l.bf16 %v11931_v14  ;;  %v10667_v22 = vunpack.c.l.bf16 %v11933_v21  ;;  %v11934_v28 = vld [vmem:[%s14549_s0 + $0x1b8] sm:$0xff]   ;;  %v11936_v37 = vld [vmem:[%s14549_s0 + $0x1a8] sm:$0xff]   ;;  %v10911_v49 = vunpack.c.l.bf16 %v11939_v48  ;;  %v5995_v59 = vsel %vm4102_vm0, %v5993_v51, %v5990_v45 }
  0xed   :  { %v5947_v19 = vld [vmem:[#allocation1 + $0x40b] ss:$16 sm:%s5946_s16]   ;;  %1637 = vst [vmem:[#allocation1 + $0x4d0] sm:$0xff] %v10803_v4  ;;  %1701 = vst [vmem:[#allocation1 + $0x4b0] sm:$0xff] %v10811_v8  ;;  %v10891_v29 = vunpack.c.l.bf16 %v11934_v28  ;;  %v10899_v38 = vunpack.c.l.bf16 %v11936_v37  ;;  %s12002_s16 = smov 88   ;;  %v11945_v8 = vld [vmem:[%s14549_s0 + $0xa0] sm:$0xff]  }
  0xee   :  { %v5949_v25 = vsel %vm4102_vm0, %v5947_v19, %v5944_v11  ;;  %1765 = vst [vmem:[#allocation1 + $0x490] sm:$0xff] %v10819_v15  ;;  %v5975_v36 = vld [vmem:[#allocation1 + $0x60b] ss:$16 sm:%s5974_s2]   ;;  %549 = vst [vmem:[#allocation1 + $0x6f0] sm:$0xff] %v10667_v22  ;;  %11463 = vrot.lane.b32.xlu0 %v11462_v32, %s12002_s16  ;;  %v11031_v9 = vunpack.c.l.bf16 %v11945_v8  ;;  %v11952_v35 = vld [vmem:[%s14549_s0 + $0x3a0] sm:$0xff]   ;;  %s6081_s2 = smov 3 }
  0xef   :  { %v5954_v34 = vsel %vm4106_vm1, %v5952_v20, %v5949_v25  ;;  %2341 = vst [vmem:[#allocation1 + $0x370] sm:$0xff] %v10891_v29  ;;  %v11938_v46 = vld [vmem:[%s14549_s0 + $0x198] sm:$0xff]   ;;  %v5977_v50 = vsel %vm4106_vm1, %v5975_v36, %v5972_v43  ;;  %2405 = vst [vmem:[#allocation1 + $0x350] sm:$0xff] %v10899_v38  ;;  %v11940_v53 = vld [vmem:[%s14549_s0 + $0x188] sm:$0xff]   ;;  %v11047_v25 = vunpack.c.l.bf16 %v11949_v23  ;;  %v10647_v36 = vunpack.c.l.bf16 %v11952_v35 }
  0xf0   :  { %v13148_v42 = vsel %vm4110_vm2, %v5957_v26, %v5954_v34  ;;  %v10907_v47 = vunpack.c.l.bf16 %v11938_v46  ;;  %v5998_v52 = vld [vmem:[#allocation1 + $0x8b] ss:$16 sm:%s5997_s8]   ;;  %v10915_v54 = vunpack.c.l.bf16 %v11940_v53  ;;  %v5982_v58 = vsel %vm4110_vm2, %v5980_v44, %v5977_v50  ;;  %2501 = vst [vmem:[#allocation1 + $0x320] sm:$0xff] %v10911_v49  ;;  %2565 = vst [vmem:[#allocation1 + $0x300] sm:$0xff] %v10919_v55  ;;  %v11950_v26 = vld [vmem:[%s14549_s0 + $0x3b0] sm:$0xff]   ;;  %s6104_s8 = smov 3 }
  0xf1   :  { %v11942_v56 = vld [vmem:[%s14549_s0 + $0xb8] sm:$0xff]   ;;  %v11944_v2 = vld [vmem:[%s14549_s0 + $0xa8] sm:$0xff]   ;;  %v11467_v4 = vpack.i.bf16 %v5982_v58, %v13148_v42  ;;  %v6000_v5 = vsel %vm4106_vm1, %v5998_v52, %v5995_v59  ;;  %3397 = vst [vmem:[#allocation1 + $0x160] sm:$0xff] %v11023_v1  ;;  %3461 = vst [vmem:[#allocation1 + $0x140] sm:$0xff] %v11031_v9  ;;  %v10639_v27 = vunpack.c.l.bf16 %v11950_v26  ;;  %v13223_v52 = vpop.permute.xlu0 %11323 }
  0xf2   :  { %v11019_v57 = vunpack.c.l.bf16 %v11942_v56  ;;  %v6003_v60 = vld [vmem:[#allocation1 + $0x8b] ss:$16 sm:%s6002_s15]   ;;  %2469 = vst [vmem:[#allocation1 + $0x330] sm:$0xff] %v10907_v47  ;;  %v11027_v3 = vunpack.c.l.bf16 %v11944_v2  ;;  %2533 = vst [vmem:[#allocation1 + $0x310] sm:$0xff] %v10915_v54  ;;  %v11954_v44 = vld [vmem:[%s14549_s0 + $0x390] sm:$0xff]   ;;  %s6222_s15 = smov 12 }
  0xf3   :  { %v6013_v62 = vld [vmem:[#allocation1 + $0x28b] ss:$16 sm:%s6012_s13]   ;;  %v13185_v12 = vsel %vm4110_vm2, %v6003_v60, %v6000_v5  ;;  %11468 = vrot.lane.b32.xlu1 %v11467_v4, %s12002_s16  ;;  %3589 = vst [vmem:[#allocation1 + $0x100] sm:$0xff] %v11047_v25  ;;  %325 = vst [vmem:[#allocation1 + $0x760] sm:$0xff] %v10639_v27  ;;  %v10655_v45 = vunpack.c.l.bf16 %v11954_v44  ;;  %v11956_v53 = vld [vmem:[%s14549_s0 + $0x380] sm:$0xff]   ;;  %s6227_s13 = smov 48 }
  0xf4   :  { %v6016_v6 = vld [vmem:[#allocation1 + $0x28b] ss:$16 sm:%s6015_s19]   ;;  %3365 = vst [vmem:[#allocation1 + $0x170] sm:$0xff] %v11019_v57  ;;  %3429 = vst [vmem:[#allocation1 + $0x150] sm:$0xff] %v11027_v3  ;;  %v10663_v54 = vunpack.c.l.bf16 %v11956_v53  ;;  %v11958_v59 = vld [vmem:[%s14549_s0 + $0x2b0] sm:$0xff]   ;;  %s6387_s19 = smov 48 }
  0xf5   :  { %v6021_v7 = vld [vmem:[#allocation1 + $0x28b] ss:$16 sm:%s6020_s27]   ;;  %v6018_v13 = vsel %vm4102_vm0, %v6016_v6, %v6013_v62  ;;  %389 = vst [vmem:[#allocation1 + $0x740] sm:$0xff] %v10647_v36  ;;  %453 = vst [vmem:[#allocation1 + $0x720] sm:$0xff] %v10655_v45  ;;  %v10767_v60 = vunpack.c.l.bf16 %v11958_v59  ;;  %v11960_v5 = vld [vmem:[%s14549_s0 + $0x2a0] sm:$0xff]   ;;  %s6186_s27 = smov 192 }
  0xf6   :  { %v11946_v10 = vld [vmem:[%s14549_s0 + $0x98] sm:$0xff]   ;;  %v11948_v18 = vld [vmem:[%s14549_s0 + $0x88] sm:$0xff]   ;;  %v6023_v20 = vsel %vm4106_vm1, %v6021_v7, %v6018_v13  ;;  %517 = vst [vmem:[#allocation1 + $0x700] sm:$0xff] %v10663_v54  ;;  %v10775_v6 = vunpack.c.l.bf16 %v11960_v5  ;;  %v13244_v7 = vpop.permute.xlu1 %11328 }
  0xf7   :  { %v11035_v11 = vunpack.c.l.bf16 %v11946_v10  ;;  %v6026_v14 = vld [vmem:[#allocation1 + $0x28b] ss:$16 sm:%s6025_s22]   ;;  %v11043_v19 = vunpack.c.l.bf16 %v11948_v18  ;;  %1349 = vst [vmem:[#allocation1 + $0x560] sm:$0xff] %v10767_v60  ;;  %s6245_s22 = smov 12 }
  0xf8   :  { %v6036_v15 = vld [vmem:[#allocation1 + $0x48b] ss:$16 sm:%s6035_s17]   ;;  %v6028_v30 = vsel %vm4110_vm2, %v6026_v14, %v6023_v20  ;;  %v11962_v14 = vld [vmem:[%s14549_s0 + $0x290] sm:$0xff]   ;;  %1413 = vst [vmem:[#allocation1 + $0x540] sm:$0xff] %v10775_v6  ;;  %s6250_s17 = smov 48 }
  0xf9   :  { %v6039_v21 = vld [vmem:[#allocation1 + $0x48b] ss:$16 sm:%s6038_s14]   ;;  %3493 = vst [vmem:[#allocation1 + $0x130] sm:$0xff] %v11035_v11  ;;  %3557 = vst [vmem:[#allocation1 + $0x110] sm:$0xff] %v11043_v19  ;;  %v11472_v39 = vpack.i.bf16 %v6028_v30, %v13185_v12  ;;  %s6153_s14 = smov 12 }
  0xfa   :  { %v6044_v22 = vld [vmem:[#allocation1 + $0x48b] ss:$16 sm:%s6043_s18]   ;;  %v6041_v31 = vsel %vm4102_vm0, %v6039_v21, %v6036_v15  ;;  %v10783_v15 = vunpack.c.l.bf16 %v11962_v14  ;;  %s6158_s18 = smov 48 }
  0xfb   :  { %v11951_v28 = vld [vmem:[%s14549_s0 + $0x3a8] sm:$0xff]   ;;  %v11953_v37 = vld [vmem:[%s14549_s0 + $0x398] sm:$0xff]   ;;  %v6046_v41 = vsel %vm4106_vm1, %v6044_v22, %v6041_v31  ;;  %11473 = vrot.lane.b32.xlu0 %v11472_v39, %s12002_s16  ;;  %v11964_v22 = vld [vmem:[%s14549_s0 + $0x280] sm:$0xff]  }
  0xfc   :  { %v10643_v29 = vunpack.c.l.bf16 %v11951_v28  ;;  %v6049_v32 = vld [vmem:[#allocation1 + $0x48b] ss:$16 sm:%s6048_s12]   ;;  %v10651_v38 = vunpack.c.l.bf16 %v11953_v37  ;;  %v10791_v23 = vunpack.c.l.bf16 %v11964_v22  ;;  %1477 = vst [vmem:[#allocation1 + $0x520] sm:$0xff] %v10783_v15  ;;  %v11967_v37 = vld [vmem:[%s14549_s0 + $0x1f0] sm:$0xff]   ;;  %s6163_s12 = smov 192 }
  0xfd   :  { %v6059_v34 = vld [vmem:[#allocation1 + $0x68b] ss:$16 sm:%s6058_s7]   ;;  %v6051_v48 = vsel %vm4110_vm2, %v6049_v32, %v6046_v41  ;;  %s6107_s7 = smov 12 }
  0xfe   :  { %v6062_v42 = vld [vmem:[#allocation1 + $0x68b] ss:$16 sm:%s6061_s20]   ;;  %357 = vst [vmem:[#allocation1 + $0x750] sm:$0xff] %v10643_v29  ;;  %421 = vst [vmem:[#allocation1 + $0x730] sm:$0xff] %v10651_v38  ;;  %s6127_s20 = smov 3  ;;  %v10863_v38 = vunpack.c.l.bf16 %v11967_v37 }
  0xff   :  { %v6067_v43 = vld [vmem:[#allocation1 + $0x68b] ss:$16 sm:%s6066_s21]   ;;  %v6064_v49 = vsel %vm4102_vm0, %v6062_v42, %v6059_v34  ;;  %1541 = vst [vmem:[#allocation1 + $0x500] sm:$0xff] %v10791_v23  ;;  %s6232_s21 = smov 192 }
 0x100   :  { %v11955_v46 = vld [vmem:[%s14549_s0 + $0x388] sm:$0xff]   ;;  %v11957_v40 = vld [vmem:[%s14549_s0 + $0x2b8] sm:$0xff]   ;;  %v6069_v56 = vsel %vm4106_vm1, %v6067_v43, %v6064_v49  ;;  %2117 = vst [vmem:[#allocation1 + $0x3e0] sm:$0xff] %v10863_v38 }
 0x101   :  { %v10659_v47 = vunpack.c.l.bf16 %v11955_v46  ;;  %v6072_v50 = vld [vmem:[#allocation1 + $0x68b] ss:$16 sm:%s6071_s25]   ;;  %v10763_v55 = vunpack.c.l.bf16 %v11957_v40  ;;  %s6135_s25 = smov 48  ;;  %v11969_v46 = vld [vmem:[%s14549_s0 + $0x1e0] sm:$0xff]   ;;  %v11971_v40 = vld [vmem:[%s14549_s0 + $0x1d0] sm:$0xff]  }
 0x102   :  { %v6082_v51 = vld [vmem:[#allocation1 + $0x10b] ss:$16 sm:%s6081_s2]   ;;  %v6074_v62 = vsel %vm4110_vm2, %v6072_v50, %v6069_v56  ;;  %s6295_s2 = smov 48 }
 0x103   :  { %v6085_v57 = vld [vmem:[#allocation1 + $0x10b] ss:$16 sm:%s6084_s30]   ;;  %485 = vst [vmem:[#allocation1 + $0x710] sm:$0xff] %v10659_v47  ;;  %1317 = vst [vmem:[#allocation1 + $0x570] sm:$0xff] %v10763_v55  ;;  %v11477_v8 = vpack.i.bf16 %v6074_v62, %v6051_v48  ;;  %s6150_s30 = smov 3  ;;  %v10871_v47 = vunpack.c.l.bf16 %v11969_v46  ;;  %v10879_v55 = vunpack.c.l.bf16 %v11971_v40  ;;  %v11973_v62 = vld [vmem:[%s14549_s0 + $0x1c0] sm:$0xff]  }
 0x104   :  { %v6090_v58 = vld [vmem:[#allocation1 + $0x10b] ss:$16 sm:%s6089_s29]   ;;  %v6087_v0 = vsel %vm4102_vm0, %v6085_v57, %v6082_v51  ;;  %s6204_s29 = smov 48 }
 0x105   :  { %v6095_v1 = vld [vmem:[#allocation1 + $0x10b] ss:$16 sm:%s6094_s11]   ;;  %v6092_v9 = vsel %vm4106_vm1, %v6090_v58, %v6087_v0  ;;  %11478 = vrot.lane.b32.xlu1 %v11477_v8, %s12002_s16  ;;  %2181 = vst [vmem:[#allocation1 + $0x3c0] sm:$0xff] %v10871_v47  ;;  %v10887_v0 = vunpack.c.l.bf16 %v11973_v62  ;;  %2245 = vst [vmem:[#allocation1 + $0x3a0] sm:$0xff] %v10879_v55  ;;  %v11975_v8 = vld [vmem:[%s14549_s0 + $0xf0] sm:$0xff]   ;;  %s6209_s11 = smov 192 }
 0x106   :  { %v6105_v2 = vld [vmem:[#allocation1 + $0x30b] ss:$16 sm:%s6104_s8]   ;;  %v6097_v16 = vsel %vm4110_vm2, %v6095_v1, %v6092_v9  ;;  %v10991_v9 = vunpack.c.l.bf16 %v11975_v8  ;;  %s6219_s8 = smov 3  ;;  %v11988_v62 = vld [vmem:[%s14549_s0 + $0x3c0] sm:$0xff]  }
 0x107   :  { %v11959_v3 = vld [vmem:[%s14549_s0 + $0x2a8] sm:$0xff]   ;;  %v11961_v12 = vld [vmem:[%s14549_s0 + $0x298] sm:$0xff]   ;;  %2309 = vst [vmem:[#allocation1 + $0x380] sm:$0xff] %v10887_v0  ;;  %v10631_v0 = vunpack.c.l.bf16 %v11988_v62 }
 0x108   :  { %v10771_v4 = vunpack.c.l.bf16 %v11959_v3  ;;  %v6108_v10 = vld [vmem:[#allocation1 + $0x30b] ss:$16 sm:%s6107_s7]   ;;  %v10779_v13 = vunpack.c.l.bf16 %v11961_v12  ;;  %s6173_s7 = smov 3  ;;  %3141 = vst [vmem:[#allocation1 + $0x1e0] sm:$0xff] %v10991_v9 }
 0x109   :  { %v6113_v11 = vld [vmem:[#allocation1 + $0x30b] ss:$16 sm:%s6112_s26]   ;;  %v6110_v17 = vsel %vm4102_vm0, %v6108_v10, %v6105_v2  ;;  %261 = vst [vmem:[#allocation1 + $0x780] sm:$0xff] %v10631_v0  ;;  %s6341_s26 = smov 48 }
 0x10a   :  { %v6118_v18 = vld [vmem:[#allocation1 + $0x30b] ss:$16 sm:%s6117_s5]   ;;  %1381 = vst [vmem:[#allocation1 + $0x550] sm:$0xff] %v10771_v4  ;;  %v6115_v25 = vsel %vm4106_vm1, %v6113_v11, %v6110_v17  ;;  %1445 = vst [vmem:[#allocation1 + $0x530] sm:$0xff] %v10779_v13  ;;  %s6181_s5 = smov 48 }
 0x10b   :  { %v6128_v19 = vld [vmem:[#allocation1 + $0x50b] ss:$16 sm:%s6127_s20]   ;;  %v6120_v30 = vsel %vm4110_vm2, %v6118_v18, %v6115_v25  ;;  %v11979_v25 = vld [vmem:[%s14549_s0 + $0xd0] sm:$0xff]   ;;  %s6369_s20 = smov 192 }
 0x10c   :  { %v11963_v20 = vld [vmem:[%s14549_s0 + $0x288] sm:$0xff]   ;;  %v11965_v28 = vld [vmem:[%s14549_s0 + $0x3b8] sm:$0xff]   ;;  %v11482_v39 = vpack.i.bf16 %v6120_v30, %v6097_v16  ;;  %v11977_v16 = vld [vmem:[%s14549_s0 + $0xe0] sm:$0xff]  }
 0x10d   :  { %v10787_v21 = vunpack.c.l.bf16 %v11963_v20  ;;  %v6131_v26 = vld [vmem:[#allocation1 + $0x50b] ss:$16 sm:%s6130_s24]   ;;  %v10635_v29 = vunpack.c.l.bf16 %v11965_v28  ;;  %s6196_s24 = smov 3  ;;  %v10999_v17 = vunpack.c.l.bf16 %v11977_v16  ;;  %v13378_v16 = vpop.permute.xlu1 %11338 }
 0x10e   :  { %v6136_v27 = vld [vmem:[#allocation1 + $0x50b] ss:$16 sm:%s6135_s25]   ;;  %v6133_v31 = vsel %vm4102_vm0, %v6131_v26, %v6128_v19  ;;  %11483 = vrot.lane.b32.xlu0 %v11482_v39, %s12002_s16  ;;  %v11007_v26 = vunpack.c.l.bf16 %v11979_v25  ;;  %s6405_s25 = smov 12 }
 0x10f   :  { %v6141_v32 = vld [vmem:[#allocation1 + $0x50b] ss:$16 sm:%s6140_s3]   ;;  %1509 = vst [vmem:[#allocation1 + $0x510] sm:$0xff] %v10787_v21  ;;  %v6138_v41 = vsel %vm4106_vm1, %v6136_v27, %v6133_v31  ;;  %293 = vst [vmem:[#allocation1 + $0x770] sm:$0xff] %v10635_v29  ;;  %s6433_s3 = smov 48 }
 0x110   :  { %v6151_v34 = vld [vmem:[#allocation1 + $0x70b] ss:$16 sm:%s6150_s30]   ;;  %v13282_v48 = vsel %vm4110_vm2, %v6141_v32, %v6138_v41  ;;  %s6199_s30 = smov 12  ;;  %3205 = vst [vmem:[#allocation1 + $0x1c0] sm:$0xff] %v10999_v17  ;;  %v11981_v32 = vld [vmem:[%s14549_s0 + $0xc0] sm:$0xff]   ;;  %3269 = vst [vmem:[#allocation1 + $0x1a0] sm:$0xff] %v11007_v26 }
 0x111   :  { %v11966_v35 = vld [vmem:[%s14549_s0 + $0x1f8] sm:$0xff]   ;;  %v11968_v44 = vld [vmem:[%s14549_s0 + $0x1e8] sm:$0xff]  }
 0x112   :  { %v10859_v36 = vunpack.c.l.bf16 %v11966_v35  ;;  %v6154_v42 = vld [vmem:[#allocation1 + $0x70b] ss:$16 sm:%s6153_s14]   ;;  %v10867_v45 = vunpack.c.l.bf16 %v11968_v44  ;;  %v11982_v35 = vld [vmem:[%s14549_s0 + $0x3f0] sm:$0xff]   ;;  %v11984_v44 = vld [vmem:[%s14549_s0 + $0x3e0] sm:$0xff]   ;;  %s6255_s14 = smov 192 }
 0x113   :  { %v6159_v43 = vld [vmem:[#allocation1 + $0x70b] ss:$16 sm:%s6158_s18]   ;;  %v6156_v49 = vsel %vm4102_vm0, %v6154_v42, %v6151_v34  ;;  %v11015_v34 = vunpack.c.l.bf16 %v11981_v32  ;;  %s6265_s18 = smov 3  ;;  %v11996_v32 = vld [vmem:[%s14549_s0 + $0x2c0] sm:$0xff]  }
 0x114   :  { %v6164_v50 = vld [vmem:[#allocation1 + $0x70b] ss:$16 sm:%s6163_s12]   ;;  %2085 = vst [vmem:[#allocation1 + $0x3f0] sm:$0xff] %v10859_v36  ;;  %v6161_v56 = vsel %vm4106_vm1, %v6159_v43, %v6156_v49  ;;  %2149 = vst [vmem:[#allocation1 + $0x3d0] sm:$0xff] %v10867_v45  ;;  %v10607_v36 = vunpack.c.l.bf16 %v11982_v35  ;;  %v10615_v45 = vunpack.c.l.bf16 %v11984_v44  ;;  %s6268_s12 = smov 12 }
 0x115   :  { %v6174_v51 = vld [vmem:[#allocation1 + $0x18b] ss:$16 sm:%s6173_s7]   ;;  %v6166_v3 = vsel %vm4110_vm2, %v6164_v50, %v6161_v56  ;;  %3333 = vst [vmem:[#allocation1 + $0x180] sm:$0xff] %v11015_v34  ;;  %s6273_s7 = smov 48  ;;  %v10759_v34 = vunpack.c.l.bf16 %v11996_v32 }
 0x116   :  { %v11970_v53 = vld [vmem:[%s14549_s0 + $0x1d8] sm:$0xff]   ;;  %v11972_v59 = vld [vmem:[%s14549_s0 + $0x1c8] sm:$0xff]   ;;  %v11487_v12 = vpack.i.bf16 %v6166_v3, %v13282_v48  ;;  %69 = vst [vmem:[#allocation1 + $0x7e0] sm:$0xff] %v10607_v36  ;;  %133 = vst [vmem:[#allocation1 + $0x7c0] sm:$0xff] %v10615_v45 }
 0x117   :  { %v10875_v54 = vunpack.c.l.bf16 %v11970_v53  ;;  %v6177_v57 = vld [vmem:[#allocation1 + $0x18b] ss:$16 sm:%s6176_s6]   ;;  %v10883_v60 = vunpack.c.l.bf16 %v11972_v59  ;;  %v11986_v53 = vld [vmem:[%s14549_s0 + $0x3d0] sm:$0xff]   ;;  %v6266_v59 = vld [vmem:[#allocation1 + $0xa] ss:$16 sm:%s6265_s18]   ;;  %s6278_s6 = smov 192 }
 0x118   :  { %v6182_v58 = vld [vmem:[#allocation1 + $0x18b] ss:$16 sm:%s6181_s5]   ;;  %v6179_v4 = vsel %vm4102_vm0, %v6177_v57, %v6174_v51  ;;  %11488 = vrot.lane.b32.xlu1 %v11487_v12, %s12002_s16  ;;  %1285 = vst [vmem:[#allocation1 + $0x580] sm:$0xff] %v10759_v34  ;;  %s6364_s5 = smov 48  ;;  %s6461_s18 = smov 192 }
 0x119   :  { %v11974_v1 = vld [vmem:[%s14549_s0 + $0xf8] sm:$0xff]   ;;  %2213 = vst [vmem:[#allocation1 + $0x3b0] sm:$0xff] %v10875_v54  ;;  %v11976_v10 = vld [vmem:[%s14549_s0 + $0xe8] sm:$0xff]   ;;  %v6184_v13 = vsel %vm4106_vm1, %v6182_v58, %v6179_v4  ;;  %2277 = vst [vmem:[#allocation1 + $0x390] sm:$0xff] %v10883_v60  ;;  %v10623_v54 = vunpack.c.l.bf16 %v11986_v53  ;;  %v13357_v60 = vpop.permute.xlu0 %11333 }
 0x11a   :  { %v10987_v2 = vunpack.c.l.bf16 %v11974_v1  ;;  %v6187_v5 = vld [vmem:[#allocation1 + $0x18b] ss:$16 sm:%s6186_s27]   ;;  %v10995_v11 = vunpack.c.l.bf16 %v11976_v10  ;;  %v6269_v4 = vld [vmem:[#allocation1 + $0xa] ss:$16 sm:%s6268_s12]   ;;  %s6392_s27 = smov 192  ;;  %s6497_s12 = smov 12 }
 0x11b   :  { %v6197_v6 = vld [vmem:[#allocation1 + $0x38b] ss:$16 sm:%s6196_s24]   ;;  %v13319_v20 = vsel %vm4110_vm2, %v6187_v5, %v6184_v13  ;;  %v6274_v5 = vld [vmem:[#allocation1 + $0xa] ss:$16 sm:%s6273_s7]   ;;  %197 = vst [vmem:[#allocation1 + $0x7a0] sm:$0xff] %v10623_v54  ;;  %v6271_v10 = vsel %vm4102_vm0, %v6269_v4, %v6266_v59  ;;  %s6336_s7 = smov 12 }
 0x11c   :  { %v6200_v14 = vld [vmem:[#allocation1 + $0x38b] ss:$16 sm:%s6199_s30]   ;;  %3109 = vst [vmem:[#allocation1 + $0x1f0] sm:$0xff] %v10987_v2  ;;  %3173 = vst [vmem:[#allocation1 + $0x1d0] sm:$0xff] %v10995_v11  ;;  %v6279_v11 = vld [vmem:[#allocation1 + $0xa] ss:$16 sm:%s6278_s6]  }
 0x11d   :  { %v6205_v15 = vld [vmem:[#allocation1 + $0x38b] ss:$16 sm:%s6204_s29]   ;;  %v6202_v21 = vsel %vm4102_vm0, %v6200_v14, %v6197_v6  ;;  %v11990_v6 = vld [vmem:[%s14549_s0 + $0x2f0] sm:$0xff]   ;;  %v11992_v14 = vld [vmem:[%s14549_s0 + $0x2e0] sm:$0xff]   ;;  %s6310_s29 = smov 3  ;;  %s12003_s6 = smov 80  }
 0x11e   :  { %v11978_v18 = vld [vmem:[%s14549_s0 + $0xd8] sm:$0xff]   ;;  %v11980_v27 = vld [vmem:[%s14549_s0 + $0xc8] sm:$0xff]   ;;  %v6207_v29 = vsel %vm4106_vm1, %v6205_v15, %v6202_v21  ;;  %v10735_v8 = vunpack.c.l.bf16 %v11990_v6  ;;  %v10743_v15 = vunpack.c.l.bf16 %v11992_v14  ;;  %s6402_s24 = smov 3  ;;  %s6438_s30 = smov 192 }
 0x11f   :  { %v11003_v19 = vunpack.c.l.bf16 %v11978_v18  ;;  %v6210_v22 = vld [vmem:[#allocation1 + $0x38b] ss:$16 sm:%s6209_s11]   ;;  %v11011_v28 = vunpack.c.l.bf16 %v11980_v27  ;;  %v6276_v18 = vsel %vm4106_vm1, %v6274_v5, %v6271_v10  ;;  %v6311_v36 = vld [vmem:[#allocation1 + $0x40a] ss:$16 sm:%s6310_s29]   ;;  %s6448_s29 = smov 3  ;;  %s6474_s11 = smov 12 }
 0x120   :  { %v6220_v23 = vld [vmem:[#allocation1 + $0x58b] ss:$16 sm:%s6219_s8]   ;;  %v6212_v39 = vsel %vm4110_vm2, %v6210_v22, %v6207_v29  ;;  %1093 = vst [vmem:[#allocation1 + $0x5e0] sm:$0xff] %v10735_v8  ;;  %v6281_v26 = vsel %vm4110_vm2, %v6279_v11, %v6276_v18  ;;  %v6301_v29 = vld [vmem:[#allocation1 + $0x20a] ss:$16 sm:%s6300_s1]   ;;  %1157 = vst [vmem:[#allocation1 + $0x5c0] sm:$0xff] %v10743_v15 }
 0x121   :  { %v6223_v30 = vld [vmem:[#allocation1 + $0x58b] ss:$16 sm:%s6222_s15]   ;;  %3237 = vst [vmem:[#allocation1 + $0x1b0] sm:$0xff] %v11003_v19  ;;  %3301 = vst [vmem:[#allocation1 + $0x190] sm:$0xff] %v11011_v28  ;;  %v11492_v48 = vpack.i.bf16 %v6212_v39, %v13319_v20  ;;  %v6296_v28 = vld [vmem:[#allocation1 + $0x20a] ss:$16 sm:%s6295_s2]  }
 0x122   :  { %v6228_v31 = vld [vmem:[#allocation1 + $0x58b] ss:$16 sm:%s6227_s13]   ;;  %v6225_v41 = vsel %vm4102_vm0, %v6223_v30, %v6220_v23  ;;  %v11994_v23 = vld [vmem:[%s14549_s0 + $0x2d0] sm:$0xff]   ;;  %s6323_s8 = smov 192  ;;  %s6346_s15 = smov 192 }
 0x123   :  { %v11983_v37 = vld [vmem:[%s14549_s0 + $0x3e8] sm:$0xff]   ;;  %v11985_v46 = vld [vmem:[%s14549_s0 + $0x3d8] sm:$0xff]   ;;  %v6230_v49 = vsel %vm4106_vm1, %v6228_v31, %v6225_v41  ;;  %11493 = vrot.lane.b32.xlu0 %v11492_v48, %s12002_s16  ;;  %v10751_v25 = vunpack.c.l.bf16 %v11994_v23  ;;  %s6356_s13 = smov 3  ;;  %s6410_s2 = smov 48 }
 0x124   :  { %v10611_v38 = vunpack.c.l.bf16 %v11983_v37  ;;  %v6233_v42 = vld [vmem:[#allocation1 + $0x58b] ss:$16 sm:%s6232_s21]   ;;  %v10619_v47 = vunpack.c.l.bf16 %v11985_v46  ;;  %s6287_s21 = smov 3  ;;  %v6314_v37 = vld [vmem:[#allocation1 + $0x40a] ss:$16 sm:%s6313_s10]   ;;  %s6415_s1 = smov 192 }
 0x125   :  { %v6243_v43 = vld [vmem:[#allocation1 + $0x78b] ss:$16 sm:%s6242_s23]   ;;  %v6235_v56 = vsel %vm4110_vm2, %v6233_v42, %v6230_v49  ;;  %s6290_s23 = smov 12  ;;  %v6288_v19 = vld [vmem:[#allocation1 + $0x20a] ss:$16 sm:%s6287_s21]   ;;  %1221 = vst [vmem:[#allocation1 + $0x5a0] sm:$0xff] %v10751_v25  ;;  %v6316_v42 = vsel %vm4102_vm0, %v6314_v37, %v6311_v36 }
 0x126   :  { %v6246_v50 = vld [vmem:[#allocation1 + $0x78b] ss:$16 sm:%s6245_s22]   ;;  %101 = vst [vmem:[#allocation1 + $0x7d0] sm:$0xff] %v10611_v38  ;;  %165 = vst [vmem:[#allocation1 + $0x7b0] sm:$0xff] %v10619_v47  ;;  %v6291_v20 = vld [vmem:[#allocation1 + $0x20a] ss:$16 sm:%s6290_s23]  }
 0x127   :  { %v6251_v51 = vld [vmem:[#allocation1 + $0x78b] ss:$16 sm:%s6250_s17]   ;;  %v6248_v57 = vsel %vm4102_vm0, %v6246_v50, %v6243_v43  ;;  %v6293_v27 = vsel %vm4102_vm0, %v6291_v20, %v6288_v19  ;;  %v6324_v44 = vld [vmem:[#allocation1 + $0x40a] ss:$16 sm:%s6323_s8]   ;;  %s6379_s21 = smov 3  ;;  %s6382_s23 = smov 12  ;;  %v13417_v20 = vpop.permute.xlu0 %11343 }
 0x128   :  { %v11987_v40 = vld [vmem:[%s14549_s0 + $0x3c8] sm:$0xff]   ;;  %v11989_v1 = vld [vmem:[%s14549_s0 + $0x2f8] sm:$0xff]   ;;  %v6253_v3 = vsel %vm4106_vm1, %v6251_v51, %v6248_v57  ;;  %v6298_v35 = vsel %vm4106_vm1, %v6296_v28, %v6293_v27  ;;  %s6425_s22 = smov 3  ;;  %s6428_s17 = smov 12 }
 0x129   :  { %v10627_v55 = vunpack.c.l.bf16 %v11987_v40  ;;  %v6256_v58 = vld [vmem:[#allocation1 + $0x78b] ss:$16 sm:%s6255_s14]   ;;  %v10731_v2 = vunpack.c.l.bf16 %v11989_v1  ;;  %v6303_v41 = vsel %vm4110_vm2, %v6301_v29, %v6298_v35  ;;  %v6337_v48 = vld [vmem:[#allocation1 + $0x60a] ss:$16 sm:%s6336_s7]   ;;  %s6451_s10 = smov 12  ;;  %s6456_s14 = smov 48 }
 0x12a   :  { %v6258_v9 = vsel %vm4110_vm2, %v6256_v58, %v6253_v3  ;;  %v11991_v12 = vld [vmem:[%s14549_s0 + $0x2e8] sm:$0xff]   ;;  %v11993_v21 = vld [vmem:[%s14549_s0 + $0x2d8] sm:$0xff]   ;;  %v11502_v45 = vpack.i.bf16 %v6303_v41, %v6281_v26  ;;  %s6484_s8 = smov 192  ;;  %s6507_s7 = smov 192 }
 0x12b   :  { %229 = vst [vmem:[#allocation1 + $0x790] sm:$0xff] %v10627_v55  ;;  %1061 = vst [vmem:[#allocation1 + $0x5f0] sm:$0xff] %v10731_v2  ;;  %v10739_v13 = vunpack.c.l.bf16 %v11991_v12  ;;  %v11497_v17 = vpack.i.bf16 %v6258_v9, %v6235_v56  ;;  %v10747_v22 = vunpack.c.l.bf16 %v11993_v21  ;;  %v11995_v30 = vld [vmem:[%s14549_s0 + $0x2c8] sm:$0xff]   ;;  %v11997_v38 = vld [vmem:[%s14549_s0 + $0x3f8] sm:$0xff]   ;;  %s6333_s0 = smov 3  ;;  %v13419_v21 = vpop.permute.xlu1 %11348 }
 0x12c   :  { %v10755_v31 = vunpack.c.l.bf16 %v11995_v30  ;;  %v10603_v39 = vunpack.c.l.bf16 %v11997_v38  ;;  %v6334_v47 = vld [vmem:[#allocation1 + $0x60a] ss:$16 sm:%s6333_s0]   ;;  %11503 = vrot.lane.b32.xlu0 %v11502_v45, %s12003_s6  ;;  %s6502_s0 = smov 48 }
 0x12d   :  { %1125 = vst [vmem:[#allocation1 + $0x5d0] sm:$0xff] %v10739_v13  ;;  %11498 = vrot.lane.b32.xlu1 %v11497_v17, %s12002_s16  ;;  %s6318_s16 = smov 48  ;;  %1189 = vst [vmem:[#allocation1 + $0x5b0] sm:$0xff] %v10747_v22  ;;  %v6339_v50 = vsel %vm4102_vm0, %v6337_v48, %v6334_v47  ;;  %v6342_v51 = vld [vmem:[#allocation1 + $0x60a] ss:$16 sm:%s6341_s26]   ;;  %s6517_s26 = smov 3 }
 0x12e   :  { %v6319_v43 = vld [vmem:[#allocation1 + $0x40a] ss:$16 sm:%s6318_s16]   ;;  %1253 = vst [vmem:[#allocation1 + $0x590] sm:$0xff] %v10755_v31  ;;  %37 = vst [vmem:[#allocation1 + $0x7f0] sm:$0xff] %v10603_v39  ;;  %v6344_v54 = vsel %vm4106_vm1, %v6342_v51, %v6339_v50  ;;  %s6479_s16 = smov 48 }
 0x12f   :  { %v6321_v46 = vsel %vm4106_vm1, %v6319_v43, %v6316_v42  ;;  %v6347_v53 = vld [vmem:[#allocation1 + $0x60a] ss:$16 sm:%s6346_s15]   ;;  %s6520_s15 = smov 12 }
 0x130   :  { %v6326_v49 = vsel %vm4110_vm2, %v6324_v44, %v6321_v46  ;;  %v6357_v40 = vld [vmem:[#allocation1 + $0x8a] ss:$16 sm:%s6356_s13]   ;;  %v6349_v56 = vsel %vm4110_vm2, %v6347_v53, %v6344_v54  ;;  %s6525_s13 = smov 48 }
 0x131   :  { %v6360_v55 = vld [vmem:[#allocation1 + $0x8a] ss:$16 sm:%s6359_s4]   ;;  %v11507_v62 = vpack.i.bf16 %v6349_v56, %v6326_v49  ;;  %s6530_s4 = smov 192  ;;  %v13437_v56 = vpop.permute.xlu1 %11358 }
 0x132   :  { %v6362_v57 = vsel %vm4102_vm0, %v6360_v55, %v6357_v40  ;;  %v6365_v58 = vld [vmem:[#allocation1 + $0x8a] ss:$16 sm:%s6364_s5]   ;;  %v13435_v55 = vpop.permute.xlu0 %11353  ;;  %s6540_s5 = smov 3 }
 0x133   :  { %v6370_v59 = vld [vmem:[#allocation1 + $0x8a] ss:$16 sm:%s6369_s20]   ;;  %v6367_v0 = vsel %vm4106_vm1, %v6365_v58, %v6362_v57  ;;  %11508 = vrot.lane.b32.xlu1 %v11507_v62, %s12003_s6  ;;  %s6543_s20 = smov 12 }
 0x134   :  { %v6380_v1 = vld [vmem:[#allocation1 + $0x28a] ss:$16 sm:%s6379_s21]   ;;  %v6372_v3 = vsel %vm4110_vm2, %v6370_v59, %v6367_v0  ;;  %s6548_s21 = smov 48 }
 0x135   :  { %v6383_v2 = vld [vmem:[#allocation1 + $0x28a] ss:$16 sm:%s6382_s23]   ;;  %s6553_s23 = smov 192 }
 0x136   :  { %v6385_v4 = vsel %vm4102_vm0, %v6383_v2, %v6380_v1  ;;  %v6388_v5 = vld [vmem:[#allocation1 + $0x28a] ss:$16 sm:%s6387_s19]   ;;  %s6563_s19 = smov 3 }
 0x137   :  { %v6393_v6 = vld [vmem:[#allocation1 + $0x28a] ss:$16 sm:%s6392_s27]   ;;  %v6390_v8 = vsel %vm4106_vm1, %v6388_v5, %v6385_v4  ;;  %s6566_s27 = smov 12 }
 0x138   :  { %v6403_v9 = vld [vmem:[#allocation1 + $0x48a] ss:$16 sm:%s6402_s24]   ;;  %v6395_v11 = vsel %vm4110_vm2, %v6393_v6, %v6390_v8  ;;  %s6571_s24 = smov 48 }
 0x139   :  { %v6406_v10 = vld [vmem:[#allocation1 + $0x48a] ss:$16 sm:%s6405_s25]   ;;  %v11512_v15 = vpack.i.bf16 %v6395_v11, %v6372_v3  ;;  %s6576_s25 = smov 192 }
 0x13a   :  { %v6408_v12 = vsel %vm4102_vm0, %v6406_v10, %v6403_v9  ;;  %v6411_v13 = vld [vmem:[#allocation1 + $0x48a] ss:$16 sm:%s6410_s2]   ;;  %s6586_s2 = smov 3 }
 0x13b   :  { %v6416_v14 = vld [vmem:[#allocation1 + $0x48a] ss:$16 sm:%s6415_s1]   ;;  %v6413_v17 = vsel %vm4106_vm1, %v6411_v13, %v6408_v12  ;;  %11513 = vrot.lane.b32.xlu0 %v11512_v15, %s12003_s6  ;;  %s6589_s1 = smov 12 }
 0x13c   :  { %v6426_v18 = vld [vmem:[#allocation1 + $0x68a] ss:$16 sm:%s6425_s22]   ;;  %v6418_v22 = vsel %vm4110_vm2, %v6416_v14, %v6413_v17  ;;  %s6594_s22 = smov 48 }
 0x13d   :  { %v6429_v19 = vld [vmem:[#allocation1 + $0x68a] ss:$16 sm:%s6428_s17]   ;;  %s6599_s17 = smov 192 }
 0x13e   :  { %v6431_v23 = vsel %vm4102_vm0, %v6429_v19, %v6426_v18  ;;  %v6434_v25 = vld [vmem:[#allocation1 + $0x68a] ss:$16 sm:%s6433_s3]   ;;  %s6609_s3 = smov 3 }
 0x13f   :  { %v6439_v26 = vld [vmem:[#allocation1 + $0x68a] ss:$16 sm:%s6438_s30]   ;;  %v6436_v27 = vsel %vm4106_vm1, %v6434_v25, %v6431_v23  ;;  %s6612_s30 = smov 12 }
 0x140   :  { %v6449_v28 = vld [vmem:[#allocation1 + $0x10a] ss:$16 sm:%s6448_s29]   ;;  %v6441_v30 = vsel %vm4110_vm2, %v6439_v26, %v6436_v27  ;;  %s6617_s29 = smov 48 }
 0x141   :  { %v6452_v29 = vld [vmem:[#allocation1 + $0x10a] ss:$16 sm:%s6451_s10]   ;;  %v11517_v35 = vpack.i.bf16 %v6441_v30, %v6418_v22  ;;  %s6622_s10 = smov 192 }
 0x142   :  { %v6454_v31 = vsel %vm4102_vm0, %v6452_v29, %v6449_v28  ;;  %v6457_v32 = vld [vmem:[#allocation1 + $0x10a] ss:$16 sm:%s6456_s14]   ;;  %s6632_s14 = smov 3 }
 0x143   :  { %v6462_v34 = vld [vmem:[#allocation1 + $0x10a] ss:$16 sm:%s6461_s18]   ;;  %v6459_v36 = vsel %vm4106_vm1, %v6457_v32, %v6454_v31  ;;  %11518 = vrot.lane.b32.xlu1 %v11517_v35, %s12003_s6  ;;  %v13453_v31 = vpop.permute.xlu0 %11363  ;;  %v13455_v32 = vpop.permute.xlu1 %11368  ;;  %s6635_s18 = smov 12 }
 0x144   :  { %v6472_v37 = vld [vmem:[#allocation1 + $0x30a] ss:$16 sm:%s6471_s28]   ;;  %v6464_v39 = vsel %vm4110_vm2, %v6462_v34, %v6459_v36  ;;  %s6640_s28 = smov 48 }
 0x145   :  { %v6475_v38 = vld [vmem:[#allocation1 + $0x30a] ss:$16 sm:%s6474_s11]   ;;  %s6645_s11 = smov 192 }
 0x146   :  { %v6477_v41 = vsel %vm4102_vm0, %v6475_v38, %v6472_v37  ;;  %v6480_v42 = vld [vmem:[#allocation1 + $0x30a] ss:$16 sm:%s6479_s16]   ;;  %s6654_s16 = smov 3 }
 0x147   :  { %v6485_v43 = vld [vmem:[#allocation1 + $0x30a] ss:$16 sm:%s6484_s8]   ;;  %v6482_v44 = vsel %vm4106_vm1, %v6480_v42, %v6477_v41  ;;  %v6636_v41 = vld [vmem:[#allocation1 + $0x9] ss:$16 sm:%s6635_s18]   ;;  %s6657_s8 = smov 12  ;;  %s6805_s18 = smov 192 }
 0x148   :  { %v6495_v45 = vld [vmem:[#allocation1 + $0x50a] ss:$16 sm:%s6494_s9]   ;;  %v6487_v47 = vsel %vm4110_vm2, %v6485_v43, %v6482_v44  ;;  %v6641_v44 = vld [vmem:[#allocation1 + $0x9] ss:$16 sm:%s6640_s28]   ;;  %s6662_s9 = smov 48  ;;  %s6815_s28 = smov 3 }
 0x149   :  { %v6498_v46 = vld [vmem:[#allocation1 + $0x50a] ss:$16 sm:%s6497_s12]   ;;  %v11522_v51 = vpack.i.bf16 %v6487_v47, %v6464_v39  ;;  %v6633_v39 = vld [vmem:[#allocation1 + $0x9] ss:$16 sm:%s6632_s14]   ;;  %s6667_s12 = smov 192  ;;  %s6800_s14 = smov 48 }
 0x14a   :  { %v6500_v48 = vsel %vm4102_vm0, %v6498_v46, %v6495_v45  ;;  %v6503_v49 = vld [vmem:[#allocation1 + $0x50a] ss:$16 sm:%s6502_s0]   ;;  %v6638_v43 = vsel %vm4102_vm0, %v6636_v41, %v6633_v39  ;;  %v6646_v45 = vld [vmem:[#allocation1 + $0x9] ss:$16 sm:%s6645_s11]   ;;  %s6677_s0 = smov 3  ;;  %s6818_s11 = smov 12 }
 0x14b   :  { %v6508_v50 = vld [vmem:[#allocation1 + $0x50a] ss:$16 sm:%s6507_s7]   ;;  %v6505_v53 = vsel %vm4106_vm1, %v6503_v49, %v6500_v48  ;;  %11523 = vrot.lane.b32.xlu0 %v11522_v51, %s12003_s6  ;;  %v6643_v47 = vsel %vm4106_vm1, %v6641_v44, %v6638_v43  ;;  %v6655_v48 = vld [vmem:[#allocation1 + $0x209] ss:$16 sm:%s6654_s16]   ;;  %s6685_s7 = smov 48  ;;  %s6823_s16 = smov 48 }
 0x14c   :  { %v6518_v54 = vld [vmem:[#allocation1 + $0x70a] ss:$16 sm:%s6517_s26]   ;;  %v6510_v57 = vsel %vm4110_vm2, %v6508_v50, %v6505_v53  ;;  %v6658_v49 = vld [vmem:[#allocation1 + $0x209] ss:$16 sm:%s6657_s8]   ;;  %v6648_v51 = vsel %vm4110_vm2, %v6646_v45, %v6643_v47  ;;  %s6690_s26 = smov 192  ;;  %s6828_s8 = smov 192 }
 0x14d   :  { %v6521_v40 = vld [vmem:[#allocation1 + $0x70a] ss:$16 sm:%s6520_s15]   ;;  %v6663_v50 = vld [vmem:[#allocation1 + $0x209] ss:$16 sm:%s6662_s9]   ;;  %v6660_v53 = vsel %vm4102_vm0, %v6658_v49, %v6655_v48  ;;  %s6700_s15 = smov 3  ;;  %s6838_s9 = smov 3 }
 0x14e   :  { %v6523_v58 = vsel %vm4102_vm0, %v6521_v40, %v6518_v54  ;;  %v6526_v59 = vld [vmem:[#allocation1 + $0x70a] ss:$16 sm:%s6525_s13]   ;;  %v6668_v54 = vld [vmem:[#allocation1 + $0x209] ss:$16 sm:%s6667_s12]   ;;  %s6703_s13 = smov 12  ;;  %s6841_s12 = smov 12 }
 0x14f   :  { %v6531_v62 = vld [vmem:[#allocation1 + $0x70a] ss:$16 sm:%s6530_s4]   ;;  %v6528_v0 = vsel %vm4106_vm1, %v6526_v59, %v6523_v58  ;;  %v6678_v40 = vld [vmem:[#allocation1 + $0x409] ss:$16 sm:%s6677_s0]   ;;  %s6708_s4 = smov 48  ;;  %s6846_s0 = smov 48 }
 0x150   :  { %v6541_v1 = vld [vmem:[#allocation1 + $0x18a] ss:$16 sm:%s6540_s5]   ;;  %v6533_v3 = vsel %vm4110_vm2, %v6531_v62, %v6528_v0  ;;  %v6686_v59 = vld [vmem:[#allocation1 + $0x409] ss:$16 sm:%s6685_s7]   ;;  %s6713_s5 = smov 192  ;;  %s6861_s7 = smov 3 }
 0x151   :  { %v6544_v2 = vld [vmem:[#allocation1 + $0x18a] ss:$16 sm:%s6543_s20]   ;;  %v11527_v8 = vpack.i.bf16 %v6533_v3, %v6510_v57  ;;  %v6665_v57 = vsel %vm4106_vm1, %v6663_v50, %v6660_v53  ;;  %v13470_v3 = vpop.permute.xlu0 %11373  ;;  %s6723_s20 = smov 3  ;;  %v6801_v49 = vld [vmem:[#allocation1 + $0x689] ss:$16 sm:%s6800_s14]   ;;  %s6976_s14 = smov 3 }
 0x152   :  { %v6546_v4 = vsel %vm4102_vm0, %v6544_v2, %v6541_v1  ;;  %v6549_v5 = vld [vmem:[#allocation1 + $0x18a] ss:$16 sm:%s6548_s21]   ;;  %v6670_v62 = vsel %vm4110_vm2, %v6668_v54, %v6665_v57  ;;  %v6691_v1 = vld [vmem:[#allocation1 + $0x409] ss:$16 sm:%s6690_s26]   ;;  %s6726_s21 = smov 12  ;;  %s6864_s26 = smov 12 }
 0x153   :  { %v6554_v6 = vld [vmem:[#allocation1 + $0x18a] ss:$16 sm:%s6553_s23]   ;;  %v6551_v9 = vsel %vm4106_vm1, %v6549_v5, %v6546_v4  ;;  %11528 = vrot.lane.b32.xlu1 %v11527_v8, %s12003_s6  ;;  %v6701_v2 = vld [vmem:[#allocation1 + $0x609] ss:$16 sm:%s6700_s15]   ;;  %v13472_v4 = vpop.permute.xlu1 %11378  ;;  %v11542_v5 = vpack.i.bf16 %v6670_v62, %v6648_v51  ;;  %s6731_s23 = smov 48  ;;  %s6869_s15 = smov 48 }
 0x154   :  { %v6564_v10 = vld [vmem:[#allocation1 + $0x38a] ss:$16 sm:%s6563_s19]   ;;  %v6556_v12 = vsel %vm4110_vm2, %v6554_v6, %v6551_v9  ;;  %v6704_v8 = vld [vmem:[#allocation1 + $0x609] ss:$16 sm:%s6703_s13]   ;;  %s12004_s19 = smov 72   ;;  %s6874_s13 = smov 192 }
 0x155   :  { %v6567_v11 = vld [vmem:[#allocation1 + $0x38a] ss:$16 sm:%s6566_s27]   ;;  %v6709_v9 = vld [vmem:[#allocation1 + $0x609] ss:$16 sm:%s6708_s4]   ;;  %s6736_s27 = smov 192  ;;  %v13488_v44 = vpop.permute.xlu0 %11383  ;;  %s6884_s4 = smov 3 }
 0x156   :  { %v6569_v13 = vsel %vm4102_vm0, %v6567_v11, %v6564_v10  ;;  %v6572_v14 = vld [vmem:[#allocation1 + $0x38a] ss:$16 sm:%s6571_s24]   ;;  %v6706_v11 = vsel %vm4102_vm0, %v6704_v8, %v6701_v2  ;;  %s6746_s24 = smov 3  ;;  %v6806_v53 = vld [vmem:[#allocation1 + $0x689] ss:$16 sm:%s6805_s18]   ;;  %s6979_s18 = smov 12 }
 0x157   :  { %v6577_v15 = vld [vmem:[#allocation1 + $0x38a] ss:$16 sm:%s6576_s25]   ;;  %v6574_v17 = vsel %vm4106_vm1, %v6572_v14, %v6569_v13  ;;  %v6724_v13 = vld [vmem:[#allocation1 + $0x89] ss:$16 sm:%s6723_s20]   ;;  %v6711_v14 = vsel %vm4106_vm1, %v6709_v9, %v6706_v11  ;;  %s6749_s25 = smov 12  ;;  %v13490_v45 = vpop.permute.xlu1 %11388  ;;  %s6892_s20 = smov 48 }
 0x158   :  { %v6587_v18 = vld [vmem:[#allocation1 + $0x58a] ss:$16 sm:%s6586_s2]   ;;  %v6579_v22 = vsel %vm4110_vm2, %v6577_v15, %v6574_v17  ;;  %v6727_v15 = vld [vmem:[#allocation1 + $0x89] ss:$16 sm:%s6726_s21]   ;;  %s6754_s2 = smov 48  ;;  %s6897_s21 = smov 192 }
 0x159   :  { %v6590_v19 = vld [vmem:[#allocation1 + $0x58a] ss:$16 sm:%s6589_s1]   ;;  %v11532_v27 = vpack.i.bf16 %v6579_v22, %v6556_v12  ;;  %v6714_v12 = vld [vmem:[#allocation1 + $0x609] ss:$16 sm:%s6713_s5]   ;;  %s6759_s1 = smov 192  ;;  %s6887_s5 = smov 12 }
 0x15a   :  { %v6592_v23 = vsel %vm4102_vm0, %v6590_v19, %v6587_v18  ;;  %v6595_v25 = vld [vmem:[#allocation1 + $0x58a] ss:$16 sm:%s6594_s22]   ;;  %v6732_v17 = vld [vmem:[#allocation1 + $0x89] ss:$16 sm:%s6731_s23]   ;;  %v6716_v18 = vsel %vm4110_vm2, %v6714_v12, %v6711_v14  ;;  %v6729_v19 = vsel %vm4102_vm0, %v6727_v15, %v6724_v13  ;;  %s6769_s22 = smov 3  ;;  %s6907_s23 = smov 3 }
 0x15b   :  { %v6600_v26 = vld [vmem:[#allocation1 + $0x58a] ss:$16 sm:%s6599_s17]   ;;  %v6597_v28 = vsel %vm4106_vm1, %v6595_v25, %v6592_v23  ;;  %11533 = vrot.lane.b32.xlu0 %v11532_v27, %s12003_s6  ;;  %v6737_v22 = vld [vmem:[#allocation1 + $0x89] ss:$16 sm:%s6736_s27]   ;;  %s6772_s17 = smov 12  ;;  %s6910_s27 = smov 12 }
 0x15c   :  { %v6610_v29 = vld [vmem:[#allocation1 + $0x78a] ss:$16 sm:%s6609_s3]   ;;  %v6602_v34 = vsel %vm4110_vm2, %v6600_v26, %v6597_v28  ;;  %v6747_v23 = vld [vmem:[#allocation1 + $0x289] ss:$16 sm:%s6746_s24]   ;;  %v6734_v26 = vsel %vm4106_vm1, %v6732_v17, %v6729_v19  ;;  %s6777_s3 = smov 48  ;;  %s6915_s24 = smov 48 }
 0x15d   :  { %v6613_v30 = vld [vmem:[#allocation1 + $0x78a] ss:$16 sm:%s6612_s30]   ;;  %v6750_v27 = vld [vmem:[#allocation1 + $0x289] ss:$16 sm:%s6749_s25]   ;;  %s6782_s30 = smov 192  ;;  %s6920_s25 = smov 192 }
 0x15e   :  { %v6615_v35 = vsel %vm4102_vm0, %v6613_v30, %v6610_v29  ;;  %v6618_v36 = vld [vmem:[#allocation1 + $0x78a] ss:$16 sm:%s6617_s29]   ;;  %v6755_v28 = vld [vmem:[#allocation1 + $0x289] ss:$16 sm:%s6754_s2]   ;;  %v6739_v29 = vsel %vm4110_vm2, %v6737_v22, %v6734_v26  ;;  %v6752_v30 = vsel %vm4102_vm0, %v6750_v27, %v6747_v23  ;;  %s6792_s29 = smov 3  ;;  %v13506_v23 = vpop.permute.xlu0 %11393  ;;  %s6930_s2 = smov 3 }
 0x15f   :  { %v6623_v37 = vld [vmem:[#allocation1 + $0x78a] ss:$16 sm:%s6622_s10]   ;;  %v6620_v38 = vsel %vm4106_vm1, %v6618_v36, %v6615_v35  ;;  %11543 = vrot.lane.b32.xlu0 %v11542_v5, %s12004_s19  ;;  %v6770_v35 = vld [vmem:[#allocation1 + $0x489] ss:$16 sm:%s6769_s22]   ;;  %v6757_v36 = vsel %vm4106_vm1, %v6755_v28, %v6752_v30  ;;  %s6795_s10 = smov 12  ;;  %s6938_s22 = smov 48 }
 0x160   :  { %v6625_v42 = vsel %vm4110_vm2, %v6623_v37, %v6620_v38  ;;  %v6773_v37 = vld [vmem:[#allocation1 + $0x489] ss:$16 sm:%s6772_s17]   ;;  %s6943_s17 = smov 192 }
 0x161   :  { %v11537_v46 = vpack.i.bf16 %v6625_v42, %v6602_v34  ;;  %v6760_v34 = vld [vmem:[#allocation1 + $0x289] ss:$16 sm:%s6759_s1]   ;;  %v6775_v41 = vsel %vm4102_vm0, %v6773_v37, %v6770_v35  ;;  %s6933_s1 = smov 12 }
 0x162   :  { %v6778_v38 = vld [vmem:[#allocation1 + $0x489] ss:$16 sm:%s6777_s3]   ;;  %v6762_v39 = vsel %vm4110_vm2, %v6760_v34, %v6757_v36  ;;  %s6953_s3 = smov 3 }
 0x163   :  { %11538 = vrot.lane.b32.xlu1 %v11537_v46, %s12003_s6  ;;  %s6680_s6 = smov 12  ;;  %v6783_v42 = vld [vmem:[#allocation1 + $0x489] ss:$16 sm:%s6782_s30]   ;;  %v11552_v46 = vpack.i.bf16 %v6762_v39, %v6739_v29  ;;  %v6780_v47 = vsel %vm4106_vm1, %v6778_v38, %v6775_v41  ;;  %s6956_s30 = smov 12 }
 0x164   :  { %v6681_v58 = vld [vmem:[#allocation1 + $0x409] ss:$16 sm:%s6680_s6]   ;;  %v6785_v50 = vsel %vm4110_vm2, %v6783_v42, %v6780_v47  ;;  %s6851_s6 = smov 192 }
 0x165   :  { %v6683_v0 = vsel %vm4102_vm0, %v6681_v58, %v6678_v40  ;;  %v6793_v43 = vld [vmem:[#allocation1 + $0x689] ss:$16 sm:%s6792_s29]   ;;  %11553 = vrot.lane.b32.xlu0 %v11552_v46, %s12004_s19  ;;  %s6961_s29 = smov 48 }
 0x166   :  { %v6688_v6 = vsel %vm4106_vm1, %v6686_v59, %v6683_v0  ;;  %v6796_v48 = vld [vmem:[#allocation1 + $0x689] ss:$16 sm:%s6795_s10]   ;;  %s6966_s10 = smov 192 }
 0x167   :  { %v6693_v10 = vsel %vm4110_vm2, %v6691_v1, %v6688_v6  ;;  %v6798_v51 = vsel %vm4102_vm0, %v6796_v48, %v6793_v43  ;;  %v6816_v54 = vld [vmem:[#allocation1 + $0x109] ss:$16 sm:%s6815_s28]   ;;  %s6984_s28 = smov 48 }
 0x168   :  { %v11547_v25 = vpack.i.bf16 %v6716_v18, %v6693_v10  ;;  %v6803_v40 = vsel %vm4106_vm1, %v6801_v49, %v6798_v51  ;;  %v6819_v57 = vld [vmem:[#allocation1 + $0x109] ss:$16 sm:%s6818_s11]   ;;  %s6989_s11 = smov 192 }
 0x169   :  { %v6824_v58 = vld [vmem:[#allocation1 + $0x109] ss:$16 sm:%s6823_s16]   ;;  %v6808_v59 = vsel %vm4110_vm2, %v6806_v53, %v6803_v40  ;;  %v6821_v62 = vsel %vm4102_vm0, %v6819_v57, %v6816_v54  ;;  %s6999_s16 = smov 3 }
 0x16a   :  { %11548 = vrot.lane.b32.xlu1 %v11547_v25, %s12004_s19  ;;  %v6829_v0 = vld [vmem:[#allocation1 + $0x109] ss:$16 sm:%s6828_s8]   ;;  %v11557_v2 = vpack.i.bf16 %v6808_v59, %v6785_v50  ;;  %v6826_v5 = vsel %vm4106_vm1, %v6824_v58, %v6821_v62  ;;  %v13508_v25 = vpop.permute.xlu1 %11398  ;;  %s7002_s8 = smov 12 }
 0x16b   :  { %v6839_v1 = vld [vmem:[#allocation1 + $0x309] ss:$16 sm:%s6838_s9]   ;;  %v6831_v9 = vsel %vm4110_vm2, %v6829_v0, %v6826_v5  ;;  %v13524_v5 = vpop.permute.xlu0 %11403  ;;  %s7007_s9 = smov 48 }
 0x16c   :  { %v6842_v6 = vld [vmem:[#allocation1 + $0x309] ss:$16 sm:%s6841_s12]   ;;  %s7012_s12 = smov 192 }
 0x16d   :  { %v6847_v8 = vld [vmem:[#allocation1 + $0x309] ss:$16 sm:%s6846_s0]   ;;  %v6844_v10 = vsel %vm4102_vm0, %v6842_v6, %v6839_v1  ;;  %s7021_s0 = smov 3 }
 0x16e   :  { %v6852_v11 = vld [vmem:[#allocation1 + $0x309] ss:$16 sm:%s6851_s6]   ;;  %11558 = vrot.lane.b32.xlu1 %v11557_v2, %s12004_s19  ;;  %v6849_v13 = vsel %vm4106_vm1, %v6847_v8, %v6844_v10  ;;  %v13526_v6 = vpop.permute.xlu1 %11408  ;;  %s7024_s6 = smov 12 }
 0x16f   :  { %v6862_v12 = vld [vmem:[#allocation1 + $0x509] ss:$16 sm:%s6861_s7]   ;;  %v6854_v17 = vsel %vm4110_vm2, %v6852_v11, %v6849_v13  ;;  %s7029_s7 = smov 48 }
 0x170   :  { %v6865_v14 = vld [vmem:[#allocation1 + $0x509] ss:$16 sm:%s6864_s26]   ;;  %v11562_v26 = vpack.i.bf16 %v6854_v17, %v6831_v9  ;;  %s7034_s26 = smov 192 }
 0x171   :  { %v6870_v15 = vld [vmem:[#allocation1 + $0x509] ss:$16 sm:%s6869_s15]   ;;  %v6867_v18 = vsel %vm4102_vm0, %v6865_v14, %v6862_v12  ;;  %s7044_s15 = smov 3 }
 0x172   :  { %v6875_v19 = vld [vmem:[#allocation1 + $0x509] ss:$16 sm:%s6874_s13]   ;;  %v6872_v27 = vsel %vm4106_vm1, %v6870_v15, %v6867_v18  ;;  %11563 = vrot.lane.b32.xlu0 %v11562_v26, %s12004_s19  ;;  %v7000_v15 = vld [vmem:[#allocation1 + $0x8] ss:$16 sm:%s6999_s16]   ;;  %s7047_s13 = smov 12  ;;  %s4207_s16 = smov 48 }
 0x173   :  { %v6885_v22 = vld [vmem:[#allocation1 + $0x709] ss:$16 sm:%s6884_s4]   ;;  %v6877_v30 = vsel %vm4110_vm2, %v6875_v19, %v6872_v27  ;;  %v7003_v18 = vld [vmem:[#allocation1 + $0x8] ss:$16 sm:%s7002_s8]   ;;  %s7057_s4 = smov 192  ;;  %s4212_s8 = smov 192 }
 0x174   :  { %v6888_v28 = vld [vmem:[#allocation1 + $0x709] ss:$16 sm:%s6887_s5]   ;;  %v7008_v19 = vld [vmem:[#allocation1 + $0x8] ss:$16 sm:%s7007_s9]   ;;  %v7005_v26 = vsel %vm4102_vm0, %v7003_v18, %v7000_v15  ;;  %s7067_s5 = smov 3  ;;  %v11345_v18 = vunpack.i.l.bf16 %v13417_v20  ;;  %v11346_v20 = vunpack.i.h.bf16 %v13417_v20  ;;  %s7090_s9 = smov 3 }
 0x175   :  { %v6893_v29 = vld [vmem:[#allocation1 + $0x709] ss:$16 sm:%s6892_s20]   ;;  %v6890_v34 = vsel %vm4102_vm0, %v6888_v28, %v6885_v22  ;;  %v7013_v27 = vld [vmem:[#allocation1 + $0x8] ss:$16 sm:%s7012_s12]   ;;  %s7070_s20 = smov 12  ;;  %s7093_s12 = smov 12 }
 0x176   :  { %v6898_v35 = vld [vmem:[#allocation1 + $0x709] ss:$16 sm:%s6897_s21]   ;;  %v6895_v37 = vsel %vm4106_vm1, %v6893_v29, %v6890_v34  ;;  %v7010_v29 = vsel %vm4106_vm1, %v7008_v19, %v7005_v26  ;;  %v7025_v34 = vld [vmem:[#allocation1 + $0x208] ss:$16 sm:%s7024_s6]   ;;  %s7075_s21 = smov 48  ;;  %s7103_s6 = smov 192 }
 0x177   :  { %v6908_v36 = vld [vmem:[#allocation1 + $0x189] ss:$16 sm:%s6907_s23]   ;;  %v6900_v41 = vsel %vm4110_vm2, %v6898_v35, %v6895_v37  ;;  %v7015_v35 = vsel %vm4110_vm2, %v7013_v27, %v7010_v29  ;;  %v7030_v37 = vld [vmem:[#allocation1 + $0x208] ss:$16 sm:%s7029_s7]   ;;  %s7080_s23 = smov 192  ;;  %s7113_s7 = smov 3 }
 0x178   :  { %v6911_v38 = vld [vmem:[#allocation1 + $0x189] ss:$16 sm:%s6910_s27]   ;;  %v11567_v47 = vpack.i.bf16 %v6900_v41, %v6877_v30  ;;  %v7022_v30 = vld [vmem:[#allocation1 + $0x208] ss:$16 sm:%s7021_s0]   ;;  %s4098_s27 = smov 3  ;;  %s7098_s0 = smov 48 }
 0x179   :  { %v6916_v39 = vld [vmem:[#allocation1 + $0x189] ss:$16 sm:%s6915_s24]   ;;  %v6913_v42 = vsel %vm4102_vm0, %v6911_v38, %v6908_v36  ;;  %v7027_v36 = vsel %vm4102_vm0, %v7025_v34, %v7022_v30  ;;  %v7035_v38 = vld [vmem:[#allocation1 + $0x208] ss:$16 sm:%s7034_s26]   ;;  %s4100_s24 = smov 12  ;;  %s7116_s26 = smov 12 }
 0x17a   :  { %v6921_v43 = vld [vmem:[#allocation1 + $0x189] ss:$16 sm:%s6920_s25]   ;;  %v6918_v48 = vsel %vm4106_vm1, %v6916_v39, %v6913_v42  ;;  %11568 = vrot.lane.b32.xlu1 %v11567_v47, %s12004_s19  ;;  %v7032_v39 = vsel %vm4106_vm1, %v7030_v37, %v7027_v36  ;;  %v7045_v41 = vld [vmem:[#allocation1 + $0x408] ss:$16 sm:%s7044_s15]   ;;  %s12005_s25 = smov 64   ;;  %s7121_s15 = smov 48 }
 0x17b   :  { %v6931_v46 = vld [vmem:[#allocation1 + $0x389] ss:$16 sm:%s6930_s2]   ;;  %v6923_v51 = vsel %vm4110_vm2, %v6921_v43, %v6918_v48  ;;  %v7048_v42 = vld [vmem:[#allocation1 + $0x408] ss:$16 sm:%s7047_s13]   ;;  %v7037_v43 = vsel %vm4110_vm2, %v7035_v38, %v7032_v39  ;;  %s4104_s2 = smov 48  ;;  %v11315_v39 = vunpack.i.l.bf16 %v13001_v24  ;;  %v11316_v24 = vunpack.i.h.bf16 %v13001_v24  ;;  %s7126_s13 = smov 192 }
 0x17c   :  { %v6934_v49 = vld [vmem:[#allocation1 + $0x389] ss:$16 sm:%s6933_s1]   ;;  %v7058_v48 = vld [vmem:[#allocation1 + $0x408] ss:$16 sm:%s7057_s4]   ;;  %s4108_s1 = smov 192  ;;  %s7139_s4 = smov 12 }
 0x17d   :  { %v6939_v50 = vld [vmem:[#allocation1 + $0x389] ss:$16 sm:%s6938_s22]   ;;  %v6936_v53 = vsel %vm4102_vm0, %v6934_v49, %v6931_v46  ;;  %v7050_v46 = vsel %vm4102_vm0, %v7048_v42, %v7045_v41  ;;  %v13542_v49 = vpop.permute.xlu0 %11413  ;;  %s4178_s22 = smov 3 }
 0x17e   :  { %v6944_v54 = vld [vmem:[#allocation1 + $0x389] ss:$16 sm:%s6943_s17]   ;;  %v6941_v57 = vsel %vm4106_vm1, %v6939_v50, %v6936_v53  ;;  %v13544_v50 = vpop.permute.xlu1 %11418  ;;  %s4181_s17 = smov 12  ;;  %v4179_v15 = vld [vmem:[#allocation1 + $0x200] ss:$16 sm:%s4178_s22]   ;;  %s4270_s22 = smov 48 }
 0x17f   :  { %v6954_v40 = vld [vmem:[#allocation1 + $0x589] ss:$16 sm:%s6953_s3]   ;;  %v6946_v62 = vsel %vm4110_vm2, %v6944_v54, %v6941_v57  ;;  %v7068_v54 = vld [vmem:[#allocation1 + $0x608] ss:$16 sm:%s7067_s5]   ;;  %s4186_s3 = smov 48  ;;  %s7144_s5 = smov 48 }
 0x180   :  { %v6957_v58 = vld [vmem:[#allocation1 + $0x589] ss:$16 sm:%s6956_s30]   ;;  %v11572_v8 = vpack.i.bf16 %v6946_v62, %v6923_v51  ;;  %v11582_v51 = vpack.i.bf16 %v7037_v43, %v7015_v35  ;;  %v7081_v62 = vld [vmem:[#allocation1 + $0x608] ss:$16 sm:%s7080_s23]   ;;  %s4191_s30 = smov 192  ;;  %s7162_s23 = smov 12 }
 0x181   :  { %v6962_v59 = vld [vmem:[#allocation1 + $0x589] ss:$16 sm:%s6961_s29]   ;;  %v6959_v0 = vsel %vm4102_vm0, %v6957_v58, %v6954_v40  ;;  %v7071_v40 = vld [vmem:[#allocation1 + $0x608] ss:$16 sm:%s7070_s20]   ;;  %v4187_v26 = vld [vmem:[#allocation1 + $0x200] ss:$16 sm:%s4186_s3]  }
 0x182   :  { %v6967_v1 = vld [vmem:[#allocation1 + $0x589] ss:$16 sm:%s6966_s10]   ;;  %v6964_v9 = vsel %vm4106_vm1, %v6962_v59, %v6959_v0  ;;  %11573 = vrot.lane.b32.xlu0 %v11572_v8, %s12004_s19  ;;  %v7073_v58 = vsel %vm4102_vm0, %v7071_v40, %v7068_v54  ;;  %v7076_v59 = vld [vmem:[#allocation1 + $0x608] ss:$16 sm:%s7075_s21]   ;;  %v4192_v27 = vld [vmem:[#allocation1 + $0x200] ss:$16 sm:%s4191_s30]  }
 0x183   :  { %v6977_v2 = vld [vmem:[#allocation1 + $0x789] ss:$16 sm:%s6976_s14]   ;;  %v6969_v12 = vsel %vm4110_vm2, %v6967_v1, %v6964_v9  ;;  %v7078_v0 = vsel %vm4106_vm1, %v7076_v59, %v7073_v58  ;;  %v4099_v1 = vld [vmem:[#allocation1] ss:$16 sm:%s4098_s27]   ;;  %s4115_s29 = smov 3  ;;  %s4118_s10 = smov 12 }
 0x184   :  { %v6980_v10 = vld [vmem:[#allocation1 + $0x789] ss:$16 sm:%s6979_s18]   ;;  %v7083_v8 = vsel %vm4110_vm2, %v7081_v62, %v7078_v0  ;;  %v4116_v30 = vld [vmem:[#allocation1 + $0x80] ss:$16 sm:%s4115_s29]   ;;  %s4123_s14 = smov 48  ;;  %s4128_s18 = smov 192 }
 0x185   :  { %v6985_v11 = vld [vmem:[#allocation1 + $0x789] ss:$16 sm:%s6984_s28]   ;;  %v6982_v13 = vsel %vm4102_vm0, %v6980_v10, %v6977_v2  ;;  %v4101_v2 = vld [vmem:[#allocation1] ss:$16 sm:%s4100_s24]   ;;  %s4199_s28 = smov 3  ;;  %s7149_s20 = smov 192 }
 0x186   :  { %v6990_v14 = vld [vmem:[#allocation1 + $0x789] ss:$16 sm:%s6989_s11]   ;;  %v6987_v17 = vsel %vm4106_vm1, %v6985_v11, %v6982_v13  ;;  %11583 = vrot.lane.b32.xlu0 %v11582_v51, %s12005_s25  ;;  %v4103_v9 = vsel %vm4102_vm0, %v4101_v2, %v4099_v1  ;;  %v4105_v10 = vld [vmem:[#allocation1] ss:$16 sm:%s4104_s2]   ;;  %s4202_s11 = smov 12  ;;  %s7159_s21 = smov 3 }
 0x187   :  { %v6992_v22 = vsel %vm4110_vm2, %v6990_v14, %v6987_v17  ;;  %v4109_v11 = vld [vmem:[#allocation1] ss:$16 sm:%s4108_s1]   ;;  %v4107_v14 = vsel %vm4106_vm1, %v4105_v10, %v4103_v9  ;;  %v7091_v59 = vld [vmem:[#allocation1 + $0x88] ss:$16 sm:%s7090_s9]   ;;  %s7167_s27 = smov 48  ;;  %s7172_s24 = smov 192 }
 0x188   :  { %v11577_v28 = vpack.i.bf16 %v6992_v22, %v6969_v12  ;;  %v11305_v12 = vunpack.i.l.bf16 %v12986_v61  ;;  %v4182_v17 = vld [vmem:[#allocation1 + $0x200] ss:$16 sm:%s4181_s17]   ;;  %v4111_v19 = vsel %vm4110_vm2, %v4109_v11, %v4107_v14  ;;  %v11306_v61 = vunpack.i.h.bf16 %v12986_v61  ;;  %v7094_v62 = vld [vmem:[#allocation1 + $0x88] ss:$16 sm:%s7093_s12]   ;;  %s4262_s2 = smov 3  ;;  %s4265_s1 = smov 12 }
 0x189   :  { %v4184_v22 = vsel %vm4102_vm0, %v4182_v17, %v4179_v15  ;;  %4113 = vst.msk [vmem:[#allocation0] sm:$0xff] %vm4112_vm3, %v4111_v19   ;;  %v4119_v34 = vld [vmem:[#allocation1 + $0x80] ss:$16 sm:%s4118_s10]   ;;  %v7096_v1 = vsel %vm4102_vm0, %v7094_v62, %v7091_v59  ;;  %v7099_v2 = vld [vmem:[#allocation1 + $0x88] ss:$16 sm:%s7098_s0]   ;;  %s4275_s17 = smov 192  ;;  %v11350_v59 = vunpack.i.l.bf16 %v13419_v21  ;;  %v11351_v21 = vunpack.i.h.bf16 %v13419_v21 }
 0x18a   :  { %11578 = vrot.lane.b32.xlu1 %v11577_v28, %s12004_s19  ;;  %s7052_s19 = smov 48  ;;  %v11385_v28 = vunpack.i.l.bf16 %v13488_v44  ;;  %v4189_v29 = vsel %vm4106_vm1, %v4187_v26, %v4184_v22  ;;  %4450 = vst.msk [vmem:[#allocation0] sm:$0xff] %vm4449_vm4, %v11305_v12   ;;  %v4121_v36 = vsel %vm4102_vm0, %v4119_v34, %v4116_v30  ;;  %v4124_v37 = vld [vmem:[#allocation1 + $0x80] ss:$16 sm:%s4123_s14]   ;;  %v11386_v44 = vunpack.i.h.bf16 %v13488_v44  ;;  %v7114_v10 = vld [vmem:[#allocation1 + $0x288] ss:$16 sm:%s7113_s7]  }
 0x18b   :  { %v7053_v47 = vld [vmem:[#allocation1 + $0x408] ss:$16 sm:%s7052_s19]   ;;  %v4194_v35 = vsel %vm4110_vm2, %v4192_v27, %v4189_v29  ;;  %v4129_v38 = vld [vmem:[#allocation1 + $0x80] ss:$16 sm:%s4128_s18]   ;;  %v4126_v41 = vsel %vm4106_vm1, %v4124_v37, %v4121_v36  ;;  %4817 = vst.msk [vmem:[#allocation0] sm:$0xff] %vm4816_vm5, %v11345_v18   ;;  %v7101_v9 = vsel %vm4106_vm1, %v7099_v2, %v7096_v1  ;;  %s7136_s19 = smov 3  ;;  %v11390_v2 = vunpack.i.l.bf16 %v13490_v45 }
 0x18c   :  { %v7055_v53 = vsel %vm4106_vm1, %v7053_v47, %v7050_v46  ;;  %4197 = vst.msk [vmem:[#allocation0 + $0x20] sm:$0xff] %vm4112_vm3, %v4194_v35   ;;  %v4200_v42 = vld [vmem:[#allocation1 + $0x280] ss:$16 sm:%s4199_s28]   ;;  %v11355_v46 = vunpack.i.l.bf16 %v13435_v55  ;;  %v13573_v47 = vpop.permute.xlu0 %11423  ;;  %v4131_v51 = vsel %vm4110_vm2, %v4129_v38, %v4126_v41  ;;  %v11356_v55 = vunpack.i.h.bf16 %v13435_v55  ;;  %v7117_v11 = vld [vmem:[#allocation1 + $0x288] ss:$16 sm:%s7116_s26]   ;;  %s4346_s3 = smov 3 }
 0x18d   :  { %v7060_v57 = vsel %vm4110_vm2, %v7058_v48, %v7055_v53  ;;  %v4203_v43 = vld [vmem:[#allocation1 + $0x280] ss:$16 sm:%s4202_s11]   ;;  %v13575_v48 = vpop.permute.xlu1 %11428  ;;  %4473 = vst.msk [vmem:[#allocation0 + $0x20] sm:$0xff] %vm4449_vm4, %v11306_v61   ;;  %v7122_v14 = vld [vmem:[#allocation1 + $0x288] ss:$16 sm:%s7121_s15]   ;;  %s4349_s30 = smov 12  ;;  %v11391_v45 = vunpack.i.h.bf16 %v13490_v45 }
 0x18e   :  { %v11587_v13 = vpack.i.bf16 %v7083_v8, %v7060_v57  ;;  %v4205_v53 = vsel %vm4102_vm0, %v4203_v43, %v4200_v42  ;;  %v4208_v54 = vld [vmem:[#allocation1 + $0x280] ss:$16 sm:%s4207_s16]   ;;  %5184 = vst.msk [vmem:[#allocation0] sm:$0xff] %vm5183_vm6, %v11385_v28   ;;  %v11395_v57 = vunpack.i.l.bf16 %v13506_v23  ;;  %v7104_v8 = vld [vmem:[#allocation1 + $0x88] ss:$16 sm:%s7103_s6]   ;;  %v11396_v23 = vunpack.i.h.bf16 %v13506_v23  ;;  %s4354_s29 = smov 48 }
 0x18f   :  { %v4213_v40 = vld [vmem:[#allocation1 + $0x280] ss:$16 sm:%s4212_s8]   ;;  %4134 = vst.msk [vmem:[#allocation0 + $0x8] sm:$0xff] %vm4112_vm3, %v4131_v51   ;;  %v4210_v58 = vsel %vm4106_vm1, %v4208_v54, %v4205_v53  ;;  %v7106_v12 = vsel %vm4110_vm2, %v7104_v8, %v7101_v9  ;;  %v7127_v15 = vld [vmem:[#allocation1 + $0x288] ss:$16 sm:%s7126_s13]   ;;  %v11310_v53 = vunpack.i.l.bf16 %v13072_v33  ;;  %s4359_s10 = smov 192  ;;  %v11311_v33 = vunpack.i.h.bf16 %v13072_v33 }
 0x190   :  { %11588 = vrot.lane.b32.xlu1 %v11587_v13, %s12005_s25  ;;  %4840 = vst.msk [vmem:[#allocation0 + $0x20] sm:$0xff] %vm4816_vm5, %v11346_v20   ;;  %v4215_v0 = vsel %vm4110_vm2, %v4213_v40, %v4210_v58  ;;  %v7119_v13 = vsel %vm4102_vm0, %v7117_v11, %v7114_v10  ;;  %v7137_v18 = vld [vmem:[#allocation1 + $0x488] ss:$16 sm:%s7136_s19]   ;;  %v13605_v20 = vpop.permute.xlu0 %11433  ;;  %v4263_v41 = vld [vmem:[#allocation1 + $0x400] ss:$16 sm:%s4262_s2]   ;;  %s4283_s14 = smov 3 }
 0x191   :  { %4542 = vst.msk [vmem:[#allocation0 + $0x8] sm:$0xff] %vm4449_vm4, %v11315_v39   ;;  %v7124_v17 = vsel %vm4106_vm1, %v7122_v14, %v7119_v13  ;;  %v7140_v19 = vld [vmem:[#allocation1 + $0x488] ss:$16 sm:%s7139_s4]   ;;  %v13607_v35 = vpop.permute.xlu1 %11438  ;;  %v4266_v42 = vld [vmem:[#allocation1 + $0x400] ss:$16 sm:%s4265_s1]   ;;  %s4286_s18 = smov 12  ;;  %v11320_v14 = vunpack.i.l.bf16 %v13102_v63  ;;  %v11321_v63 = vunpack.i.h.bf16 %v13102_v63 }
 0x192   :  { %5207 = vst.msk [vmem:[#allocation0 + $0x20] sm:$0xff] %vm5183_vm6, %v11386_v44   ;;  %v7129_v61 = vsel %vm4110_vm2, %v7127_v15, %v7124_v17  ;;  %v7142_v22 = vsel %vm4102_vm0, %v7140_v19, %v7137_v18  ;;  %v7145_v26 = vld [vmem:[#allocation1 + $0x488] ss:$16 sm:%s7144_s5]   ;;  %v4271_v51 = vld [vmem:[#allocation1 + $0x400] ss:$16 sm:%s4270_s22]   ;;  %s4291_s28 = smov 48  ;;  %v11360_v19 = vunpack.i.l.bf16 %v13437_v56  ;;  %v11361_v56 = vunpack.i.h.bf16 %v13437_v56 }
 0x193   :  { %4218 = vst.msk [vmem:[#allocation0 + $0x28] sm:$0xff] %vm4112_vm3, %v4215_v0   ;;  %v7150_v27 = vld [vmem:[#allocation1 + $0x488] ss:$16 sm:%s7149_s20]   ;;  %v11592_v28 = vpack.i.bf16 %v7129_v61, %v7106_v12  ;;  %v7147_v29 = vsel %vm4106_vm1, %v7145_v26, %v7142_v22  ;;  %v4350_v58 = vld [vmem:[#allocation1 + $0x600] ss:$16 sm:%s4349_s30]   ;;  %s4296_s11 = smov 192 }
 0x194   :  { %4909 = vst.msk [vmem:[#allocation0 + $0x8] sm:$0xff] %vm4816_vm5, %v11355_v46   ;;  %v7160_v30 = vld [vmem:[#allocation1 + $0x688] ss:$16 sm:%s7159_s21]   ;;  %v7152_v36 = vsel %vm4110_vm2, %v7150_v27, %v7147_v29  ;;  %v4268_v46 = vsel %vm4102_vm0, %v4266_v42, %v4263_v41  ;;  %v4355_v0 = vld [vmem:[#allocation1 + $0x600] ss:$16 sm:%s4354_s29]   ;;  %s4367_s16 = smov 3  ;;  %v13635_v61 = vpop.permute.xlu0 %11443 }
 0x195   :  { %4565 = vst.msk [vmem:[#allocation0 + $0x28] sm:$0xff] %vm4449_vm4, %v11316_v24   ;;  %v7163_v34 = vld [vmem:[#allocation1 + $0x688] ss:$16 sm:%s7162_s23]   ;;  %11593 = vrot.lane.b32.xlu0 %v11592_v28, %s12005_s25  ;;  %v4276_v24 = vld [vmem:[#allocation1 + $0x400] ss:$16 sm:%s4275_s17]   ;;  %v4273_v40 = vsel %vm4106_vm1, %v4271_v51, %v4268_v46  ;;  %s4370_s8 = smov 12  ;;  %v13637_v22 = vpop.permute.xlu1 %11448 }
 0x196   :  { %5276 = vst.msk [vmem:[#allocation0 + $0x8] sm:$0xff] %vm5183_vm6, %v11395_v57   ;;  %v7165_v37 = vsel %vm4102_vm0, %v7163_v34, %v7160_v30  ;;  %v7168_v38 = vld [vmem:[#allocation1 + $0x688] ss:$16 sm:%s7167_s27]   ;;  %v4347_v57 = vld [vmem:[#allocation1 + $0x600] ss:$16 sm:%s4346_s3]   ;;  %v4278_v62 = vsel %vm4110_vm2, %v4276_v24, %v4273_v40  ;;  %s4375_s9 = smov 48  ;;  %v11400_v30 = vunpack.i.l.bf16 %v13508_v25  ;;  %v11401_v25 = vunpack.i.h.bf16 %v13508_v25 }
 0x197   :  { %4932 = vst.msk [vmem:[#allocation0 + $0x28] sm:$0xff] %vm4816_vm5, %v11356_v55   ;;  %v7173_v39 = vld [vmem:[#allocation1 + $0x688] ss:$16 sm:%s7172_s24]   ;;  %v7170_v44 = vsel %vm4106_vm1, %v7168_v38, %v7165_v37  ;;  %v4352_v55 = vsel %vm4102_vm0, %v4350_v58, %v4347_v57  ;;  %v4360_v1 = vld [vmem:[#allocation1 + $0x600] ss:$16 sm:%s4359_s10]   ;;  %s4380_s12 = smov 192 }
 0x198   :  { %5299 = vst.msk [vmem:[#allocation0 + $0x28] sm:$0xff] %vm5183_vm6, %v11396_v23   ;;  %v7175_v43 = vsel %vm4110_vm2, %v7173_v39, %v7170_v44  ;;  %v4357_v8 = vsel %vm4106_vm1, %v4355_v0, %v4352_v55  ;;  %v4284_v23 = vld [vmem:[#allocation1 + $0x480] ss:$16 sm:%s4283_s14]   ;;  %s7182_s0 = smov 3  ;;  %s7185_s6 = smov 12 }
 0x199   :  { %v11597_v54 = vpack.i.bf16 %v7175_v43, %v7152_v36  ;;  %4281 = vst.msk [vmem:[#allocation0 + $0x40] sm:$0xff] %vm4112_vm3, %v4278_v62   ;;  %v4287_v9 = vld [vmem:[#allocation1 + $0x480] ss:$16 sm:%s4286_s18]   ;;  %v4362_v10 = vsel %vm4110_vm2, %v4360_v1, %v4357_v8  ;;  %v7183_v36 = vld [vmem:[#allocation1 + $0x108] ss:$16 sm:%s7182_s0]   ;;  %s7190_s7 = smov 48 }
 0x19a   :  { %4496 = vst.msk [vmem:[#allocation0 + $0x40] sm:$0xff] %vm4449_vm4, %v11310_v53   ;;  %v4289_v11 = vsel %vm4102_vm0, %v4287_v9, %v4284_v23  ;;  %v4292_v12 = vld [vmem:[#allocation1 + $0x480] ss:$16 sm:%s4291_s28]   ;;  %v7186_v37 = vld [vmem:[#allocation1 + $0x108] ss:$16 sm:%s7185_s6]   ;;  %s7195_s26 = smov 192  ;;  %v13667_v23 = vpop.permute.xlu0 %11453  ;;  %v13669_v9 = vpop.permute.xlu1 %11458 }
 0x19b   :  { %11598 = vrot.lane.b32.xlu1 %v11597_v54, %s12005_s25  ;;  %v4297_v13 = vld [vmem:[#allocation1 + $0x480] ss:$16 sm:%s4296_s11]   ;;  %4365 = vst.msk [vmem:[#allocation0 + $0x60] sm:$0xff] %vm4112_vm3, %v4362_v10   ;;  %v4294_v15 = vsel %vm4106_vm1, %v4292_v12, %v4289_v11  ;;  %v7188_v39 = vsel %vm4102_vm0, %v7186_v37, %v7183_v36  ;;  %v7191_v44 = vld [vmem:[#allocation1 + $0x108] ss:$16 sm:%s7190_s7]   ;;  %s7205_s15 = smov 3 }
 0x19c   :  { %v4368_v17 = vld [vmem:[#allocation1 + $0x680] ss:$16 sm:%s4367_s16]   ;;  %4863 = vst.msk [vmem:[#allocation0 + $0x40] sm:$0xff] %vm4816_vm5, %v11350_v59   ;;  %v4299_v26 = vsel %vm4110_vm2, %v4297_v13, %v4294_v15  ;;  %v7196_v41 = vld [vmem:[#allocation1 + $0x108] ss:$16 sm:%s7195_s26]   ;;  %s7208_s13 = smov 12  ;;  %v7193_v42 = vsel %vm4106_vm1, %v7191_v44, %v7188_v39 }
 0x19d   :  { %v4371_v18 = vld [vmem:[#allocation1 + $0x680] ss:$16 sm:%s4370_s8]   ;;  %4519 = vst.msk [vmem:[#allocation0 + $0x60] sm:$0xff] %vm4449_vm4, %v11311_v33   ;;  %v7206_v43 = vld [vmem:[#allocation1 + $0x308] ss:$16 sm:%s7205_s15]   ;;  %s7213_s19 = smov 48  ;;  %v7198_v51 = vsel %vm4110_vm2, %v7196_v41, %v7193_v42 }
 0x19e   :  { %v4373_v27 = vsel %vm4102_vm0, %v4371_v18, %v4368_v17  ;;  %v4376_v28 = vld [vmem:[#allocation1 + $0x680] ss:$16 sm:%s4375_s9]   ;;  %5230 = vst.msk [vmem:[#allocation0 + $0x40] sm:$0xff] %vm5183_vm6, %v11390_v2   ;;  %v7209_v46 = vld [vmem:[#allocation1 + $0x308] ss:$16 sm:%s7208_s13]   ;;  %s7218_s4 = smov 192 }
 0x19f   :  { %v4381_v29 = vld [vmem:[#allocation1 + $0x680] ss:$16 sm:%s4380_s12]   ;;  %4302 = vst.msk [vmem:[#allocation0 + $0x48] sm:$0xff] %vm4112_vm3, %v4299_v26   ;;  %v4378_v34 = vsel %vm4106_vm1, %v4376_v28, %v4373_v27  ;;  %v7211_v24 = vsel %vm4102_vm0, %v7209_v46, %v7206_v43  ;;  %v7214_v53 = vld [vmem:[#allocation1 + $0x308] ss:$16 sm:%s7213_s19]   ;;  %s7228_s5 = smov 3  ;;  %v11325_v26 = vunpack.i.l.bf16 %v13223_v52  ;;  %v11326_v52 = vunpack.i.h.bf16 %v13223_v52 }
 0x1a0   :  { %4886 = vst.msk [vmem:[#allocation0 + $0x60] sm:$0xff] %vm4816_vm5, %v11351_v21   ;;  %v4383_v38 = vsel %vm4110_vm2, %v4381_v29, %v4378_v34  ;;  %v7219_v54 = vld [vmem:[#allocation1 + $0x308] ss:$16 sm:%s7218_s4]   ;;  %s7231_s20 = smov 12  ;;  %v7216_v40 = vsel %vm4106_vm1, %v7214_v53, %v7211_v24  ;;  %s7236_s21 = smov 48 }
 0x1a1   :  { %4588 = vst.msk [vmem:[#allocation0 + $0x48] sm:$0xff] %vm4449_vm4, %v11320_v14   ;;  %v7229_v57 = vld [vmem:[#allocation1 + $0x508] ss:$16 sm:%s7228_s5]   ;;  %s7241_s23 = smov 192  ;;  %v7221_v59 = vsel %vm4110_vm2, %v7219_v54, %v7216_v40  ;;  %s7251_s27 = smov 3  ;;  %v11370_v40 = vunpack.i.l.bf16 %v13455_v32  ;;  %v11371_v32 = vunpack.i.h.bf16 %v13455_v32 }
 0x1a2   :  { %5253 = vst.msk [vmem:[#allocation0 + $0x60] sm:$0xff] %vm5183_vm6, %v11391_v45   ;;  %v7232_v58 = vld [vmem:[#allocation1 + $0x508] ss:$16 sm:%s7231_s20]   ;;  %s7254_s24 = smov 12  ;;  %v11602_v0 = vpack.i.bf16 %v7221_v59, %v7198_v51  ;;  %s7259_s2 = smov 48  ;;  %v11330_v51 = vunpack.i.l.bf16 %v13244_v7  ;;  %v11331_v7 = vunpack.i.h.bf16 %v13244_v7 }
 0x1a3   :  { %4386 = vst.msk [vmem:[#allocation0 + $0x68] sm:$0xff] %vm4112_vm3, %v4383_v38   ;;  %v7234_v62 = vsel %vm4102_vm0, %v7232_v58, %v7229_v57  ;;  %v7237_v33 = vld [vmem:[#allocation1 + $0x508] ss:$16 sm:%s7236_s21]   ;;  %s7264_s1 = smov 192  ;;  %s4136_s22 = smov 3  ;;  %v11405_v38 = vunpack.i.l.bf16 %v13524_v5  ;;  %v11406_v5 = vunpack.i.h.bf16 %v13524_v5  ;;  %v13697_v57 = vpop.permute.xlu0 %11463  ;;  %v13699_v58 = vpop.permute.xlu1 %11468 }
 0x1a4   :  { %4955 = vst.msk [vmem:[#allocation0 + $0x48] sm:$0xff] %vm4816_vm5, %v11360_v19   ;;  %v7242_v55 = vld [vmem:[#allocation1 + $0x508] ss:$16 sm:%s7241_s23]   ;;  %v7239_v1 = vsel %vm4106_vm1, %v7237_v33, %v7234_v62  ;;  %s4139_s17 = smov 12  ;;  %11603 = vrot.lane.b32.xlu0 %v11602_v0, %s12005_s25  ;;  %v4137_v14 = vld [vmem:[#allocation1 + $0x100] ss:$16 sm:%s4136_s22]   ;;  %v11410_v0 = vunpack.i.l.bf16 %v13526_v6  ;;  %v11411_v6 = vunpack.i.h.bf16 %v13526_v6 }
 0x1a5   :  { %4611 = vst.msk [vmem:[#allocation0 + $0x68] sm:$0xff] %vm4449_vm4, %v11321_v63   ;;  %v7252_v2 = vld [vmem:[#allocation1 + $0x708] ss:$16 sm:%s7251_s27]   ;;  %v7244_v21 = vsel %vm4110_vm2, %v7242_v55, %v7239_v1  ;;  %v4140_v45 = vld [vmem:[#allocation1 + $0x100] ss:$16 sm:%s4139_s17]   ;;  %s4144_s3 = smov 48 }
 0x1a6   :  { %5322 = vst.msk [vmem:[#allocation0 + $0x48] sm:$0xff] %vm5183_vm6, %v11400_v30   ;;  %v7255_v8 = vld [vmem:[#allocation1 + $0x708] ss:$16 sm:%s7254_s24]   ;;  %s4149_s30 = smov 192  ;;  %v4142_v17 = vsel %vm4102_vm0, %v4140_v45, %v4137_v14  ;;  %v4145_v18 = vld [vmem:[#allocation1 + $0x100] ss:$16 sm:%s4144_s3]   ;;  %v11365_v30 = vunpack.i.l.bf16 %v13453_v31  ;;  %v11366_v31 = vunpack.i.h.bf16 %v13453_v31  ;;  %v11335_v14 = vunpack.i.l.bf16 %v13357_v60 }
 0x1a7   :  { %4978 = vst.msk [vmem:[#allocation0 + $0x68] sm:$0xff] %vm4816_vm5, %v11361_v56   ;;  %v7257_v10 = vsel %vm4102_vm0, %v7255_v8, %v7252_v2  ;;  %v7260_v11 = vld [vmem:[#allocation1 + $0x708] ss:$16 sm:%s7259_s2]   ;;  %v4150_v19 = vld [vmem:[#allocation1 + $0x100] ss:$16 sm:%s4149_s30]   ;;  %s4220_s29 = smov 3  ;;  %v4147_v27 = vsel %vm4106_vm1, %v4145_v18, %v4142_v17  ;;  %v11341_v18 = vunpack.i.h.bf16 %v13378_v16 }
 0x1a8   :  { %5345 = vst.msk [vmem:[#allocation0 + $0x68] sm:$0xff] %vm5183_vm6, %v11401_v25   ;;  %v7265_v12 = vld [vmem:[#allocation1 + $0x708] ss:$16 sm:%s7264_s1]   ;;  %v7262_v13 = vsel %vm4106_vm1, %v7260_v11, %v7257_v10  ;;  %s4223_s10 = smov 12  ;;  %v4221_v28 = vld [vmem:[#allocation1 + $0x300] ss:$16 sm:%s4220_s29]   ;;  %v4152_v34 = vsel %vm4110_vm2, %v4150_v19, %v4147_v27  ;;  %v11340_v19 = vunpack.i.l.bf16 %v13378_v16 }
 0x1a9   :  { %v7267_v15 = vsel %vm4110_vm2, %v7265_v12, %v7262_v13  ;;  %v4224_v29 = vld [vmem:[#allocation1 + $0x300] ss:$16 sm:%s4223_s10]   ;;  %s4228_s14 = smov 48  ;;  %s4233_s18 = smov 192  ;;  %4155 = vst.msk [vmem:[#allocation0 + $0x10] sm:$0xff] %vm4112_vm3, %v4152_v34   ;;  %v11381_v34 = vunpack.i.h.bf16 %v13472_v4 }
 0x1aa   :  { %v11607_v63 = vpack.i.bf16 %v7267_v15, %v7244_v21  ;;  %v4226_v36 = vsel %vm4102_vm0, %v4224_v29, %v4221_v28  ;;  %v4229_v37 = vld [vmem:[#allocation1 + $0x300] ss:$16 sm:%s4228_s14]   ;;  %s4304_s28 = smov 3  ;;  %s4307_s11 = smov 12  ;;  %4634 = vst.msk [vmem:[#allocation0 + $0x10] sm:$0xff] %vm4449_vm4, %v11325_v26   ;;  %v11336_v21 = vunpack.i.h.bf16 %v13357_v60  ;;  %v11376_v26 = vunpack.i.h.bf16 %v13470_v3 }
 0x1ab   :  { %v4234_v56 = vld [vmem:[#allocation1 + $0x300] ss:$16 sm:%s4233_s18]   ;;  %v4231_v39 = vsel %vm4106_vm1, %v4229_v37, %v4226_v36  ;;  %s4312_s16 = smov 48  ;;  %s4317_s8 = smov 192  ;;  %5001 = vst.msk [vmem:[#allocation0 + $0x10] sm:$0xff] %vm4816_vm5, %v11365_v30   ;;  %v11375_v30 = vunpack.i.l.bf16 %v13470_v3 }
 0x1ac   :  { %11608 = vrot.lane.b32.xlu1 %v11607_v63, %s12005_s25  ;;  %v4305_v44 = vld [vmem:[#allocation1 + $0x500] ss:$16 sm:%s4304_s28]   ;;  %v4236_v25 = vsel %vm4110_vm2, %v4234_v56, %v4231_v39  ;;  %s4388_s9 = smov 3  ;;  %s4391_s12 = smov 12  ;;  %5368 = vst.msk [vmem:[#allocation0 + $0x10] sm:$0xff] %vm5183_vm6, %v11405_v38   ;;  %v11416_v38 = vunpack.i.h.bf16 %v13542_v49  ;;  %v11415_v39 = vunpack.i.l.bf16 %v13542_v49  ;;  %v11421_v49 = vunpack.i.h.bf16 %v13544_v50 }
 0x1ad   :  { %v4308_v41 = vld [vmem:[#allocation1 + $0x500] ss:$16 sm:%s4307_s11]   ;;  %4239 = vst.msk [vmem:[#allocation0 + $0x30] sm:$0xff] %vm4112_vm3, %v4236_v25   ;;  %s4396_s0 = smov 48  ;;  %s4401_s6 = smov 192 }
 0x1ae   :  { %v4310_v42 = vsel %vm4102_vm0, %v4308_v41, %v4305_v44  ;;  %v4313_v43 = vld [vmem:[#allocation1 + $0x500] ss:$16 sm:%s4312_s16]   ;;  %4657 = vst.msk [vmem:[#allocation0 + $0x30] sm:$0xff] %vm4449_vm4, %v11326_v52   ;;  %s7274_s7 = smov 3  ;;  %s7277_s26 = smov 12  ;;  %v11380_v52 = vunpack.i.l.bf16 %v13472_v4 }
 0x1af   :  { %v4318_v46 = vld [vmem:[#allocation1 + $0x500] ss:$16 sm:%s4317_s8]   ;;  %v4315_v24 = vsel %vm4106_vm1, %v4313_v43, %v4310_v42  ;;  %v7275_v2 = vld [vmem:[#allocation1 + $0x188] ss:$16 sm:%s7274_s7]   ;;  %s7282_s15 = smov 48  ;;  %s7287_s13 = smov 192  ;;  %v11420_v42 = vunpack.i.l.bf16 %v13544_v50  ;;  %v11426_v43 = vunpack.i.h.bf16 %v13573_v47 }
 0x1b0   :  { %v4389_v53 = vld [vmem:[#allocation1 + $0x700] ss:$16 sm:%s4388_s9]   ;;  %v4320_v59 = vsel %vm4110_vm2, %v4318_v46, %v4315_v24  ;;  %v7278_v8 = vld [vmem:[#allocation1 + $0x188] ss:$16 sm:%s7277_s26]   ;;  %5024 = vst.msk [vmem:[#allocation0 + $0x30] sm:$0xff] %vm4816_vm5, %v11366_v31   ;;  %s7297_s19 = smov 3 }
 0x1b1   :  { %v4392_v54 = vld [vmem:[#allocation1 + $0x700] ss:$16 sm:%s4391_s12]   ;;  %4323 = vst.msk [vmem:[#allocation0 + $0x50] sm:$0xff] %vm4112_vm3, %v4320_v59   ;;  %v7280_v11 = vsel %vm4102_vm0, %v7278_v8, %v7275_v2  ;;  %v7283_v12 = vld [vmem:[#allocation1 + $0x188] ss:$16 sm:%s7282_s15]   ;;  %s7300_s4 = smov 12  ;;  %v13745_v59 = vpop.permute.xlu1 %11478 }
 0x1b2   :  { %v4394_v62 = vsel %vm4102_vm0, %v4392_v54, %v4389_v53  ;;  %v4397_v33 = vld [vmem:[#allocation1 + $0x700] ss:$16 sm:%s4396_s0]   ;;  %4680 = vst.msk [vmem:[#allocation0 + $0x50] sm:$0xff] %vm4449_vm4, %v11330_v51   ;;  %v7288_v13 = vld [vmem:[#allocation1 + $0x188] ss:$16 sm:%s7287_s13]   ;;  %v7285_v45 = vsel %vm4106_vm1, %v7283_v12, %v7280_v11  ;;  %s7305_s5 = smov 48  ;;  %v11425_v53 = vunpack.i.l.bf16 %v13573_v47  ;;  %v11431_v54 = vunpack.i.h.bf16 %v13575_v48 }
 0x1b3   :  { %v4402_v55 = vld [vmem:[#allocation1 + $0x700] ss:$16 sm:%s4401_s6]   ;;  %v4399_v1 = vsel %vm4106_vm1, %v4397_v33, %v4394_v62  ;;  %5391 = vst.msk [vmem:[#allocation0 + $0x30] sm:$0xff] %vm5183_vm6, %v11406_v5   ;;  %v7298_v15 = vld [vmem:[#allocation1 + $0x388] ss:$16 sm:%s7297_s19]   ;;  %s7310_s20 = smov 192  ;;  %v7290_v63 = vsel %vm4110_vm2, %v7288_v13, %v7285_v45  ;;  %v11441_v11 = vunpack.i.h.bf16 %v13607_v35  ;;  %v11440_v12 = vunpack.i.l.bf16 %v13607_v35 }
 0x1b4   :  { %v4404_v10 = vsel %vm4110_vm2, %v4402_v55, %v4399_v1  ;;  %v7301_v17 = vld [vmem:[#allocation1 + $0x388] ss:$16 sm:%s7300_s4]   ;;  %5047 = vst.msk [vmem:[#allocation0 + $0x50] sm:$0xff] %vm4816_vm5, %v11370_v40   ;;  %s7320_s21 = smov 3  ;;  %s7323_s23 = smov 12  ;;  %v13743_v40 = vpop.permute.xlu0 %11473  ;;  %v11436_v1 = vunpack.i.h.bf16 %v13605_v20 }
 0x1b5   :  { %4407 = vst.msk [vmem:[#allocation0 + $0x70] sm:$0xff] %vm4112_vm3, %v4404_v10   ;;  %v7303_v27 = vsel %vm4102_vm0, %v7301_v17, %v7298_v15  ;;  %v7306_v28 = vld [vmem:[#allocation1 + $0x388] ss:$16 sm:%s7305_s5]   ;;  %s7328_s27 = smov 48  ;;  %s7333_s24 = smov 192  ;;  %v11435_v10 = vunpack.i.l.bf16 %v13605_v20  ;;  %v11446_v17 = vunpack.i.h.bf16 %v13635_v61 }
 0x1b6   :  { %4703 = vst.msk [vmem:[#allocation0 + $0x70] sm:$0xff] %vm4449_vm4, %v11331_v7   ;;  %v7311_v29 = vld [vmem:[#allocation1 + $0x388] ss:$16 sm:%s7310_s20]   ;;  %v7308_v36 = vsel %vm4106_vm1, %v7306_v28, %v7303_v27  ;;  %s7343_s2 = smov 3  ;;  %s7346_s1 = smov 12 }
 0x1b7   :  { %5414 = vst.msk [vmem:[#allocation0 + $0x50] sm:$0xff] %vm5183_vm6, %v11410_v0   ;;  %v7321_v37 = vld [vmem:[#allocation1 + $0x588] ss:$16 sm:%s7320_s21]   ;;  %v7313_v44 = vsel %vm4110_vm2, %v7311_v29, %v7308_v36  ;;  %s7351_s22 = smov 48  ;;  %s7356_s17 = smov 192  ;;  %v11430_v0 = vunpack.i.l.bf16 %v13575_v48 }
 0x1b8   :  { %v7324_v56 = vld [vmem:[#allocation1 + $0x588] ss:$16 sm:%s7323_s23]   ;;  %5070 = vst.msk [vmem:[#allocation0 + $0x70] sm:$0xff] %vm4816_vm5, %v11371_v32   ;;  %v11612_v46 = vpack.i.bf16 %v7313_v44, %v7290_v63  ;;  %s4157_s3 = smov 3  ;;  %s4160_s30 = smov 12  ;;  %v11445_v63 = vunpack.i.l.bf16 %v13635_v61 }
 0x1b9   :  { %v7326_v41 = vsel %vm4102_vm0, %v7324_v56, %v7321_v37  ;;  %v7329_v31 = vld [vmem:[#allocation1 + $0x588] ss:$16 sm:%s7328_s27]   ;;  %5437 = vst.msk [vmem:[#allocation0 + $0x70] sm:$0xff] %vm5183_vm6, %v11411_v6   ;;  %v4158_v8 = vld [vmem:[#allocation1 + $0x180] ss:$16 sm:%s4157_s3]   ;;  %s4165_s29 = smov 48  ;;  %v11451_v37 = vunpack.i.h.bf16 %v13637_v22  ;;  %v11450_v56 = vunpack.i.l.bf16 %v13637_v22 }
 0x1ba   :  { %v7334_v25 = vld [vmem:[#allocation1 + $0x588] ss:$16 sm:%s7333_s24]   ;;  %v7331_v51 = vsel %vm4106_vm1, %v7329_v31, %v7326_v41  ;;  %11613 = vrot.lane.b32.xlu0 %v11612_v46, %s12005_s25  ;;  %v4161_v32 = vld [vmem:[#allocation1 + $0x180] ss:$16 sm:%s4160_s30]   ;;  %s4170_s10 = smov 192  ;;  %s4241_s14 = smov 3  ;;  %v11456_v46 = vunpack.i.h.bf16 %v13667_v23 }
 0x1bb   :  { %v7344_v5 = vld [vmem:[#allocation1 + $0x788] ss:$16 sm:%s7343_s2]   ;;  %v7336_v7 = vsel %vm4110_vm2, %v7334_v25, %v7331_v51  ;;  %v4163_v6 = vsel %vm4102_vm0, %v4161_v32, %v4158_v8  ;;  %v4166_v45 = vld [vmem:[#allocation1 + $0x180] ss:$16 sm:%s4165_s29]   ;;  %s4244_s18 = smov 12  ;;  %s4249_s28 = smov 48  ;;  %v11455_v51 = vunpack.i.l.bf16 %v13667_v23 }
 0x1bc   :  { %v7347_v24 = vld [vmem:[#allocation1 + $0x788] ss:$16 sm:%s7346_s1]   ;;  %v4171_v15 = vld [vmem:[#allocation1 + $0x180] ss:$16 sm:%s4170_s10]   ;;  %v4168_v28 = vsel %vm4106_vm1, %v4166_v45, %v4163_v6  ;;  %s4254_s11 = smov 192  ;;  %s4325_s16 = smov 3  ;;  %v11470_v6 = vunpack.i.l.bf16 %v13699_v58 }
 0x1bd   :  { %v7349_v62 = vsel %vm4102_vm0, %v7347_v24, %v7344_v5  ;;  %v7352_v33 = vld [vmem:[#allocation1 + $0x788] ss:$16 sm:%s7351_s22]   ;;  %v4242_v29 = vld [vmem:[#allocation1 + $0x380] ss:$16 sm:%s4241_s14]   ;;  %v4173_v44 = vsel %vm4110_vm2, %v4171_v15, %v4168_v28  ;;  %s4328_s8 = smov 12  ;;  %s4338_s9 = smov 192  ;;  %v11475_v28 = vunpack.i.l.bf16 %v13743_v40 }
 0x1be   :  { %v7357_v55 = vld [vmem:[#allocation1 + $0x788] ss:$16 sm:%s7356_s17]   ;;  %v7354_v2 = vsel %vm4106_vm1, %v7352_v33, %v7349_v62  ;;  %v4245_v36 = vld [vmem:[#allocation1 + $0x380] ss:$16 sm:%s4244_s18]   ;;  %4176 = vst.msk [vmem:[#allocation0 + $0x18] sm:$0xff] %vm4112_vm3, %v4173_v44   ;;  %v11460_v62 = vunpack.i.l.bf16 %v13669_v9  ;;  %v11466_v33 = vunpack.i.h.bf16 %v13697_v57  ;;  %s4409_s12 = smov 3  ;;  %v13790_v44 = vpop.permute.xlu1 %11488 }
 0x1bf   :  { %v7359_v13 = vsel %vm4110_vm2, %v7357_v55, %v7354_v2  ;;  %v4247_v41 = vsel %vm4102_vm0, %v4245_v36, %v4242_v29  ;;  %v4250_v31 = vld [vmem:[#allocation1 + $0x380] ss:$16 sm:%s4249_s28]   ;;  %v11465_v55 = vunpack.i.l.bf16 %v13697_v57  ;;  %4726 = vst.msk [vmem:[#allocation0 + $0x18] sm:$0xff] %vm4449_vm4, %v11335_v14   ;;  %s4412_s0 = smov 12  ;;  %s4417_s6 = smov 48  ;;  %v11481_v29 = vunpack.i.h.bf16 %v13745_v59  ;;  %v13788_v36 = vpop.permute.xlu0 %11483 }
 0x1c0   :  { %v11617_v27 = vpack.i.bf16 %v7359_v13, %v7336_v7  ;;  %v4255_v25 = vld [vmem:[#allocation1 + $0x380] ss:$16 sm:%s4254_s11]   ;;  %v4252_v5 = vsel %vm4106_vm1, %v4250_v31, %v4247_v41  ;;  %v11471_v13 = vunpack.i.h.bf16 %v13699_v58  ;;  %s4422_s7 = smov 192  ;;  %5093 = vst.msk [vmem:[#allocation0 + $0x18] sm:$0xff] %vm4816_vm5, %v11375_v30   ;;  %v11476_v30 = vunpack.i.h.bf16 %v13743_v40  ;;  %s7366_s26 = smov 3 }
 0x1c1   :  { %v4326_v24 = vld [vmem:[#allocation1 + $0x580] ss:$16 sm:%s4325_s16]   ;;  %v4257_v2 = vsel %vm4110_vm2, %v4255_v25, %v4252_v5  ;;  %s7369_s15 = smov 12  ;;  %5460 = vst.msk [vmem:[#allocation0 + $0x18] sm:$0xff] %vm5183_vm6, %v11415_v39   ;;  %v11480_v39 = vunpack.i.l.bf16 %v13745_v59  ;;  %v11486_v25 = vunpack.i.h.bf16 %v13788_v36  ;;  %s7374_s13 = smov 48  ;;  %v11485_v3 = vunpack.i.l.bf16 %v13788_v36 }
 0x1c2   :  { %11618 = vrot.lane.b32.xlu1 %v11617_v27, %s12005_s25  ;;  %v4329_v7 = vld [vmem:[#allocation1 + $0x580] ss:$16 sm:%s4328_s8]   ;;  %s4333_s25 = smov 48  ;;  %4260 = vst.msk [vmem:[#allocation0 + $0x38] sm:$0xff] %vm4112_vm3, %v4257_v2   ;;  %s7379_s19 = smov 192  ;;  %v11490_v2 = vunpack.i.l.bf16 %v13790_v44 }
 0x1c3   :  { %v4331_v14 = vsel %vm4102_vm0, %v4329_v7, %v4326_v24  ;;  %v4334_v8 = vld [vmem:[#allocation1 + $0x580] ss:$16 sm:%s4333_s25]   ;;  %4749 = vst.msk [vmem:[#allocation0 + $0x38] sm:$0xff] %vm4449_vm4, %v11336_v21   ;;  %v7367_v24 = vld [vmem:[#allocation1 + $0x7] ss:$16 sm:%s7366_s26]   ;;  %s7388_s4 = smov 3  ;;  %v11494_v58 = vpop.permute.xlu0 %11493 }
 0x1c4   :  { %v4339_v32 = vld [vmem:[#allocation1 + $0x580] ss:$16 sm:%s4338_s9]   ;;  %v4336_v45 = vsel %vm4106_vm1, %v4334_v8, %v4331_v14  ;;  %v7370_v7 = vld [vmem:[#allocation1 + $0x7] ss:$16 sm:%s7369_s15]   ;;  %5116 = vst.msk [vmem:[#allocation0 + $0x38] sm:$0xff] %vm4816_vm5, %v11376_v26   ;;  %v11491_v26 = vunpack.i.h.bf16 %v13790_v44  ;;  %s7391_s5 = smov 12  ;;  %v11496_v40 = vunpack.i.h.bf16 %v11494_v58  ;;  %v11495_v59 = vunpack.i.l.bf16 %v11494_v58 }
 0x1c5   :  { %v4410_v15 = vld [vmem:[#allocation1 + $0x780] ss:$16 sm:%s4409_s12]   ;;  %v4341_v60 = vsel %vm4110_vm2, %v4339_v32, %v4336_v45  ;;  %v7375_v8 = vld [vmem:[#allocation1 + $0x7] ss:$16 sm:%s7374_s13]   ;;  %5483 = vst.msk [vmem:[#allocation0 + $0x38] sm:$0xff] %vm5183_vm6, %v11416_v38   ;;  %s7396_s20 = smov 48 }
 0x1c6   :  { %v4413_v27 = vld [vmem:[#allocation1 + $0x780] ss:$16 sm:%s4412_s0]   ;;  %4344 = vst.msk [vmem:[#allocation0 + $0x58] sm:$0xff] %vm4112_vm3, %v4341_v60   ;;  %v7380_v32 = vld [vmem:[#allocation1 + $0x7] ss:$16 sm:%s7379_s19]   ;;  %s7401_s21 = smov 192 }
 0x1c7   :  { %v4415_v21 = vsel %vm4102_vm0, %v4413_v27, %v4410_v15  ;;  %v4418_v41 = vld [vmem:[#allocation1 + $0x780] ss:$16 sm:%s4417_s6]   ;;  %4772 = vst.msk [vmem:[#allocation0 + $0x58] sm:$0xff] %vm4449_vm4, %v11340_v19   ;;  %v7372_v19 = vsel %vm4102_vm0, %v7370_v7, %v7367_v24  ;;  %v7389_v45 = vld [vmem:[#allocation1 + $0x207] ss:$16 sm:%s7388_s4]   ;;  %s7411_s23 = smov 3 }
 0x1c8   :  { %v4423_v31 = vld [vmem:[#allocation1 + $0x780] ss:$16 sm:%s4422_s7]   ;;  %v4420_v5 = vsel %vm4106_vm1, %v4418_v41, %v4415_v21  ;;  %v7377_v38 = vsel %vm4106_vm1, %v7375_v8, %v7372_v19  ;;  %5139 = vst.msk [vmem:[#allocation0 + $0x58] sm:$0xff] %vm4816_vm5, %v11380_v52   ;;  %v11461_v52 = vunpack.i.h.bf16 %v13669_v9  ;;  %v7392_v16 = vld [vmem:[#allocation1 + $0x207] ss:$16 sm:%s7391_s5]   ;;  %s7414_s27 = smov 12 }
 0x1c9   :  { %v4425_v14 = vsel %vm4110_vm2, %v4423_v31, %v4420_v5  ;;  %5506 = vst.msk [vmem:[#allocation0 + $0x58] sm:$0xff] %vm5183_vm6, %v11420_v42   ;;  %v7382_v50 = vsel %vm4110_vm2, %v7380_v32, %v7377_v38  ;;  %v7394_v47 = vsel %vm4102_vm0, %v7392_v16, %v7389_v45  ;;  %v7402_v48 = vld [vmem:[#allocation1 + $0x207] ss:$16 sm:%s7401_s21]   ;;  %s7419_s24 = smov 48  ;;  %s7424_s2 = smov 192 }
 0x1ca   :  { %4428 = vst.msk [vmem:[#allocation0 + $0x78] sm:$0xff] %vm4112_vm3, %v4425_v14   ;;  %v7412_v20 = vld [vmem:[#allocation1 + $0x407] ss:$16 sm:%s7411_s23]   ;;  %s7434_s1 = smov 3  ;;  %s7437_s22 = smov 12 }
 0x1cb   :  { %4795 = vst.msk [vmem:[#allocation0 + $0x78] sm:$0xff] %vm4449_vm4, %v11341_v18   ;;  %v7397_v18 = vld [vmem:[#allocation1 + $0x207] ss:$16 sm:%s7396_s20]   ;;  %s7442_s17 = smov 48  ;;  %s7447_s3 = smov 192 }
 0x1cc   :  { %5551 = vst.msk [vmem:[#allocation0] sm:$0xff] %vm5550_vm7, %v11425_v53   ;;  %5574 = vst.msk [vmem:[#allocation0 + $0x20] sm:$0xff] %vm5550_vm7, %v11426_v43   ;;  %v7399_v4 = vsel %vm4106_vm1, %v7397_v18, %v7394_v47  ;;  %v7415_v35 = vld [vmem:[#allocation1 + $0x407] ss:$16 sm:%s7414_s27]   ;;  %s7457_s30 = smov 3  ;;  %s7460_s29 = smov 12 }
 0x1cd   :  { %5597 = vst.msk [vmem:[#allocation0 + $0x40] sm:$0xff] %vm5550_vm7, %v11430_v0   ;;  %5620 = vst.msk [vmem:[#allocation0 + $0x60] sm:$0xff] %vm5550_vm7, %v11431_v54   ;;  %v7420_v61 = vld [vmem:[#allocation1 + $0x407] ss:$16 sm:%s7419_s24]   ;;  %v7404_v22 = vsel %vm4110_vm2, %v7402_v48, %v7399_v4  ;;  %v7417_v23 = vsel %vm4102_vm0, %v7415_v35, %v7412_v20  ;;  %s7465_s10 = smov 48  ;;  %s12006_s14 = smov 56  }
 0x1ce   :  { %5643 = vst.msk [vmem:[#allocation0 + $0x8] sm:$0xff] %vm5550_vm7, %v11435_v10   ;;  %5666 = vst.msk [vmem:[#allocation0 + $0x28] sm:$0xff] %vm5550_vm7, %v11436_v1   ;;  %v7425_v9 = vld [vmem:[#allocation1 + $0x407] ss:$16 sm:%s7424_s2]   ;;  %v11622_v42 = vpack.i.bf16 %v7404_v22, %v7382_v50  ;;  %v7422_v43 = vsel %vm4106_vm1, %v7420_v61, %v7417_v23  ;;  %s7470_s18 = smov 192  ;;  %s7480_s28 = smov 3 }
 0x1cf   :  { %5689 = vst.msk [vmem:[#allocation0 + $0x48] sm:$0xff] %vm5550_vm7, %v11440_v12   ;;  %5712 = vst.msk [vmem:[#allocation0 + $0x68] sm:$0xff] %vm5550_vm7, %v11441_v11   ;;  %v7435_v57 = vld [vmem:[#allocation1 + $0x607] ss:$16 sm:%s7434_s1]   ;;  %v7427_v0 = vsel %vm4110_vm2, %v7425_v9, %v7422_v43  ;;  %s7483_s11 = smov 12  ;;  %s7488_s16 = smov 48 }
 0x1d0   :  { %5735 = vst.msk [vmem:[#allocation0 + $0x10] sm:$0xff] %vm5550_vm7, %v11445_v63   ;;  %5758 = vst.msk [vmem:[#allocation0 + $0x30] sm:$0xff] %vm5550_vm7, %v11446_v17   ;;  %v7438_v53 = vld [vmem:[#allocation1 + $0x607] ss:$16 sm:%s7437_s22]   ;;  %11623 = vrot.lane.b32.xlu0 %v11622_v42, %s12006_s14  ;;  %s7493_s8 = smov 192  ;;  %s7503_s25 = smov 3 }
 0x1d1   :  { %5781 = vst.msk [vmem:[#allocation0 + $0x50] sm:$0xff] %vm5550_vm7, %v11450_v56   ;;  %5804 = vst.msk [vmem:[#allocation0 + $0x70] sm:$0xff] %vm5550_vm7, %v11451_v37   ;;  %v7443_v54 = vld [vmem:[#allocation1 + $0x607] ss:$16 sm:%s7442_s17]   ;;  %v7440_v1 = vsel %vm4102_vm0, %v7438_v53, %v7435_v57  ;;  %s7506_s9 = smov 12  ;;  %s7511_s12 = smov 48 }
 0x1d2   :  { %5827 = vst.msk [vmem:[#allocation0 + $0x18] sm:$0xff] %vm5550_vm7, %v11455_v51   ;;  %5850 = vst.msk [vmem:[#allocation0 + $0x38] sm:$0xff] %vm5550_vm7, %v11456_v46   ;;  %v7448_v10 = vld [vmem:[#allocation1 + $0x607] ss:$16 sm:%s7447_s3]   ;;  %v7445_v63 = vsel %vm4106_vm1, %v7443_v54, %v7440_v1  ;;  %s7516_s0 = smov 192  ;;  %s7526_s6 = smov 3 }
 0x1d3   :  { %5162 = vst.msk [vmem:[#allocation0 + $0x78] sm:$0xff] %vm4816_vm5, %v11381_v34   ;;  %v11499_v34 = vpop.permute.xlu1 %11498  ;;  %v7458_v11 = vld [vmem:[#allocation1 + $0x87] ss:$16 sm:%s7457_s30]   ;;  %v7450_v46 = vsel %vm4110_vm2, %v7448_v10, %v7445_v63  ;;  %s7529_s7 = smov 12  ;;  %s7534_s26 = smov 48 }
 0x1d4   :  { %5873 = vst.msk [vmem:[#allocation0 + $0x58] sm:$0xff] %vm5550_vm7, %v11460_v62   ;;  %v11501_v12 = vunpack.i.h.bf16 %v11499_v34  ;;  %v11500_v17 = vunpack.i.l.bf16 %v11499_v34  ;;  %v7461_v37 = vld [vmem:[#allocation1 + $0x87] ss:$16 sm:%s7460_s29]   ;;  %s7539_s15 = smov 192  ;;  %s7549_s13 = smov 3 }
 0x1d5   :  { %5918 = vst.msk [vmem:[#allocation0] sm:$0xff] %vm5917_vm8, %v11465_v55   ;;  %5941 = vst.msk [vmem:[#allocation0 + $0x20] sm:$0xff] %vm5917_vm8, %v11466_v33   ;;  %v7466_v56 = vld [vmem:[#allocation1 + $0x87] ss:$16 sm:%s7465_s10]   ;;  %v7463_v51 = vsel %vm4102_vm0, %v7461_v37, %v7458_v11  ;;  %v11627_v55 = vpack.i.bf16 %v7450_v46, %v7427_v0  ;;  %s7552_s19 = smov 12  ;;  %s7557_s4 = smov 48 }
 0x1d6   :  { %5964 = vst.msk [vmem:[#allocation0 + $0x40] sm:$0xff] %vm5917_vm8, %v11470_v6   ;;  %5987 = vst.msk [vmem:[#allocation0 + $0x60] sm:$0xff] %vm5917_vm8, %v11471_v13   ;;  %v7471_v62 = vld [vmem:[#allocation1 + $0x87] ss:$16 sm:%s7470_s18]   ;;  %v7468_v13 = vsel %vm4106_vm1, %v7466_v56, %v7463_v51  ;;  %s7562_s5 = smov 192  ;;  %s7572_s20 = smov 3 }
 0x1d7   :  { %6010 = vst.msk [vmem:[#allocation0 + $0x8] sm:$0xff] %vm5917_vm8, %v11475_v28   ;;  %6033 = vst.msk [vmem:[#allocation0 + $0x28] sm:$0xff] %vm5917_vm8, %v11476_v30   ;;  %v7481_v33 = vld [vmem:[#allocation1 + $0x287] ss:$16 sm:%s7480_s28]   ;;  %v7473_v27 = vsel %vm4110_vm2, %v7471_v62, %v7468_v13  ;;  %11628 = vrot.lane.b32.xlu1 %v11627_v55, %s12006_s14  ;;  %s7575_s21 = smov 12  ;;  %s7580_s23 = smov 48 }
 0x1d8   :  { %6056 = vst.msk [vmem:[#allocation0 + $0x48] sm:$0xff] %vm5917_vm8, %v11480_v39   ;;  %6079 = vst.msk [vmem:[#allocation0 + $0x68] sm:$0xff] %vm5917_vm8, %v11481_v29   ;;  %v7484_v6 = vld [vmem:[#allocation1 + $0x287] ss:$16 sm:%s7483_s11]   ;;  %s7585_s27 = smov 192  ;;  %s7595_s24 = smov 3 }
 0x1d9   :  { %6102 = vst.msk [vmem:[#allocation0 + $0x10] sm:$0xff] %vm5917_vm8, %v11485_v3   ;;  %6125 = vst.msk [vmem:[#allocation0 + $0x30] sm:$0xff] %vm5917_vm8, %v11486_v25   ;;  %v7489_v15 = vld [vmem:[#allocation1 + $0x287] ss:$16 sm:%s7488_s16]   ;;  %v7486_v30 = vsel %vm4102_vm0, %v7484_v6, %v7481_v33  ;;  %v13935_v3 = vpop.permute.xlu0 %11503  ;;  %s7598_s2 = smov 12  ;;  %s7603_s1 = smov 48 }
 0x1da   :  { %6148 = vst.msk [vmem:[#allocation0 + $0x50] sm:$0xff] %vm5917_vm8, %v11490_v2   ;;  %6171 = vst.msk [vmem:[#allocation0 + $0x70] sm:$0xff] %vm5917_vm8, %v11491_v26   ;;  %v7494_v28 = vld [vmem:[#allocation1 + $0x287] ss:$16 sm:%s7493_s8]   ;;  %v7491_v36 = vsel %vm4106_vm1, %v7489_v15, %v7486_v30  ;;  %v13937_v26 = vpop.permute.xlu1 %11508  ;;  %s7608_s22 = smov 192  ;;  %s7618_s17 = smov 3 }
 0x1db   :  { %5529 = vst.msk [vmem:[#allocation0 + $0x78] sm:$0xff] %vm5183_vm6, %v11421_v49   ;;  %v7504_v29 = vld [vmem:[#allocation1 + $0x487] ss:$16 sm:%s7503_s25]   ;;  %v7496_v21 = vsel %vm4110_vm2, %v7494_v28, %v7491_v36  ;;  %s7621_s3 = smov 12  ;;  %s7626_s30 = smov 48  ;;  %v11506_v36 = vunpack.i.h.bf16 %v13935_v3 }
 0x1dc   :  { %5896 = vst.msk [vmem:[#allocation0 + $0x78] sm:$0xff] %vm5550_vm7, %v11461_v52   ;;  %v7507_v44 = vld [vmem:[#allocation1 + $0x487] ss:$16 sm:%s7506_s9]   ;;  %v11632_v25 = vpack.i.bf16 %v7496_v21, %v7473_v27  ;;  %s7631_s29 = smov 192  ;;  %s7641_s10 = smov 3 }
 0x1dd   :  { %6194 = vst.msk [vmem:[#allocation0 + $0x18] sm:$0xff] %vm5917_vm8, %v11495_v59   ;;  %6217 = vst.msk [vmem:[#allocation0 + $0x38] sm:$0xff] %vm5917_vm8, %v11496_v40   ;;  %v7512_v60 = vld [vmem:[#allocation1 + $0x487] ss:$16 sm:%s7511_s12]   ;;  %v7509_v41 = vsel %vm4102_vm0, %v7507_v44, %v7504_v29  ;;  %v13953_v0 = vpop.permute.xlu0 %11513  ;;  %s7644_s18 = smov 12  ;;  %s7649_s28 = smov 48 }
 0x1de   :  { %6240 = vst.msk [vmem:[#allocation0 + $0x58] sm:$0xff] %vm5917_vm8, %v11500_v17   ;;  %6263 = vst.msk [vmem:[#allocation0 + $0x78] sm:$0xff] %vm5917_vm8, %v11501_v12   ;;  %v7517_v31 = vld [vmem:[#allocation1 + $0x487] ss:$16 sm:%s7516_s0]   ;;  %v7514_v5 = vsel %vm4106_vm1, %v7512_v60, %v7509_v41  ;;  %11633 = vrot.lane.b32.xlu0 %v11632_v25, %s12006_s14  ;;  %v13955_v1 = vpop.permute.xlu1 %11518  ;;  %s7654_s11 = smov 192  ;;  %s7664_s16 = smov 3  ;;  %v11505_v41 = vunpack.i.l.bf16 %v13935_v3  ;;  %v11516_v3 = vunpack.i.h.bf16 %v13953_v0 }
 0x1df   :  { %v7527_v39 = vld [vmem:[#allocation1 + $0x687] ss:$16 sm:%s7526_s6]   ;;  %v7519_v2 = vsel %vm4110_vm2, %v7517_v31, %v7514_v5  ;;  %s7667_s8 = smov 12  ;;  %s7672_s25 = smov 48  ;;  %v11511_v31 = vunpack.i.h.bf16 %v13937_v26  ;;  %6308 = vst.msk [vmem:[#allocation0 + $0x20] sm:$0xff] %vm6284_vm9, %v11506_v36  }
 0x1e0   :  { %v7530_v24 = vld [vmem:[#allocation1 + $0x687] ss:$16 sm:%s7529_s7]   ;;  %s7677_s9 = smov 192  ;;  %s7687_s12 = smov 3  ;;  %6285 = vst.msk [vmem:[#allocation0] sm:$0xff] %vm6284_vm9, %v11505_v41   ;;  %6400 = vst.msk [vmem:[#allocation0 + $0x28] sm:$0xff] %vm6284_vm9, %v11516_v3  }
 0x1e1   :  { %v7535_v7 = vld [vmem:[#allocation1 + $0x687] ss:$16 sm:%s7534_s26]   ;;  %v7532_v14 = vsel %vm4102_vm0, %v7530_v24, %v7527_v39  ;;  %s7690_s0 = smov 12  ;;  %s7695_s6 = smov 48  ;;  %v11510_v39 = vunpack.i.l.bf16 %v13937_v26  ;;  %v11515_v26 = vunpack.i.l.bf16 %v13953_v0  ;;  %6354 = vst.msk [vmem:[#allocation0 + $0x60] sm:$0xff] %vm6284_vm9, %v11511_v31  }
 0x1e2   :  { %v7540_v19 = vld [vmem:[#allocation1 + $0x687] ss:$16 sm:%s7539_s15]   ;;  %v7537_v32 = vsel %vm4106_vm1, %v7535_v7, %v7532_v14  ;;  %s7700_s7 = smov 192  ;;  %s7710_s26 = smov 3 }
 0x1e3   :  { %v7550_v8 = vld [vmem:[#allocation1 + $0x107] ss:$16 sm:%s7549_s13]   ;;  %v7542_v45 = vsel %vm4110_vm2, %v7540_v19, %v7537_v32  ;;  %s7713_s15 = smov 12  ;;  %s7718_s13 = smov 48  ;;  %v11521_v32 = vunpack.i.h.bf16 %v13955_v1  ;;  %6331 = vst.msk [vmem:[#allocation0 + $0x40] sm:$0xff] %vm6284_vm9, %v11510_v39   ;;  %6377 = vst.msk [vmem:[#allocation0 + $0x8] sm:$0xff] %vm6284_vm9, %v11515_v26  }
 0x1e4   :  { %v7553_v49 = vld [vmem:[#allocation1 + $0x107] ss:$16 sm:%s7552_s19]   ;;  %v11637_v50 = vpack.i.bf16 %v7542_v45, %v7519_v2  ;;  %s7723_s19 = smov 192  ;;  %v11529_v45 = vpop.permute.xlu1 %11528 }
 0x1e5   :  { %v7558_v38 = vld [vmem:[#allocation1 + $0x107] ss:$16 sm:%s7557_s4]   ;;  %v7555_v52 = vsel %vm4102_vm0, %v7553_v49, %v7550_v8  ;;  %s7733_s4 = smov 3  ;;  %v11520_v49 = vunpack.i.l.bf16 %v13955_v1  ;;  %6446 = vst.msk [vmem:[#allocation0 + $0x68] sm:$0xff] %vm6284_vm9, %v11521_v32  }
 0x1e6   :  { %v7563_v16 = vld [vmem:[#allocation1 + $0x107] ss:$16 sm:%s7562_s5]   ;;  %v7560_v47 = vsel %vm4106_vm1, %v7558_v38, %v7555_v52  ;;  %11638 = vrot.lane.b32.xlu1 %v11637_v50, %s12006_s14  ;;  %v11524_v38 = vpop.permute.xlu0 %11523  ;;  %v7734_v50 = vld [vmem:[#allocation1 + $0x6] ss:$16 sm:%s7733_s4]   ;;  %s7736_s5 = smov 12  ;;  %s7901_s4 = smov 48 }
 0x1e7   :  { %v7573_v18 = vld [vmem:[#allocation1 + $0x307] ss:$16 sm:%s7572_s20]   ;;  %v7565_v4 = vsel %vm4110_vm2, %v7563_v16, %v7560_v47  ;;  %s7741_s20 = smov 48  ;;  %v11526_v47 = vunpack.i.h.bf16 %v11524_v38  ;;  %6423 = vst.msk [vmem:[#allocation0 + $0x48] sm:$0xff] %vm6284_vm9, %v11520_v49  }
 0x1e8   :  { %v7576_v48 = vld [vmem:[#allocation1 + $0x307] ss:$16 sm:%s7575_s21]   ;;  %s7746_s21 = smov 192 }
 0x1e9   :  { %v7581_v20 = vld [vmem:[#allocation1 + $0x307] ss:$16 sm:%s7580_s23]   ;;  %v7578_v35 = vsel %vm4102_vm0, %v7576_v48, %v7573_v18  ;;  %v11525_v48 = vunpack.i.l.bf16 %v11524_v38  ;;  %s7755_s23 = smov 3  ;;  %6492 = vst.msk [vmem:[#allocation0 + $0x30] sm:$0xff] %vm6284_vm9, %v11526_v47  }
 0x1ea   :  { %v7586_v61 = vld [vmem:[#allocation1 + $0x307] ss:$16 sm:%s7585_s27]   ;;  %v7583_v23 = vsel %vm4106_vm1, %v7581_v20, %v7578_v35  ;;  %v7742_v35 = vld [vmem:[#allocation1 + $0x6] ss:$16 sm:%s7741_s20]   ;;  %s7758_s27 = smov 12  ;;  %s7916_s20 = smov 3 }
 0x1eb   :  { %v7596_v22 = vld [vmem:[#allocation1 + $0x507] ss:$16 sm:%s7595_s24]   ;;  %v7588_v58 = vsel %vm4110_vm2, %v7586_v61, %v7583_v23  ;;  %v11531_v61 = vunpack.i.h.bf16 %v11529_v45  ;;  %s7763_s24 = smov 48  ;;  %6469 = vst.msk [vmem:[#allocation0 + $0x10] sm:$0xff] %vm6284_vm9, %v11525_v48  }
 0x1ec   :  { %v7599_v9 = vld [vmem:[#allocation1 + $0x507] ss:$16 sm:%s7598_s2]   ;;  %v11642_v53 = vpack.i.bf16 %v7588_v58, %v7565_v4  ;;  %v7737_v4 = vld [vmem:[#allocation1 + $0x6] ss:$16 sm:%s7736_s5]   ;;  %s7768_s2 = smov 192  ;;  %s7906_s5 = smov 192 }
 0x1ed   :  { %v7604_v57 = vld [vmem:[#allocation1 + $0x507] ss:$16 sm:%s7603_s1]   ;;  %v7601_v34 = vsel %vm4102_vm0, %v7599_v9, %v7596_v22  ;;  %v11530_v22 = vunpack.i.l.bf16 %v11529_v45  ;;  %v7739_v9 = vsel %vm4102_vm0, %v7737_v4, %v7734_v50  ;;  %6538 = vst.msk [vmem:[#allocation0 + $0x70] sm:$0xff] %vm6284_vm9, %v11531_v61   ;;  %s7778_s1 = smov 3  ;;  %v7902_v61 = vld [vmem:[#allocation1 + $0x686] ss:$16 sm:%s7901_s4]  }
 0x1ee   :  { %v7609_v42 = vld [vmem:[#allocation1 + $0x507] ss:$16 sm:%s7608_s22]   ;;  %v7606_v54 = vsel %vm4106_vm1, %v7604_v57, %v7601_v34  ;;  %11643 = vrot.lane.b32.xlu0 %v11642_v53, %s12006_s14  ;;  %v7747_v57 = vld [vmem:[#allocation1 + $0x6] ss:$16 sm:%s7746_s21]   ;;  %v7744_v34 = vsel %vm4106_vm1, %v7742_v35, %v7739_v9  ;;  %s7781_s22 = smov 12  ;;  %s7919_s21 = smov 12 }
 0x1ef   :  { %v7619_v43 = vld [vmem:[#allocation1 + $0x707] ss:$16 sm:%s7618_s17]   ;;  %v7611_v10 = vsel %vm4110_vm2, %v7609_v42, %v7606_v54  ;;  %v7756_v42 = vld [vmem:[#allocation1 + $0x206] ss:$16 sm:%s7755_s23]   ;;  %6515 = vst.msk [vmem:[#allocation0 + $0x50] sm:$0xff] %vm6284_vm9, %v11530_v22   ;;  %v7749_v53 = vsel %vm4110_vm2, %v7747_v57, %v7744_v34  ;;  %s7791_s17 = smov 192 }
 0x1f0   :  { %v7622_v40 = vld [vmem:[#allocation1 + $0x707] ss:$16 sm:%s7621_s3]   ;;  %v7779_v1 = vld [vmem:[#allocation1 + $0x406] ss:$16 sm:%s7778_s1]   ;;  %s7801_s3 = smov 3  ;;  %s7924_s23 = smov 48 }
 0x1f1   :  { %v7627_v59 = vld [vmem:[#allocation1 + $0x707] ss:$16 sm:%s7626_s30]   ;;  %v7624_v11 = vsel %vm4102_vm0, %v7622_v40, %v7619_v43  ;;  %v7759_v43 = vld [vmem:[#allocation1 + $0x206] ss:$16 sm:%s7758_s27]   ;;  %s7804_s30 = smov 12  ;;  %s7929_s27 = smov 192 }
 0x1f2   :  { %v7632_v12 = vld [vmem:[#allocation1 + $0x707] ss:$16 sm:%s7631_s29]   ;;  %v7629_v63 = vsel %vm4106_vm1, %v7627_v59, %v7624_v11  ;;  %v7761_v54 = vsel %vm4102_vm0, %v7759_v43, %v7756_v42  ;;  %v7764_v40 = vld [vmem:[#allocation1 + $0x206] ss:$16 sm:%s7763_s24]   ;;  %s7809_s29 = smov 48  ;;  %s7939_s24 = smov 3 }
 0x1f3   :  { %v7642_v17 = vld [vmem:[#allocation1 + $0x187] ss:$16 sm:%s7641_s10]   ;;  %v7634_v46 = vsel %vm4110_vm2, %v7632_v12, %v7629_v63  ;;  %v7769_v59 = vld [vmem:[#allocation1 + $0x206] ss:$16 sm:%s7768_s2]   ;;  %v7766_v0 = vsel %vm4106_vm1, %v7764_v40, %v7761_v54  ;;  %s7814_s10 = smov 192  ;;  %s7942_s2 = smov 12 }
 0x1f4   :  { %v7645_v37 = vld [vmem:[#allocation1 + $0x187] ss:$16 sm:%s7644_s18]   ;;  %v11647_v55 = vpack.i.bf16 %v7634_v46, %v7611_v10  ;;  %v7782_v10 = vld [vmem:[#allocation1 + $0x406] ss:$16 sm:%s7781_s22]   ;;  %v7771_v11 = vsel %vm4110_vm2, %v7769_v59, %v7766_v0  ;;  %s7824_s18 = smov 3  ;;  %s7947_s1 = smov 48 }
 0x1f5   :  { %v7650_v56 = vld [vmem:[#allocation1 + $0x187] ss:$16 sm:%s7649_s28]   ;;  %v7647_v51 = vsel %vm4102_vm0, %v7645_v37, %v7642_v17  ;;  %v7784_v12 = vsel %vm4102_vm0, %v7782_v10, %v7779_v1  ;;  %v7792_v63 = vld [vmem:[#allocation1 + $0x406] ss:$16 sm:%s7791_s17]   ;;  %v11662_v37 = vpack.i.bf16 %v7771_v11, %v7749_v53  ;;  %s7827_s28 = smov 12  ;;  %s7952_s22 = smov 192 }
 0x1f6   :  { %v7655_v62 = vld [vmem:[#allocation1 + $0x187] ss:$16 sm:%s7654_s11]   ;;  %v7652_v13 = vsel %vm4106_vm1, %v7650_v56, %v7647_v51  ;;  %11648 = vrot.lane.b32.xlu1 %v11647_v55, %s12006_s14  ;;  %v7802_v46 = vld [vmem:[#allocation1 + $0x606] ss:$16 sm:%s7801_s3]   ;;  %s12007_s11 = smov 48   ;;  %s7965_s17 = smov 12 }
 0x1f7   :  { %v7665_v33 = vld [vmem:[#allocation1 + $0x387] ss:$16 sm:%s7664_s16]   ;;  %v7657_v27 = vsel %vm4110_vm2, %v7655_v62, %v7652_v13  ;;  %v7805_v51 = vld [vmem:[#allocation1 + $0x606] ss:$16 sm:%s7804_s30]   ;;  %v11534_v62 = vpop.permute.xlu0 %11533  ;;  %s7832_s16 = smov 48  ;;  %s7970_s3 = smov 48 }
 0x1f8   :  { %v7668_v6 = vld [vmem:[#allocation1 + $0x387] ss:$16 sm:%s7667_s8]   ;;  %v7807_v13 = vsel %vm4102_vm0, %v7805_v51, %v7802_v46  ;;  %v7828_v36 = vld [vmem:[#allocation1 + $0x86] ss:$16 sm:%s7827_s28]   ;;  %s7837_s8 = smov 192  ;;  %s7975_s30 = smov 192 }
 0x1f9   :  { %v7673_v15 = vld [vmem:[#allocation1 + $0x387] ss:$16 sm:%s7672_s25]   ;;  %v7670_v30 = vsel %vm4102_vm0, %v7668_v6, %v7665_v33  ;;  %v11539_v33 = vpop.permute.xlu1 %11538  ;;  %v7810_v6 = vld [vmem:[#allocation1 + $0x606] ss:$16 sm:%s7809_s29]   ;;  %s7847_s25 = smov 3  ;;  %s7985_s29 = smov 3 }
 0x1fa   :  { %v7678_v28 = vld [vmem:[#allocation1 + $0x387] ss:$16 sm:%s7677_s9]   ;;  %v7675_v44 = vsel %vm4106_vm1, %v7673_v15, %v7670_v30  ;;  %v7815_v15 = vld [vmem:[#allocation1 + $0x606] ss:$16 sm:%s7814_s10]   ;;  %v11535_v30 = vunpack.i.l.bf16 %v11534_v62  ;;  %s7850_s9 = smov 12  ;;  %s7988_s10 = smov 12 }
 0x1fb   :  { %v7688_v29 = vld [vmem:[#allocation1 + $0x587] ss:$16 sm:%s7687_s12]   ;;  %v7680_v25 = vsel %vm4110_vm2, %v7678_v28, %v7675_v44  ;;  %v7812_v28 = vsel %vm4106_vm1, %v7810_v6, %v7807_v13  ;;  %v11541_v44 = vunpack.i.h.bf16 %v11539_v33  ;;  %v7833_v31 = vld [vmem:[#allocation1 + $0x86] ss:$16 sm:%s7832_s16]   ;;  %s7855_s12 = smov 48  ;;  %v14023_v48 = vpop.permute.xlu0 %11543  ;;  %s7998_s28 = smov 192 }
 0x1fc   :  { %v7691_v60 = vld [vmem:[#allocation1 + $0x587] ss:$16 sm:%s7690_s0]   ;;  %v11652_v2 = vpack.i.bf16 %v7680_v25, %v7657_v27  ;;  %v11536_v27 = vunpack.i.h.bf16 %v11534_v62  ;;  %v7838_v39 = vld [vmem:[#allocation1 + $0x86] ss:$16 sm:%s7837_s8]   ;;  %6561 = vst.msk [vmem:[#allocation0 + $0x18] sm:$0xff] %vm6284_vm9, %v11535_v30   ;;  %s7860_s0 = smov 192 }
 0x1fd   :  { %v7696_v21 = vld [vmem:[#allocation1 + $0x587] ss:$16 sm:%s7695_s6]   ;;  %v7693_v5 = vsel %vm4102_vm0, %v7691_v60, %v7688_v29  ;;  %v7825_v29 = vld [vmem:[#allocation1 + $0x86] ss:$16 sm:%s7824_s18]   ;;  %v11540_v60 = vunpack.i.l.bf16 %v11539_v33  ;;  %6630 = vst.msk [vmem:[#allocation0 + $0x78] sm:$0xff] %vm6284_vm9, %v11541_v44   ;;  %s7870_s6 = smov 3 }
 0x1fe   :  { %v7701_v24 = vld [vmem:[#allocation1 + $0x587] ss:$16 sm:%s7700_s7]   ;;  %v7698_v14 = vsel %vm4106_vm1, %v7696_v21, %v7693_v5  ;;  %11653 = vrot.lane.b32.xlu0 %v11652_v2, %s12006_s14  ;;  %v7817_v21 = vsel %vm4110_vm2, %v7815_v15, %v7812_v28  ;;  %v7830_v41 = vsel %vm4102_vm0, %v7828_v36, %v7825_v29  ;;  %6584 = vst.msk [vmem:[#allocation0 + $0x38] sm:$0xff] %vm6284_vm9, %v11536_v27   ;;  %v7856_v2 = vld [vmem:[#allocation1 + $0x286] ss:$16 sm:%s7855_s12]   ;;  %s7873_s7 = smov 12 }
 0x1ff   :  { %v7711_v7 = vld [vmem:[#allocation1 + $0x787] ss:$16 sm:%s7710_s26]   ;;  %v7703_v52 = vsel %vm4110_vm2, %v7701_v24, %v7698_v14  ;;  %v7835_v5 = vsel %vm4106_vm1, %v7833_v31, %v7830_v41  ;;  %v7848_v24 = vld [vmem:[#allocation1 + $0x286] ss:$16 sm:%s7847_s25]   ;;  %6607 = vst.msk [vmem:[#allocation0 + $0x58] sm:$0xff] %vm6284_vm9, %v11540_v60   ;;  %s7878_s26 = smov 48  ;;  %v14041_v6 = vpop.permute.xlu0 %11553 }
 0x200   :  { %v7714_v19 = vld [vmem:[#allocation1 + $0x787] ss:$16 sm:%s7713_s15]   ;;  %v7840_v3 = vsel %vm4110_vm2, %v7838_v39, %v7835_v5  ;;  %v7861_v14 = vld [vmem:[#allocation1 + $0x286] ss:$16 sm:%s7860_s0]   ;;  %s7883_s15 = smov 192  ;;  %s7993_s18 = smov 48 }
 0x201   :  { %v7719_v8 = vld [vmem:[#allocation1 + $0x787] ss:$16 sm:%s7718_s13]   ;;  %v7716_v16 = vsel %vm4102_vm0, %v7714_v19, %v7711_v7  ;;  %v7851_v7 = vld [vmem:[#allocation1 + $0x286] ss:$16 sm:%s7850_s9]   ;;  %s7893_s13 = smov 3  ;;  %s8008_s16 = smov 3 }
 0x202   :  { %v7724_v18 = vld [vmem:[#allocation1 + $0x787] ss:$16 sm:%s7723_s19]   ;;  %v7721_v20 = vsel %vm4106_vm1, %v7719_v8, %v7716_v16  ;;  %11663 = vrot.lane.b32.xlu0 %v11662_v37, %s12007_s11  ;;  %v7853_v26 = vsel %vm4102_vm0, %v7851_v7, %v7848_v24  ;;  %v7871_v8 = vld [vmem:[#allocation1 + $0x486] ss:$16 sm:%s7870_s6]   ;;  %s7896_s19 = smov 12  ;;  %s8011_s8 = smov 12 }
 0x203   :  { %v7726_v23 = vsel %vm4110_vm2, %v7724_v18, %v7721_v20  ;;  %v7858_v19 = vsel %vm4106_vm1, %v7856_v2, %v7853_v26  ;;  %v7874_v32 = vld [vmem:[#allocation1 + $0x486] ss:$16 sm:%s7873_s7]   ;;  %v14025_v20 = vpop.permute.xlu1 %11548  ;;  %s8016_s25 = smov 48  ;;  %s8021_s9 = smov 192 }
 0x204   :  { %v11657_v58 = vpack.i.bf16 %v7726_v23, %v7703_v52  ;;  %v7863_v49 = vsel %vm4110_vm2, %v7861_v14, %v7858_v19  ;;  %v7876_v38 = vsel %vm4102_vm0, %v7874_v32, %v7871_v8  ;;  %v7879_v45 = vld [vmem:[#allocation1 + $0x486] ss:$16 sm:%s7878_s26]   ;;  %s8031_s12 = smov 3  ;;  %s8034_s0 = smov 12  ;;  %v11546_v19 = vunpack.i.h.bf16 %v14023_v48 }
 0x205   :  { %v7884_v52 = vld [vmem:[#allocation1 + $0x486] ss:$16 sm:%s7883_s15]   ;;  %v11672_v16 = vpack.i.bf16 %v7863_v49, %v7840_v3  ;;  %v7881_v18 = vsel %vm4106_vm1, %v7879_v45, %v7876_v38  ;;  %s8039_s6 = smov 48  ;;  %s8044_s7 = smov 192  ;;  %v11545_v38 = vunpack.i.l.bf16 %v14023_v48  ;;  %v11551_v45 = vunpack.i.h.bf16 %v14025_v20 }
 0x206   :  { %11658 = vrot.lane.b32.xlu1 %v11657_v58, %s12006_s14  ;;  %s7786_s14 = smov 48  ;;  %v7894_v50 = vld [vmem:[#allocation1 + $0x686] ss:$16 sm:%s7893_s13]   ;;  %v7886_v4 = vsel %vm4110_vm2, %v7884_v52, %v7881_v18  ;;  %s8054_s26 = smov 3  ;;  %v11550_v52 = vunpack.i.l.bf16 %v14025_v20  ;;  %v11556_v48 = vunpack.i.h.bf16 %v14041_v6  ;;  %v11555_v20 = vunpack.i.l.bf16 %v14041_v6  ;;  %6675 = vst.msk [vmem:[#allocation0 + $0x20] sm:$0xff] %vm6651_vm10, %v11546_v19  }
 0x207   :  { %v7787_v17 = vld [vmem:[#allocation1 + $0x406] ss:$16 sm:%s7786_s14]   ;;  %11673 = vrot.lane.b32.xlu0 %v11672_v16, %s12007_s11  ;;  %s7962_s14 = smov 3  ;;  %v14043_v15 = vpop.permute.xlu1 %11558  ;;  %s8057_s15 = smov 12  ;;  %6652 = vst.msk [vmem:[#allocation0] sm:$0xff] %vm6651_vm10, %v11545_v38   ;;  %6721 = vst.msk [vmem:[#allocation0 + $0x60] sm:$0xff] %vm6651_vm10, %v11551_v45  }
 0x208   :  { %v7789_v56 = vsel %vm4106_vm1, %v7787_v17, %v7784_v12  ;;  %v7897_v47 = vld [vmem:[#allocation1 + $0x686] ss:$16 sm:%s7896_s19]   ;;  %s8062_s13 = smov 48  ;;  %s8067_s19 = smov 192  ;;  %6698 = vst.msk [vmem:[#allocation0 + $0x40] sm:$0xff] %vm6651_vm10, %v11550_v52   ;;  %6744 = vst.msk [vmem:[#allocation0 + $0x8] sm:$0xff] %vm6651_vm10, %v11555_v20  }
 0x209   :  { %v7794_v55 = vsel %vm4110_vm2, %v7792_v63, %v7789_v56  ;;  %v7899_v35 = vsel %vm4102_vm0, %v7897_v47, %v7894_v50  ;;  %v7907_v22 = vld [vmem:[#allocation1 + $0x686] ss:$16 sm:%s7906_s5]   ;;  %s8077_s4 = smov 3  ;;  %s8080_s5 = smov 12  ;;  %6767 = vst.msk [vmem:[#allocation0 + $0x28] sm:$0xff] %vm6651_vm10, %v11556_v48  }
 0x20a   :  { %v11667_v25 = vpack.i.bf16 %v7817_v21, %v7794_v55  ;;  %v7904_v23 = vsel %vm4106_vm1, %v7902_v61, %v7899_v35  ;;  %v7917_v9 = vld [vmem:[#allocation1 + $0x106] ss:$16 sm:%s7916_s20]   ;;  %s8085_s20 = smov 48 }
 0x20b   :  { %v7920_v57 = vld [vmem:[#allocation1 + $0x106] ss:$16 sm:%s7919_s21]   ;;  %v7909_v58 = vsel %vm4110_vm2, %v7907_v22, %v7904_v23  ;;  %s8090_s21 = smov 192  ;;  %v11561_v23 = vunpack.i.h.bf16 %v14043_v15 }
 0x20c   :  { %11668 = vrot.lane.b32.xlu1 %v11667_v25, %s12007_s11  ;;  %v7922_v34 = vsel %vm4102_vm0, %v7920_v57, %v7917_v9  ;;  %v7925_v42 = vld [vmem:[#allocation1 + $0x106] ss:$16 sm:%s7924_s23]   ;;  %v11677_v53 = vpack.i.bf16 %v7909_v58, %v7886_v4  ;;  %v11560_v9 = vunpack.i.l.bf16 %v14043_v15  ;;  %v11564_v57 = vpop.permute.xlu0 %11563  ;;  %v11569_v58 = vpop.permute.xlu1 %11568  ;;  %s8100_s23 = smov 3 }
 0x20d   :  { %v7930_v43 = vld [vmem:[#allocation1 + $0x106] ss:$16 sm:%s7929_s27]   ;;  %v7927_v54 = vsel %vm4106_vm1, %v7925_v42, %v7922_v34  ;;  %s8103_s27 = smov 12  ;;  %6813 = vst.msk [vmem:[#allocation0 + $0x68] sm:$0xff] %vm6651_vm10, %v11561_v23  }
 0x20e   :  { %v7940_v40 = vld [vmem:[#allocation1 + $0x306] ss:$16 sm:%s7939_s24]   ;;  %v7932_v0 = vsel %vm4110_vm2, %v7930_v43, %v7927_v54  ;;  %v11566_v54 = vunpack.i.h.bf16 %v11564_v57  ;;  %s8108_s24 = smov 48  ;;  %6790 = vst.msk [vmem:[#allocation0 + $0x48] sm:$0xff] %vm6651_vm10, %v11560_v9  }
 0x20f   :  { %v7943_v59 = vld [vmem:[#allocation1 + $0x306] ss:$16 sm:%s7942_s2]   ;;  %s8113_s2 = smov 192 }
 0x210   :  { %v7945_v1 = vsel %vm4102_vm0, %v7943_v59, %v7940_v40  ;;  %v7948_v10 = vld [vmem:[#allocation1 + $0x306] ss:$16 sm:%s7947_s1]   ;;  %11678 = vrot.lane.b32.xlu1 %v11677_v53, %s12007_s11  ;;  %v11565_v40 = vunpack.i.l.bf16 %v11564_v57  ;;  %s8122_s1 = smov 3  ;;  %6859 = vst.msk [vmem:[#allocation0 + $0x30] sm:$0xff] %vm6651_vm10, %v11566_v54  }
 0x211   :  { %v7953_v11 = vld [vmem:[#allocation1 + $0x306] ss:$16 sm:%s7952_s22]   ;;  %v7950_v12 = vsel %vm4106_vm1, %v7948_v10, %v7945_v1  ;;  %v8104_v1 = vld [vmem:[#allocation1 + $0x5] ss:$16 sm:%s8103_s27]   ;;  %v11571_v10 = vunpack.i.h.bf16 %v11569_v58  ;;  %s8125_s22 = smov 12  ;;  %s8273_s27 = smov 192 }
 0x212   :  { %v7963_v17 = vld [vmem:[#allocation1 + $0x506] ss:$16 sm:%s7962_s14]   ;;  %v7955_v37 = vsel %vm4110_vm2, %v7953_v11, %v7950_v12  ;;  %v11570_v11 = vunpack.i.l.bf16 %v11569_v58  ;;  %s8130_s14 = smov 48  ;;  %6836 = vst.msk [vmem:[#allocation0 + $0x10] sm:$0xff] %vm6651_vm10, %v11565_v40  }
 0x213   :  { %v7966_v63 = vld [vmem:[#allocation1 + $0x506] ss:$16 sm:%s7965_s17]   ;;  %v11682_v62 = vpack.i.bf16 %v7955_v37, %v7932_v0  ;;  %v8101_v0 = vld [vmem:[#allocation1 + $0x5] ss:$16 sm:%s8100_s23]   ;;  %s8135_s17 = smov 192  ;;  %6905 = vst.msk [vmem:[#allocation0 + $0x70] sm:$0xff] %vm6651_vm10, %v11571_v10  }
 0x214   :  { %v7968_v56 = vsel %vm4102_vm0, %v7966_v63, %v7963_v17  ;;  %v7971_v46 = vld [vmem:[#allocation1 + $0x506] ss:$16 sm:%s7970_s3]   ;;  %v8106_v17 = vsel %vm4102_vm0, %v8104_v1, %v8101_v0  ;;  %v8109_v63 = vld [vmem:[#allocation1 + $0x5] ss:$16 sm:%s8108_s24]   ;;  %s8145_s3 = smov 3  ;;  %6882 = vst.msk [vmem:[#allocation0 + $0x50] sm:$0xff] %vm6651_vm10, %v11570_v11  }
 0x215   :  { %v7976_v51 = vld [vmem:[#allocation1 + $0x506] ss:$16 sm:%s7975_s30]   ;;  %v7973_v33 = vsel %vm4106_vm1, %v7971_v46, %v7968_v56  ;;  %11683 = vrot.lane.b32.xlu0 %v11682_v62, %s12007_s11  ;;  %v8114_v37 = vld [vmem:[#allocation1 + $0x5] ss:$16 sm:%s8113_s2]   ;;  %v8111_v46 = vsel %vm4106_vm1, %v8109_v63, %v8106_v17  ;;  %s8153_s30 = smov 48  ;;  %s8268_s23 = smov 48 }
 0x216   :  { %v7986_v55 = vld [vmem:[#allocation1 + $0x706] ss:$16 sm:%s7985_s29]   ;;  %v7978_v27 = vsel %vm4110_vm2, %v7976_v51, %v7973_v33  ;;  %v8123_v51 = vld [vmem:[#allocation1 + $0x205] ss:$16 sm:%s8122_s1]   ;;  %s8158_s29 = smov 192  ;;  %s8283_s24 = smov 3 }
 0x217   :  { %v7989_v13 = vld [vmem:[#allocation1 + $0x706] ss:$16 sm:%s7988_s10]   ;;  %v8126_v62 = vld [vmem:[#allocation1 + $0x205] ss:$16 sm:%s8125_s22]   ;;  %s8168_s10 = smov 3  ;;  %s8286_s2 = smov 12 }
 0x218   :  { %v7991_v30 = vsel %vm4102_vm0, %v7989_v13, %v7986_v55  ;;  %v7994_v28 = vld [vmem:[#allocation1 + $0x706] ss:$16 sm:%s7993_s18]   ;;  %v8131_v33 = vld [vmem:[#allocation1 + $0x205] ss:$16 sm:%s8130_s14]   ;;  %v8116_v55 = vsel %vm4110_vm2, %v8114_v37, %v8111_v46  ;;  %v8128_v13 = vsel %vm4102_vm0, %v8126_v62, %v8123_v51  ;;  %s8171_s18 = smov 12  ;;  %s8291_s1 = smov 48 }
 0x219   :  { %v7999_v29 = vld [vmem:[#allocation1 + $0x706] ss:$16 sm:%s7998_s28]   ;;  %v7996_v36 = vsel %vm4106_vm1, %v7994_v28, %v7991_v30  ;;  %v8136_v6 = vld [vmem:[#allocation1 + $0x205] ss:$16 sm:%s8135_s17]   ;;  %s8176_s28 = smov 48  ;;  %s8296_s22 = smov 192 }
 0x21a   :  { %v8009_v44 = vld [vmem:[#allocation1 + $0x186] ss:$16 sm:%s8008_s16]   ;;  %v8001_v21 = vsel %vm4110_vm2, %v7999_v29, %v7996_v36  ;;  %v8146_v15 = vld [vmem:[#allocation1 + $0x405] ss:$16 sm:%s8145_s3]   ;;  %s8181_s16 = smov 192  ;;  %s8306_s14 = smov 3 }
 0x21b   :  { %v8012_v60 = vld [vmem:[#allocation1 + $0x186] ss:$16 sm:%s8011_s8]   ;;  %v11687_v25 = vpack.i.bf16 %v8001_v21, %v7978_v27  ;;  %v8133_v27 = vsel %vm4106_vm1, %v8131_v33, %v8128_v13  ;;  %v8154_v28 = vld [vmem:[#allocation1 + $0x405] ss:$16 sm:%s8153_s30]   ;;  %v11574_v21 = vpop.permute.xlu0 %11573  ;;  %s8191_s8 = smov 3  ;;  %s8309_s17 = smov 12 }
 0x21c   :  { %v8014_v41 = vsel %vm4102_vm0, %v8012_v60, %v8009_v44  ;;  %v8017_v31 = vld [vmem:[#allocation1 + $0x186] ss:$16 sm:%s8016_s25]   ;;  %v8138_v29 = vsel %vm4110_vm2, %v8136_v6, %v8133_v27  ;;  %v8159_v44 = vld [vmem:[#allocation1 + $0x405] ss:$16 sm:%s8158_s29]   ;;  %s8194_s25 = smov 12  ;;  %s8314_s3 = smov 48 }
 0x21d   :  { %v8022_v39 = vld [vmem:[#allocation1 + $0x186] ss:$16 sm:%s8021_s9]   ;;  %v8019_v5 = vsel %vm4106_vm1, %v8017_v31, %v8014_v41  ;;  %11688 = vrot.lane.b32.xlu1 %v11687_v25, %s12007_s11  ;;  %v8169_v60 = vld [vmem:[#allocation1 + $0x605] ss:$16 sm:%s8168_s10]   ;;  %v11579_v41 = vpop.permute.xlu1 %11578  ;;  %v11702_v31 = vpack.i.bf16 %v8138_v29, %v8116_v55  ;;  %s8199_s9 = smov 48  ;;  %s8329_s30 = smov 3 }
 0x21e   :  { %v8032_v24 = vld [vmem:[#allocation1 + $0x386] ss:$16 sm:%s8031_s12]   ;;  %v8024_v3 = vsel %vm4110_vm2, %v8022_v39, %v8019_v5  ;;  %v8172_v25 = vld [vmem:[#allocation1 + $0x605] ss:$16 sm:%s8171_s18]   ;;  %v11581_v19 = vunpack.i.h.bf16 %v11579_v41  ;;  %s12008_s12 = smov 40   ;;  %s8332_s29 = smov 12 }
 0x21f   :  { %v8035_v7 = vld [vmem:[#allocation1 + $0x386] ss:$16 sm:%s8034_s0]   ;;  %v8177_v5 = vld [vmem:[#allocation1 + $0x605] ss:$16 sm:%s8176_s28]   ;;  %s8204_s0 = smov 192  ;;  %v14111_v0 = vpop.permute.xlu0 %11583  ;;  %s8337_s10 = smov 48 }
 0x220   :  { %v8037_v26 = vsel %vm4102_vm0, %v8035_v7, %v8032_v24  ;;  %v8040_v2 = vld [vmem:[#allocation1 + $0x386] ss:$16 sm:%s8039_s6]   ;;  %v11576_v24 = vunpack.i.h.bf16 %v11574_v21  ;;  %v11575_v7 = vunpack.i.l.bf16 %v11574_v21  ;;  %v8200_v38 = vld [vmem:[#allocation1 + $0x85] ss:$16 sm:%s8199_s9]   ;;  %s8214_s6 = smov 3  ;;  %6997 = vst.msk [vmem:[#allocation0 + $0x78] sm:$0xff] %vm6651_vm10, %v11581_v19  }
 0x221   :  { %v8045_v14 = vld [vmem:[#allocation1 + $0x386] ss:$16 sm:%s8044_s7]   ;;  %v8042_v8 = vsel %vm4106_vm1, %v8040_v2, %v8037_v26  ;;  %v8174_v26 = vsel %vm4102_vm0, %v8172_v25, %v8169_v60  ;;  %v8182_v2 = vld [vmem:[#allocation1 + $0x605] ss:$16 sm:%s8181_s16]   ;;  %s8217_s7 = smov 12  ;;  %v14113_v1 = vpop.permute.xlu1 %11588  ;;  %s8342_s18 = smov 192 }
 0x222   :  { %v8055_v32 = vld [vmem:[#allocation1 + $0x586] ss:$16 sm:%s8054_s26]   ;;  %v8047_v16 = vsel %vm4110_vm2, %v8045_v14, %v8042_v8  ;;  %v8192_v14 = vld [vmem:[#allocation1 + $0x85] ss:$16 sm:%s8191_s8]   ;;  %v11580_v8 = vunpack.i.l.bf16 %v11579_v41  ;;  %6928 = vst.msk [vmem:[#allocation0 + $0x18] sm:$0xff] %vm6651_vm10, %v11575_v7   ;;  %6951 = vst.msk [vmem:[#allocation0 + $0x38] sm:$0xff] %vm6651_vm10, %v11576_v24  }
 0x223   :  { %v8058_v49 = vld [vmem:[#allocation1 + $0x586] ss:$16 sm:%s8057_s15]   ;;  %v11692_v4 = vpack.i.bf16 %v8047_v16, %v8024_v3  ;;  %v8205_v16 = vld [vmem:[#allocation1 + $0x85] ss:$16 sm:%s8204_s0]   ;;  %s8222_s26 = smov 48  ;;  %s8227_s15 = smov 192 }
 0x224   :  { %v8060_v18 = vsel %vm4102_vm0, %v8058_v49, %v8055_v32  ;;  %v8063_v50 = vld [vmem:[#allocation1 + $0x586] ss:$16 sm:%s8062_s13]   ;;  %v8179_v32 = vsel %vm4106_vm1, %v8177_v5, %v8174_v26  ;;  %v8195_v49 = vld [vmem:[#allocation1 + $0x85] ss:$16 sm:%s8194_s25]   ;;  %6974 = vst.msk [vmem:[#allocation0 + $0x58] sm:$0xff] %vm6651_vm10, %v11580_v8   ;;  %s8237_s13 = smov 3 }
 0x225   :  { %v8068_v47 = vld [vmem:[#allocation1 + $0x586] ss:$16 sm:%s8067_s19]   ;;  %v8065_v35 = vsel %vm4106_vm1, %v8063_v50, %v8060_v18  ;;  %11693 = vrot.lane.b32.xlu0 %v11692_v4, %s12007_s11  ;;  %v8184_v45 = vsel %vm4110_vm2, %v8182_v2, %v8179_v32  ;;  %v8197_v52 = vsel %vm4102_vm0, %v8195_v49, %v8192_v14  ;;  %v8215_v18 = vld [vmem:[#allocation1 + $0x285] ss:$16 sm:%s8214_s6]   ;;  %s8240_s19 = smov 12  ;;  %s8352_s28 = smov 3  ;;  %v14131_v26 = vpop.permute.xlu1 %11598 }
 0x226   :  { %v8078_v61 = vld [vmem:[#allocation1 + $0x786] ss:$16 sm:%s8077_s4]   ;;  %v8070_v34 = vsel %vm4110_vm2, %v8068_v47, %v8065_v35  ;;  %v8202_v47 = vsel %vm4106_vm1, %v8200_v38, %v8197_v52  ;;  %v8218_v48 = vld [vmem:[#allocation1 + $0x285] ss:$16 sm:%s8217_s7]   ;;  %s8245_s4 = smov 48  ;;  %s8355_s16 = smov 12 }
 0x227   :  { %v8081_v22 = vld [vmem:[#allocation1 + $0x786] ss:$16 sm:%s8080_s5]   ;;  %v8223_v20 = vld [vmem:[#allocation1 + $0x285] ss:$16 sm:%s8222_s26]   ;;  %v8207_v4 = vsel %vm4110_vm2, %v8205_v16, %v8202_v47  ;;  %v8220_v35 = vsel %vm4102_vm0, %v8218_v48, %v8215_v18  ;;  %s8250_s5 = smov 192  ;;  %s8360_s8 = smov 48 }
 0x228   :  { %v8083_v42 = vsel %vm4102_vm0, %v8081_v22, %v8078_v61  ;;  %v8086_v43 = vld [vmem:[#allocation1 + $0x786] ss:$16 sm:%s8085_s20]   ;;  %v8228_v61 = vld [vmem:[#allocation1 + $0x285] ss:$16 sm:%s8227_s15]   ;;  %v8225_v23 = vsel %vm4106_vm1, %v8223_v20, %v8220_v35  ;;  %s8260_s20 = smov 3  ;;  %s8365_s25 = smov 192 }
 0x229   :  { %v8091_v53 = vld [vmem:[#allocation1 + $0x786] ss:$16 sm:%s8090_s21]   ;;  %v8088_v59 = vsel %vm4106_vm1, %v8086_v43, %v8083_v42  ;;  %11703 = vrot.lane.b32.xlu0 %v11702_v31, %s12008_s12  ;;  %v8238_v22 = vld [vmem:[#allocation1 + $0x485] ss:$16 sm:%s8237_s13]   ;;  %v8230_v58 = vsel %vm4110_vm2, %v8228_v61, %v8225_v23  ;;  %s8263_s21 = smov 12  ;;  %s8375_s9 = smov 3  ;;  %v11586_v23 = vunpack.i.h.bf16 %v14111_v0 }
 0x22a   :  { %v8093_v12 = vsel %vm4110_vm2, %v8091_v53, %v8088_v59  ;;  %v8241_v9 = vld [vmem:[#allocation1 + $0x485] ss:$16 sm:%s8240_s19]   ;;  %v11712_v53 = vpack.i.bf16 %v8230_v58, %v8207_v4  ;;  %s8378_s0 = smov 12  ;;  %s8383_s6 = smov 48 }
 0x22b   :  { %v11697_v56 = vpack.i.bf16 %v8093_v12, %v8070_v34  ;;  %v8246_v57 = vld [vmem:[#allocation1 + $0x485] ss:$16 sm:%s8245_s4]   ;;  %v8243_v34 = vsel %vm4102_vm0, %v8241_v9, %v8238_v22  ;;  %s8388_s7 = smov 192  ;;  %s8398_s26 = smov 3  ;;  %7042 = vst.msk [vmem:[#allocation0 + $0x20] sm:$0xff] %vm7018_vm11, %v11586_v23  }
 0x22c   :  { %v8251_v42 = vld [vmem:[#allocation1 + $0x485] ss:$16 sm:%s8250_s5]   ;;  %v8248_v54 = vsel %vm4106_vm1, %v8246_v57, %v8243_v34  ;;  %s8401_s15 = smov 12  ;;  %s8406_s13 = smov 48  ;;  %v11585_v34 = vunpack.i.l.bf16 %v14111_v0 }
 0x22d   :  { %11698 = vrot.lane.b32.xlu1 %v11697_v56, %s12007_s11  ;;  %s8148_s11 = smov 12  ;;  %v8261_v43 = vld [vmem:[#allocation1 + $0x685] ss:$16 sm:%s8260_s20]   ;;  %v8253_v10 = vsel %vm4110_vm2, %v8251_v42, %v8248_v54  ;;  %11713 = vrot.lane.b32.xlu0 %v11712_v53, %s12008_s12  ;;  %s8411_s19 = smov 192  ;;  %v11591_v42 = vunpack.i.h.bf16 %v14113_v1 }
 0x22e   :  { %v8149_v30 = vld [vmem:[#allocation1 + $0x405] ss:$16 sm:%s8148_s11]   ;;  %s8319_s11 = smov 192  ;;  %s8421_s4 = smov 3  ;;  %7019 = vst.msk [vmem:[#allocation0] sm:$0xff] %vm7018_vm11, %v11585_v34  }
 0x22f   :  { %v8151_v36 = vsel %vm4102_vm0, %v8149_v30, %v8146_v15  ;;  %v8264_v40 = vld [vmem:[#allocation1 + $0x685] ss:$16 sm:%s8263_s21]   ;;  %s8424_s5 = smov 12  ;;  %s8429_s20 = smov 48  ;;  %7088 = vst.msk [vmem:[#allocation0 + $0x60] sm:$0xff] %vm7018_vm11, %v11591_v42  }
 0x230   :  { %v8156_v39 = vsel %vm4106_vm1, %v8154_v28, %v8151_v36  ;;  %v8269_v59 = vld [vmem:[#allocation1 + $0x685] ss:$16 sm:%s8268_s23]   ;;  %v8266_v11 = vsel %vm4102_vm0, %v8264_v40, %v8261_v43  ;;  %s8434_s21 = smov 192  ;;  %s8444_s23 = smov 3  ;;  %v11590_v43 = vunpack.i.l.bf16 %v14113_v1 }
 0x231   :  { %v8161_v3 = vsel %vm4110_vm2, %v8159_v44, %v8156_v39  ;;  %v8274_v12 = vld [vmem:[#allocation1 + $0x685] ss:$16 sm:%s8273_s27]   ;;  %v8271_v63 = vsel %vm4106_vm1, %v8269_v59, %v8266_v11  ;;  %s8447_s27 = smov 12 }
 0x232   :  { %v11707_v50 = vpack.i.bf16 %v8184_v45, %v8161_v3  ;;  %v8284_v17 = vld [vmem:[#allocation1 + $0x105] ss:$16 sm:%s8283_s24]   ;;  %v8276_v46 = vsel %vm4110_vm2, %v8274_v12, %v8271_v63  ;;  %v14129_v3 = vpop.permute.xlu0 %11593  ;;  %s8452_s24 = smov 48  ;;  %v11601_v63 = vunpack.i.h.bf16 %v14131_v26  ;;  %7065 = vst.msk [vmem:[#allocation0 + $0x40] sm:$0xff] %vm7018_vm11, %v11590_v43  }
 0x233   :  { %v8287_v37 = vld [vmem:[#allocation1 + $0x105] ss:$16 sm:%s8286_s2]   ;;  %v11717_v55 = vpack.i.bf16 %v8276_v46, %v8253_v10  ;;  %v11596_v0 = vunpack.i.h.bf16 %v14129_v3  ;;  %v11595_v1 = vunpack.i.l.bf16 %v14129_v3  ;;  %s8457_s2 = smov 192  ;;  %v11609_v46 = vpop.permute.xlu1 %11608 }
 0x234   :  { %11708 = vrot.lane.b32.xlu1 %v11707_v50, %s12008_s12  ;;  %v8292_v56 = vld [vmem:[#allocation1 + $0x105] ss:$16 sm:%s8291_s1]   ;;  %v8289_v51 = vsel %vm4102_vm0, %v8287_v37, %v8284_v17  ;;  %s8467_s1 = smov 3  ;;  %v11600_v37 = vunpack.i.l.bf16 %v14131_v26  ;;  %7180 = vst.msk [vmem:[#allocation0 + $0x68] sm:$0xff] %vm7018_vm11, %v11601_v63  }
 0x235   :  { %v8297_v62 = vld [vmem:[#allocation1 + $0x105] ss:$16 sm:%s8296_s22]   ;;  %v8294_v13 = vsel %vm4106_vm1, %v8292_v56, %v8289_v51  ;;  %s8470_s22 = smov 12  ;;  %7111 = vst.msk [vmem:[#allocation0 + $0x8] sm:$0xff] %vm7018_vm11, %v11595_v1   ;;  %7134 = vst.msk [vmem:[#allocation0 + $0x28] sm:$0xff] %vm7018_vm11, %v11596_v0  }
 0x236   :  { %v8307_v33 = vld [vmem:[#allocation1 + $0x305] ss:$16 sm:%s8306_s14]   ;;  %v8299_v27 = vsel %vm4110_vm2, %v8297_v62, %v8294_v13  ;;  %v11604_v56 = vpop.permute.xlu0 %11603  ;;  %s8475_s14 = smov 48  ;;  %7157 = vst.msk [vmem:[#allocation0 + $0x48] sm:$0xff] %vm7018_vm11, %v11600_v37  }
 0x237   :  { %v8310_v6 = vld [vmem:[#allocation1 + $0x305] ss:$16 sm:%s8309_s17]   ;;  %v11606_v13 = vunpack.i.h.bf16 %v11604_v56  ;;  %s8480_s17 = smov 192 }
 0x238   :  { %v8315_v15 = vld [vmem:[#allocation1 + $0x305] ss:$16 sm:%s8314_s3]   ;;  %v8312_v30 = vsel %vm4102_vm0, %v8310_v6, %v8307_v33  ;;  %11718 = vrot.lane.b32.xlu1 %v11717_v55, %s12008_s12  ;;  %v8468_v55 = vld [vmem:[#allocation1 + $0x4] ss:$16 sm:%s8467_s1]   ;;  %v11605_v6 = vunpack.i.l.bf16 %v11604_v56  ;;  %s8489_s3 = smov 3  ;;  %s8635_s1 = smov 48 }
 0x239   :  { %v8320_v28 = vld [vmem:[#allocation1 + $0x305] ss:$16 sm:%s8319_s11]   ;;  %v8317_v36 = vsel %vm4106_vm1, %v8315_v15, %v8312_v30  ;;  %v8476_v30 = vld [vmem:[#allocation1 + $0x4] ss:$16 sm:%s8475_s14]   ;;  %s8492_s11 = smov 12  ;;  %7226 = vst.msk [vmem:[#allocation0 + $0x30] sm:$0xff] %vm7018_vm11, %v11606_v13  }
 0x23a   :  { %v8330_v29 = vld [vmem:[#allocation1 + $0x505] ss:$16 sm:%s8329_s30]   ;;  %v8322_v21 = vsel %vm4110_vm2, %v8320_v28, %v8317_v36  ;;  %v11611_v28 = vunpack.i.h.bf16 %v11609_v46  ;;  %s8497_s30 = smov 48  ;;  %7203 = vst.msk [vmem:[#allocation0 + $0x10] sm:$0xff] %vm7018_vm11, %v11605_v6   ;;  %s8650_s14 = smov 3 }
 0x23b   :  { %v8333_v44 = vld [vmem:[#allocation1 + $0x505] ss:$16 sm:%s8332_s29]   ;;  %v11722_v25 = vpack.i.bf16 %v8322_v21, %v8299_v27  ;;  %v8471_v27 = vld [vmem:[#allocation1 + $0x4] ss:$16 sm:%s8470_s22]   ;;  %s8502_s29 = smov 192  ;;  %s8640_s22 = smov 192 }
 0x23c   :  { %v8338_v60 = vld [vmem:[#allocation1 + $0x505] ss:$16 sm:%s8337_s10]   ;;  %v8335_v41 = vsel %vm4102_vm0, %v8333_v44, %v8330_v29  ;;  %v11610_v29 = vunpack.i.l.bf16 %v11609_v46  ;;  %v8473_v44 = vsel %vm4102_vm0, %v8471_v27, %v8468_v55  ;;  %7272 = vst.msk [vmem:[#allocation0 + $0x70] sm:$0xff] %vm7018_vm11, %v11611_v28   ;;  %s8512_s10 = smov 3  ;;  %v8636_v27 = vld [vmem:[#allocation1 + $0x684] ss:$16 sm:%s8635_s1]  }
 0x23d   :  { %v8343_v31 = vld [vmem:[#allocation1 + $0x505] ss:$16 sm:%s8342_s18]   ;;  %v8340_v5 = vsel %vm4106_vm1, %v8338_v60, %v8335_v41  ;;  %11723 = vrot.lane.b32.xlu0 %v11722_v25, %s12008_s12  ;;  %v8481_v60 = vld [vmem:[#allocation1 + $0x4] ss:$16 sm:%s8480_s17]   ;;  %v8478_v41 = vsel %vm4106_vm1, %v8476_v30, %v8473_v44  ;;  %s8515_s18 = smov 12  ;;  %s8653_s17 = smov 12 }
 0x23e   :  { %v8353_v39 = vld [vmem:[#allocation1 + $0x705] ss:$16 sm:%s8352_s28]   ;;  %v8345_v2 = vsel %vm4110_vm2, %v8343_v31, %v8340_v5  ;;  %v8490_v31 = vld [vmem:[#allocation1 + $0x204] ss:$16 sm:%s8489_s3]   ;;  %7249 = vst.msk [vmem:[#allocation0 + $0x50] sm:$0xff] %vm7018_vm11, %v11610_v29   ;;  %v8483_v25 = vsel %vm4110_vm2, %v8481_v60, %v8478_v41  ;;  %s8525_s28 = smov 192 }
 0x23f   :  { %v8356_v24 = vld [vmem:[#allocation1 + $0x705] ss:$16 sm:%s8355_s16]   ;;  %v8513_v26 = vld [vmem:[#allocation1 + $0x404] ss:$16 sm:%s8512_s10]   ;;  %s8535_s16 = smov 3  ;;  %s8658_s3 = smov 48 }
 0x240   :  { %v8361_v7 = vld [vmem:[#allocation1 + $0x705] ss:$16 sm:%s8360_s8]   ;;  %v8358_v14 = vsel %vm4102_vm0, %v8356_v24, %v8353_v39  ;;  %v8493_v39 = vld [vmem:[#allocation1 + $0x204] ss:$16 sm:%s8492_s11]   ;;  %s8538_s8 = smov 12  ;;  %s8663_s11 = smov 192 }
 0x241   :  { %v8366_v19 = vld [vmem:[#allocation1 + $0x705] ss:$16 sm:%s8365_s25]   ;;  %v8363_v32 = vsel %vm4106_vm1, %v8361_v7, %v8358_v14  ;;  %v8495_v5 = vsel %vm4102_vm0, %v8493_v39, %v8490_v31  ;;  %v8498_v24 = vld [vmem:[#allocation1 + $0x204] ss:$16 sm:%s8497_s30]   ;;  %s8543_s25 = smov 48  ;;  %s8673_s30 = smov 3 }
 0x242   :  { %v8376_v8 = vld [vmem:[#allocation1 + $0x185] ss:$16 sm:%s8375_s9]   ;;  %v8368_v45 = vsel %vm4110_vm2, %v8366_v19, %v8363_v32  ;;  %v8503_v7 = vld [vmem:[#allocation1 + $0x204] ss:$16 sm:%s8502_s29]   ;;  %v8500_v3 = vsel %vm4106_vm1, %v8498_v24, %v8495_v5  ;;  %s8548_s9 = smov 192  ;;  %s8676_s29 = smov 12 }
 0x243   :  { %v8379_v49 = vld [vmem:[#allocation1 + $0x185] ss:$16 sm:%s8378_s0]   ;;  %v11727_v50 = vpack.i.bf16 %v8368_v45, %v8345_v2  ;;  %v8516_v2 = vld [vmem:[#allocation1 + $0x404] ss:$16 sm:%s8515_s18]   ;;  %v8505_v14 = vsel %vm4110_vm2, %v8503_v7, %v8500_v3  ;;  %s8558_s0 = smov 3  ;;  %s8681_s10 = smov 48 }
 0x244   :  { %v8384_v38 = vld [vmem:[#allocation1 + $0x185] ss:$16 sm:%s8383_s6]   ;;  %v8381_v52 = vsel %vm4102_vm0, %v8379_v49, %v8376_v8  ;;  %v8518_v19 = vsel %vm4102_vm0, %v8516_v2, %v8513_v26  ;;  %v8526_v32 = vld [vmem:[#allocation1 + $0x404] ss:$16 sm:%s8525_s28]   ;;  %v11742_v49 = vpack.i.bf16 %v8505_v14, %v8483_v25  ;;  %s8561_s6 = smov 12  ;;  %s8686_s18 = smov 192 }
 0x245   :  { %v8389_v16 = vld [vmem:[#allocation1 + $0x185] ss:$16 sm:%s8388_s7]   ;;  %v8386_v47 = vsel %vm4106_vm1, %v8384_v38, %v8381_v52  ;;  %11728 = vrot.lane.b32.xlu1 %v11727_v50, %s12008_s12  ;;  %v8536_v45 = vld [vmem:[#allocation1 + $0x604] ss:$16 sm:%s8535_s16]   ;;  %s12009_s7 = smov 32   ;;  %s8699_s28 = smov 12 }
 0x246   :  { %v8399_v18 = vld [vmem:[#allocation1 + $0x385] ss:$16 sm:%s8398_s26]   ;;  %v8391_v4 = vsel %vm4110_vm2, %v8389_v16, %v8386_v47  ;;  %v8539_v52 = vld [vmem:[#allocation1 + $0x604] ss:$16 sm:%s8538_s8]   ;;  %s8566_s26 = smov 48  ;;  %s8704_s16 = smov 48 }
 0x247   :  { %v8402_v48 = vld [vmem:[#allocation1 + $0x385] ss:$16 sm:%s8401_s15]   ;;  %v8544_v50 = vld [vmem:[#allocation1 + $0x604] ss:$16 sm:%s8543_s25]   ;;  %s8571_s15 = smov 192  ;;  %s8709_s8 = smov 192 }
 0x248   :  { %v8407_v20 = vld [vmem:[#allocation1 + $0x385] ss:$16 sm:%s8406_s13]   ;;  %v8404_v35 = vsel %vm4102_vm0, %v8402_v48, %v8399_v18  ;;  %v8541_v18 = vsel %vm4102_vm0, %v8539_v52, %v8536_v45  ;;  %v8549_v47 = vld [vmem:[#allocation1 + $0x604] ss:$16 sm:%s8548_s9]   ;;  %s8581_s13 = smov 3  ;;  %s8719_s25 = smov 3 }
 0x249   :  { %v8412_v61 = vld [vmem:[#allocation1 + $0x385] ss:$16 sm:%s8411_s19]   ;;  %v8409_v9 = vsel %vm4106_vm1, %v8407_v20, %v8404_v35  ;;  %v8546_v48 = vsel %vm4106_vm1, %v8544_v50, %v8541_v18  ;;  %v8559_v20 = vld [vmem:[#allocation1 + $0x84] ss:$16 sm:%s8558_s0]   ;;  %v11614_v35 = vpop.permute.xlu0 %11613  ;;  %s8584_s19 = smov 12  ;;  %s8722_s9 = smov 12 }
 0x24a   :  { %v8422_v22 = vld [vmem:[#allocation1 + $0x585] ss:$16 sm:%s8421_s4]   ;;  %v8414_v53 = vsel %vm4110_vm2, %v8412_v61, %v8409_v9  ;;  %v8551_v61 = vsel %vm4110_vm2, %v8549_v47, %v8546_v48  ;;  %v8567_v23 = vld [vmem:[#allocation1 + $0x84] ss:$16 sm:%s8566_s26]   ;;  %s8589_s4 = smov 48  ;;  %s8727_s0 = smov 48 }
 0x24b   :  { %v8425_v57 = vld [vmem:[#allocation1 + $0x585] ss:$16 sm:%s8424_s5]   ;;  %v11732_v10 = vpack.i.bf16 %v8414_v53, %v8391_v4  ;;  %v8562_v4 = vld [vmem:[#allocation1 + $0x84] ss:$16 sm:%s8561_s6]   ;;  %s8594_s5 = smov 192  ;;  %s8732_s6 = smov 192 }
 0x24c   :  { %v8430_v58 = vld [vmem:[#allocation1 + $0x585] ss:$16 sm:%s8429_s20]   ;;  %v8427_v54 = vsel %vm4102_vm0, %v8425_v57, %v8422_v22  ;;  %v8564_v22 = vsel %vm4102_vm0, %v8562_v4, %v8559_v20  ;;  %v8572_v9 = vld [vmem:[#allocation1 + $0x84] ss:$16 sm:%s8571_s15]   ;;  %v11616_v57 = vunpack.i.h.bf16 %v11614_v35  ;;  %s8604_s20 = smov 3  ;;  %s8742_s26 = smov 3 }
 0x24d   :  { %v8435_v40 = vld [vmem:[#allocation1 + $0x585] ss:$16 sm:%s8434_s21]   ;;  %v8432_v11 = vsel %vm4106_vm1, %v8430_v58, %v8427_v54  ;;  %11733 = vrot.lane.b32.xlu0 %v11732_v10, %s12008_s12  ;;  %v11615_v58 = vunpack.i.l.bf16 %v11614_v35  ;;  %v8569_v42 = vsel %vm4106_vm1, %v8567_v23, %v8564_v22  ;;  %v8582_v43 = vld [vmem:[#allocation1 + $0x284] ss:$16 sm:%s8581_s13]   ;;  %s8607_s21 = smov 12  ;;  %s8745_s15 = smov 12 }
 0x24e   :  { %v8445_v59 = vld [vmem:[#allocation1 + $0x785] ss:$16 sm:%s8444_s23]   ;;  %v8437_v51 = vsel %vm4110_vm2, %v8435_v40, %v8432_v11  ;;  %v8585_v53 = vld [vmem:[#allocation1 + $0x284] ss:$16 sm:%s8584_s19]   ;;  %v8574_v54 = vsel %vm4110_vm2, %v8572_v9, %v8569_v42  ;;  %7318 = vst.msk [vmem:[#allocation0 + $0x38] sm:$0xff] %vm7018_vm11, %v11616_v57   ;;  %s8612_s23 = smov 48 }
 0x24f   :  { %v8448_v12 = vld [vmem:[#allocation1 + $0x785] ss:$16 sm:%s8447_s27]   ;;  %v8587_v40 = vsel %vm4102_vm0, %v8585_v53, %v8582_v43  ;;  %v8595_v0 = vld [vmem:[#allocation1 + $0x284] ss:$16 sm:%s8594_s5]   ;;  %7295 = vst.msk [vmem:[#allocation0 + $0x18] sm:$0xff] %vm7018_vm11, %v11615_v58   ;;  %s8617_s27 = smov 192  ;;  %v14219_v58 = vpop.permute.xlu0 %11623 }
 0x250   :  { %v8453_v17 = vld [vmem:[#allocation1 + $0x785] ss:$16 sm:%s8452_s24]   ;;  %v8450_v62 = vsel %vm4102_vm0, %v8448_v12, %v8445_v59  ;;  %v8590_v59 = vld [vmem:[#allocation1 + $0x284] ss:$16 sm:%s8589_s4]   ;;  %v11619_v12 = vpop.permute.xlu1 %11618  ;;  %s8627_s24 = smov 3  ;;  %s8750_s13 = smov 48 }
 0x251   :  { %v8458_v33 = vld [vmem:[#allocation1 + $0x785] ss:$16 sm:%s8457_s2]   ;;  %v8455_v15 = vsel %vm4106_vm1, %v8453_v17, %v8450_v62  ;;  %11743 = vrot.lane.b32.xlu0 %v11742_v49, %s12009_s7  ;;  %v8592_v1 = vsel %vm4106_vm1, %v8590_v59, %v8587_v40  ;;  %v8605_v10 = vld [vmem:[#allocation1 + $0x484] ss:$16 sm:%s8604_s20]   ;;  %s8630_s2 = smov 12  ;;  %v11621_v46 = vunpack.i.h.bf16 %v11619_v12  ;;  %s8755_s19 = smov 192 }
 0x252   :  { %v8460_v36 = vsel %vm4110_vm2, %v8458_v33, %v8455_v15  ;;  %v8608_v11 = vld [vmem:[#allocation1 + $0x484] ss:$16 sm:%s8607_s21]   ;;  %v8597_v17 = vsel %vm4110_vm2, %v8595_v0, %v8592_v1  ;;  %s8765_s4 = smov 3  ;;  %s8768_s5 = smov 12 }
 0x253   :  { %v11737_v21 = vpack.i.bf16 %v8460_v36, %v8437_v51  ;;  %v8610_v63 = vsel %vm4102_vm0, %v8608_v11, %v8605_v10  ;;  %v8613_v37 = vld [vmem:[#allocation1 + $0x484] ss:$16 sm:%s8612_s23]   ;;  %v11620_v51 = vunpack.i.l.bf16 %v11619_v12  ;;  %v11752_v62 = vpack.i.bf16 %v8597_v17, %v8574_v54  ;;  %7364 = vst.msk [vmem:[#allocation0 + $0x78] sm:$0xff] %vm7018_vm11, %v11621_v46   ;;  %s8773_s20 = smov 48  ;;  %s8778_s21 = smov 192 }
 0x254   :  { %v8618_v56 = vld [vmem:[#allocation1 + $0x484] ss:$16 sm:%s8617_s27]   ;;  %v8615_v33 = vsel %vm4106_vm1, %v8613_v37, %v8610_v63  ;;  %s8788_s23 = smov 3  ;;  %s8791_s27 = smov 12 }
 0x255   :  { %11738 = vrot.lane.b32.xlu1 %v11737_v21, %s12008_s12  ;;  %s8520_s12 = smov 48  ;;  %v8628_v55 = vld [vmem:[#allocation1 + $0x684] ss:$16 sm:%s8627_s24]   ;;  %v8620_v6 = vsel %vm4110_vm2, %v8618_v56, %v8615_v33  ;;  %7341 = vst.msk [vmem:[#allocation0 + $0x58] sm:$0xff] %vm7018_vm11, %v11620_v51   ;;  %11753 = vrot.lane.b32.xlu0 %v11752_v62, %s12009_s7  ;;  %s8796_s24 = smov 48  ;;  %v11629_v56 = vpop.permute.xlu1 %11628 }
 0x256   :  { %v8521_v8 = vld [vmem:[#allocation1 + $0x404] ss:$16 sm:%s8520_s12]   ;;  %s8696_s12 = smov 3  ;;  %s8811_s1 = smov 3 }
 0x257   :  { %v8523_v38 = vsel %vm4106_vm1, %v8521_v8, %v8518_v19  ;;  %v8631_v13 = vld [vmem:[#allocation1 + $0x684] ss:$16 sm:%s8630_s2]   ;;  %s8801_s2 = smov 192 }
 0x258   :  { %v8528_v16 = vsel %vm4110_vm2, %v8526_v32, %v8523_v38  ;;  %v8633_v15 = vsel %vm4102_vm0, %v8631_v13, %v8628_v55  ;;  %v8641_v30 = vld [vmem:[#allocation1 + $0x684] ss:$16 sm:%s8640_s22]   ;;  %s8814_s22 = smov 12  ;;  %v11626_v55 = vunpack.i.h.bf16 %v14219_v58  ;;  %v11625_v13 = vunpack.i.l.bf16 %v14219_v58 }
 0x259   :  { %v11747_v34 = vpack.i.bf16 %v8551_v61, %v8528_v16  ;;  %v8638_v28 = vsel %vm4106_vm1, %v8636_v27, %v8633_v15  ;;  %v8651_v29 = vld [vmem:[#allocation1 + $0x104] ss:$16 sm:%s8650_s14]   ;;  %s8819_s14 = smov 48 }
 0x25a   :  { %v8654_v36 = vld [vmem:[#allocation1 + $0x104] ss:$16 sm:%s8653_s17]   ;;  %v8643_v44 = vsel %vm4110_vm2, %v8641_v30, %v8638_v28  ;;  %s8824_s17 = smov 192  ;;  %v11631_v28 = vunpack.i.h.bf16 %v11629_v56  ;;  %7386 = vst.msk [vmem:[#allocation0] sm:$0xff] %vm7385_vm12, %v11625_v13   ;;  %7409 = vst.msk [vmem:[#allocation0 + $0x20] sm:$0xff] %vm7385_vm12, %v11626_v55  }
 0x25b   :  { %11748 = vrot.lane.b32.xlu1 %v11747_v34, %s12009_s7  ;;  %v8656_v60 = vsel %vm4102_vm0, %v8654_v36, %v8651_v29  ;;  %v8659_v21 = vld [vmem:[#allocation1 + $0x104] ss:$16 sm:%s8658_s3]   ;;  %v11757_v31 = vpack.i.bf16 %v8643_v44, %v8620_v6  ;;  %s8834_s3 = smov 3  ;;  %v11630_v29 = vunpack.i.l.bf16 %v11629_v56 }
 0x25c   :  { %v8664_v41 = vld [vmem:[#allocation1 + $0x104] ss:$16 sm:%s8663_s11]   ;;  %v8661_v39 = vsel %vm4106_vm1, %v8659_v21, %v8656_v60  ;;  %s8837_s11 = smov 12  ;;  %v8835_v44 = vld [vmem:[#allocation1 + $0x3] ss:$16 sm:%s8834_s3]   ;;  %7455 = vst.msk [vmem:[#allocation0 + $0x60] sm:$0xff] %vm7385_vm12, %v11631_v28  }
 0x25d   :  { %v8674_v25 = vld [vmem:[#allocation1 + $0x304] ss:$16 sm:%s8673_s30]   ;;  %v8666_v24 = vsel %vm4110_vm2, %v8664_v41, %v8661_v39  ;;  %v8838_v60 = vld [vmem:[#allocation1 + $0x3] ss:$16 sm:%s8837_s11]   ;;  %s8842_s30 = smov 48  ;;  %7432 = vst.msk [vmem:[#allocation0 + $0x40] sm:$0xff] %vm7385_vm12, %v11630_v29  }
 0x25e   :  { %v8677_v5 = vld [vmem:[#allocation1 + $0x304] ss:$16 sm:%s8676_s29]   ;;  %s8847_s29 = smov 192  ;;  %v8840_v41 = vsel %vm4102_vm0, %v8838_v60, %v8835_v44  ;;  %s9002_s3 = smov 48 }
 0x25f   :  { %v8679_v7 = vsel %vm4102_vm0, %v8677_v5, %v8674_v25  ;;  %v8682_v3 = vld [vmem:[#allocation1 + $0x304] ss:$16 sm:%s8681_s10]   ;;  %11758 = vrot.lane.b32.xlu1 %v11757_v31, %s12009_s7  ;;  %v8843_v31 = vld [vmem:[#allocation1 + $0x3] ss:$16 sm:%s8842_s30]   ;;  %s8856_s10 = smov 3  ;;  %v11634_v25 = vpop.permute.xlu0 %11633  ;;  %s9007_s11 = smov 192 }
 0x260   :  { %v8687_v26 = vld [vmem:[#allocation1 + $0x304] ss:$16 sm:%s8686_s18]   ;;  %v8684_v2 = vsel %vm4106_vm1, %v8682_v3, %v8679_v7  ;;  %v8848_v39 = vld [vmem:[#allocation1 + $0x3] ss:$16 sm:%s8847_s29]   ;;  %s8859_s18 = smov 12  ;;  %v11636_v3 = vunpack.i.h.bf16 %v11634_v25  ;;  %s9017_s30 = smov 3 }
 0x261   :  { %v8697_v14 = vld [vmem:[#allocation1 + $0x504] ss:$16 sm:%s8696_s12]   ;;  %v8689_v8 = vsel %vm4110_vm2, %v8687_v26, %v8684_v2  ;;  %v8857_v7 = vld [vmem:[#allocation1 + $0x203] ss:$16 sm:%s8856_s10]   ;;  %s8864_s12 = smov 48  ;;  %s9020_s29 = smov 12 }
 0x262   :  { %v8700_v19 = vld [vmem:[#allocation1 + $0x504] ss:$16 sm:%s8699_s28]   ;;  %v11762_v45 = vpack.i.bf16 %v8689_v8, %v8666_v24  ;;  %v8845_v24 = vsel %vm4106_vm1, %v8843_v31, %v8840_v41  ;;  %v8860_v26 = vld [vmem:[#allocation1 + $0x203] ss:$16 sm:%s8859_s18]   ;;  %s8869_s28 = smov 192  ;;  %7501 = vst.msk [vmem:[#allocation0 + $0x28] sm:$0xff] %vm7385_vm12, %v11636_v3  }
 0x263   :  { %v8702_v32 = vsel %vm4102_vm0, %v8700_v19, %v8697_v14  ;;  %v8705_v49 = vld [vmem:[#allocation1 + $0x504] ss:$16 sm:%s8704_s16]   ;;  %v8865_v2 = vld [vmem:[#allocation1 + $0x203] ss:$16 sm:%s8864_s12]   ;;  %s8879_s16 = smov 3  ;;  %v11635_v14 = vunpack.i.l.bf16 %v11634_v25  ;;  %v8850_v19 = vsel %vm4110_vm2, %v8848_v39, %v8845_v24  ;;  %v8862_v8 = vsel %vm4102_vm0, %v8860_v26, %v8857_v7  ;;  %s9025_s10 = smov 48 }
 0x264   :  { %v8710_v38 = vld [vmem:[#allocation1 + $0x504] ss:$16 sm:%s8709_s8]   ;;  %v8707_v52 = vsel %vm4106_vm1, %v8705_v49, %v8702_v32  ;;  %11763 = vrot.lane.b32.xlu0 %v11762_v45, %s12009_s7  ;;  %v8870_v32 = vld [vmem:[#allocation1 + $0x203] ss:$16 sm:%s8869_s28]   ;;  %s8887_s8 = smov 48  ;;  %s9030_s18 = smov 192 }
 0x265   :  { %v8720_v16 = vld [vmem:[#allocation1 + $0x704] ss:$16 sm:%s8719_s25]   ;;  %v8712_v50 = vsel %vm4110_vm2, %v8710_v38, %v8707_v52  ;;  %v8880_v49 = vld [vmem:[#allocation1 + $0x403] ss:$16 sm:%s8879_s16]   ;;  %v8867_v38 = vsel %vm4106_vm1, %v8865_v2, %v8862_v8  ;;  %s8892_s25 = smov 192  ;;  %7478 = vst.msk [vmem:[#allocation0 + $0x8] sm:$0xff] %vm7385_vm12, %v11635_v14  }
 0x266   :  { %v8723_v18 = vld [vmem:[#allocation1 + $0x704] ss:$16 sm:%s8722_s9]   ;;  %v8888_v52 = vld [vmem:[#allocation1 + $0x403] ss:$16 sm:%s8887_s8]   ;;  %s8902_s9 = smov 3  ;;  %s9040_s12 = smov 3 }
 0x267   :  { %v8725_v47 = vsel %vm4102_vm0, %v8723_v18, %v8720_v16  ;;  %v8728_v48 = vld [vmem:[#allocation1 + $0x704] ss:$16 sm:%s8727_s0]   ;;  %v11639_v16 = vpop.permute.xlu1 %11638  ;;  %v8872_v18 = vsel %vm4110_vm2, %v8870_v32, %v8867_v38  ;;  %s8905_s0 = smov 12  ;;  %v9003_v41 = vld [vmem:[#allocation1 + $0x683] ss:$16 sm:%s9002_s3]   ;;  %s9043_s28 = smov 12 }
 0x268   :  { %v8733_v20 = vld [vmem:[#allocation1 + $0x704] ss:$16 sm:%s8732_s6]   ;;  %v8730_v4 = vsel %vm4106_vm1, %v8728_v48, %v8725_v47  ;;  %v8893_v47 = vld [vmem:[#allocation1 + $0x403] ss:$16 sm:%s8892_s25]   ;;  %s8910_s6 = smov 48  ;;  %s9048_s16 = smov 48 }
 0x269   :  { %v8743_v35 = vld [vmem:[#allocation1 + $0x184] ss:$16 sm:%s8742_s26]   ;;  %v8735_v22 = vsel %vm4110_vm2, %v8733_v20, %v8730_v4  ;;  %v8903_v48 = vld [vmem:[#allocation1 + $0x603] ss:$16 sm:%s8902_s9]   ;;  %v11641_v20 = vunpack.i.h.bf16 %v11639_v16  ;;  %v11640_v4 = vunpack.i.l.bf16 %v11639_v16  ;;  %s8915_s26 = smov 192  ;;  %s9063_s8 = smov 3 }
 0x26a   :  { %v8746_v61 = vld [vmem:[#allocation1 + $0x184] ss:$16 sm:%s8745_s15]   ;;  %v11767_v34 = vpack.i.bf16 %v8735_v22, %v8712_v50  ;;  %v8906_v22 = vld [vmem:[#allocation1 + $0x603] ss:$16 sm:%s8905_s0]   ;;  %s8925_s15 = smov 3  ;;  %s9066_s25 = smov 12 }
 0x26b   :  { %v8748_v23 = vsel %vm4102_vm0, %v8746_v61, %v8743_v35  ;;  %v8751_v9 = vld [vmem:[#allocation1 + $0x184] ss:$16 sm:%s8750_s13]   ;;  %v11782_v35 = vpack.i.bf16 %v8872_v18, %v8850_v19  ;;  %v8916_v58 = vld [vmem:[#allocation1 + $0x603] ss:$16 sm:%s8915_s26]   ;;  %s8928_s13 = smov 12  ;;  %7524 = vst.msk [vmem:[#allocation0 + $0x48] sm:$0xff] %vm7385_vm12, %v11640_v4  }
 0x26c   :  { %v8756_v57 = vld [vmem:[#allocation1 + $0x184] ss:$16 sm:%s8755_s19]   ;;  %v8753_v42 = vsel %vm4106_vm1, %v8751_v9, %v8748_v23  ;;  %11768 = vrot.lane.b32.xlu1 %v11767_v34, %s12009_s7  ;;  %v8911_v23 = vld [vmem:[#allocation1 + $0x603] ss:$16 sm:%s8910_s6]   ;;  %s8933_s19 = smov 48  ;;  %7547 = vst.msk [vmem:[#allocation0 + $0x68] sm:$0xff] %vm7385_vm12, %v11641_v20  }
 0x26d   :  { %v8766_v43 = vld [vmem:[#allocation1 + $0x384] ss:$16 sm:%s8765_s4]   ;;  %v8758_v54 = vsel %vm4110_vm2, %v8756_v57, %v8753_v42  ;;  %v8908_v57 = vsel %vm4102_vm0, %v8906_v22, %v8903_v48  ;;  %v8926_v34 = vld [vmem:[#allocation1 + $0x83] ss:$16 sm:%s8925_s15]   ;;  %s12010_s4 = smov 24   ;;  %s9071_s9 = smov 48 }
 0x26e   :  { %v8769_v53 = vld [vmem:[#allocation1 + $0x384] ss:$16 sm:%s8768_s5]   ;;  %v8913_v42 = vsel %vm4106_vm1, %v8911_v23, %v8908_v57  ;;  %s8938_s5 = smov 192  ;;  %v9008_v25 = vld [vmem:[#allocation1 + $0x683] ss:$16 sm:%s9007_s11]   ;;  %s9076_s0 = smov 192 }
 0x26f   :  { %v8771_v40 = vsel %vm4102_vm0, %v8769_v53, %v8766_v43  ;;  %v8774_v59 = vld [vmem:[#allocation1 + $0x384] ss:$16 sm:%s8773_s20]   ;;  %v8929_v43 = vld [vmem:[#allocation1 + $0x83] ss:$16 sm:%s8928_s13]   ;;  %s8948_s20 = smov 3  ;;  %s9086_s6 = smov 3 }
 0x270   :  { %v8779_v0 = vld [vmem:[#allocation1 + $0x384] ss:$16 sm:%s8778_s21]   ;;  %v8776_v1 = vsel %vm4106_vm1, %v8774_v59, %v8771_v40  ;;  %v8934_v53 = vld [vmem:[#allocation1 + $0x83] ss:$16 sm:%s8933_s19]   ;;  %v8918_v40 = vsel %vm4110_vm2, %v8916_v58, %v8913_v42  ;;  %v8931_v59 = vsel %vm4102_vm0, %v8929_v43, %v8926_v34  ;;  %s8951_s21 = smov 12  ;;  %s9089_s26 = smov 12 }
 0x271   :  { %v8789_v10 = vld [vmem:[#allocation1 + $0x584] ss:$16 sm:%s8788_s23]   ;;  %v8781_v12 = vsel %vm4110_vm2, %v8779_v0, %v8776_v1  ;;  %v8939_v0 = vld [vmem:[#allocation1 + $0x83] ss:$16 sm:%s8938_s5]   ;;  %s8956_s23 = smov 48  ;;  %s9094_s15 = smov 48 }
 0x272   :  { %v8792_v11 = vld [vmem:[#allocation1 + $0x584] ss:$16 sm:%s8791_s27]   ;;  %v11772_v46 = vpack.i.bf16 %v8781_v12, %v8758_v54  ;;  %v11644_v54 = vpop.permute.xlu0 %11643  ;;  %v8949_v1 = vld [vmem:[#allocation1 + $0x283] ss:$16 sm:%s8948_s20]   ;;  %s8961_s27 = smov 192  ;;  %s9099_s13 = smov 192 }
 0x273   :  { %v8794_v17 = vsel %vm4102_vm0, %v8792_v11, %v8789_v10  ;;  %v8797_v63 = vld [vmem:[#allocation1 + $0x584] ss:$16 sm:%s8796_s24]   ;;  %v11646_v10 = vunpack.i.h.bf16 %v11644_v54  ;;  %v11645_v11 = vunpack.i.l.bf16 %v11644_v54  ;;  %s8971_s24 = smov 3  ;;  %v9021_v7 = vld [vmem:[#allocation1 + $0x103] ss:$16 sm:%s9020_s29]   ;;  %s9109_s19 = smov 3 }
 0x274   :  { %v8802_v37 = vld [vmem:[#allocation1 + $0x584] ss:$16 sm:%s8801_s2]   ;;  %v8799_v51 = vsel %vm4106_vm1, %v8797_v63, %v8794_v17  ;;  %11773 = vrot.lane.b32.xlu0 %v11772_v46, %s12009_s7  ;;  %v8936_v17 = vsel %vm4106_vm1, %v8934_v53, %v8931_v59  ;;  %v8952_v63 = vld [vmem:[#allocation1 + $0x283] ss:$16 sm:%s8951_s21]   ;;  %s8974_s2 = smov 12  ;;  %s9112_s5 = smov 12 }
 0x275   :  { %v8812_v62 = vld [vmem:[#allocation1 + $0x784] ss:$16 sm:%s8811_s1]   ;;  %v8804_v6 = vsel %vm4110_vm2, %v8802_v37, %v8799_v51  ;;  %v8957_v37 = vld [vmem:[#allocation1 + $0x283] ss:$16 sm:%s8956_s23]   ;;  %v8941_v56 = vsel %vm4110_vm2, %v8939_v0, %v8936_v17  ;;  %v8954_v46 = vsel %vm4102_vm0, %v8952_v63, %v8949_v1  ;;  %s8979_s1 = smov 48  ;;  %7570 = vst.msk [vmem:[#allocation0 + $0x10] sm:$0xff] %vm7385_vm12, %v11645_v11  }
 0x276   :  { %v8815_v33 = vld [vmem:[#allocation1 + $0x784] ss:$16 sm:%s8814_s22]   ;;  %v8962_v51 = vld [vmem:[#allocation1 + $0x283] ss:$16 sm:%s8961_s27]   ;;  %7593 = vst.msk [vmem:[#allocation0 + $0x30] sm:$0xff] %vm7385_vm12, %v11646_v10   ;;  %s8984_s22 = smov 192  ;;  %v11654_v26 = vpop.permute.xlu0 %11653 }
 0x277   :  { %v8817_v15 = vsel %vm4102_vm0, %v8815_v33, %v8812_v62  ;;  %v8820_v27 = vld [vmem:[#allocation1 + $0x784] ss:$16 sm:%s8819_s14]   ;;  %v8972_v62 = vld [vmem:[#allocation1 + $0x483] ss:$16 sm:%s8971_s24]   ;;  %v8959_v33 = vsel %vm4106_vm1, %v8957_v37, %v8954_v46  ;;  %s8994_s14 = smov 3  ;;  %v11656_v32 = vunpack.i.h.bf16 %v11654_v26  ;;  %s9117_s20 = smov 48 }
 0x278   :  { %v8825_v30 = vld [vmem:[#allocation1 + $0x784] ss:$16 sm:%s8824_s17]   ;;  %v8822_v36 = vsel %vm4106_vm1, %v8820_v27, %v8817_v15  ;;  %11783 = vrot.lane.b32.xlu0 %v11782_v35, %s12010_s4  ;;  %v8975_v55 = vld [vmem:[#allocation1 + $0x483] ss:$16 sm:%s8974_s2]   ;;  %v8964_v15 = vsel %vm4110_vm2, %v8962_v51, %v8959_v33  ;;  %s8997_s17 = smov 12  ;;  %s9122_s21 = smov 192 }
 0x279   :  { %v8827_v21 = vsel %vm4110_vm2, %v8825_v30, %v8822_v36  ;;  %v8980_v13 = vld [vmem:[#allocation1 + $0x483] ss:$16 sm:%s8979_s1]   ;;  %v8977_v27 = vsel %vm4102_vm0, %v8975_v55, %v8972_v62  ;;  %v11792_v44 = vpack.i.bf16 %v8964_v15, %v8941_v56  ;;  %7685 = vst.msk [vmem:[#allocation0 + $0x38] sm:$0xff] %vm7385_vm12, %v11656_v32   ;;  %s9132_s23 = smov 3  ;;  %s9135_s27 = smov 12 }
 0x27a   :  { %v11777_v5 = vpack.i.bf16 %v8827_v21, %v8804_v6  ;;  %v11649_v6 = vpop.permute.xlu1 %11648  ;;  %v8985_v30 = vld [vmem:[#allocation1 + $0x483] ss:$16 sm:%s8984_s22]   ;;  %v8982_v60 = vsel %vm4106_vm1, %v8980_v13, %v8977_v27  ;;  %v14293_v17 = vpop.permute.xlu0 %11663  ;;  %s9140_s24 = smov 48  ;;  %s9145_s2 = smov 192 }
 0x27b   :  { %v8995_v28 = vld [vmem:[#allocation1 + $0x683] ss:$16 sm:%s8994_s14]   ;;  %v11651_v29 = vunpack.i.h.bf16 %v11649_v6  ;;  %v11650_v36 = vunpack.i.l.bf16 %v11649_v6  ;;  %v8987_v31 = vsel %vm4110_vm2, %v8985_v30, %v8982_v60  ;;  %s9155_s1 = smov 3  ;;  %s9158_s22 = smov 12 }
 0x27c   :  { %11778 = vrot.lane.b32.xlu1 %v11777_v5, %s12009_s7  ;;  %s8882_s7 = smov 12  ;;  %v8998_v21 = vld [vmem:[#allocation1 + $0x683] ss:$16 sm:%s8997_s17]   ;;  %11793 = vrot.lane.b32.xlu0 %v11792_v44, %s12010_s4  ;;  %s9163_s14 = smov 48 }
 0x27d   :  { %v8883_v45 = vld [vmem:[#allocation1 + $0x403] ss:$16 sm:%s8882_s7]   ;;  %v9000_v39 = vsel %vm4102_vm0, %v8998_v21, %v8995_v28  ;;  %7616 = vst.msk [vmem:[#allocation0 + $0x50] sm:$0xff] %vm7385_vm12, %v11650_v36   ;;  %7639 = vst.msk [vmem:[#allocation0 + $0x70] sm:$0xff] %vm7385_vm12, %v11651_v29   ;;  %s9053_s7 = smov 192  ;;  %s9168_s17 = smov 192 }
 0x27e   :  { %v8885_v50 = vsel %vm4102_vm0, %v8883_v45, %v8880_v49  ;;  %v9018_v5 = vld [vmem:[#allocation1 + $0x103] ss:$16 sm:%s9017_s30]   ;;  %v9005_v24 = vsel %vm4106_vm1, %v9003_v41, %v9000_v39  ;;  %v11655_v49 = vunpack.i.l.bf16 %v11654_v26  ;;  %s9178_s3 = smov 3  ;;  %s9181_s11 = smov 12  ;;  %v11665_v39 = vunpack.i.l.bf16 %v14293_v17 }
 0x27f   :  { %v8890_v61 = vsel %vm4106_vm1, %v8888_v52, %v8885_v50  ;;  %v9026_v3 = vld [vmem:[#allocation1 + $0x103] ss:$16 sm:%s9025_s10]   ;;  %v9010_v2 = vsel %vm4110_vm2, %v9008_v25, %v9005_v24  ;;  %v9023_v14 = vsel %vm4102_vm0, %v9021_v7, %v9018_v5  ;;  %s9186_s30 = smov 48  ;;  %s9191_s29 = smov 192 }
 0x280   :  { %v8895_v9 = vsel %vm4110_vm2, %v8893_v47, %v8890_v61  ;;  %v9031_v19 = vld [vmem:[#allocation1 + $0x103] ss:$16 sm:%s9030_s18]   ;;  %v11797_v38 = vpack.i.bf16 %v9010_v2, %v8987_v31  ;;  %v9028_v45 = vsel %vm4106_vm1, %v9026_v3, %v9023_v14  ;;  %7662 = vst.msk [vmem:[#allocation0 + $0x18] sm:$0xff] %vm7385_vm12, %v11655_v49   ;;  %v11659_v61 = vpop.permute.xlu1 %11658  ;;  %v11666_v31 = vunpack.i.h.bf16 %v14293_v17  ;;  %s9201_s10 = smov 3  ;;  %s9204_s18 = smov 12 }
 0x281   :  { %v11787_v12 = vpack.i.bf16 %v8918_v40, %v8895_v9  ;;  %v9041_v8 = vld [vmem:[#allocation1 + $0x303] ss:$16 sm:%s9040_s12]   ;;  %v9033_v18 = vsel %vm4110_vm2, %v9031_v19, %v9028_v45  ;;  %v11661_v58 = vunpack.i.h.bf16 %v11659_v61  ;;  %v11660_v34 = vunpack.i.l.bf16 %v11659_v61  ;;  %s9209_s12 = smov 48  ;;  %v9205_v49 = vld [vmem:[#allocation1 + $0x2] ss:$16 sm:%s9204_s18]   ;;  %v11674_v45 = vpop.permute.xlu0 %11673  ;;  %7753 = vst.msk [vmem:[#allocation0] sm:$0xff] %vm7752_vm13, %v11665_v39  }
 0x282   :  { %v9044_v52 = vld [vmem:[#allocation1 + $0x303] ss:$16 sm:%s9043_s28]   ;;  %s9214_s28 = smov 192  ;;  %7776 = vst.msk [vmem:[#allocation0 + $0x20] sm:$0xff] %vm7752_vm13, %v11666_v31   ;;  %s9374_s18 = smov 192 }
 0x283   :  { %11788 = vrot.lane.b32.xlu1 %v11787_v12, %s12010_s4  ;;  %v9049_v16 = vld [vmem:[#allocation1 + $0x303] ss:$16 sm:%s9048_s16]   ;;  %v9046_v50 = vsel %vm4102_vm0, %v9044_v52, %v9041_v8  ;;  %7708 = vst.msk [vmem:[#allocation0 + $0x58] sm:$0xff] %vm7385_vm12, %v11660_v34   ;;  %7731 = vst.msk [vmem:[#allocation0 + $0x78] sm:$0xff] %vm7385_vm12, %v11661_v58   ;;  %v9202_v8 = vld [vmem:[#allocation1 + $0x2] ss:$16 sm:%s9201_s10]  }
 0x284   :  { %v9054_v47 = vld [vmem:[#allocation1 + $0x303] ss:$16 sm:%s9053_s7]   ;;  %v9051_v20 = vsel %vm4106_vm1, %v9049_v16, %v9046_v50  ;;  %v11669_v36 = vpop.permute.xlu1 %11668  ;;  %v9207_v16 = vsel %vm4102_vm0, %v9205_v49, %v9202_v8  ;;  %s9223_s16 = smov 3  ;;  %s9226_s7 = smov 12  ;;  %v11676_v50 = vunpack.i.h.bf16 %v11674_v45 }
 0x285   :  { %v9064_v48 = vld [vmem:[#allocation1 + $0x503] ss:$16 sm:%s9063_s8]   ;;  %v9056_v22 = vsel %vm4110_vm2, %v9054_v47, %v9051_v20  ;;  %v11671_v3 = vunpack.i.h.bf16 %v11669_v36  ;;  %v11670_v26 = vunpack.i.l.bf16 %v11669_v36  ;;  %v9224_v20 = vld [vmem:[#allocation1 + $0x202] ss:$16 sm:%s9223_s16]   ;;  %s9231_s8 = smov 48  ;;  %s9369_s10 = smov 48 }
 0x286   :  { %v9067_v4 = vld [vmem:[#allocation1 + $0x503] ss:$16 sm:%s9066_s25]   ;;  %v11802_v42 = vpack.i.bf16 %v9056_v22, %v9033_v18  ;;  %v9215_v18 = vld [vmem:[#allocation1 + $0x2] ss:$16 sm:%s9214_s28]   ;;  %s9236_s25 = smov 192  ;;  %7868 = vst.msk [vmem:[#allocation0 + $0x28] sm:$0xff] %vm7752_vm13, %v11676_v50  }
 0x287   :  { %11798 = vrot.lane.b32.xlu1 %v11797_v38, %s12010_s4  ;;  %v9072_v35 = vld [vmem:[#allocation1 + $0x503] ss:$16 sm:%s9071_s9]   ;;  %v9069_v23 = vsel %vm4102_vm0, %v9067_v4, %v9064_v48  ;;  %v9210_v38 = vld [vmem:[#allocation1 + $0x2] ss:$16 sm:%s9209_s12]   ;;  %7822 = vst.msk [vmem:[#allocation0 + $0x60] sm:$0xff] %vm7752_vm13, %v11671_v3   ;;  %7799 = vst.msk [vmem:[#allocation0 + $0x40] sm:$0xff] %vm7752_vm13, %v11670_v26  }
 0x288   :  { %v9077_v9 = vld [vmem:[#allocation1 + $0x503] ss:$16 sm:%s9076_s0]   ;;  %v9074_v43 = vsel %vm4106_vm1, %v9072_v35, %v9069_v23  ;;  %11803 = vrot.lane.b32.xlu0 %v11802_v42, %s12010_s4  ;;  %v9212_v48 = vsel %vm4106_vm1, %v9210_v38, %v9207_v16  ;;  %v9227_v4 = vld [vmem:[#allocation1 + $0x202] ss:$16 sm:%s9226_s7]   ;;  %v11675_v35 = vunpack.i.l.bf16 %v11674_v45  ;;  %s9246_s9 = smov 3  ;;  %s9249_s0 = smov 12  ;;  %v11679_v42 = vpop.permute.xlu1 %11678 }
 0x289   :  { %v9087_v57 = vld [vmem:[#allocation1 + $0x703] ss:$16 sm:%s9086_s6]   ;;  %v9079_v40 = vsel %vm4110_vm2, %v9077_v9, %v9074_v43  ;;  %v9217_v61 = vsel %vm4110_vm2, %v9215_v18, %v9212_v48  ;;  %v9229_v22 = vsel %vm4102_vm0, %v9227_v4, %v9224_v20  ;;  %v9232_v23 = vld [vmem:[#allocation1 + $0x202] ss:$16 sm:%s9231_s8]   ;;  %s9259_s6 = smov 192  ;;  %s9384_s12 = smov 3 }
 0x28a   :  { %v9090_v53 = vld [vmem:[#allocation1 + $0x703] ss:$16 sm:%s9089_s26]   ;;  %v9237_v9 = vld [vmem:[#allocation1 + $0x202] ss:$16 sm:%s9236_s25]   ;;  %7845 = vst.msk [vmem:[#allocation0 + $0x8] sm:$0xff] %vm7752_vm13, %v11675_v35   ;;  %s9269_s26 = smov 3 }
 0x28b   :  { %v9095_v54 = vld [vmem:[#allocation1 + $0x703] ss:$16 sm:%s9094_s15]   ;;  %v9092_v59 = vsel %vm4102_vm0, %v9090_v53, %v9087_v57  ;;  %v9234_v57 = vsel %vm4106_vm1, %v9232_v23, %v9229_v22  ;;  %v9247_v58 = vld [vmem:[#allocation1 + $0x402] ss:$16 sm:%s9246_s9]   ;;  %s9272_s15 = smov 12  ;;  %s9387_s28 = smov 12 }
 0x28c   :  { %v9100_v0 = vld [vmem:[#allocation1 + $0x703] ss:$16 sm:%s9099_s13]   ;;  %v9097_v10 = vsel %vm4106_vm1, %v9095_v54, %v9092_v59  ;;  %v9250_v34 = vld [vmem:[#allocation1 + $0x402] ss:$16 sm:%s9249_s0]   ;;  %v9239_v43 = vsel %vm4110_vm2, %v9237_v9, %v9234_v57  ;;  %v11681_v59 = vunpack.i.h.bf16 %v11679_v42  ;;  %s9277_s13 = smov 48  ;;  %s9392_s16 = smov 48 }
 0x28d   :  { %v9110_v1 = vld [vmem:[#allocation1 + $0x183] ss:$16 sm:%s9109_s19]   ;;  %v9102_v63 = vsel %vm4110_vm2, %v9100_v0, %v9097_v10  ;;  %v9252_v53 = vsel %vm4102_vm0, %v9250_v34, %v9247_v58  ;;  %v11680_v0 = vunpack.i.l.bf16 %v11679_v42  ;;  %s9282_s19 = smov 192  ;;  %v9370_v16 = vld [vmem:[#allocation1 + $0x682] ss:$16 sm:%s9369_s10]   ;;  %s9397_s7 = smov 192 }
 0x28e   :  { %v9113_v11 = vld [vmem:[#allocation1 + $0x183] ss:$16 sm:%s9112_s5]   ;;  %v11807_v51 = vpack.i.bf16 %v9102_v63, %v9079_v40  ;;  %v9260_v40 = vld [vmem:[#allocation1 + $0x402] ss:$16 sm:%s9259_s6]   ;;  %s9292_s5 = smov 3  ;;  %7914 = vst.msk [vmem:[#allocation0 + $0x68] sm:$0xff] %vm7752_vm13, %v11681_v59  }
 0x28f   :  { %v9118_v12 = vld [vmem:[#allocation1 + $0x183] ss:$16 sm:%s9117_s20]   ;;  %v9115_v37 = vsel %vm4102_vm0, %v9113_v11, %v9110_v1  ;;  %v11822_v1 = vpack.i.bf16 %v9239_v43, %v9217_v61  ;;  %v9270_v11 = vld [vmem:[#allocation1 + $0x602] ss:$16 sm:%s9269_s26]   ;;  %s9295_s20 = smov 12  ;;  %7891 = vst.msk [vmem:[#allocation0 + $0x48] sm:$0xff] %vm7752_vm13, %v11680_v0  }
 0x290   :  { %v9123_v56 = vld [vmem:[#allocation1 + $0x183] ss:$16 sm:%s9122_s21]   ;;  %v9120_v62 = vsel %vm4106_vm1, %v9118_v12, %v9115_v37  ;;  %11808 = vrot.lane.b32.xlu1 %v11807_v51, %s12010_s4  ;;  %v9273_v12 = vld [vmem:[#allocation1 + $0x602] ss:$16 sm:%s9272_s15]   ;;  %s12011_s21 = smov 16   ;;  %s9407_s8 = smov 3 }
 0x291   :  { %v9133_v46 = vld [vmem:[#allocation1 + $0x383] ss:$16 sm:%s9132_s23]   ;;  %v9125_v13 = vsel %vm4110_vm2, %v9123_v56, %v9120_v62  ;;  %v9275_v63 = vsel %vm4102_vm0, %v9273_v12, %v9270_v11  ;;  %v9278_v37 = vld [vmem:[#allocation1 + $0x602] ss:$16 sm:%s9277_s13]   ;;  %s9300_s23 = smov 48  ;;  %s9410_s25 = smov 12 }
 0x292   :  { %v9136_v33 = vld [vmem:[#allocation1 + $0x383] ss:$16 sm:%s9135_s27]   ;;  %v9283_v56 = vld [vmem:[#allocation1 + $0x602] ss:$16 sm:%s9282_s19]   ;;  %s9305_s27 = smov 192  ;;  %s9415_s9 = smov 48 }
 0x293   :  { %v9141_v55 = vld [vmem:[#allocation1 + $0x383] ss:$16 sm:%s9140_s24]   ;;  %v9138_v6 = vsel %vm4102_vm0, %v9136_v33, %v9133_v46  ;;  %v9280_v46 = vsel %vm4106_vm1, %v9278_v37, %v9275_v63  ;;  %v9293_v51 = vld [vmem:[#allocation1 + $0x82] ss:$16 sm:%s9292_s5]   ;;  %v11684_v33 = vpop.permute.xlu0 %11683  ;;  %s9315_s24 = smov 3  ;;  %s9420_s0 = smov 192 }
 0x294   :  { %v9146_v15 = vld [vmem:[#allocation1 + $0x383] ss:$16 sm:%s9145_s2]   ;;  %v9143_v30 = vsel %vm4106_vm1, %v9141_v55, %v9138_v6  ;;  %v9296_v62 = vld [vmem:[#allocation1 + $0x82] ss:$16 sm:%s9295_s20]   ;;  %v9285_v55 = vsel %vm4110_vm2, %v9283_v56, %v9280_v46  ;;  %s9318_s2 = smov 12  ;;  %s9433_s6 = smov 12 }
 0x295   :  { %v9156_v27 = vld [vmem:[#allocation1 + $0x583] ss:$16 sm:%s9155_s1]   ;;  %v9148_v44 = vsel %vm4110_vm2, %v9146_v15, %v9143_v30  ;;  %v9301_v6 = vld [vmem:[#allocation1 + $0x82] ss:$16 sm:%s9300_s23]   ;;  %v11685_v30 = vunpack.i.l.bf16 %v11684_v33  ;;  %s9323_s1 = smov 48  ;;  %s9438_s26 = smov 48 }
 0x296   :  { %v9159_v28 = vld [vmem:[#allocation1 + $0x583] ss:$16 sm:%s9158_s22]   ;;  %v11812_v25 = vpack.i.bf16 %v9148_v44, %v9125_v13  ;;  %v9298_v13 = vsel %vm4102_vm0, %v9296_v62, %v9293_v51  ;;  %v9306_v15 = vld [vmem:[#allocation1 + $0x82] ss:$16 sm:%s9305_s27]   ;;  %s9328_s22 = smov 192  ;;  %s9443_s15 = smov 192 }
 0x297   :  { %v9164_v29 = vld [vmem:[#allocation1 + $0x583] ss:$16 sm:%s9163_s14]   ;;  %v9161_v60 = vsel %vm4102_vm0, %v9159_v28, %v9156_v27  ;;  %v11686_v27 = vunpack.i.h.bf16 %v11684_v33  ;;  %v9316_v36 = vld [vmem:[#allocation1 + $0x282] ss:$16 sm:%s9315_s24]   ;;  %s9338_s14 = smov 3  ;;  %7937 = vst.msk [vmem:[#allocation0 + $0x10] sm:$0xff] %vm7752_vm13, %v11685_v30   ;;  %v11694_v20 = vpop.permute.xlu0 %11693 }
 0x298   :  { %v9169_v21 = vld [vmem:[#allocation1 + $0x583] ss:$16 sm:%s9168_s17]   ;;  %v9166_v5 = vsel %vm4106_vm1, %v9164_v29, %v9161_v60  ;;  %11813 = vrot.lane.b32.xlu0 %v11812_v25, %s12010_s4  ;;  %v9303_v29 = vsel %vm4106_vm1, %v9301_v6, %v9298_v13  ;;  %v9319_v44 = vld [vmem:[#allocation1 + $0x282] ss:$16 sm:%s9318_s2]   ;;  %s9341_s17 = smov 12  ;;  %v11696_v23 = vunpack.i.h.bf16 %v11694_v20  ;;  %v11695_v9 = vunpack.i.l.bf16 %v11694_v20  ;;  %s9453_s13 = smov 3 }
 0x299   :  { %v9179_v41 = vld [vmem:[#allocation1 + $0x783] ss:$16 sm:%s9178_s3]   ;;  %v9171_v2 = vsel %vm4110_vm2, %v9169_v21, %v9166_v5  ;;  %v9308_v60 = vsel %vm4110_vm2, %v9306_v15, %v9303_v29  ;;  %v9321_v21 = vsel %vm4102_vm0, %v9319_v44, %v9316_v36  ;;  %v9329_v31 = vld [vmem:[#allocation1 + $0x282] ss:$16 sm:%s9328_s22]   ;;  %7960 = vst.msk [vmem:[#allocation0 + $0x30] sm:$0xff] %vm7752_vm13, %v11686_v27   ;;  %s9346_s3 = smov 48 }
 0x29a   :  { %v9182_v24 = vld [vmem:[#allocation1 + $0x783] ss:$16 sm:%s9181_s11]   ;;  %v9339_v25 = vld [vmem:[#allocation1 + $0x482] ss:$16 sm:%s9338_s14]   ;;  %s9351_s11 = smov 192  ;;  %8029 = vst.msk [vmem:[#allocation0 + $0x18] sm:$0xff] %vm7752_vm13, %v11695_v9  }
 0x29b   :  { %v9187_v7 = vld [vmem:[#allocation1 + $0x783] ss:$16 sm:%s9186_s30]   ;;  %v9184_v14 = vsel %vm4102_vm0, %v9182_v24, %v9179_v41  ;;  %v9324_v41 = vld [vmem:[#allocation1 + $0x282] ss:$16 sm:%s9323_s1]   ;;  %v11689_v24 = vpop.permute.xlu1 %11688  ;;  %s9361_s30 = smov 3  ;;  %8052 = vst.msk [vmem:[#allocation0 + $0x38] sm:$0xff] %vm7752_vm13, %v11696_v23  }
 0x29c   :  { %v9192_v19 = vld [vmem:[#allocation1 + $0x783] ss:$16 sm:%s9191_s29]   ;;  %v9189_v32 = vsel %vm4106_vm1, %v9187_v7, %v9184_v14  ;;  %11823 = vrot.lane.b32.xlu0 %v11822_v1, %s12011_s21  ;;  %v9326_v39 = vsel %vm4106_vm1, %v9324_v41, %v9321_v21  ;;  %v9342_v5 = vld [vmem:[#allocation1 + $0x482] ss:$16 sm:%s9341_s17]   ;;  %s9364_s29 = smov 12  ;;  %v11691_v14 = vunpack.i.h.bf16 %v11689_v24  ;;  %s9456_s19 = smov 12  ;;  %v14371_v21 = vpop.permute.xlu0 %11703 }
 0x29d   :  { %v9194_v52 = vsel %vm4110_vm2, %v9192_v19, %v9189_v32  ;;  %v9331_v7 = vsel %vm4110_vm2, %v9329_v31, %v9326_v39  ;;  %v9344_v3 = vsel %vm4102_vm0, %v9342_v5, %v9339_v25  ;;  %v9347_v26 = vld [vmem:[#allocation1 + $0x482] ss:$16 sm:%s9346_s3]   ;;  %v11690_v19 = vunpack.i.l.bf16 %v11689_v24  ;;  %s9461_s5 = smov 48  ;;  %s9466_s20 = smov 192 }
 0x29e   :  { %v11817_v47 = vpack.i.bf16 %v9194_v52, %v9171_v2  ;;  %v9352_v2 = vld [vmem:[#allocation1 + $0x482] ss:$16 sm:%s9351_s11]   ;;  %v11832_v8 = vpack.i.bf16 %v9331_v7, %v9308_v60  ;;  %v9349_v32 = vsel %vm4106_vm1, %v9347_v26, %v9344_v3  ;;  %8006 = vst.msk [vmem:[#allocation0 + $0x70] sm:$0xff] %vm7752_vm13, %v11691_v14   ;;  %s9476_s23 = smov 3  ;;  %s9479_s27 = smov 12 }
 0x29f   :  { %v9362_v49 = vld [vmem:[#allocation1 + $0x682] ss:$16 sm:%s9361_s30]   ;;  %v9354_v45 = vsel %vm4110_vm2, %v9352_v2, %v9349_v32  ;;  %7983 = vst.msk [vmem:[#allocation0 + $0x50] sm:$0xff] %vm7752_vm13, %v11690_v19   ;;  %s9484_s24 = smov 48  ;;  %s9489_s2 = smov 192 }
 0x2a0   :  { %11818 = vrot.lane.b32.xlu1 %v11817_v47, %s12010_s4  ;;  %s9254_s4 = smov 48  ;;  %v9365_v38 = vld [vmem:[#allocation1 + $0x682] ss:$16 sm:%s9364_s29]   ;;  %11833 = vrot.lane.b32.xlu0 %v11832_v8, %s12011_s21  ;;  %s9499_s1 = smov 3 }
 0x2a1   :  { %v9255_v54 = vld [vmem:[#allocation1 + $0x402] ss:$16 sm:%s9254_s4]   ;;  %v9367_v52 = vsel %vm4102_vm0, %v9365_v38, %v9362_v49  ;;  %s9430_s4 = smov 3  ;;  %s9502_s22 = smov 12 }
 0x2a2   :  { %v9257_v10 = vsel %vm4106_vm1, %v9255_v54, %v9252_v53  ;;  %v9375_v18 = vld [vmem:[#allocation1 + $0x682] ss:$16 sm:%s9374_s18]   ;;  %v9372_v50 = vsel %vm4106_vm1, %v9370_v16, %v9367_v52  ;;  %s9507_s14 = smov 48  ;;  %s9512_s17 = smov 192 }
 0x2a3   :  { %v9262_v17 = vsel %vm4110_vm2, %v9260_v40, %v9257_v10  ;;  %v9385_v47 = vld [vmem:[#allocation1 + $0x102] ss:$16 sm:%s9384_s12]   ;;  %v9377_v4 = vsel %vm4110_vm2, %v9375_v18, %v9372_v50  ;;  %v11699_v10 = vpop.permute.xlu1 %11698  ;;  %s9522_s3 = smov 3  ;;  %s9525_s11 = smov 12  ;;  %v11706_v50 = vunpack.i.h.bf16 %v14371_v21 }
 0x2a4   :  { %v11827_v28 = vpack.i.bf16 %v9285_v55, %v9262_v17  ;;  %v9388_v48 = vld [vmem:[#allocation1 + $0x102] ss:$16 sm:%s9387_s28]   ;;  %v11837_v57 = vpack.i.bf16 %v9377_v4, %v9354_v45  ;;  %v11701_v37 = vunpack.i.h.bf16 %v11699_v10  ;;  %v11700_v56 = vunpack.i.l.bf16 %v11699_v10  ;;  %s9530_s30 = smov 48  ;;  %s9535_s29 = smov 192 }
 0x2a5   :  { %v9390_v35 = vsel %vm4102_vm0, %v9388_v48, %v9385_v47  ;;  %v9393_v61 = vld [vmem:[#allocation1 + $0x102] ss:$16 sm:%s9392_s16]   ;;  %s9545_s10 = smov 3  ;;  %s9548_s18 = smov 12  ;;  %v11705_v47 = vunpack.i.l.bf16 %v14371_v21  ;;  %8143 = vst.msk [vmem:[#allocation0 + $0x20] sm:$0xff] %vm8119_vm14, %v11706_v50  }
 0x2a6   :  { %11828 = vrot.lane.b32.xlu1 %v11827_v28, %s12011_s21  ;;  %v9398_v22 = vld [vmem:[#allocation1 + $0x102] ss:$16 sm:%s9397_s7]   ;;  %v9395_v58 = vsel %vm4106_vm1, %v9393_v61, %v9390_v35  ;;  %8075 = vst.msk [vmem:[#allocation0 + $0x58] sm:$0xff] %vm7752_vm13, %v11700_v56   ;;  %8098 = vst.msk [vmem:[#allocation0 + $0x78] sm:$0xff] %vm7752_vm13, %v11701_v37   ;;  %s9553_s12 = smov 48  ;;  %s9558_s28 = smov 192 }
 0x2a7   :  { %v9408_v34 = vld [vmem:[#allocation1 + $0x302] ss:$16 sm:%s9407_s8]   ;;  %v9400_v43 = vsel %vm4110_vm2, %v9398_v22, %v9395_v58  ;;  %v11709_v38 = vpop.permute.xlu1 %11708  ;;  %s9568_s16 = smov 3  ;;  %s9571_s7 = smov 12  ;;  %8120 = vst.msk [vmem:[#allocation0] sm:$0xff] %vm8119_vm14, %v11705_v47  }
 0x2a8   :  { %v9411_v42 = vld [vmem:[#allocation1 + $0x302] ss:$16 sm:%s9410_s25]   ;;  %v11711_v61 = vunpack.i.h.bf16 %v11709_v38  ;;  %v11710_v22 = vunpack.i.l.bf16 %v11709_v38  ;;  %v9569_v9 = vld [vmem:[#allocation1 + $0x1] ss:$16 sm:%s9568_s16]   ;;  %s9576_s8 = smov 48  ;;  %s9581_s25 = smov 192 }
 0x2a9   :  { %v9413_v53 = vsel %vm4102_vm0, %v9411_v42, %v9408_v34  ;;  %v9416_v54 = vld [vmem:[#allocation1 + $0x302] ss:$16 sm:%s9415_s9]   ;;  %v9577_v42 = vld [vmem:[#allocation1 + $0x1] ss:$16 sm:%s9576_s8]   ;;  %s9590_s9 = smov 3  ;;  %s9736_s16 = smov 48 }
 0x2aa   :  { %v9421_v40 = vld [vmem:[#allocation1 + $0x302] ss:$16 sm:%s9420_s0]   ;;  %11838 = vrot.lane.b32.xlu1 %v11837_v57, %s12011_s21  ;;  %v9418_v59 = vsel %vm4106_vm1, %v9416_v54, %v9413_v53  ;;  %v9572_v57 = vld [vmem:[#allocation1 + $0x1] ss:$16 sm:%s9571_s7]   ;;  %v11714_v53 = vpop.permute.xlu0 %11713  ;;  %s9593_s0 = smov 12  ;;  %8166 = vst.msk [vmem:[#allocation0 + $0x40] sm:$0xff] %vm8119_vm14, %v11710_v22  }
 0x2ab   :  { %v9431_v0 = vld [vmem:[#allocation1 + $0x502] ss:$16 sm:%s9430_s4]   ;;  %v9423_v11 = vsel %vm4110_vm2, %v9421_v40, %v9418_v59  ;;  %v9574_v34 = vsel %vm4102_vm0, %v9572_v57, %v9569_v9  ;;  %v9591_v59 = vld [vmem:[#allocation1 + $0x201] ss:$16 sm:%s9590_s9]   ;;  %s9598_s4 = smov 48  ;;  %8189 = vst.msk [vmem:[#allocation0 + $0x60] sm:$0xff] %vm8119_vm14, %v11711_v61  }
 0x2ac   :  { %v9434_v1 = vld [vmem:[#allocation1 + $0x502] ss:$16 sm:%s9433_s6]   ;;  %v11842_v46 = vpack.i.bf16 %v9423_v11, %v9400_v43  ;;  %v9582_v43 = vld [vmem:[#allocation1 + $0x1] ss:$16 sm:%s9581_s25]   ;;  %v9579_v40 = vsel %vm4106_vm1, %v9577_v42, %v9574_v34  ;;  %s9603_s6 = smov 192  ;;  %v11715_v11 = vunpack.i.l.bf16 %v11714_v53  ;;  %s9741_s7 = smov 192 }
 0x2ad   :  { %v9436_v12 = vsel %vm4102_vm0, %v9434_v1, %v9431_v0  ;;  %v9439_v17 = vld [vmem:[#allocation1 + $0x502] ss:$16 sm:%s9438_s26]   ;;  %v11716_v0 = vunpack.i.h.bf16 %v11714_v53  ;;  %v9594_v1 = vld [vmem:[#allocation1 + $0x201] ss:$16 sm:%s9593_s0]   ;;  %s9613_s26 = smov 3  ;;  %s9751_s8 = smov 3 }
 0x2ae   :  { %v9444_v63 = vld [vmem:[#allocation1 + $0x502] ss:$16 sm:%s9443_s15]   ;;  %v9441_v51 = vsel %vm4106_vm1, %v9439_v17, %v9436_v12  ;;  %11843 = vrot.lane.b32.xlu0 %v11842_v46, %s12011_s21  ;;  %v9599_v10 = vld [vmem:[#allocation1 + $0x201] ss:$16 sm:%s9598_s4]   ;;  %v9584_v12 = vsel %vm4110_vm2, %v9582_v43, %v9579_v40  ;;  %v9596_v17 = vsel %vm4102_vm0, %v9594_v1, %v9591_v59  ;;  %s9621_s15 = smov 48  ;;  %8212 = vst.msk [vmem:[#allocation0 + $0x8] sm:$0xff] %vm8119_vm14, %v11715_v11  }
 0x2af   :  { %v9454_v62 = vld [vmem:[#allocation1 + $0x702] ss:$16 sm:%s9453_s13]   ;;  %v9446_v55 = vsel %vm4110_vm2, %v9444_v63, %v9441_v51  ;;  %v9604_v63 = vld [vmem:[#allocation1 + $0x201] ss:$16 sm:%s9603_s6]   ;;  %8235 = vst.msk [vmem:[#allocation0 + $0x28] sm:$0xff] %vm8119_vm14, %v11716_v0   ;;  %v9601_v56 = vsel %vm4106_vm1, %v9599_v10, %v9596_v17  ;;  %s9626_s13 = smov 192 }
 0x2b0   :  { %v9457_v33 = vld [vmem:[#allocation1 + $0x702] ss:$16 sm:%s9456_s19]   ;;  %v9614_v37 = vld [vmem:[#allocation1 + $0x401] ss:$16 sm:%s9613_s26]   ;;  %s9636_s19 = smov 3  ;;  %s9754_s25 = smov 12 }
 0x2b1   :  { %v9459_v13 = vsel %vm4102_vm0, %v9457_v33, %v9454_v62  ;;  %v9462_v6 = vld [vmem:[#allocation1 + $0x702] ss:$16 sm:%s9461_s5]   ;;  %v9622_v51 = vld [vmem:[#allocation1 + $0x401] ss:$16 sm:%s9621_s15]   ;;  %v11719_v62 = vpop.permute.xlu1 %11718  ;;  %v9606_v33 = vsel %vm4110_vm2, %v9604_v63, %v9601_v56  ;;  %s9639_s5 = smov 12  ;;  %s9759_s9 = smov 48 }
 0x2b2   :  { %v9467_v15 = vld [vmem:[#allocation1 + $0x702] ss:$16 sm:%s9466_s20]   ;;  %v9464_v27 = vsel %vm4106_vm1, %v9462_v6, %v9459_v13  ;;  %v9627_v13 = vld [vmem:[#allocation1 + $0x401] ss:$16 sm:%s9626_s13]   ;;  %s9644_s20 = smov 48  ;;  %s9764_s0 = smov 192 }
 0x2b3   :  { %v9477_v30 = vld [vmem:[#allocation1 + $0x182] ss:$16 sm:%s9476_s23]   ;;  %v9469_v29 = vsel %vm4110_vm2, %v9467_v15, %v9464_v27  ;;  %v9637_v6 = vld [vmem:[#allocation1 + $0x601] ss:$16 sm:%s9636_s19]   ;;  %v11721_v15 = vunpack.i.h.bf16 %v11719_v62  ;;  %v11720_v27 = vunpack.i.l.bf16 %v11719_v62  ;;  %s9649_s23 = smov 192  ;;  %s9774_s4 = smov 3 }
 0x2b4   :  { %v9480_v28 = vld [vmem:[#allocation1 + $0x182] ss:$16 sm:%s9479_s27]   ;;  %v11847_v41 = vpack.i.bf16 %v9469_v29, %v9446_v55  ;;  %v9640_v29 = vld [vmem:[#allocation1 + $0x601] ss:$16 sm:%s9639_s5]   ;;  %s9659_s27 = smov 3  ;;  %s9777_s6 = smov 12 }
 0x2b5   :  { %v9482_v36 = vsel %vm4102_vm0, %v9480_v28, %v9477_v30  ;;  %v9485_v44 = vld [vmem:[#allocation1 + $0x182] ss:$16 sm:%s9484_s24]   ;;  %v11862_v30 = vpack.i.bf16 %v9606_v33, %v9584_v12  ;;  %v9650_v21 = vld [vmem:[#allocation1 + $0x601] ss:$16 sm:%s9649_s23]   ;;  %s9662_s24 = smov 12  ;;  %8258 = vst.msk [vmem:[#allocation0 + $0x48] sm:$0xff] %vm8119_vm14, %v11720_v27  }
 0x2b6   :  { %v9490_v60 = vld [vmem:[#allocation1 + $0x182] ss:$16 sm:%s9489_s2]   ;;  %v9487_v31 = vsel %vm4106_vm1, %v9485_v44, %v9482_v36  ;;  %11848 = vrot.lane.b32.xlu1 %v11847_v41, %s12011_s21  ;;  %v9645_v36 = vld [vmem:[#allocation1 + $0x601] ss:$16 sm:%s9644_s20]   ;;  %s9667_s2 = smov 48  ;;  %8281 = vst.msk [vmem:[#allocation0 + $0x68] sm:$0xff] %vm8119_vm14, %v11721_v15  }
 0x2b7   :  { %v9500_v39 = vld [vmem:[#allocation1 + $0x382] ss:$16 sm:%s9499_s1]   ;;  %v9492_v5 = vsel %vm4110_vm2, %v9490_v60, %v9487_v31  ;;  %v9642_v60 = vsel %vm4102_vm0, %v9640_v29, %v9637_v6  ;;  %v9660_v41 = vld [vmem:[#allocation1 + $0x81] ss:$16 sm:%s9659_s27]   ;;  %s12012_s1 = smov 8   ;;  %s9782_s26 = smov 48 }
 0x2b8   :  { %v9503_v25 = vld [vmem:[#allocation1 + $0x382] ss:$16 sm:%s9502_s22]   ;;  %v9647_v31 = vsel %vm4106_vm1, %v9645_v36, %v9642_v60  ;;  %s9672_s22 = smov 192  ;;  %v9737_v34 = vld [vmem:[#allocation1 + $0x681] ss:$16 sm:%s9736_s16]   ;;  %s9797_s15 = smov 3 }
 0x2b9   :  { %v9505_v24 = vsel %vm4102_vm0, %v9503_v25, %v9500_v39  ;;  %v9508_v7 = vld [vmem:[#allocation1 + $0x382] ss:$16 sm:%s9507_s14]   ;;  %v9663_v39 = vld [vmem:[#allocation1 + $0x81] ss:$16 sm:%s9662_s24]   ;;  %s9682_s14 = smov 3  ;;  %s9800_s13 = smov 12 }
 0x2ba   :  { %v9513_v3 = vld [vmem:[#allocation1 + $0x382] ss:$16 sm:%s9512_s17]   ;;  %v9510_v26 = vsel %vm4106_vm1, %v9508_v7, %v9505_v24  ;;  %v9668_v25 = vld [vmem:[#allocation1 + $0x81] ss:$16 sm:%s9667_s2]   ;;  %v9652_v24 = vsel %vm4110_vm2, %v9650_v21, %v9647_v31  ;;  %v9665_v7 = vsel %vm4102_vm0, %v9663_v39, %v9660_v41  ;;  %s9685_s17 = smov 12  ;;  %s9805_s19 = smov 48 }
 0x2bb   :  { %v9523_v2 = vld [vmem:[#allocation1 + $0x582] ss:$16 sm:%s9522_s3]   ;;  %v9515_v19 = vsel %vm4110_vm2, %v9513_v3, %v9510_v26  ;;  %v9673_v3 = vld [vmem:[#allocation1 + $0x81] ss:$16 sm:%s9672_s22]   ;;  %s9690_s3 = smov 48  ;;  %s9810_s5 = smov 192 }
 0x2bc   :  { %v9526_v14 = vld [vmem:[#allocation1 + $0x582] ss:$16 sm:%s9525_s11]   ;;  %v11852_v45 = vpack.i.bf16 %v9515_v19, %v9492_v5  ;;  %v11724_v5 = vpop.permute.xlu0 %11723  ;;  %v9683_v26 = vld [vmem:[#allocation1 + $0x281] ss:$16 sm:%s9682_s14]   ;;  %s9695_s11 = smov 192  ;;  %s9820_s20 = smov 3 }
 0x2bd   :  { %v9528_v8 = vsel %vm4102_vm0, %v9526_v14, %v9523_v2  ;;  %v9531_v32 = vld [vmem:[#allocation1 + $0x582] ss:$16 sm:%s9530_s30]   ;;  %v11726_v2 = vunpack.i.h.bf16 %v11724_v5  ;;  %v11725_v14 = vunpack.i.l.bf16 %v11724_v5  ;;  %s9705_s30 = smov 3  ;;  %v9742_v53 = vld [vmem:[#allocation1 + $0x681] ss:$16 sm:%s9741_s7]   ;;  %s9823_s23 = smov 12 }
 0x2be   :  { %v9536_v49 = vld [vmem:[#allocation1 + $0x582] ss:$16 sm:%s9535_s29]   ;;  %v9533_v52 = vsel %vm4106_vm1, %v9531_v32, %v9528_v8  ;;  %11853 = vrot.lane.b32.xlu0 %v11852_v45, %s12011_s21  ;;  %v9670_v8 = vsel %vm4106_vm1, %v9668_v25, %v9665_v7  ;;  %v9686_v32 = vld [vmem:[#allocation1 + $0x281] ss:$16 sm:%s9685_s17]   ;;  %s9708_s29 = smov 12  ;;  %s9828_s27 = smov 48 }
 0x2bf   :  { %v9546_v16 = vld [vmem:[#allocation1 + $0x782] ss:$16 sm:%s9545_s10]   ;;  %v9538_v48 = vsel %vm4110_vm2, %v9536_v49, %v9533_v52  ;;  %v9691_v49 = vld [vmem:[#allocation1 + $0x281] ss:$16 sm:%s9690_s3]   ;;  %v9675_v38 = vsel %vm4110_vm2, %v9673_v3, %v9670_v8  ;;  %v9688_v45 = vsel %vm4102_vm0, %v9686_v32, %v9683_v26  ;;  %s9713_s10 = smov 48  ;;  %8304 = vst.msk [vmem:[#allocation0 + $0x10] sm:$0xff] %vm8119_vm14, %v11725_v14  }
 0x2c0   :  { %v9549_v18 = vld [vmem:[#allocation1 + $0x782] ss:$16 sm:%s9548_s18]   ;;  %v9696_v52 = vld [vmem:[#allocation1 + $0x281] ss:$16 sm:%s9695_s11]   ;;  %8327 = vst.msk [vmem:[#allocation0 + $0x30] sm:$0xff] %vm8119_vm14, %v11726_v2   ;;  %s9718_s18 = smov 192  ;;  %v11734_v1 = vpop.permute.xlu0 %11733 }
 0x2c1   :  { %v9551_v20 = vsel %vm4102_vm0, %v9549_v18, %v9546_v16  ;;  %v9554_v4 = vld [vmem:[#allocation1 + $0x782] ss:$16 sm:%s9553_s12]   ;;  %v9706_v16 = vld [vmem:[#allocation1 + $0x481] ss:$16 sm:%s9705_s30]   ;;  %v9693_v18 = vsel %vm4106_vm1, %v9691_v49, %v9688_v45  ;;  %s9728_s12 = smov 3  ;;  %v11736_v63 = vunpack.i.h.bf16 %v11734_v1  ;;  %s9833_s24 = smov 192 }
 0x2c2   :  { %v9559_v35 = vld [vmem:[#allocation1 + $0x782] ss:$16 sm:%s9558_s28]   ;;  %v9556_v23 = vsel %vm4106_vm1, %v9554_v4, %v9551_v20  ;;  %11863 = vrot.lane.b32.xlu0 %v11862_v30, %s12012_s1  ;;  %v9709_v50 = vld [vmem:[#allocation1 + $0x481] ss:$16 sm:%s9708_s29]   ;;  %v9698_v20 = vsel %vm4110_vm2, %v9696_v52, %v9693_v18  ;;  %s9731_s28 = smov 12  ;;  %s9843_s2 = smov 3 }
 0x2c3   :  { %v9561_v58 = vsel %vm4110_vm2, %v9559_v35, %v9556_v23  ;;  %v9714_v47 = vld [vmem:[#allocation1 + $0x481] ss:$16 sm:%s9713_s10]   ;;  %v9711_v4 = vsel %vm4102_vm0, %v9709_v50, %v9706_v16  ;;  %v11872_v9 = vpack.i.bf16 %v9698_v20, %v9675_v38  ;;  %8419 = vst.msk [vmem:[#allocation0 + $0x38] sm:$0xff] %vm8119_vm14, %v11736_v63   ;;  %s9846_s22 = smov 12  ;;  %s9851_s14 = smov 48 }
 0x2c4   :  { %v11857_v54 = vpack.i.bf16 %v9561_v58, %v9538_v48  ;;  %v11729_v48 = vpop.permute.xlu1 %11728  ;;  %v9719_v35 = vld [vmem:[#allocation1 + $0x481] ss:$16 sm:%s9718_s18]   ;;  %v9716_v57 = vsel %vm4106_vm1, %v9714_v47, %v9711_v4  ;;  %s9856_s17 = smov 192  ;;  %s9866_s3 = smov 3  ;;  %v11744_v8 = vpop.permute.xlu0 %11743 }
 0x2c5   :  { %v9729_v61 = vld [vmem:[#allocation1 + $0x681] ss:$16 sm:%s9728_s12]   ;;  %v11731_v22 = vunpack.i.h.bf16 %v11729_v48  ;;  %v11730_v23 = vunpack.i.l.bf16 %v11729_v48  ;;  %v9721_v42 = vsel %vm4110_vm2, %v9719_v35, %v9716_v57  ;;  %s9869_s11 = smov 12  ;;  %s9874_s30 = smov 48  ;;  %v11746_v35 = vunpack.i.h.bf16 %v11744_v8 }
 0x2c6   :  { %11858 = vrot.lane.b32.xlu1 %v11857_v54, %s12011_s21  ;;  %s9616_s21 = smov 12  ;;  %v9732_v58 = vld [vmem:[#allocation1 + $0x681] ss:$16 sm:%s9731_s28]   ;;  %11873 = vrot.lane.b32.xlu0 %v11872_v9, %s12012_s1  ;;  %s9879_s29 = smov 192 }
 0x2c7   :  { %v9617_v46 = vld [vmem:[#allocation1 + $0x401] ss:$16 sm:%s9616_s21]   ;;  %v9734_v43 = vsel %vm4102_vm0, %v9732_v58, %v9729_v61  ;;  %8350 = vst.msk [vmem:[#allocation0 + $0x50] sm:$0xff] %vm8119_vm14, %v11730_v23   ;;  %8373 = vst.msk [vmem:[#allocation0 + $0x70] sm:$0xff] %vm8119_vm14, %v11731_v22   ;;  %s9787_s21 = smov 192  ;;  %s9889_s10 = smov 3  ;;  %v11745_v61 = vunpack.i.l.bf16 %v11744_v8 }
 0x2c8   :  { %v9619_v55 = vsel %vm4102_vm0, %v9617_v46, %v9614_v37  ;;  %v9752_v54 = vld [vmem:[#allocation1 + $0x101] ss:$16 sm:%s9751_s8]   ;;  %v9739_v40 = vsel %vm4106_vm1, %v9737_v34, %v9734_v43  ;;  %v11735_v37 = vunpack.i.l.bf16 %v11734_v1  ;;  %s9892_s18 = smov 12  ;;  %s9897_s12 = smov 48  ;;  %8510 = vst.msk [vmem:[#allocation0 + $0x20] sm:$0xff] %vm8486_vm15, %v11746_v35   ;;  %v11754_v63 = vpop.permute.xlu0 %11753 }
 0x2c9   :  { %v9624_v28 = vsel %vm4106_vm1, %v9622_v51, %v9619_v55  ;;  %v9755_v59 = vld [vmem:[#allocation1 + $0x101] ss:$16 sm:%s9754_s25]   ;;  %v9744_v10 = vsel %vm4110_vm2, %v9742_v53, %v9739_v40  ;;  %s9902_s28 = smov 192  ;;  %s9912_s16 = smov 3  ;;  %8487 = vst.msk [vmem:[#allocation0] sm:$0xff] %vm8486_vm15, %v11745_v61  }
 0x2ca   :  { %v9629_v44 = vsel %vm4110_vm2, %v9627_v13, %v9624_v28  ;;  %v9760_v0 = vld [vmem:[#allocation1 + $0x101] ss:$16 sm:%s9759_s9]   ;;  %v9757_v11 = vsel %vm4102_vm0, %v9755_v59, %v9752_v54  ;;  %v11877_v56 = vpack.i.bf16 %v9744_v10, %v9721_v42  ;;  %8396 = vst.msk [vmem:[#allocation0 + $0x18] sm:$0xff] %vm8119_vm14, %v11735_v37   ;;  %v11739_v28 = vpop.permute.xlu1 %11738  ;;  %s9915_s7 = smov 12  ;;  %s9920_s8 = smov 48 }
 0x2cb   :  { %v11867_v19 = vpack.i.bf16 %v9652_v24, %v9629_v44  ;;  %v9765_v12 = vld [vmem:[#allocation1 + $0x101] ss:$16 sm:%s9764_s0]   ;;  %v9762_v46 = vsel %vm4106_vm1, %v9760_v0, %v9757_v11  ;;  %v11741_v21 = vunpack.i.h.bf16 %v11739_v28  ;;  %v11740_v41 = vunpack.i.l.bf16 %v11739_v28  ;;  %s9925_s25 = smov 192  ;;  %s14576_s0 = sld [smem:[#allocation11_spill]] }
 0x2cc   :  { %v9775_v17 = vld [vmem:[#allocation1 + $0x301] ss:$16 sm:%s9774_s4]   ;;  %v9767_v33 = vsel %vm4110_vm2, %v9765_v12, %v9762_v46  ;;  %v11755_v46 = vunpack.i.l.bf16 %v11754_v63 }
 0x2cd   :  { %11868 = vrot.lane.b32.xlu1 %v11867_v19, %s12012_s1  ;;  %v9778_v51 = vld [vmem:[#allocation1 + $0x301] ss:$16 sm:%s9777_s6]   ;;  %8442 = vst.msk [vmem:[#allocation0 + $0x58] sm:$0xff] %vm8119_vm14, %v11740_v41   ;;  %8465 = vst.msk [vmem:[#allocation0 + $0x78] sm:$0xff] %vm8119_vm14, %v11741_v21  }
 0x2ce   :  { %v9783_v62 = vld [vmem:[#allocation1 + $0x301] ss:$16 sm:%s9782_s26]   ;;  %v9780_v55 = vsel %vm4102_vm0, %v9778_v51, %v9775_v17  ;;  %v11749_v57 = vpop.permute.xlu1 %11748  ;;  %8579 = vst.msk [vmem:[#allocation0 + $0x8] sm:$0xff] %vm8486_vm15, %v11755_v46  }
 0x2cf   :  { %v9788_v13 = vld [vmem:[#allocation1 + $0x301] ss:$16 sm:%s9787_s21]   ;;  %v9785_v15 = vsel %vm4106_vm1, %v9783_v62, %v9780_v55  ;;  %v11751_v53 = vunpack.i.h.bf16 %v11749_v57  ;;  %v11750_v54 = vunpack.i.l.bf16 %v11749_v57 }
 0x2d0   :  { %v9798_v6 = vld [vmem:[#allocation1 + $0x501] ss:$16 sm:%s9797_s15]   ;;  %v9790_v29 = vsel %vm4110_vm2, %v9788_v13, %v9785_v15 }
 0x2d1   :  { %11878 = vrot.lane.b32.xlu1 %v11877_v56, %s12012_s1  ;;  %v9801_v27 = vld [vmem:[#allocation1 + $0x501] ss:$16 sm:%s9800_s13]   ;;  %v11882_v31 = vpack.i.bf16 %v9790_v29, %v9767_v33  ;;  %8533 = vst.msk [vmem:[#allocation0 + $0x40] sm:$0xff] %vm8486_vm15, %v11750_v54   ;;  %8556 = vst.msk [vmem:[#allocation0 + $0x60] sm:$0xff] %vm8486_vm15, %v11751_v53   ;;  %v11756_v56 = vunpack.i.h.bf16 %v11754_v63 }
 0x2d2   :  { %v9806_v30 = vld [vmem:[#allocation1 + $0x501] ss:$16 sm:%s9805_s19]   ;;  %v9803_v36 = vsel %vm4102_vm0, %v9801_v27, %v9798_v6  ;;  %v11759_v62 = vpop.permute.xlu1 %11758 }
 0x2d3   :  { %v9811_v44 = vld [vmem:[#allocation1 + $0x501] ss:$16 sm:%s9810_s5]   ;;  %v9808_v39 = vsel %vm4106_vm1, %v9806_v30, %v9803_v36  ;;  %11883 = vrot.lane.b32.xlu0 %v11882_v31, %s12012_s1  ;;  %8602 = vst.msk [vmem:[#allocation0 + $0x28] sm:$0xff] %vm8486_vm15, %v11756_v56   ;;  %v11761_v33 = vunpack.i.h.bf16 %v11759_v62  ;;  %v11760_v55 = vunpack.i.l.bf16 %v11759_v62 }
 0x2d4   :  { %v9821_v60 = vld [vmem:[#allocation1 + $0x701] ss:$16 sm:%s9820_s20]   ;;  %v9813_v24 = vsel %vm4110_vm2, %v9811_v44, %v9808_v39 }
 0x2d5   :  { %v9824_v25 = vld [vmem:[#allocation1 + $0x701] ss:$16 sm:%s9823_s23]   ;;  %8625 = vst.msk [vmem:[#allocation0 + $0x48] sm:$0xff] %vm8486_vm15, %v11760_v55   ;;  %8648 = vst.msk [vmem:[#allocation0 + $0x68] sm:$0xff] %vm8486_vm15, %v11761_v33  }
 0x2d6   :  { %v9829_v5 = vld [vmem:[#allocation1 + $0x701] ss:$16 sm:%s9828_s27]   ;;  %v9826_v7 = vsel %vm4102_vm0, %v9824_v25, %v9821_v60  ;;  %v11764_v13 = vpop.permute.xlu0 %11763 }
 0x2d7   :  { %v9834_v3 = vld [vmem:[#allocation1 + $0x701] ss:$16 sm:%s9833_s24]   ;;  %v9831_v2 = vsel %vm4106_vm1, %v9829_v5, %v9826_v7  ;;  %v11766_v6 = vunpack.i.h.bf16 %v11764_v13  ;;  %v11765_v15 = vunpack.i.l.bf16 %v11764_v13 }
 0x2d8   :  { %v9844_v26 = vld [vmem:[#allocation1 + $0x181] ss:$16 sm:%s9843_s2]   ;;  %v9836_v32 = vsel %vm4110_vm2, %v9834_v3, %v9831_v2 }
 0x2d9   :  { %v9847_v14 = vld [vmem:[#allocation1 + $0x181] ss:$16 sm:%s9846_s22]   ;;  %v11887_v52 = vpack.i.bf16 %v9836_v32, %v9813_v24  ;;  %8671 = vst.msk [vmem:[#allocation0 + $0x10] sm:$0xff] %vm8486_vm15, %v11765_v15   ;;  %8694 = vst.msk [vmem:[#allocation0 + $0x30] sm:$0xff] %vm8486_vm15, %v11766_v6  }
 0x2da   :  { %v9852_v19 = vld [vmem:[#allocation1 + $0x181] ss:$16 sm:%s9851_s14]   ;;  %v9849_v49 = vsel %vm4102_vm0, %v9847_v14, %v9844_v26 }
 0x2db   :  { %v9857_v38 = vld [vmem:[#allocation1 + $0x181] ss:$16 sm:%s9856_s17]   ;;  %v9854_v16 = vsel %vm4106_vm1, %v9852_v19, %v9849_v49  ;;  %11888 = vrot.lane.b32.xlu1 %v11887_v52, %s12012_s1 }
 0x2dc   :  { %v9867_v45 = vld [vmem:[#allocation1 + $0x381] ss:$16 sm:%s9866_s3]   ;;  %v9859_v47 = vsel %vm4110_vm2, %v9857_v38, %v9854_v16 }
 0x2dd   :  { %v9870_v18 = vld [vmem:[#allocation1 + $0x381] ss:$16 sm:%s9869_s11]  }
 0x2de   :  { %v9875_v50 = vld [vmem:[#allocation1 + $0x381] ss:$16 sm:%s9874_s30]   ;;  %v9872_v48 = vsel %vm4102_vm0, %v9870_v18, %v9867_v45  ;;  %v11769_v27 = vpop.permute.xlu1 %11768 }
 0x2df   :  { %v9880_v20 = vld [vmem:[#allocation1 + $0x381] ss:$16 sm:%s9879_s29]   ;;  %v9877_v22 = vsel %vm4106_vm1, %v9875_v50, %v9872_v48  ;;  %v11771_v30 = vunpack.i.h.bf16 %v11769_v27  ;;  %v11770_v28 = vunpack.i.l.bf16 %v11769_v27 }
 0x2e0   :  { %v9890_v4 = vld [vmem:[#allocation1 + $0x581] ss:$16 sm:%s9889_s10]   ;;  %v9882_v58 = vsel %vm4110_vm2, %v9880_v20, %v9877_v22 }
 0x2e1   :  { %v9893_v23 = vld [vmem:[#allocation1 + $0x581] ss:$16 sm:%s9892_s18]   ;;  %v11892_v40 = vpack.i.bf16 %v9882_v58, %v9859_v47  ;;  %8717 = vst.msk [vmem:[#allocation0 + $0x50] sm:$0xff] %vm8486_vm15, %v11770_v28   ;;  %8740 = vst.msk [vmem:[#allocation0 + $0x70] sm:$0xff] %vm8486_vm15, %v11771_v30  }
 0x2e2   :  { %v9898_v9 = vld [vmem:[#allocation1 + $0x581] ss:$16 sm:%s9897_s12]   ;;  %v9895_v34 = vsel %vm4102_vm0, %v9893_v23, %v9890_v4 }
 0x2e3   :  { %v9903_v42 = vld [vmem:[#allocation1 + $0x581] ss:$16 sm:%s9902_s28]   ;;  %v9900_v59 = vsel %vm4106_vm1, %v9898_v9, %v9895_v34  ;;  %11893 = vrot.lane.b32.xlu0 %v11892_v40, %s12012_s1 }
 0x2e4   :  { %v9913_v43 = vld [vmem:[#allocation1 + $0x781] ss:$16 sm:%s9912_s16]   ;;  %v9905_v10 = vsel %vm4110_vm2, %v9903_v42, %v9900_v59 }
 0x2e5   :  { %v9916_v0 = vld [vmem:[#allocation1 + $0x781] ss:$16 sm:%s9915_s7]  }
 0x2e6   :  { %v9921_v1 = vld [vmem:[#allocation1 + $0x781] ss:$16 sm:%s9920_s8]   ;;  %v9918_v11 = vsel %vm4102_vm0, %v9916_v0, %v9913_v43  ;;  %v11774_v29 = vpop.permute.xlu0 %11773  ;;  %vm8853_vm0 = vcmask 261312  }
 0x2e7   :  { %v9926_v12 = vld [vmem:[#allocation1 + $0x781] ss:$16 sm:%s9925_s25]   ;;  %v9923_v17 = vsel %vm4106_vm1, %v9921_v1, %v9918_v11  ;;  %v11776_v36 = vunpack.i.h.bf16 %v11774_v29  ;;  %v11775_v44 = vunpack.i.l.bf16 %v11774_v29  ;;  %vm9220_vm1 = vcmask 195712  }
 0x2e8   :  { %v9928_v37 = vsel %vm4110_vm2, %v9926_v12, %v9923_v17  ;;  %vm9587_vm2 = vcmask 130112  }
 0x2e9   :  { %v11897_v51 = vpack.i.bf16 %v9928_v37, %v9905_v10  ;;  %8763 = vst.msk [vmem:[#allocation0 + $0x18] sm:$0xff] %vm8486_vm15, %v11775_v44   ;;  %8786 = vst.msk [vmem:[#allocation0 + $0x38] sm:$0xff] %vm8486_vm15, %v11776_v36  }
 0x2ea   :  { %v11784_v31 = vpop.permute.xlu0 %11783 }
 0x2eb   :  { %11898 = vrot.lane.b32.xlu1 %v11897_v51, %s12012_s1  ;;  %v11786_v39 = vunpack.i.h.bf16 %v11784_v31  ;;  %v11785_v25 = vunpack.i.l.bf16 %v11784_v31 }
 0x2ed   :  { %8854 = vst.msk [vmem:[#allocation0] sm:$0xff] %vm8853_vm0, %v11785_v25   ;;  %8877 = vst.msk [vmem:[#allocation0 + $0x20] sm:$0xff] %vm8853_vm0, %v11786_v39  }
 0x2ee   :  { %v11779_v60 = vpop.permute.xlu1 %11778  ;;  %v11794_v3 = vpop.permute.xlu0 %11793 }
 0x2ef   :  { %v11781_v21 = vunpack.i.h.bf16 %v11779_v60  ;;  %v11780_v41 = vunpack.i.l.bf16 %v11779_v60  ;;  %v11796_v26 = vunpack.i.h.bf16 %v11794_v3  ;;  %v11795_v2 = vunpack.i.l.bf16 %v11794_v3 }
 0x2f1   :  { %8809 = vst.msk [vmem:[#allocation0 + $0x58] sm:$0xff] %vm8486_vm15, %v11780_v41   ;;  %8832 = vst.msk [vmem:[#allocation0 + $0x78] sm:$0xff] %vm8486_vm15, %v11781_v21  }
 0x2f2   :  { %8946 = vst.msk [vmem:[#allocation0 + $0x8] sm:$0xff] %vm8853_vm0, %v11795_v2   ;;  %8969 = vst.msk [vmem:[#allocation0 + $0x28] sm:$0xff] %vm8853_vm0, %v11796_v26  }
 0x2f5   :  { %v11789_v5 = vpop.permute.xlu1 %11788 }
 0x2f6   :  { %v11791_v24 = vunpack.i.h.bf16 %v11789_v5  ;;  %v11790_v7 = vunpack.i.l.bf16 %v11789_v5 }
 0x2f8   :  { %8900 = vst.msk [vmem:[#allocation0 + $0x40] sm:$0xff] %vm8853_vm0, %v11790_v7   ;;  %8923 = vst.msk [vmem:[#allocation0 + $0x60] sm:$0xff] %vm8853_vm0, %v11791_v24  }
 0x2f9   :  { %v11799_v14 = vpop.permute.xlu1 %11798 }
 0x2fa   :  { %v11801_v19 = vunpack.i.h.bf16 %v11799_v14  ;;  %v11800_v8 = vunpack.i.l.bf16 %v11799_v14  ;;  %v11804_v32 = vpop.permute.xlu0 %11803 }
 0x2fb   :  { %v11806_v49 = vunpack.i.h.bf16 %v11804_v32  ;;  %v11805_v38 = vunpack.i.l.bf16 %v11804_v32 }
 0x2fc   :  { %8992 = vst.msk [vmem:[#allocation0 + $0x48] sm:$0xff] %vm8853_vm0, %v11800_v8   ;;  %9015 = vst.msk [vmem:[#allocation0 + $0x68] sm:$0xff] %vm8853_vm0, %v11801_v19  }
 0x2fd   :  { %9038 = vst.msk [vmem:[#allocation0 + $0x10] sm:$0xff] %vm8853_vm0, %v11805_v38   ;;  %9061 = vst.msk [vmem:[#allocation0 + $0x30] sm:$0xff] %vm8853_vm0, %v11806_v49  }
 0x302   :  { %v11809_v45 = vpop.permute.xlu1 %11808 }
 0x303   :  { %v11811_v52 = vunpack.i.h.bf16 %v11809_v45  ;;  %v11810_v16 = vunpack.i.l.bf16 %v11809_v45 }
 0x305   :  { %9084 = vst.msk [vmem:[#allocation0 + $0x50] sm:$0xff] %vm8853_vm0, %v11810_v16   ;;  %9107 = vst.msk [vmem:[#allocation0 + $0x70] sm:$0xff] %vm8853_vm0, %v11811_v52  }
 0x30a   :  { %v11814_v18 = vpop.permute.xlu0 %11813 }
 0x30b   :  { %v11816_v50 = vunpack.i.h.bf16 %v11814_v18  ;;  %v11815_v47 = vunpack.i.l.bf16 %v11814_v18 }
 0x30d   :  { %9130 = vst.msk [vmem:[#allocation0 + $0x18] sm:$0xff] %vm8853_vm0, %v11815_v47   ;;  %9153 = vst.msk [vmem:[#allocation0 + $0x38] sm:$0xff] %vm8853_vm0, %v11816_v50  }
 0x30e   :  { %v11824_v35 = vpop.permute.xlu0 %11823 }
 0x30f   :  { %v11826_v61 = vunpack.i.h.bf16 %v11824_v35  ;;  %v11825_v22 = vunpack.i.l.bf16 %v11824_v35 }
 0x311   :  { %9221 = vst.msk [vmem:[#allocation0] sm:$0xff] %vm9220_vm1, %v11825_v22   ;;  %9244 = vst.msk [vmem:[#allocation0 + $0x20] sm:$0xff] %vm9220_vm1, %v11826_v61  }
 0x312   :  { %v11819_v48 = vpop.permute.xlu1 %11818  ;;  %v11834_v58 = vpop.permute.xlu0 %11833 }
 0x313   :  { %v11821_v20 = vunpack.i.h.bf16 %v11819_v48  ;;  %v11820_v4 = vunpack.i.l.bf16 %v11819_v48  ;;  %v11836_v34 = vunpack.i.h.bf16 %v11834_v58  ;;  %v11835_v42 = vunpack.i.l.bf16 %v11834_v58 }
 0x315   :  { %9176 = vst.msk [vmem:[#allocation0 + $0x58] sm:$0xff] %vm8853_vm0, %v11820_v4   ;;  %9199 = vst.msk [vmem:[#allocation0 + $0x78] sm:$0xff] %vm8853_vm0, %v11821_v20  }
 0x316   :  { %9313 = vst.msk [vmem:[#allocation0 + $0x8] sm:$0xff] %vm9220_vm1, %v11835_v42   ;;  %9336 = vst.msk [vmem:[#allocation0 + $0x28] sm:$0xff] %vm9220_vm1, %v11836_v34  }
 0x318   :  { %v11829_v23 = vpop.permute.xlu1 %11828 }
 0x319   :  { %v11831_v9 = vunpack.i.h.bf16 %v11829_v23  ;;  %v11830_v57 = vunpack.i.l.bf16 %v11829_v23 }
 0x31b   :  { %9267 = vst.msk [vmem:[#allocation0 + $0x40] sm:$0xff] %vm9220_vm1, %v11830_v57   ;;  %9290 = vst.msk [vmem:[#allocation0 + $0x60] sm:$0xff] %vm9220_vm1, %v11831_v9  }
 0x31c   :  { %v11839_v43 = vpop.permute.xlu1 %11838 }
 0x31d   :  { %v11841_v53 = vunpack.i.h.bf16 %v11839_v43  ;;  %v11840_v54 = vunpack.i.l.bf16 %v11839_v43 }
 0x31f   :  { %9359 = vst.msk [vmem:[#allocation0 + $0x48] sm:$0xff] %vm9220_vm1, %v11840_v54   ;;  %9382 = vst.msk [vmem:[#allocation0 + $0x68] sm:$0xff] %vm9220_vm1, %v11841_v53  }
 0x320   :  { %v11844_v40 = vpop.permute.xlu0 %11843 }
 0x321   :  { %v11846_v59 = vunpack.i.h.bf16 %v11844_v40  ;;  %v11845_v0 = vunpack.i.l.bf16 %v11844_v40 }
 0x323   :  { %9405 = vst.msk [vmem:[#allocation0 + $0x10] sm:$0xff] %vm9220_vm1, %v11845_v0   ;;  %9428 = vst.msk [vmem:[#allocation0 + $0x30] sm:$0xff] %vm9220_vm1, %v11846_v59  }
 0x328   :  { %v11849_v1 = vpop.permute.xlu1 %11848 }
 0x329   :  { %v11851_v10 = vunpack.i.h.bf16 %v11849_v1  ;;  %v11850_v11 = vunpack.i.l.bf16 %v11849_v1 }
 0x32b   :  { %9451 = vst.msk [vmem:[#allocation0 + $0x50] sm:$0xff] %vm9220_vm1, %v11850_v11   ;;  %9474 = vst.msk [vmem:[#allocation0 + $0x70] sm:$0xff] %vm9220_vm1, %v11851_v10  }
 0x330   :  { %v11854_v12 = vpop.permute.xlu0 %11853 }
 0x331   :  { %v11856_v17 = vunpack.i.h.bf16 %v11854_v12  ;;  %v11855_v63 = vunpack.i.l.bf16 %v11854_v12 }
 0x333   :  { %9497 = vst.msk [vmem:[#allocation0 + $0x18] sm:$0xff] %vm9220_vm1, %v11855_v63   ;;  %9520 = vst.msk [vmem:[#allocation0 + $0x38] sm:$0xff] %vm9220_vm1, %v11856_v17  }
 0x334   :  { %v11864_v51 = vpop.permute.xlu0 %11863 }
 0x335   :  { %v11866_v62 = vunpack.i.h.bf16 %v11864_v51  ;;  %v11865_v33 = vunpack.i.l.bf16 %v11864_v51 }
 0x337   :  { %9588 = vst.msk [vmem:[#allocation0] sm:$0xff] %vm9587_vm2, %v11865_v33   ;;  %9611 = vst.msk [vmem:[#allocation0 + $0x20] sm:$0xff] %vm9587_vm2, %v11866_v62  }
 0x338   :  { %v11859_v37 = vpop.permute.xlu1 %11858  ;;  %v11874_v15 = vpop.permute.xlu0 %11873 }
 0x339   :  { %v11861_v56 = vunpack.i.h.bf16 %v11859_v37  ;;  %v11860_v46 = vunpack.i.l.bf16 %v11859_v37  ;;  %v11876_v27 = vunpack.i.h.bf16 %v11874_v15  ;;  %v11875_v30 = vunpack.i.l.bf16 %v11874_v15 }
 0x33b   :  { %9543 = vst.msk [vmem:[#allocation0 + $0x58] sm:$0xff] %vm9220_vm1, %v11860_v46   ;;  %9566 = vst.msk [vmem:[#allocation0 + $0x78] sm:$0xff] %vm9220_vm1, %v11861_v56  }
 0x33c   :  { %9680 = vst.msk [vmem:[#allocation0 + $0x8] sm:$0xff] %vm9587_vm2, %v11875_v30   ;;  %9703 = vst.msk [vmem:[#allocation0 + $0x28] sm:$0xff] %vm9587_vm2, %v11876_v27  }
 0x33e   :  { %v9939_v60 = vld [vmem:[#allocation0] sm:$0xff] }
 0x33f   :  { %v11869_v55 = vpop.permute.xlu1 %11868  ;;  %v9968_v31 = vld [vmem:[#allocation0 + $0x20] sm:$0xff] }
 0x340   :  { %v11871_v13 = vunpack.i.h.bf16 %v11869_v55  ;;  %v11870_v6 = vunpack.i.l.bf16 %v11869_v55 }
 0x342   :  { %9634 = vst.msk [vmem:[#allocation0 + $0x40] sm:$0xff] %vm9587_vm2, %v11870_v6   ;;  %9657 = vst.msk [vmem:[#allocation0 + $0x60] sm:$0xff] %vm9587_vm2, %v11871_v13  }
 0x343   :  { %v11879_v28 = vpop.permute.xlu1 %11878  ;;  %v9945_v39 = vld [vmem:[#allocation0 + $0x8] sm:$0xff] }
 0x344   :  { %v11881_v29 = vunpack.i.h.bf16 %v11879_v28  ;;  %v11880_v36 = vunpack.i.l.bf16 %v11879_v28  ;;  %v9976_v25 = vld [vmem:[#allocation0 + $0x28] sm:$0xff]  ;;  %v11116_v24 = vpack.c.bf16 %v9945_v39, %v9939_v60 }
 0x345   :  { %v11884_v44 = vpop.permute.xlu0 %11883  ;;  %v11126_v5 = vpack.c.bf16 %v9976_v25, %v9968_v31 }
 0x346   :  { %9726 = vst.msk [vmem:[#allocation0 + $0x48] sm:$0xff] %vm9587_vm2, %v11880_v36   ;;  %9749 = vst.msk [vmem:[#allocation0 + $0x68] sm:$0xff] %vm9587_vm2, %v11881_v29   ;;  %v11886_v21 = vunpack.i.h.bf16 %v11884_v44  ;;  %v11885_v41 = vunpack.i.l.bf16 %v11884_v44 }
 0x347   :  { %11281 = vst [vmem:[%s14576_s0 + $0x10] sm:$0xff] %v11126_v5   ;;  %11117 = vst [vmem:[%s14576_s0] sm:$0xff] %v11116_v24  }
 0x348   :  { %9772 = vst.msk [vmem:[#allocation0 + $0x10] sm:$0xff] %vm9587_vm2, %v11885_v41   ;;  %9795 = vst.msk [vmem:[#allocation0 + $0x30] sm:$0xff] %vm9587_vm2, %v11886_v21  }
 0x349   :  { %v10000_v3 = vld [vmem:[#allocation0 + $0x40] sm:$0xff] }
 0x34a   :  { %v10032_v14 = vld [vmem:[#allocation0 + $0x60] sm:$0xff] }
 0x34d   :  { %v11889_v7 = vpop.permute.xlu1 %11888  ;;  %v10008_v19 = vld [vmem:[#allocation0 + $0x48] sm:$0xff] }
 0x34e   :  { %v11891_v26 = vunpack.i.h.bf16 %v11889_v7  ;;  %v11890_v2 = vunpack.i.l.bf16 %v11889_v7  ;;  %v10040_v8 = vld [vmem:[#allocation0 + $0x68] sm:$0xff]  ;;  %v11136_v32 = vpack.c.bf16 %v10008_v19, %v10000_v3 }
 0x34f   :  { %v11146_v49 = vpack.c.bf16 %v10040_v8, %v10032_v14  ;;  %v9952_v47 = vld [vmem:[#allocation0 + $0x10] sm:$0xff] }
 0x350   :  { %9818 = vst.msk [vmem:[#allocation0 + $0x50] sm:$0xff] %vm9587_vm2, %v11890_v2   ;;  %9841 = vst.msk [vmem:[#allocation0 + $0x70] sm:$0xff] %vm9587_vm2, %v11891_v26   ;;  %v9984_v48 = vld [vmem:[#allocation0 + $0x30] sm:$0xff] }
 0x351   :  { %11283 = vst [vmem:[%s14576_s0 + $0x20] sm:$0xff] %v11136_v32   ;;  %11285 = vst [vmem:[%s14576_s0 + $0x30] sm:$0xff] %v11146_v49  }
 0x355   :  { %v11894_v38 = vpop.permute.xlu0 %11893 }
 0x356   :  { %v11896_v45 = vunpack.i.h.bf16 %v11894_v38  ;;  %v11895_v52 = vunpack.i.l.bf16 %v11894_v38 }
 0x357   :  { %v10016_v22 = vld [vmem:[#allocation0 + $0x50] sm:$0xff] }
 0x358   :  { %9864 = vst.msk [vmem:[#allocation0 + $0x18] sm:$0xff] %vm9587_vm2, %v11895_v52   ;;  %9887 = vst.msk [vmem:[#allocation0 + $0x38] sm:$0xff] %vm9587_vm2, %v11896_v45   ;;  %v10048_v23 = vld [vmem:[#allocation0 + $0x70] sm:$0xff] }
 0x35d   :  { %v11899_v16 = vpop.permute.xlu1 %11898 }
 0x35e   :  { %v11901_v18 = vunpack.i.h.bf16 %v11899_v16  ;;  %v11900_v50 = vunpack.i.l.bf16 %v11899_v16 }
 0x35f   :  { %v9960_v20 = vld [vmem:[#allocation0 + $0x18] sm:$0xff] }
 0x360   :  { %9910 = vst.msk [vmem:[#allocation0 + $0x58] sm:$0xff] %vm9587_vm2, %v11900_v50   ;;  %9933 = vst.msk [vmem:[#allocation0 + $0x78] sm:$0xff] %vm9587_vm2, %v11901_v18   ;;  %v9992_v4 = vld [vmem:[#allocation0 + $0x38] sm:$0xff]  ;;  %v11121_v35 = vpack.c.bf16 %v9960_v20, %v9952_v47 }
 0x361   :  { %v11131_v61 = vpack.c.bf16 %v9992_v4, %v9984_v48 }
 0x362   :  { %11280 = vst [vmem:[%s14576_s0 + $0x8] sm:$0xff] %v11121_v35  }
 0x363   :  { %11282 = vst [vmem:[%s14576_s0 + $0x18] sm:$0xff] %v11131_v61  }
 0x367   :  { %v10024_v9 = vld [vmem:[#allocation0 + $0x58] sm:$0xff] }
 0x368   :  { %v10056_v57 = vld [vmem:[#allocation0 + $0x78] sm:$0xff]  ;;  %v11141_v58 = vpack.c.bf16 %v10024_v9, %v10016_v22 }
 0x369   :  { %v11151_v34 = vpack.c.bf16 %v10056_v57, %v10048_v23 }
 0x36a   :  { %11284 = vst [vmem:[%s14576_s0 + $0x28] sm:$0xff] %v11141_v58  }
 0x36b   :  { %11286 = vst [vmem:[%s14576_s0 + $0x38] sm:$0xff] %v11151_v34  }

// kernel: tile.23
= control target key start
LH: loop header
LB: loop body
LE: loop exit
PB: predicated region body
PF: predicated region fallthrough
CT: control target
= control target key end

     0   :  { %s28_s0 = inlined_call_operand.vmem [shape: f32[8], index: 0, kind: input, shape index: {}]   ;;  %s29_s1 = inlined_call_operand.vmem [shape: f32[16,8], index: 1, kind: output, shape index: {}]  }
   0x1   :  { %v4_v0 = vld [vmem:[%s28_s0] ss:$0 sm:$0xff] }
   0x2   :  { %5 = vst [vmem:[%s29_s1] sm:$0xff] %v4_v0  ;;  %8 = vst [vmem:[%s29_s1 + $0x8] sm:$0xff] %v4_v0 }

// kernel: tile.24
= control target key start
LH: loop header
LB: loop body
LE: loop exit
PB: predicated region body
PF: predicated region fallthrough
CT: control target
= control target key end

     0   :  { %s133_s10 = smov 120   ;;  %s134_s11 = smov 104   ;;  %vm3_vm0 = vcmask 64512   ;;  %vm9_vm1 = vcmask 1048512   ;;  %vm15_vm2 = vcmask 982912   ;;  %vm21_vm3 = vcmask 917312   ;;  %s209_s0 = inlined_call_operand.vmem [shape: f32[16,8], index: 0, kind: input, shape index: {}]   ;;  %s210_s1 = inlined_call_operand.vmem [shape: f32[1,128], index: 1, kind: output, shape index: {}]  }
   0x1   :  { %v103_v0 = vld [vmem:[%s209_s0 + $0xf] sm:$0x1]   ;;  %v105_v1 = vld [vmem:[%s209_s0 + $0xd] sm:$0x1]   ;;  %v104_v2 = vld [vmem:[%s209_s0 + $0xe] sm:$0x1]  }
   0x2   :  { %7 = vrot.lane.b32.xlu0 %v103_v0, %s133_s10  ;;  %19 = vrot.lane.b32.xlu1 %v105_v1, %s134_s11  ;;  %v106_v3 = vld [vmem:[%s209_s0 + $0xc] sm:$0x1]   ;;  %s135_s16 = smov 112   ;;  %s136_s17 = smov 96   ;;  %v107_v4 = vld [vmem:[%s209_s0 + $0xb] sm:$0x1]  }
   0x3   :  { %v108_v5 = vld [vmem:[%s209_s0 + $0xa] sm:$0x1]   ;;  %v2_v6 = vld [vmem:[%s209_s0] sm:$0x1]   ;;  %s137_s24 = smov 88   ;;  %s138_s25 = smov 80  }
   0x4   :  { %4 = vst.msk [vmem:[#allocation0] sm:$0x1] %vm3_vm0, %v2_v6   ;;  %v109_v7 = vld [vmem:[%s209_s0 + $0x9] sm:$0x1]   ;;  %v110_v8 = vld [vmem:[%s209_s0 + $0x8] sm:$0x1]  }
   0x5   :  { %s139_s30 = smov 72   ;;  %s140_s2 = smov 64   ;;  %v111_v9 = vld [vmem:[%s209_s0 + $0x7] sm:$0x1]   ;;  %v112_v10 = vld [vmem:[%s209_s0 + $0x6] sm:$0x1]  }
   0x6   :  { %13 = vrot.lane.b32.xlu0 %v104_v2, %s135_s16  ;;  %25 = vrot.lane.b32.xlu1 %v106_v3, %s136_s17  ;;  %s141_s7 = smov 56   ;;  %s142_s8 = smov 48   ;;  %v113_v11 = vld [vmem:[%s209_s0 + $0x5] sm:$0x1]   ;;  %v114_v12 = vld [vmem:[%s209_s0 + $0x4] sm:$0x1]  }
   0x7   :  { %s143_s13 = smov 40   ;;  %s144_s14 = smov 32   ;;  %v115_v13 = vld [vmem:[%s209_s0 + $0x3] sm:$0x1]   ;;  %v116_v14 = vld [vmem:[%s209_s0 + $0x2] sm:$0x1]  }
   0x8   :  { %s145_s19 = smov 24   ;;  %s146_s20 = smov 16   ;;  %v117_v15 = vld [vmem:[%s209_s0 + $0x1] sm:$0x1]   ;;  %vm27_vm4 = vcmask 851712   ;;  %vm33_vm5 = vcmask 786112  }
   0x9   :  { %s147_s0 = smov 8   ;;  %vm39_vm6 = vcmask 720512   ;;  %vm45_vm7 = vcmask 654912   ;;  %vm51_vm8 = vcmask 589312   ;;  %vm57_vm9 = vcmask 523712  }
   0xa   :  { %31 = vrot.lane.b32.xlu0 %v107_v4, %s137_s24  ;;  %37 = vrot.lane.b32.xlu1 %v108_v5, %s138_s25  ;;  %vm63_vm10 = vcmask 458112   ;;  %vm69_vm11 = vcmask 392512   ;;  %vm75_vm12 = vcmask 326912   ;;  %vm81_vm13 = vcmask 261312  }
   0xb   :  { %vm87_vm14 = vcmask 195712   ;;  %vm93_vm15 = vcmask 130112  }
   0xe   :  { %43 = vrot.lane.b32.xlu0 %v109_v7, %s139_s30  ;;  %49 = vrot.lane.b32.xlu1 %v110_v8, %s140_s2 }
  0x12   :  { %55 = vrot.lane.b32.xlu0 %v111_v9, %s141_s7  ;;  %61 = vrot.lane.b32.xlu1 %v112_v10, %s142_s8 }
  0x16   :  { %67 = vrot.lane.b32.xlu0 %v113_v11, %s143_s13  ;;  %73 = vrot.lane.b32.xlu1 %v114_v12, %s144_s14 }
  0x1a   :  { %79 = vrot.lane.b32.xlu0 %v115_v13, %s145_s19  ;;  %85 = vrot.lane.b32.xlu1 %v116_v14, %s146_s20 }
  0x1e   :  { %91 = vrot.lane.b32.xlu0 %v117_v15, %s147_s0 }
  0x74   :  { %v8_v16 = vpop.permute.xlu0 %7   ;;  %v20_v17 = vpop.permute.xlu1 %19  }
  0x75   :  { %10 = vst.msk [vmem:[#allocation0] sm:$0x1] %vm9_vm1, %v8_v16  }
  0x78   :  { %v14_v18 = vpop.permute.xlu0 %13   ;;  %v26_v19 = vpop.permute.xlu1 %25  }
  0x79   :  { %16 = vst.msk [vmem:[#allocation0] sm:$0x1] %vm15_vm2, %v14_v18  }
  0x7a   :  { %22 = vst.msk [vmem:[#allocation0] sm:$0x1] %vm21_vm3, %v20_v17  }
  0x7b   :  { %28 = vst.msk [vmem:[#allocation0] sm:$0x1] %vm27_vm4, %v26_v19  }
  0x7c   :  { %v32_v20 = vpop.permute.xlu0 %31   ;;  %v38_v21 = vpop.permute.xlu1 %37  }
  0x7d   :  { %34 = vst.msk [vmem:[#allocation0] sm:$0x1] %vm33_vm5, %v32_v20  }
  0x7e   :  { %40 = vst.msk [vmem:[#allocation0] sm:$0x1] %vm39_vm6, %v38_v21  }
  0x80   :  { %v44_v22 = vpop.permute.xlu0 %43   ;;  %v50_v23 = vpop.permute.xlu1 %49  }
  0x81   :  { %46 = vst.msk [vmem:[#allocation0] sm:$0x1] %vm45_vm7, %v44_v22  }
  0x82   :  { %52 = vst.msk [vmem:[#allocation0] sm:$0x1] %vm51_vm8, %v50_v23  }
  0x84   :  { %v56_v24 = vpop.permute.xlu0 %55   ;;  %v62_v25 = vpop.permute.xlu1 %61  }
  0x85   :  { %58 = vst.msk [vmem:[#allocation0] sm:$0x1] %vm57_vm9, %v56_v24  }
  0x86   :  { %64 = vst.msk [vmem:[#allocation0] sm:$0x1] %vm63_vm10, %v62_v25  }
  0x88   :  { %v68_v26 = vpop.permute.xlu0 %67   ;;  %v74_v27 = vpop.permute.xlu1 %73  }
  0x89   :  { %70 = vst.msk [vmem:[#allocation0] sm:$0x1] %vm69_vm11, %v68_v26  }
  0x8a   :  { %76 = vst.msk [vmem:[#allocation0] sm:$0x1] %vm75_vm12, %v74_v27  }
  0x8c   :  { %v80_v28 = vpop.permute.xlu0 %79   ;;  %v86_v29 = vpop.permute.xlu1 %85  }
  0x8d   :  { %82 = vst.msk [vmem:[#allocation0] sm:$0x1] %vm81_vm13, %v80_v28  }
  0x8e   :  { %88 = vst.msk [vmem:[#allocation0] sm:$0x1] %vm87_vm14, %v86_v29  }
  0x90   :  { %v92_v30 = vpop.permute.xlu0 %91  }
  0x91   :  { %94 = vst.msk [vmem:[#allocation0] sm:$0x1] %vm93_vm15, %v92_v30  }
  0x98   :  { %v99_v31 = vld [vmem:[#allocation0] sm:$0x1] }
  0x99   :  { %102 = vst [vmem:[%s210_s1] sm:$0x1] %v99_v31 }

// kernel: basic_block.1
= control target key start
LH: loop header
LB: loop body
LE: loop exit
PB: predicated region body
PF: predicated region fallthrough
CT: control target
= control target key end

     0   :  { %v1059_v1 = vmov 0   ;;  %v31_v31 = vlaneseq  ;;  %s1062_s11 = smov 16   ;;  %s1063_s20 = smov 8   ;;  %s1447_s1 = inlined_call_operand.vmem [shape: bf16[128,384], index: 1, kind: input, shape index: {}]   ;;  %s1448_s0 = inlined_call_operand.vmem [shape: f32[32,128], index: 0, kind: input, shape index: {}]   ;;  %s1449_s2 = inlined_call_operand.vmem [shape: bf16[128,384], index: 2, kind: input, shape index: {}]   ;;  %s1450_s3 = inlined_call_operand.vmem [shape: f32[1,128], index: 3, kind: input, shape index: {}]   ;;  %s1451_s4 = inlined_call_operand.vmem [shape: f32[1,128], index: 4, kind: input, shape index: {}]   ;;  %s1452_s5 = inlined_call_operand.vmem [shape: f32[1,128], index: 5, kind: input, shape index: {}]   ;;  %s1453_s6 = inlined_call_operand.vmem [shape: f32[1,128], index: 6, kind: input, shape index: {}]   ;;  %s1454_s7 = inlined_call_operand.vmem [shape: f32[32,128], index: 7, kind: output, shape index: {}]  }
   0x1   :  { %v991_v0 = vld [vmem:[%s1447_s1 + $0xac] ss:$12 sps:$4 sm:$0xff]   ;;  %286 = vmatprep.mubr.bf16.mxu0 %v1059_v1  ;;  %v993_v2 = vld [vmem:[%s1447_s1 + $0xb0] ss:$12 sps:$4 sm:$0xff]   ;;  %v994_v3 = vld [vmem:[%s1447_s1 + $0xa8] ss:$12 sps:$4 sm:$0xff]  }
   0x2   :  { %254 = vmatprep.subr.bf16.mxu0 %v991_v0  ;;  %946 = vmatprep.subr.bf16.mxu1 %v993_v2  ;;  %v995_v4 = vld [vmem:[%s1447_s1 + $0x94] ss:$12 sps:$4 sm:$0xff]   ;;  %v997_v5 = vld [vmem:[%s1447_s1 + $0x98] ss:$12 sps:$4 sm:$0xff]   ;;  %v998_v6 = vld [vmem:[%s1447_s1 + $0x90] ss:$12 sps:$4 sm:$0xff]  }
   0x3   :  { %255 = vmatpush1.bf16.msra.mxu0 %v994_v3  ;;  %947 = vmatpush3.bf16.msra.mxu1 %v993_v2  ;;  %v999_v7 = vld [vmem:[%s1447_s1 + $0x7c] ss:$12 sps:$4 sm:$0xff]   ;;  %v1001_v8 = vld [vmem:[%s1447_s1 + $0x80] ss:$12 sps:$4 sm:$0xff]   ;;  %v1002_v9 = vld [vmem:[%s1447_s1 + $0x78] ss:$12 sps:$4 sm:$0xff]  }
   0x4   :  { %256 = vmatprep.subr.bf16.mxu0 %v995_v4  ;;  %948 = vmatprep.subr.bf16.mxu1 %v997_v5  ;;  %v1003_v10 = vld [vmem:[%s1447_s1 + $0x64] ss:$12 sps:$4 sm:$0xff]   ;;  %v1005_v11 = vld [vmem:[%s1447_s1 + $0x68] ss:$12 sps:$4 sm:$0xff]   ;;  %v1006_v12 = vld [vmem:[%s1447_s1 + $0x60] ss:$12 sps:$4 sm:$0xff]  }
   0x5   :  { %v1007_v13 = vld [vmem:[%s1447_s1 + $0x4c] ss:$12 sps:$4 sm:$0xff]   ;;  %v1009_v14 = vld [vmem:[%s1447_s1 + $0x50] ss:$12 sps:$4 sm:$0xff]   ;;  %v1010_v15 = vld [vmem:[%s1447_s1 + $0x48] ss:$12 sps:$4 sm:$0xff]  }
   0x6   :  { %v1011_v16 = vld [vmem:[%s1447_s1 + $0x34] ss:$12 sps:$4 sm:$0xff]   ;;  %v1013_v17 = vld [vmem:[%s1447_s1 + $0x38] ss:$12 sps:$4 sm:$0xff]   ;;  %v1164_v19 = vld [vmem:[%s1448_s0 + $0x8] sm:$0xff]  ;;  %v1203_v32 = vshrl.u32 %v31_v31, 7 }
   0x7   :  { %257 = vmatpush1.bf16.msra.mxu0 %v998_v6  ;;  %949 = vmatpush3.bf16.msra.mxu1 %v997_v5  ;;  %v1159_v18 = vld [vmem:[%s1448_s0] sm:$0xff]  ;;  %v1014_v20 = vld [vmem:[%s1447_s1 + $0x30] ss:$12 sps:$4 sm:$0xff]   ;;  %v1021_v26 = vld [vmem:[%s1447_s1 + $0x8] ss:$12 sps:$4 sm:$0xff]  }
   0x8   :  { %258 = vmatprep.subr.bf16.mxu0 %v999_v7  ;;  %950 = vmatprep.subr.bf16.mxu1 %v1001_v8  ;;  %v92_v21 = vpack.c.bf16 %v1164_v19, %v1159_v18  ;;  %v1015_v22 = vld [vmem:[%s1447_s1 + $0x1c] ss:$12 sps:$4 sm:$0xff]   ;;  %v1017_v23 = vld [vmem:[%s1447_s1 + $0x20] ss:$12 sps:$4 sm:$0xff]   ;;  %v1018_v24 = vld [vmem:[%s1447_s1 + $0x18] ss:$12 sps:$4 sm:$0xff]  }
   0x9   :  { %v1019_v25 = vld [vmem:[%s1447_s1 + $0x4] ss:$12 sps:$4 sm:$0xff]   ;;  %v1022_v27 = vld [vmem:[%s1447_s1] ss:$12 sps:$4 sm:$0xff]   ;;  %v1197_v29 = vld [vmem:[%s1448_s0 + $0x18] sm:$0xff]  ;;  %v34_v35 = vadd.s32 16, %v1203_v32 }
   0xa   :  { %962 = vmatprep.mubr.bf16.mxu1 %v92_v21  ;;  %v1192_v28 = vld [vmem:[%s1448_s0 + $0x10] sm:$0xff]  ;;  %v33_v38 = vadd.s32 8, %v1203_v32  ;;  %vm360_vm0 = vcmp.lt.s32.totalorder %v1203_v32, 1  ;;  %vm381_vm1 = vcmp.lt.s32.totalorder %v1203_v32, 7  ;;  %v40_v50 = vand.u32 15, %v1203_v32  ;;  %s1060_s0 = smov 64  }
   0xb   :  { %259 = vmatpush1.bf16.msra.mxu0 %v1002_v9  ;;  %951 = vmatpush3.bf16.msra.mxu1 %v1001_v8  ;;  %v93_v30 = vpack.c.bf16 %v1197_v29, %v1192_v28  ;;  %v54_v41 = vand.u32 15, %v34_v35  ;;  %v35_v51 = vadd.s32 24, %v1203_v32  ;;  %s1061_s1 = smov 32  }
   0xc   :  { %260 = vmatprep.subr.bf16.mxu0 %v1003_v10  ;;  %952 = vmatprep.subr.bf16.mxu1 %v1005_v11  ;;  %v47_v46 = vand.u32 15, %v33_v38  ;;  %vm1227_vm4 = vcmp.ne.s32.totalorder %v40_v50, 0 }
   0xd   :  { %vm1211_vm2 = vcmp.ne.s32.totalorder %v54_v41, 0  ;;  %v61_v62 = vand.u32 15, %v35_v51 }
   0xe   :  { %vm1217_vm3 = vcmp.ne.s32.totalorder %v47_v46, 15 }
   0xf   :  { %261 = vmatpush1.bf16.msra.mxu0 %v1006_v12  ;;  %953 = vmatpush3.bf16.msra.mxu1 %v1005_v11  ;;  %vm1239_vm5 = vcmp.ne.s32.totalorder %v61_v62, 15  ;;  %v1026_v62 = vld [vmem:[%s1449_s2 + $0xb0] ss:$12 sps:$4 sm:$0xff]  }
  0x10   :  { %262 = vmatprep.subr.bf16.mxu0 %v1007_v13  ;;  %954 = vmatprep.subr.bf16.mxu1 %v1009_v14 }
  0x13   :  { %263 = vmatpush1.bf16.msra.mxu0 %v1010_v15  ;;  %955 = vmatpush3.bf16.msra.mxu1 %v1009_v14 }
  0x14   :  { %264 = vmatprep.subr.bf16.mxu0 %v1011_v16  ;;  %956 = vmatprep.subr.bf16.mxu1 %v1013_v17 }
  0x17   :  { %265 = vmatpush1.bf16.msra.mxu0 %v1014_v20  ;;  %957 = vmatpush3.bf16.msra.mxu1 %v1013_v17 }
  0x18   :  { %266 = vmatprep.subr.bf16.mxu0 %v1015_v22  ;;  %958 = vmatprep.subr.bf16.mxu1 %v1017_v23 }
  0x1b   :  { %267 = vmatpush1.bf16.msra.mxu0 %v1018_v24  ;;  %959 = vmatpush3.bf16.msra.mxu1 %v1017_v23 }
  0x1c   :  { %268 = vmatprep.subr.bf16.mxu0 %v1019_v25  ;;  %960 = vmatprep.subr.bf16.mxu1 %v1021_v26 }
  0x1f   :  { %269 = vmatpush1.bf16.msra.mxu0 %v1022_v27  ;;  %961 = vmatpush3.bf16.msra.mxu1 %v1021_v26 }
  0x20   :  { %966 = vmatprep.subr.bf16.mxu1 %v1026_v62 }
  0x22   :  { %287 = vmatmul.mubr.bf16.vlgmr.msra.gmra.mxu0 %v92_v21  ;;  %963 = vmatmul.mubr.bf16.vlgmr.msra.gmra.mxu1 %v93_v30 }
  0x23   :  { %296 = vmatprep.mubr.bf16.mxu0 %v1059_v1  ;;  %967 = vmatpush3.bf16.msra.mxu1 %v1026_v62 }
  0x2a   :  { %297 = vmatmul.mubr.bf16.gmra.mxu0 %v93_v30 }
  0x2b   :  { %682 = vmatprep.mubr.bf16.mxu0 %v1059_v1 }
  0xe2   :  { %v288_v33 = vpop.f32.mrf.mxu0  ;;  %v964_v34 = vpop.f32.mrf.mxu1 }
  0xe3   :  { %v379_v45 = vrot.slane %v964_v34, 1  ;;  %v356_v48 = vrot.slane %v288_v33, 7 }
  0xe4   :  { %v290_v36 = vpop.f32.mrf.mxu0  ;;  %v341_v37 = vpop.f32.mrf.mxu1 }
  0xe5   :  { %v377_v63 = vrot.slane %v341_v37, 1 }
  0xe6   :  { %v292_v39 = vpop.f32.mrf.mxu0  ;;  %v965_v40 = vpop.f32.mrf.mxu1 }
  0xe7   :  { %v357_v42 = vrot.slane %v292_v39, 7  ;;  %v380_v0 = vrot.slane %v965_v40, 1 }
  0xe8   :  { %v294_v43 = vpop.f32.mrf.mxu0  ;;  %v344_v44 = vpop.f32.mrf.mxu1 }
  0xe9   :  { %v378_v47 = vrot.slane %v344_v44, 1  ;;  %v363_v54 = vsel %vm360_vm0, %v356_v48, %v357_v42  ;;  %v385_v13 = vsel %vm381_vm1, %v380_v0, %v377_v63  ;;  %v382_v16 = vsel %vm381_vm1, %v379_v45, %v380_v0  ;;  %v1029_v0 = vld [vmem:[%s1449_s2 + $0x94] ss:$12 sps:$4 sm:$0xff]  }
  0xea   :  { %v298_v49 = vpop.f32.mrf.mxu0  ;;  %v399_v2 = vadd.f32 %v363_v54, %v294_v43  ;;  %v397_v21 = vsel %vm1239_vm5, %v385_v13, 0.0  ;;  %v1038_v13 = vld [vmem:[%s1449_s2 + $0x68] ss:$12 sps:$4 sm:$0xff]  }
  0xeb   :  { %v358_v52 = vrot.slane %v298_v49, 7  ;;  %v383_v57 = vsel %vm381_vm1, %v378_v47, %v379_v45  ;;  %v384_v15 = vsel %vm381_vm1, %v377_v63, %v378_v47 }
  0xec   :  { %v300_v55 = vpop.f32.mrf.mxu0  ;;  %v395_v4 = vsel %vm1217_vm3, %v383_v57, 0.0 }
  0xed   :  { %v362_v58 = vsel %vm360_vm0, %v357_v42, %v358_v52  ;;  %v1243_v11 = vadd.f32 %v399_v2, %v395_v4  ;;  %v1027_v2 = vld [vmem:[%s1449_s2 + $0x90] ss:$12 sps:$4 sm:$0xff]  }
  0xee   :  { %v375_v59 = vsel %vm1211_vm2, %v362_v58, 0.0  ;;  %v302_v61 = vpop.f32.mrf.mxu0  ;;  %v1025_v58 = vld [vmem:[%s1449_s2 + $0xac] ss:$12 sps:$4 sm:$0xff]  }
  0xef   :  { %v359_v3 = vrot.slane %v302_v61, 7  ;;  %v400_v6 = vadd.f32 %v375_v59, %v300_v55  ;;  %v416_v22 = vmul.f32 %v1243_v11, %v1243_v11  ;;  %v1023_v59 = vld [vmem:[%s1449_s2 + $0xa8] ss:$12 sps:$4 sm:$0xff]   ;;  %650 = vmatprep.subr.bf16.mxu0 %v1025_v58 }
  0xf0   :  { %v304_v5 = vpop.f32.mrf.mxu0  ;;  %651 = vmatpush1.bf16.msra.mxu0 %v1023_v59 }
  0xf1   :  { %v364_v7 = vsel %vm360_vm0, %v359_v3, %v356_v48  ;;  %v361_v8 = vsel %vm360_vm0, %v358_v52, %v359_v3  ;;  %v1251_v17 = vadd.f32 %v400_v6, %v382_v16  ;;  %v1030_v3 = vld [vmem:[%s1449_s2 + $0x98] ss:$12 sps:$4 sm:$0xff]   ;;  %652 = vmatprep.subr.bf16.mxu0 %v1029_v0  ;;  %v1033_v6 = vld [vmem:[%s1449_s2 + $0x7c] ss:$12 sps:$4 sm:$0xff]  }
  0xf2   :  { %v373_v9 = vsel %vm1227_vm4, %v364_v7, 0.0  ;;  %v401_v14 = vadd.f32 %v361_v8, %v304_v5  ;;  %968 = vmatprep.subr.bf16.mxu1 %v1030_v3  ;;  %v1031_v7 = vld [vmem:[%s1449_s2 + $0x78] ss:$12 sps:$4 sm:$0xff]   ;;  %v1034_v8 = vld [vmem:[%s1449_s2 + $0x80] ss:$12 sps:$4 sm:$0xff]  }
  0xf3   :  { %v398_v12 = vadd.f32 %v373_v9, %v290_v36  ;;  %v417_v26 = vmul.f32 %v1251_v17, %v1251_v17  ;;  %969 = vmatpush3.bf16.msra.mxu1 %v1030_v3  ;;  %v1037_v9 = vld [vmem:[%s1449_s2 + $0x64] ss:$12 sps:$4 sm:$0xff]  }
  0xf4   :  { %v1261_v24 = vadd.f32 %v401_v14, %v397_v21  ;;  %653 = vmatpush1.bf16.msra.mxu0 %v1027_v2  ;;  %970 = vmatprep.subr.bf16.mxu1 %v1034_v8  ;;  %v1041_v14 = vld [vmem:[%s1449_s2 + $0x4c] ss:$12 sps:$4 sm:$0xff]   ;;  %v1042_v16 = vld [vmem:[%s1449_s2 + $0x50] ss:$12 sps:$4 sm:$0xff]   ;;  %v1045_v21 = vld [vmem:[%s1449_s2 + $0x34] ss:$12 sps:$4 sm:$0xff]  }
  0xf5   :  { %v1253_v20 = vadd.f32 %v398_v12, %v384_v15  ;;  %654 = vmatprep.subr.bf16.mxu0 %v1033_v6  ;;  %v1035_v12 = vld [vmem:[%s1449_s2 + $0x60] ss:$12 sps:$4 sm:$0xff]   ;;  %v1039_v15 = vld [vmem:[%s1449_s2 + $0x48] ss:$12 sps:$4 sm:$0xff]  }
  0xf6   :  { %v418_v33 = vmul.f32 %v1261_v24, %v1261_v24 }
  0xf7   :  { %v415_v23 = vmul.f32 %v1253_v20, %v1253_v20  ;;  %v406_v25 = vadd.f32 %v1243_v11, %v1253_v20  ;;  %971 = vmatpush3.bf16.msra.mxu1 %v1034_v8 }
  0xf8   :  { %655 = vmatpush1.bf16.msra.mxu0 %v1031_v7  ;;  %972 = vmatprep.subr.bf16.mxu1 %v1038_v13 }
  0xf9   :  { %v407_v27 = vadd.f32 %v406_v25, %v1251_v17  ;;  %v419_v30 = vadd.f32 %v416_v22, %v415_v23  ;;  %656 = vmatprep.subr.bf16.mxu0 %v1037_v9  ;;  %v1043_v22 = vld [vmem:[%s1449_s2 + $0x30] ss:$12 sps:$4 sm:$0xff]   ;;  %v1046_v23 = vld [vmem:[%s1449_s2 + $0x38] ss:$12 sps:$4 sm:$0xff]  }
  0xfa   :  { %v1047_v25 = vld [vmem:[%s1449_s2 + $0x18] ss:$12 sps:$4 sm:$0xff]  }
  0xfb   :  { %v408_v31 = vadd.f32 %v407_v27, %v1261_v24  ;;  %v420_v34 = vadd.f32 %v419_v30, %v417_v26  ;;  %973 = vmatpush3.bf16.msra.mxu1 %v1038_v13  ;;  %v1049_v26 = vld [vmem:[%s1449_s2 + $0x1c] ss:$12 sps:$4 sm:$0xff]   ;;  %v1050_v27 = vld [vmem:[%s1449_s2 + $0x20] ss:$12 sps:$4 sm:$0xff]   ;;  %v1053_v30 = vld [vmem:[%s1449_s2 + $0x4] ss:$12 sps:$4 sm:$0xff]  }
  0xfc   :  { %657 = vmatpush1.bf16.msra.mxu0 %v1035_v12  ;;  %974 = vmatprep.subr.bf16.mxu1 %v1042_v16 }
  0xfd   :  { %v421_v35 = vadd.f32 %v420_v34, %v418_v33  ;;  %v409_v36 = vrot.slane %v408_v31, 4  ;;  %658 = vmatprep.subr.bf16.mxu0 %v1041_v14  ;;  %v1051_v33 = vld [vmem:[%s1449_s2] ss:$12 sps:$4 sm:$0xff]  }
  0xff   :  { %v410_v37 = vadd.f32 %v409_v36, %v408_v31  ;;  %v422_v38 = vrot.slane %v421_v35, 4  ;;  %975 = vmatpush3.bf16.msra.mxu1 %v1042_v16  ;;  %v1054_v31 = vld [vmem:[%s1449_s2 + $0x8] ss:$12 sps:$4 sm:$0xff]  }
 0x100   :  { %659 = vmatpush1.bf16.msra.mxu0 %v1039_v15  ;;  %976 = vmatprep.subr.bf16.mxu1 %v1046_v23 }
 0x101   :  { %v411_v39 = vrot.slane %v410_v37, 2  ;;  %v423_v40 = vadd.f32 %v422_v38, %v421_v35  ;;  %660 = vmatprep.subr.bf16.mxu0 %v1045_v21 }
 0x103   :  { %v412_v41 = vadd.f32 %v411_v39, %v410_v37  ;;  %v424_v42 = vrot.slane %v423_v40, 2  ;;  %977 = vmatpush3.bf16.msra.mxu1 %v1046_v23 }
 0x104   :  { %661 = vmatpush1.bf16.msra.mxu0 %v1043_v22  ;;  %978 = vmatprep.subr.bf16.mxu1 %v1050_v27 }
 0x105   :  { %v413_v43 = vrot.slane %v412_v41, 1  ;;  %v425_v44 = vadd.f32 %v424_v42, %v423_v40  ;;  %662 = vmatprep.subr.bf16.mxu0 %v1049_v26 }
 0x107   :  { %v414_v45 = vadd.f32 %v413_v43, %v412_v41  ;;  %v426_v46 = vrot.slane %v425_v44, 1  ;;  %979 = vmatpush3.bf16.msra.mxu1 %v1050_v27 }
 0x108   :  { %663 = vmatpush1.bf16.msra.mxu0 %v1047_v25  ;;  %980 = vmatprep.subr.bf16.mxu1 %v1054_v31 }
 0x109   :  { %428 = vrot.lane.b32.xlu0 %v414_v45, %s1060_s0  ;;  %v427_v47 = vadd.f32 %v426_v46, %v425_v44  ;;  %664 = vmatprep.subr.bf16.mxu0 %v1053_v30  ;;  %v457_v44 = vld [vmem:[%s1450_s3] sm:$0x1] }
 0x10b   :  { %981 = vmatpush3.bf16.msra.mxu1 %v1054_v31 }
 0x10c   :  { %665 = vmatpush1.bf16.msra.mxu0 %v1051_v33 }
 0x10d   :  { %431 = vrot.lane.b32.xlu0 %v427_v47, %s1060_s0 }
 0x17b   :  { %v429_v48 = vpop.permute.xlu0 %428 }
 0x17c   :  { %v430_v49 = vadd.f32 %v429_v48, %v414_v45  ;;  %v1355_v45 = vsub.s32 0, %v1203_v32  ;;  %v461_v48 = vld [vmem:[%s1451_s4] sm:$0x1] }
 0x17e   :  { %434 = vrot.lane.b32.xlu1 %v430_v49, %s1061_s1 }
 0x17f   :  { %v432_v50 = vpop.permute.xlu0 %431 }
 0x180   :  { %v433_v51 = vadd.f32 %v432_v50, %v427_v47 }
 0x182   :  { %437 = vrot.lane.b32.xlu1 %v433_v51, %s1061_s1 }
 0x1f0   :  { %v435_v52 = vpop.permute.xlu1 %434 }
 0x1f1   :  { %v436_v54 = vadd.f32 %v435_v52, %v430_v49 }
 0x1f3   :  { %440 = vrot.lane.b32.xlu0 %v436_v54, %s1062_s11 }
 0x1f4   :  { %v438_v55 = vpop.permute.xlu1 %437 }
 0x1f5   :  { %v439_v57 = vadd.f32 %v438_v55, %v433_v51 }
 0x1f7   :  { %443 = vrot.lane.b32.xlu1 %v439_v57, %s1062_s11 }
 0x265   :  { %v441_v61 = vpop.permute.xlu0 %440 }
 0x266   :  { %v442_v63 = vadd.f32 %v441_v61, %v436_v54 }
 0x268   :  { %446 = vrot.lane.b32.xlu0 %v442_v63, %s1063_s20 }
 0x269   :  { %v444_v4 = vpop.permute.xlu1 %443 }
 0x26a   :  { %v445_v5 = vadd.f32 %v444_v4, %v439_v57 }
 0x26c   :  { %449 = vrot.lane.b32.xlu1 %v445_v5, %s1063_s20 }
 0x2da   :  { %v447_v34 = vpop.permute.xlu0 %446 }
 0x2db   :  { %v448_v35 = vadd.f32 %v447_v34, %v442_v63 }
 0x2dd   :  { %v452_v36 = vmul.f32 0.001953125, %v448_v35 }
 0x2de   :  { %v450_v37 = vpop.permute.xlu1 %449 }
 0x2df   :  { %v451_v38 = vadd.f32 %v450_v37, %v445_v5  ;;  %v454_v39 = vmul.f32 %v452_v36, %v452_v36 }
 0x2e1   :  { %v453_v40 = vmul.f32 0.001953125, %v451_v38 }
 0x2e3   :  { %v455_v41 = vsub.f32 %v453_v40, %v454_v39 }
 0x2e5   :  { %v456_v42 = vmax.f32 %v455_v41, 0.0 }
 0x2e7   :  { %v458_v43 = vadd.f32 1e-05, %v456_v42 }
 0x2e9   :  { %1055 = vrsqrt.f32 %v458_v43 }
 0x2f6   :  { %v1056_v46 = vpop.eup %1055 }
 0x2f7   :  { %v460_v47 = vmul.f32 %v1056_v46, %v457_v44 }
 0x2f9   :  { %v462_v49 = vmul.f32 %v460_v47, %v452_v36  ;;  %v468_v50 = vrot.slane %v460_v47, %v1355_v45 }
 0x2fb   :  { %v463_v51 = vsub.f32 %v461_v48, %v462_v49  ;;  %v470_v52 = vmul.f32 %v468_v50, %v1253_v20  ;;  %v471_v54 = vmul.f32 %v468_v50, %v1243_v11  ;;  %v472_v57 = vmul.f32 %v468_v50, %v1251_v17 }
 0x2fc   :  { %v473_v58 = vmul.f32 %v468_v50, %v1261_v24 }
 0x2fd   :  { %v478_v55 = vrot.slane %v463_v51, %v1355_v45 }
 0x2ff   :  { %v480_v59 = vadd.f32 %v478_v55, %v470_v52  ;;  %v481_v61 = vadd.f32 %v478_v55, %v471_v54  ;;  %v482_v62 = vadd.f32 %v478_v55, %v472_v57  ;;  %v483_v63 = vadd.f32 %v478_v55, %v473_v58 }
 0x301   :  { %v484_v0 = vmax.f32 %v480_v59, 0.0  ;;  %v485_v2 = vmax.f32 %v481_v61, 0.0  ;;  %v486_v3 = vmax.f32 %v482_v62, 0.0  ;;  %v487_v4 = vmax.f32 %v483_v63, 0.0 }
 0x303   :  { %v488_v5 = vpack.c.bf16 %v485_v2, %v484_v0  ;;  %v489_v6 = vpack.c.bf16 %v487_v4, %v486_v3 }
 0x305   :  { %683 = vmatmul.mubr.bf16.vlgmr.msra.gmra.mxu0 %v488_v5  ;;  %982 = vmatprep.mubr.bf16.mxu1 %v488_v5 }
 0x306   :  { %983 = vmatmul.mubr.bf16.vlgmr.msra.gmra.mxu1 %v489_v6  ;;  %692 = vmatprep.mubr.bf16.mxu0 %v1059_v1 }
 0x30d   :  { %693 = vmatmul.mubr.bf16.gmra.mxu0 %v489_v6 }
 0x3c5   :  { %v684_v11 = vpop.f32.mrf.mxu0 }
 0x3c6   :  { %v984_v17 = vpop.f32.mrf.mxu1  ;;  %v752_v22 = vrot.slane %v684_v11, 7 }
 0x3c7   :  { %v686_v20 = vpop.f32.mrf.mxu0  ;;  %v766_v16 = vrot.slane %v984_v17, 1 }
 0x3c8   :  { %v737_v24 = vpop.f32.mrf.mxu1 }
 0x3c9   :  { %v688_v7 = vpop.f32.mrf.mxu0  ;;  %v764_v34 = vrot.slane %v737_v24, 1 }
 0x3ca   :  { %v985_v8 = vpop.f32.mrf.mxu1  ;;  %v753_v13 = vrot.slane %v688_v7, 7 }
 0x3cb   :  { %v690_v9 = vpop.f32.mrf.mxu0  ;;  %v767_v31 = vrot.slane %v985_v8, 1 }
 0x3cc   :  { %v740_v12 = vpop.f32.mrf.mxu1  ;;  %v758_v26 = vsel %vm360_vm0, %v752_v22, %v753_v13 }
 0x3cd   :  { %v765_v14 = vrot.slane %v740_v12, 1  ;;  %v694_v15 = vpop.f32.mrf.mxu0  ;;  %v777_v37 = vadd.f32 %v758_v26, %v690_v9  ;;  %v771_v43 = vsel %vm381_vm1, %v767_v31, %v764_v34  ;;  %v768_v46 = vsel %vm381_vm1, %v766_v16, %v767_v31 }
 0x3ce   :  { %v754_v21 = vrot.slane %v694_v15, 7  ;;  %v775_v60 = vsel %vm1239_vm5, %v771_v43, 0.0 }
 0x3cf   :  { %v696_v23 = vpop.f32.mrf.mxu0  ;;  %v769_v25 = vsel %vm381_vm1, %v765_v14, %v766_v16  ;;  %v770_v44 = vsel %vm381_vm1, %v764_v34, %v765_v14 }
 0x3d0   :  { %v757_v1 = vsel %vm360_vm0, %v753_v13, %v754_v21  ;;  %v773_v35 = vsel %vm1217_vm3, %v769_v25, 0.0 }
 0x3d1   :  { %v762_v27 = vsel %vm1211_vm2, %v757_v1, 0.0  ;;  %v698_v30 = vpop.f32.mrf.mxu0  ;;  %v1383_v41 = vadd.f32 %v777_v37, %v773_v35  ;;  %v835_v37 = vld [vmem:[%s1452_s5] sm:$0x1] }
 0x3d2   :  { %v755_v33 = vrot.slane %v698_v30, 7  ;;  %v778_v38 = vadd.f32 %v762_v27, %v696_v23 }
 0x3d3   :  { %v700_v36 = vpop.f32.mrf.mxu0  ;;  %v794_v49 = vmul.f32 %v1383_v41, %v1383_v41 }
 0x3d4   :  { %v759_v39 = vsel %vm360_vm0, %v755_v33, %v752_v22  ;;  %v756_v40 = vsel %vm360_vm0, %v754_v21, %v755_v33  ;;  %v1391_v47 = vadd.f32 %v778_v38, %v768_v46 }
 0x3d5   :  { %v760_v53 = vsel %vm1227_vm4, %v759_v39, 0.0  ;;  %v779_v56 = vadd.f32 %v756_v40, %v700_v36  ;;  %v839_v40 = vld [vmem:[%s1453_s6] sm:$0x1] }
 0x3d6   :  { %v776_v42 = vadd.f32 %v760_v53, %v686_v20  ;;  %v795_v32 = vmul.f32 %v1391_v47, %v1391_v47 }
 0x3d7   :  { %v1401_v51 = vadd.f32 %v779_v56, %v775_v60 }
 0x3d8   :  { %v1393_v48 = vadd.f32 %v776_v42, %v770_v44 }
 0x3d9   :  { %v796_v57 = vmul.f32 %v1401_v51, %v1401_v51 }
 0x3da   :  { %v793_v50 = vmul.f32 %v1393_v48, %v1393_v48  ;;  %v784_v52 = vadd.f32 %v1383_v41, %v1393_v48 }
 0x3dc   :  { %v785_v54 = vadd.f32 %v784_v52, %v1391_v47  ;;  %v797_v55 = vadd.f32 %v794_v49, %v793_v50 }
 0x3de   :  { %v786_v10 = vadd.f32 %v785_v54, %v1401_v51  ;;  %v798_v58 = vadd.f32 %v797_v55, %v795_v32 }
 0x3e0   :  { %v787_v59 = vrot.slane %v786_v10, 4  ;;  %v799_v61 = vadd.f32 %v798_v58, %v796_v57 }
 0x3e2   :  { %v788_v62 = vadd.f32 %v787_v59, %v786_v10  ;;  %v800_v63 = vrot.slane %v799_v61, 4 }
 0x3e4   :  { %v789_v0 = vrot.slane %v788_v62, 2  ;;  %v801_v2 = vadd.f32 %v800_v63, %v799_v61 }
 0x3e6   :  { %v790_v3 = vadd.f32 %v789_v0, %v788_v62  ;;  %v802_v4 = vrot.slane %v801_v2, 2 }
 0x3e8   :  { %v791_v5 = vrot.slane %v790_v3, 1  ;;  %v803_v6 = vadd.f32 %v802_v4, %v801_v2 }
 0x3ea   :  { %v792_v11 = vadd.f32 %v791_v5, %v790_v3  ;;  %v804_v17 = vrot.slane %v803_v6, 1 }
 0x3ec   :  { %806 = vrot.lane.b32.xlu0 %v792_v11, %s1060_s0  ;;  %v805_v20 = vadd.f32 %v804_v17, %v803_v6 }
 0x3ee   :  { %809 = vrot.lane.b32.xlu1 %v805_v20, %s1060_s0 }
 0x45e   :  { %v807_v24 = vpop.permute.xlu0 %806 }
 0x45f   :  { %v808_v7 = vadd.f32 %v807_v24, %v792_v11 }
 0x460   :  { %v810_v8 = vpop.permute.xlu1 %809 }
 0x461   :  { %v811_v9 = vadd.f32 %v810_v8, %v805_v20  ;;  %812 = vrot.lane.b32.xlu0 %v808_v7, %s1061_s1 }
 0x463   :  { %815 = vrot.lane.b32.xlu1 %v811_v9, %s1061_s1 }
 0x4d3   :  { %v813_v12 = vpop.permute.xlu0 %812 }
 0x4d4   :  { %v814_v13 = vadd.f32 %v813_v12, %v808_v7 }
 0x4d5   :  { %v816_v14 = vpop.permute.xlu1 %815 }
 0x4d6   :  { %v817_v15 = vadd.f32 %v816_v14, %v811_v9  ;;  %818 = vrot.lane.b32.xlu0 %v814_v13, %s1062_s11 }
 0x4d8   :  { %821 = vrot.lane.b32.xlu1 %v817_v15, %s1062_s11 }
 0x548   :  { %v819_v16 = vpop.permute.xlu0 %818 }
 0x549   :  { %v820_v21 = vadd.f32 %v819_v16, %v814_v13 }
 0x54a   :  { %v822_v22 = vpop.permute.xlu1 %821 }
 0x54b   :  { %v823_v23 = vadd.f32 %v822_v22, %v817_v15  ;;  %824 = vrot.lane.b32.xlu0 %v820_v21, %s1063_s20 }
 0x54d   :  { %827 = vrot.lane.b32.xlu1 %v823_v23, %s1063_s20 }
 0x5bd   :  { %v825_v25 = vpop.permute.xlu0 %824 }
 0x5be   :  { %v826_v1 = vadd.f32 %v825_v25, %v820_v21 }
 0x5bf   :  { %v828_v26 = vpop.permute.xlu1 %827 }
 0x5c0   :  { %v830_v27 = vmul.f32 0.001953125, %v826_v1  ;;  %v829_v30 = vadd.f32 %v828_v26, %v823_v23 }
 0x5c2   :  { %v832_v31 = vmul.f32 %v830_v27, %v830_v27  ;;  %v831_v33 = vmul.f32 0.001953125, %v829_v30 }
 0x5c4   :  { %v833_v34 = vsub.f32 %v831_v33, %v832_v31 }
 0x5c6   :  { %v834_v35 = vmax.f32 %v833_v34, 0.0 }
 0x5c8   :  { %v836_v36 = vadd.f32 1e-05, %v834_v35 }
 0x5ca   :  { %1057 = vrsqrt.f32 %v836_v36 }
 0x5d7   :  { %v1058_v38 = vpop.eup %1057 }
 0x5d8   :  { %v838_v39 = vmul.f32 %v1058_v38, %v835_v37 }
 0x5da   :  { %v840_v53 = vmul.f32 %v838_v39, %v830_v27  ;;  %v846_v42 = vrot.slane %v838_v39, %v1355_v45 }
 0x5dc   :  { %v841_v43 = vsub.f32 %v839_v40, %v840_v53  ;;  %v848_v56 = vmul.f32 %v846_v42, %v1393_v48  ;;  %v849_v44 = vmul.f32 %v846_v42, %v1383_v41  ;;  %v850_v46 = vmul.f32 %v846_v42, %v1391_v47 }
 0x5dd   :  { %v851_v60 = vmul.f32 %v846_v42, %v1401_v51 }
 0x5de   :  { %v856_v49 = vrot.slane %v841_v43, %v1355_v45 }
 0x5e0   :  { %v858_v50 = vadd.f32 %v856_v49, %v848_v56  ;;  %v859_v52 = vadd.f32 %v856_v49, %v849_v44  ;;  %v860_v32 = vadd.f32 %v856_v49, %v850_v46  ;;  %v861_v54 = vadd.f32 %v856_v49, %v851_v60 }
 0x5e2   :  { %v862_v55 = vadd.f32 %v858_v50, %v1159_v18  ;;  %v863_v10 = vadd.f32 %v859_v52, %v1164_v19  ;;  %v864_v57 = vadd.f32 %v860_v32, %v1192_v28  ;;  %v865_v48 = vadd.f32 %v861_v54, %v1197_v29 }
 0x5e4   :  { %v866_v58 = vmax.f32 %v862_v55, 0.0  ;;  %v867_v41 = vmax.f32 %v863_v10, 0.0  ;;  %v868_v59 = vmax.f32 %v864_v57, 0.0  ;;  %v869_v47 = vmax.f32 %v865_v48, 0.0 }
 0x5e6   :  { %870 = vst [vmem:[%s1454_s7] sm:$0xff] %v866_v58  ;;  %871 = vst [vmem:[%s1454_s7 + $0x8] sm:$0xff] %v867_v41 }
 0x5e7   :  { %872 = vst [vmem:[%s1454_s7 + $0x10] sm:$0xff] %v868_v59  ;;  %873 = vst [vmem:[%s1454_s7 + $0x18] sm:$0xff] %v869_v47 }

</bundles_post_ra>
